<compile_context>
chip_gen: v5e
topology: v5e:2x2
jax: 0.10.0
libtpu: 0.0.40
codegen_flags: <defaults>
</compile_context>

<pallas_src>
import functools

import jax
import jax.numpy as jnp
import numpy as np
from jax.experimental import pallas as pl
from jax.experimental.pallas import tpu as pltpu


def _round_up(x, m):
    return (x + m - 1) // m * m


def _clip_layer_kernel(h_ref, mask_ref,
                       wq_ref, bq_ref, wkv_ref, bkv_ref, wo_ref, bo_ref,
                       ln1g_ref, ln1b_ref, ln2g_ref, ln2b_ref,
                       w1_ref, b1_ref, w2_ref, b2_ref,
                       out_ref,
                       k_scr, v_scr,
                       *, num_heads, head_dim, q_tile, eps):
    S = h_ref.shape[1]
    E = h_ref.shape[2]
    H, Dh, TQ = num_heads, head_dim, q_tile

    qi = pl.program_id(1)

    def layer_norm(x, g, b):
        mu = jnp.mean(x, axis=-1, keepdims=True)
        var = jnp.mean((x - mu) ** 2, axis=-1, keepdims=True)
        return (x - mu) * jax.lax.rsqrt(var + eps) * g + b

    # ---- K/V: computed once per batch element (first query tile) and cached
    # head-major in persistent bf16 VMEM scratch.  The hidden block's index
    # map depends only on b, so it is DMA'd once per batch element as well.
    @pl.when(qi == 0)
    def _():
        h_full = h_ref[0]                                            # (S, E)
        x_full = layer_norm(h_full, ln1g_ref[0], ln1b_ref[0])        # f32
        kv = jnp.dot(x_full.astype(jnp.bfloat16), wkv_ref[...],
                     preferred_element_type=jnp.float32) + bkv_ref[0]  # (S, 2E)
        k3 = pltpu.einshape("khd->hkd", kv[:, :E].reshape(S, H, Dh))
        v3 = pltpu.einshape("khd->hkd", kv[:, E:].reshape(S, H, Dh))
        k_scr[...] = k3.astype(jnp.bfloat16)                         # (H, S, Dh)
        v_scr[...] = v3.astype(jnp.bfloat16)                         # (H, S, Dh)

    q_start = pl.multiple_of(qi * TQ, TQ)
    h_q = h_ref[0, pl.ds(q_start, TQ), :]                            # (TQ, E)
    mask = mask_ref[0, 0]                                            # (TQ, S)

    # ---- LayerNorm 1 (query tile only) + Q projection ----
    x_q = layer_norm(h_q, ln1g_ref[0], ln1b_ref[0])
    scale = Dh ** -0.5
    q = jnp.dot(x_q.astype(jnp.bfloat16), wq_ref[...],
                preferred_element_type=jnp.float32) + bq_ref[0]
    q = q * scale                                                    # (TQ, E)
    q3 = pltpu.einshape("qhd->hqd", q.reshape(TQ, H, Dh))            # (H, TQ, Dh)

    # ---- attention: head-batched contractions against the cached K/V ----
    scores = jnp.einsum("hqd,hkd->hqk",
                        q3.astype(jnp.bfloat16), k_scr[...],
                        preferred_element_type=jnp.float32)          # (H, TQ, S)
    scores = scores + mask[None, :, :]
    scores = scores - jnp.max(scores, axis=-1, keepdims=True)
    e = jnp.exp(scores)
    p = e * pl.reciprocal(jnp.sum(e, axis=-1, keepdims=True), approx=True)
    attn = jnp.einsum("hqk,hkd->hqd",
                      p.astype(jnp.bfloat16), v_scr[...],
                      preferred_element_type=jnp.float32)            # (H, TQ, Dh)

    attn = pltpu.einshape("hqd->qhd", attn).reshape(TQ, E)           # (TQ, E)
    attn = jnp.dot(attn.astype(jnp.bfloat16), wo_ref[...],
                   preferred_element_type=jnp.float32) + bo_ref[0]

    h1 = h_q + attn                                                  # residual 1

    # ---- LayerNorm 2 + MLP (quick_gelu) ----
    x2 = layer_norm(h1, ln2g_ref[0], ln2b_ref[0])
    f = jnp.dot(x2.astype(jnp.bfloat16), w1_ref[...],
                preferred_element_type=jnp.float32) + b1_ref[0]
    f = f * jax.nn.sigmoid(1.702 * f)                                # quick_gelu (f32)
    f = jnp.dot(f.astype(jnp.bfloat16), w2_ref[...],
                preferred_element_type=jnp.float32) + b2_ref[0]

    out_ref[0] = (h1 + f).astype(out_ref.dtype)                      # residual 2


def clip_encoder_layer(h, attention_mask, causal_attention_mask, params,
                       num_heads, q_tile=None, eps=1e-5):
    B, S0, E = h.shape
    I = params["w1"].shape[1]
    head_dim = E // num_heads
    assert head_dim * num_heads == E

    # Combined additive mask (padding + causal), same semantics as the module.
    mask = (attention_mask + causal_attention_mask).astype(jnp.float32)

    # Pad the sequence to a lane-aligned length (multiple of 128): padded key
    # columns get -1e9 in the mask, padded query rows are sliced off at the end.
    S = max(128, _round_up(S0, 128))
    if S != S0:
        h_in = jnp.pad(h, ((0, 0), (0, S - S0), (0, 0)))
        mask = jnp.pad(mask, ((0, 0), (0, 0), (0, S - S0), (0, S - S0)))
        key_valid = jnp.arange(S) < S0
        mask = jnp.where(key_valid[None, None, None, :], mask, jnp.float32(-1e9))
    else:
        h_in = h

    if q_tile is None:
        q_tile = 256 if S % 256 == 0 else 128
    assert S % q_tile == 0, "q_tile must divide (padded) seq_len"
    nq = S // q_tile

    # bf16 weights (MXU-native, half VMEM); biases / LN params stay f32.
    wq = params["wq"].astype(jnp.bfloat16)
    wkv = jnp.concatenate([params["wk"], params["wv"]], axis=1).astype(jnp.bfloat16)
    bkv = jnp.concatenate([params["bk"], params["bv"]], axis=1)
    wo = params["wo"].astype(jnp.bfloat16)
    w1 = params["w1"].astype(jnp.bfloat16)
    w2 = params["w2"].astype(jnp.bfloat16)

    kernel = functools.partial(_clip_layer_kernel, num_heads=num_heads,
                               head_dim=head_dim, q_tile=q_tile, eps=eps)

    def invariant(shape):
        # Grid-invariant input (constant index map): single-buffer it.
        idx = lambda b, qi: (0,) * len(shape)
        try:
            return pl.BlockSpec(shape, idx, pipeline_mode=pl.Buffered(1))
        except (TypeError, AttributeError):
            return pl.BlockSpec(shape, idx)

    in_specs = [
        pl.BlockSpec((1, S, E), lambda b, qi: (b, 0, 0)),               # hidden (once per b)
        pl.BlockSpec((1, 1, q_tile, S), lambda b, qi: (b, 0, qi, 0)),   # mask tile
        invariant((E, E)), invariant((1, E)),                           # q proj
        invariant((E, 2 * E)), invariant((1, 2 * E)),                   # fused k/v
        invariant((E, E)), invariant((1, E)),                           # out proj
        invariant((1, E)), invariant((1, E)),                           # ln1 g/b
        invariant((1, E)), invariant((1, E)),                           # ln2 g/b
        invariant((E, I)), invariant((1, I)),                           # fc1
        invariant((I, E)), invariant((1, E)),                           # fc2
    ]
    out_specs = pl.BlockSpec((1, q_tile, E), lambda b, qi: (b, qi, 0))

    scratch_shapes = [
        pltpu.VMEM((num_heads, S, head_dim), jnp.bfloat16),   # K cache (head-major)
        pltpu.VMEM((num_heads, S, head_dim), jnp.bfloat16),   # V cache (head-major)
    ]

    # VMEM budget from the actual footprint, capped at ~85% of physical VMEM.
    f32b, bf16b = 4, 2
    dh_pad = _round_up(head_dim, 128)
    weight_bytes = bf16b * (E * E + E * 2 * E + E * E + E * I + I * E)      # single-buffered
    small_bytes = 2 * f32b * (E + 2 * E + E + 4 * E + I + E)                # biases / LN
    block_bytes = 2 * f32b * (S * E + q_tile * S + q_tile * E)              # hidden / mask / out
    scratch_bytes = 2 * bf16b * num_heads * S * dh_pad                      # K/V caches
    interm_bytes = f32b * (S * E + S * 2 * E + 2 * num_heads * q_tile * S
                           + 2 * q_tile * I + 4 * q_tile * E)               # live temporaries
    footprint = (weight_bytes + small_bytes + block_bytes
                 + scratch_bytes + interm_bytes)
    try:
        vmem_cap = pltpu.get_tpu_info().vmem_capacity_bytes
    except Exception:
        vmem_cap = 64 * 1024 * 1024
    vmem_limit = int(min(int(0.85 * vmem_cap),
                         max(32 * 1024 * 1024, int(1.25 * footprint))))

    out = pl.pallas_call(
        kernel,
        out_shape=jax.ShapeDtypeStruct((B, S, E), h.dtype),
        grid=(B, nq),
        in_specs=in_specs,
        out_specs=out_specs,
        scratch_shapes=scratch_shapes,
        compiler_params=pltpu.CompilerParams(
            # qi carries the K/V scratch -> must be "arbitrary"; b stays parallel
            # for megacore sharding on v7x.
            dimension_semantics=("parallel", "arbitrary"),
            vmem_limit_bytes=vmem_limit),
    )(h_in, mask,
      wq, params["bq"], wkv, bkv, wo, params["bo"],
      params["ln1g"], params["ln1b"], params["ln2g"], params["ln2b"],
      w1, params["b1"], w2, params["b2"])

    return out[:, :S0, :] if S != S0 else out


# ---------------- pure-JAX reference (for correctness check) ----------------
def ref_forward(h, amask, cmask, p, num_heads):
    B, S, E = h.shape
    Dh = E // num_heads

    def ln(x, g, b):
        mu = jnp.mean(x, -1, keepdims=True)
        var = jnp.mean((x - mu) ** 2, -1, keepdims=True)
        return (x - mu) / jnp.sqrt(var + 1e-5) * g + b

    residual = h
    x = ln(h, p["ln1g"][0], p["ln1b"][0])
    q = (x @ p["wq"] + p["bq"][0]) * (Dh ** -0.5)
    k = x @ p["wk"] + p["bk"][0]
    v = x @ p["wv"] + p["bv"][0]
    q = q.reshape(B, S, num_heads, Dh).transpose(0, 2, 1, 3)
    k = k.reshape(B, S, num_heads, Dh).transpose(0, 2, 1, 3)
    v = v.reshape(B, S, num_heads, Dh).transpose(0, 2, 1, 3)
    w = jnp.einsum("bhqd,bhkd->bhqk", q, k) + cmask + amask
    w = jax.nn.softmax(w, axis=-1)
    a = jnp.einsum("bhqk,bhkd->bhqd", w, v).transpose(0, 2, 1, 3).reshape(B, S, E)
    a = a @ p["wo"] + p["bo"][0]
    h1 = residual + a
    x2 = ln(h1, p["ln2g"][0], p["ln2b"][0])
    f = x2 @ p["w1"] + p["b1"][0]
    f = f * jax.nn.sigmoid(1.702 * f)
    f = f @ p["w2"] + p["b2"][0]
    return h1 + f


if __name__ == "__main__":
    # Small shapes; E = 128 (one lane width).  S=16 gets padded to 128 in the
    # wrapper; q_tile=64 -> 2 query tiles per batch element, exercising the
    # K/V-cache reuse path (qi > 0 reads scratch without recompute).
    B, S, E, H, I = 2, 16, 128, 4, 256
    TQ = 64

    key = jax.random.PRNGKey(0)
    keys = jax.random.split(key, 16)

    def w(k, shape, scale=0.02):
        return (scale * jax.random.normal(k, shape)).astype(jnp.float32)

    params = {
        # weights stored transposed (in, out) so the kernel does x @ W
        "wq": w(keys[0], (E, E)), "bq": w(keys[1], (1, E)),
        "wk": w(keys[2], (E, E)), "bk": w(keys[3], (1, E)),
        "wv": w(keys[4], (E, E)), "bv": w(keys[5], (1, E)),
        "wo": w(keys[6], (E, E)), "bo": w(keys[7], (1, E)),
        "ln1g": jnp.ones((1, E), jnp.float32), "ln1b": jnp.zeros((1, E), jnp.float32),
        "ln2g": jnp.ones((1, E), jnp.float32), "ln2b": jnp.zeros((1, E), jnp.float32),
        "w1": w(keys[8], (E, I)), "b1": w(keys[9], (1, I)),
        "w2": w(keys[10], (I, E)), "b2": w(keys[11], (1, E)),
    }

    hidden = jax.random.normal(keys[12], (B, S, E), jnp.float32)

    # additive causal mask (upper triangle masked)
    causal = jnp.where(jnp.tril(jnp.ones((S, S), jnp.bool_)), 0.0, -1e9)
    causal = jnp.broadcast_to(causal, (B, 1, S, S)).astype(jnp.float32)
    # padding mask: mask out the last 2 key positions of batch 1
    amask = np.zeros((B, 1, S, S), np.float32)
    amask[1, 0, :, -2:] = -1e9
    amask = jnp.asarray(amask)

    out = clip_encoder_layer(hidden, amask, causal, params, num_heads=H, q_tile=TQ)
    out = jax.block_until_ready(out)

    ref = ref_forward(hidden, amask, causal, params, num_heads=H)
    # bf16 matmul operands + approx reciprocal -> loosened (still tight) tolerance
    np.testing.assert_allclose(np.asarray(out), np.asarray(ref), rtol=1e-2, atol=1e-2)

    print("KERNEL_OK")
</pallas_src>

<mosaic_0001>
module attributes {stable_mosaic.version = 11 : i64} {
  func.func @_clip_layer_kernel(%arg0: i32, %arg1: i32, %arg2: memref<1x128x128xf32, #tpu.memory_space<vmem>>, %arg3: memref<1x1x64x128xf32, #tpu.memory_space<vmem>>, %arg4: memref<128x128xbf16, #tpu.memory_space<vmem>>, %arg5: memref<1x128xf32, #tpu.memory_space<vmem>>, %arg6: memref<128x256xbf16, #tpu.memory_space<vmem>>, %arg7: memref<1x256xf32, #tpu.memory_space<vmem>>, %arg8: memref<128x128xbf16, #tpu.memory_space<vmem>>, %arg9: memref<1x128xf32, #tpu.memory_space<vmem>>, %arg10: memref<1x128xf32, #tpu.memory_space<vmem>>, %arg11: memref<1x128xf32, #tpu.memory_space<vmem>>, %arg12: memref<1x128xf32, #tpu.memory_space<vmem>>, %arg13: memref<1x128xf32, #tpu.memory_space<vmem>>, %arg14: memref<128x256xbf16, #tpu.memory_space<vmem>>, %arg15: memref<1x256xf32, #tpu.memory_space<vmem>>, %arg16: memref<256x128xbf16, #tpu.memory_space<vmem>>, %arg17: memref<1x128xf32, #tpu.memory_space<vmem>>, %arg18: memref<1x64x128xf32, #tpu.memory_space<vmem>>, %arg19: memref<4x128x32xbf16, #tpu.memory_space<vmem>>, %arg20: memref<4x128x32xbf16, #tpu.memory_space<vmem>>) attributes {dimension_semantics = [#tpu.dimension_semantics<parallel>, #tpu.dimension_semantics<arbitrary>], iteration_bounds = array<i64: 2, 2>, scalar_prefetch = 0 : i64, scratch_operands = 2 : i64, tpu.core_type = #tpu.core_type<tc>, window_params = [{transform_indices = @transform_0, window_bounds = array<i64: 1, 128, 128>}, {transform_indices = @transform_1, window_bounds = array<i64: 1, 1, 64, 128>}, {pipeline_mode = #tpu.pipeline_mode<synchronous>, transform_indices = @transform_2, window_bounds = array<i64: 128, 128>}, {pipeline_mode = #tpu.pipeline_mode<synchronous>, transform_indices = @transform_3, window_bounds = array<i64: 1, 128>}, {pipeline_mode = #tpu.pipeline_mode<synchronous>, transform_indices = @transform_4, window_bounds = array<i64: 128, 256>}, {pipeline_mode = #tpu.pipeline_mode<synchronous>, transform_indices = @transform_5, window_bounds = array<i64: 1, 256>}, {pipeline_mode = #tpu.pipeline_mode<synchronous>, transform_indices = @transform_6, window_bounds = array<i64: 128, 128>}, {pipeline_mode = #tpu.pipeline_mode<synchronous>, transform_indices = @transform_7, window_bounds = array<i64: 1, 128>}, {pipeline_mode = #tpu.pipeline_mode<synchronous>, transform_indices = @transform_8, window_bounds = array<i64: 1, 128>}, {pipeline_mode = #tpu.pipeline_mode<synchronous>, transform_indices = @transform_9, window_bounds = array<i64: 1, 128>}, {pipeline_mode = #tpu.pipeline_mode<synchronous>, transform_indices = @transform_10, window_bounds = array<i64: 1, 128>}, {pipeline_mode = #tpu.pipeline_mode<synchronous>, transform_indices = @transform_11, window_bounds = array<i64: 1, 128>}, {pipeline_mode = #tpu.pipeline_mode<synchronous>, transform_indices = @transform_12, window_bounds = array<i64: 128, 256>}, {pipeline_mode = #tpu.pipeline_mode<synchronous>, transform_indices = @transform_13, window_bounds = array<i64: 1, 256>}, {pipeline_mode = #tpu.pipeline_mode<synchronous>, transform_indices = @transform_14, window_bounds = array<i64: 256, 128>}, {pipeline_mode = #tpu.pipeline_mode<synchronous>, transform_indices = @transform_15, window_bounds = array<i64: 1, 128>}, {transform_indices = @transform_16, window_bounds = array<i64: 1, 64, 128>}]} {
    %c0_i32 = arith.constant 0 : i32
    %0 = arith.cmpi eq, %arg1, %c0_i32 : i32
    %1 = arith.extui %0 : i1 to i32
    %c0_i32_0 = arith.constant 0 : i32
    %2 = arith.cmpi ne, %1, %c0_i32_0 : i32
    scf.if %2 {
      %c0_59 = arith.constant 0 : index
      %c0_60 = arith.constant 0 : index
      %c0_61 = arith.constant 0 : index
      %136 = vector.load %arg2[%c0_59, %c0_60, %c0_61] : memref<1x128x128xf32, #tpu.memory_space<vmem>>, vector<1x128x128xf32>
      %137 = vector.shape_cast %136 : vector<1x128x128xf32> to vector<128x128xf32>
      %c0_62 = arith.constant 0 : index
      %c0_63 = arith.constant 0 : index
      %138 = vector.load %arg10[%c0_62, %c0_63] : memref<1x128xf32, #tpu.memory_space<vmem>>, vector<1x128xf32>
      %139 = vector.shape_cast %138 : vector<1x128xf32> to vector<128xf32>
      %c0_64 = arith.constant 0 : index
      %c0_65 = arith.constant 0 : index
      %140 = vector.load %arg11[%c0_64, %c0_65] : memref<1x128xf32, #tpu.memory_space<vmem>>, vector<1x128xf32>
      %141 = vector.shape_cast %140 : vector<1x128xf32> to vector<128xf32>
      %cst_66 = arith.constant dense<0.000000e+00> : vector<128xf32>
      %142 = vector.multi_reduction <add>, %137, %cst_66 [1] : vector<128x128xf32> to vector<128xf32>
      %143 = vector.shape_cast %142 : vector<128xf32> to vector<128x1xf32>
      %cst_67 = arith.constant 1.280000e+02 : f32
      %144 = vector.broadcast %cst_67 : f32 to vector<128x1xf32>
      %145 = arith.divf %143, %144 : vector<128x1xf32>
      %146 = vector.broadcast %145 : vector<128x1xf32> to vector<128x128xf32>
      %147 = arith.subf %137, %146 : vector<128x128xf32>
      %148 = arith.mulf %147, %147 : vector<128x128xf32>
      %cst_68 = arith.constant dense<0.000000e+00> : vector<128xf32>
      %149 = vector.multi_reduction <add>, %148, %cst_68 [1] : vector<128x128xf32> to vector<128xf32>
      %150 = vector.shape_cast %149 : vector<128xf32> to vector<128x1xf32>
      %cst_69 = arith.constant 1.280000e+02 : f32
      %151 = vector.broadcast %cst_69 : f32 to vector<128x1xf32>
      %152 = arith.divf %150, %151 : vector<128x1xf32>
      %153 = vector.broadcast %145 : vector<128x1xf32> to vector<128x128xf32>
      %154 = arith.subf %137, %153 : vector<128x128xf32>
      %cst_70 = arith.constant 9.99999974E-6 : f32
      %155 = vector.broadcast %cst_70 : f32 to vector<128x1xf32>
      %156 = arith.addf %152, %155 : vector<128x1xf32>
      %157 = math.rsqrt %156 : vector<128x1xf32>
      %158 = vector.broadcast %157 : vector<128x1xf32> to vector<128x128xf32>
      %159 = arith.mulf %154, %158 : vector<128x128xf32>
      %160 = vector.shape_cast %139 : vector<128xf32> to vector<1x128xf32>
      %161 = vector.broadcast %160 : vector<1x128xf32> to vector<128x128xf32>
      %162 = arith.mulf %159, %161 : vector<128x128xf32>
      %163 = vector.shape_cast %141 : vector<128xf32> to vector<1x128xf32>
      %164 = vector.broadcast %163 : vector<1x128xf32> to vector<128x128xf32>
      %165 = arith.addf %162, %164 : vector<128x128xf32>
      %166 = arith.truncf %165 : vector<128x128xf32> to vector<128x128xbf16>
      %c0_71 = arith.constant 0 : index
      %c0_72 = arith.constant 0 : index
      %167 = vector.load %arg6[%c0_71, %c0_72] : memref<128x256xbf16, #tpu.memory_space<vmem>>, vector<128x256xbf16>
      %cst_73 = arith.constant dense<0.000000e+00> : vector<128x256xf32>
      %168 = tpu.matmul %166, %167, %cst_73 {dimension_numbers = #tpu.dot_dimension_numbers<[1], [0], [0], [1], [0, 0, 1, 1], [], []>} : vector<128x128xbf16>, vector<128x256xbf16>, vector<128x256xf32> -> vector<128x256xf32>
      %c0_74 = arith.constant 0 : index
      %c0_75 = arith.constant 0 : index
      %169 = vector.load %arg7[%c0_74, %c0_75] : memref<1x256xf32, #tpu.memory_space<vmem>>, vector<1x256xf32>
      %170 = vector.shape_cast %169 : vector<1x256xf32> to vector<256xf32>
      %171 = vector.shape_cast %170 : vector<256xf32> to vector<1x256xf32>
      %172 = vector.broadcast %171 : vector<1x256xf32> to vector<128x256xf32>
      %173 = arith.addf %168, %172 : vector<128x256xf32>
      %174 = vector.extract_strided_slice %173 {offsets = [0, 0], sizes = [128, 128], strides = [1, 1]} : vector<128x256xf32> to vector<128x128xf32>
      %175 = vector.shape_cast %174 : vector<128x128xf32> to vector<128x4x32xf32>
      %176 = tpu.transpose %175, [1, 0, 2] : vector<128x4x32xf32> -> vector<4x128x32xf32>
      %177 = vector.extract_strided_slice %173 {offsets = [0, 128], sizes = [128, 128], strides = [1, 1]} : vector<128x256xf32> to vector<128x128xf32>
      %178 = vector.shape_cast %177 : vector<128x128xf32> to vector<128x4x32xf32>
      %179 = tpu.transpose %178, [1, 0, 2] : vector<128x4x32xf32> -> vector<4x128x32xf32>
      %180 = arith.truncf %176 : vector<4x128x32xf32> to vector<4x128x32xbf16>
      %c0_76 = arith.constant 0 : index
      %c0_77 = arith.constant 0 : index
      %c0_78 = arith.constant 0 : index
      %181 = vector.load %arg19[%c0_76, %c0_77, %c0_78] : memref<4x128x32xbf16, #tpu.memory_space<vmem>>, vector<4x128x32xbf16>
      tpu.vector_store %arg19[%c0_76, %c0_77, %c0_78], %180 {strides = array<i32>} : memref<4x128x32xbf16, #tpu.memory_space<vmem>>, vector<4x128x32xbf16>,
      %182 = arith.truncf %179 : vector<4x128x32xf32> to vector<4x128x32xbf16>
      %c0_79 = arith.constant 0 : index
      %c0_80 = arith.constant 0 : index
      %c0_81 = arith.constant 0 : index
      %183 = vector.load %arg20[%c0_79, %c0_80, %c0_81] : memref<4x128x32xbf16, #tpu.memory_space<vmem>>, vector<4x128x32xbf16>
      tpu.vector_store %arg20[%c0_79, %c0_80, %c0_81], %182 {strides = array<i32>} : memref<4x128x32xbf16, #tpu.memory_space<vmem>>, vector<4x128x32xbf16>,
    } else {
    }
    %c64_i32 = arith.constant 64 : i32
    %3 = arith.muli %arg1, %c64_i32 : i32
    %4 = tpu.assume_multiple %3, 64 : i32
    %c0 = arith.constant 0 : index
    %5 = arith.index_cast %4 : i32 to index
    %c0_1 = arith.constant 0 : index
    %6 = vector.load %arg2[%c0, %5, %c0_1] : memref<1x128x128xf32, #tpu.memory_space<vmem>>, vector<1x64x128xf32>
    %7 = vector.shape_cast %6 : vector<1x64x128xf32> to vector<64x128xf32>
    %c0_2 = arith.constant 0 : index
    %c0_3 = arith.constant 0 : index
    %c0_4 = arith.constant 0 : index
    %c0_5 = arith.constant 0 : index
    %8 = vector.load %arg3[%c0_2, %c0_3, %c0_4, %c0_5] : memref<1x1x64x128xf32, #tpu.memory_space<vmem>>, vector<1x1x64x128xf32>
    %9 = vector.shape_cast %8 : vector<1x1x64x128xf32> to vector<64x128xf32>
    %c0_6 = arith.constant 0 : index
    %c0_7 = arith.constant 0 : index
    %10 = vector.load %arg10[%c0_6, %c0_7] : memref<1x128xf32, #tpu.memory_space<vmem>>, vector<1x128xf32>
    %11 = vector.shape_cast %10 : vector<1x128xf32> to vector<128xf32>
    %c0_8 = arith.constant 0 : index
    %c0_9 = arith.constant 0 : index
    %12 = vector.load %arg11[%c0_8, %c0_9] : memref<1x128xf32, #tpu.memory_space<vmem>>, vector<1x128xf32>
    %13 = vector.shape_cast %12 : vector<1x128xf32> to vector<128xf32>
    %cst = arith.constant dense<0.000000e+00> : vector<64xf32>
    %14 = vector.multi_reduction <add>, %7, %cst [1] : vector<64x128xf32> to vector<64xf32>
    %15 = vector.shape_cast %14 : vector<64xf32> to vector<64x1xf32>
    %cst_10 = arith.constant 1.280000e+02 : f32
    %16 = vector.broadcast %cst_10 : f32 to vector<64x1xf32>
    %17 = arith.divf %15, %16 : vector<64x1xf32>
    %18 = vector.broadcast %17 : vector<64x1xf32> to vector<64x128xf32>
    %19 = arith.subf %7, %18 : vector<64x128xf32>
    %20 = arith.mulf %19, %19 : vector<64x128xf32>
    %cst_11 = arith.constant dense<0.000000e+00> : vector<64xf32>
    %21 = vector.multi_reduction <add>, %20, %cst_11 [1] : vector<64x128xf32> to vector<64xf32>
    %22 = vector.shape_cast %21 : vector<64xf32> to vector<64x1xf32>
    %cst_12 = arith.constant 1.280000e+02 : f32
    %23 = vector.broadcast %cst_12 : f32 to vector<64x1xf32>
    %24 = arith.divf %22, %23 : vector<64x1xf32>
    %25 = vector.broadcast %17 : vector<64x1xf32> to vector<64x128xf32>
    %26 = arith.subf %7, %25 : vector<64x128xf32>
    %cst_13 = arith.constant 9.99999974E-6 : f32
    %27 = vector.broadcast %cst_13 : f32 to vector<64x1xf32>
    %28 = arith.addf %24, %27 : vector<64x1xf32>
    %29 = math.rsqrt %28 : vector<64x1xf32>
    %30 = vector.broadcast %29 : vector<64x1xf32> to vector<64x128xf32>
    %31 = arith.mulf %26, %30 : vector<64x128xf32>
    %32 = vector.shape_cast %11 : vector<128xf32> to vector<1x128xf32>
    %33 = vector.broadcast %32 : vector<1x128xf32> to vector<64x128xf32>
    %34 = arith.mulf %31, %33 : vector<64x128xf32>
    %35 = vector.shape_cast %13 : vector<128xf32> to vector<1x128xf32>
    %36 = vector.broadcast %35 : vector<1x128xf32> to vector<64x128xf32>
    %37 = arith.addf %34, %36 : vector<64x128xf32>
    %38 = arith.truncf %37 : vector<64x128xf32> to vector<64x128xbf16>
    %c0_14 = arith.constant 0 : index
    %c0_15 = arith.constant 0 : index
    %39 = vector.load %arg4[%c0_14, %c0_15] : memref<128x128xbf16, #tpu.memory_space<vmem>>, vector<128x128xbf16>
    %cst_16 = arith.constant dense<0.000000e+00> : vector<64x128xf32>
    %40 = tpu.matmul %38, %39, %cst_16 {dimension_numbers = #tpu.dot_dimension_numbers<[1], [0], [0], [1], [0, 0, 1, 1], [], []>} : vector<64x128xbf16>, vector<128x128xbf16>, vector<64x128xf32> -> vector<64x128xf32>
    %c0_17 = arith.constant 0 : index
    %c0_18 = arith.constant 0 : index
    %41 = vector.load %arg5[%c0_17, %c0_18] : memref<1x128xf32, #tpu.memory_space<vmem>>, vector<1x128xf32>
    %42 = vector.shape_cast %41 : vector<1x128xf32> to vector<128xf32>
    %43 = vector.shape_cast %42 : vector<128xf32> to vector<1x128xf32>
    %44 = vector.broadcast %43 : vector<1x128xf32> to vector<64x128xf32>
    %45 = arith.addf %40, %44 : vector<64x128xf32>
    %cst_19 = arith.constant 0.176776692 : f32
    %46 = vector.broadcast %cst_19 : f32 to vector<64x128xf32>
    %47 = arith.mulf %45, %46 : vector<64x128xf32>
    %48 = vector.shape_cast %47 : vector<64x128xf32> to vector<64x4x32xf32>
    %49 = tpu.transpose %48, [1, 0, 2] : vector<64x4x32xf32> -> vector<4x64x32xf32>
    %50 = arith.truncf %49 : vector<4x64x32xf32> to vector<4x64x32xbf16>
    %c0_20 = arith.constant 0 : index
    %c0_21 = arith.constant 0 : index
    %c0_22 = arith.constant 0 : index
    %51 = vector.load %arg19[%c0_20, %c0_21, %c0_22] : memref<4x128x32xbf16, #tpu.memory_space<vmem>>, vector<4x128x32xbf16>
    "tpu.trace_start"() <{level = 10 : i32, message = "hqd,hkd->hqk"}> : () -> ()
    %cst_23 = arith.constant dense<0.000000e+00> : vector<4x64x128xf32>
    %52 = tpu.matmul %50, %51, %cst_23 {dimension_numbers = #tpu.dot_dimension_numbers<[2], [2], [1], [1], [0, 0, 0, 1, 1, 1], [0], [0]>} : vector<4x64x32xbf16>, vector<4x128x32xbf16>, vector<4x64x128xf32> -> vector<4x64x128xf32>
    "tpu.trace_stop"() : () -> ()
    %53 = vector.shape_cast %9 : vector<64x128xf32> to vector<1x64x128xf32>
    %54 = vector.broadcast %53 : vector<1x64x128xf32> to vector<4x64x128xf32>
    %55 = arith.addf %52, %54 : vector<4x64x128xf32>
    %cst_24 = arith.constant dense<0xFF800000> : vector<4x64xf32>
    %56 = vector.multi_reduction <maximumf>, %55, %cst_24 [2] : vector<4x64x128xf32> to vector<4x64xf32>
    %57 = vector.shape_cast %56 : vector<4x64xf32> to vector<4x64x1xf32>
    %58 = vector.broadcast %57 : vector<4x64x1xf32> to vector<4x64x128xf32>
    %59 = arith.subf %55, %58 : vector<4x64x128xf32>
    %60 = math.exp %59 : vector<4x64x128xf32>
    %cst_25 = arith.constant dense<0.000000e+00> : vector<4x64xf32>
    %61 = vector.multi_reduction <add>, %60, %cst_25 [2] : vector<4x64x128xf32> to vector<4x64xf32>
    %62 = vector.shape_cast %61 : vector<4x64xf32> to vector<4x64x1xf32>
    %63 = tpu.reciprocal %62 {approx = true} : vector<4x64x1xf32> -> vector<4x64x1xf32>
    %64 = vector.broadcast %63 : vector<4x64x1xf32> to vector<4x64x128xf32>
    %65 = arith.mulf %60, %64 : vector<4x64x128xf32>
    %66 = arith.truncf %65 : vector<4x64x128xf32> to vector<4x64x128xbf16>
    %c0_26 = arith.constant 0 : index
    %c0_27 = arith.constant 0 : index
    %c0_28 = arith.constant 0 : index
    %67 = vector.load %arg20[%c0_26, %c0_27, %c0_28] : memref<4x128x32xbf16, #tpu.memory_space<vmem>>, vector<4x128x32xbf16>
    "tpu.trace_start"() <{level = 10 : i32, message = "hqk,hkd->hqd"}> : () -> ()
    %cst_29 = arith.constant dense<0.000000e+00> : vector<4x64x32xf32>
    %68 = tpu.matmul %66, %67, %cst_29 {dimension_numbers = #tpu.dot_dimension_numbers<[2], [1], [1], [2], [0, 0, 0, 1, 1, 2], [0], [0]>} : vector<4x64x128xbf16>, vector<4x128x32xbf16>, vector<4x64x32xf32> -> vector<4x64x32xf32>
    "tpu.trace_stop"() : () -> ()
    %69 = tpu.transpose %68, [1, 0, 2] : vector<4x64x32xf32> -> vector<64x4x32xf32>
    %70 = vector.shape_cast %69 : vector<64x4x32xf32> to vector<64x128xf32>
    %71 = arith.truncf %70 : vector<64x128xf32> to vector<64x128xbf16>
    %c0_30 = arith.constant 0 : index
    %c0_31 = arith.constant 0 : index
    %72 = vector.load %arg8[%c0_30, %c0_31] : memref<128x128xbf16, #tpu.memory_space<vmem>>, vector<128x128xbf16>
    %cst_32 = arith.constant dense<0.000000e+00> : vector<64x128xf32>
    %73 = tpu.matmul %71, %72, %cst_32 {dimension_numbers = #tpu.dot_dimension_numbers<[1], [0], [0], [1], [0, 0, 1, 1], [], []>} : vector<64x128xbf16>, vector<128x128xbf16>, vector<64x128xf32> -> vector<64x128xf32>
    %c0_33 = arith.constant 0 : index
    %c0_34 = arith.constant 0 : index
    %74 = vector.load %arg9[%c0_33, %c0_34] : memref<1x128xf32, #tpu.memory_space<vmem>>, vector<1x128xf32>
    %75 = vector.shape_cast %74 : vector<1x128xf32> to vector<128xf32>
    %76 = vector.shape_cast %75 : vector<128xf32> to vector<1x128xf32>
    %77 = vector.broadcast %76 : vector<1x128xf32> to vector<64x128xf32>
    %78 = arith.addf %73, %77 : vector<64x128xf32>
    %79 = arith.addf %7, %78 : vector<64x128xf32>
    %c0_35 = arith.constant 0 : index
    %c0_36 = arith.constant 0 : index
    %80 = vector.load %arg12[%c0_35, %c0_36] : memref<1x128xf32, #tpu.memory_space<vmem>>, vector<1x128xf32>
    %81 = vector.shape_cast %80 : vector<1x128xf32> to vector<128xf32>
    %c0_37 = arith.constant 0 : index
    %c0_38 = arith.constant 0 : index
    %82 = vector.load %arg13[%c0_37, %c0_38] : memref<1x128xf32, #tpu.memory_space<vmem>>, vector<1x128xf32>
    %83 = vector.shape_cast %82 : vector<1x128xf32> to vector<128xf32>
    %cst_39 = arith.constant dense<0.000000e+00> : vector<64xf32>
    %84 = vector.multi_reduction <add>, %79, %cst_39 [1] : vector<64x128xf32> to vector<64xf32>
    %85 = vector.shape_cast %84 : vector<64xf32> to vector<64x1xf32>
    %cst_40 = arith.constant 1.280000e+02 : f32
    %86 = vector.broadcast %cst_40 : f32 to vector<64x1xf32>
    %87 = arith.divf %85, %86 : vector<64x1xf32>
    %88 = vector.broadcast %87 : vector<64x1xf32> to vector<64x128xf32>
    %89 = arith.subf %79, %88 : vector<64x128xf32>
    %90 = arith.mulf %89, %89 : vector<64x128xf32>
    %cst_41 = arith.constant dense<0.000000e+00> : vector<64xf32>
    %91 = vector.multi_reduction <add>, %90, %cst_41 [1] : vector<64x128xf32> to vector<64xf32>
    %92 = vector.shape_cast %91 : vector<64xf32> to vector<64x1xf32>
    %cst_42 = arith.constant 1.280000e+02 : f32
    %93 = vector.broadcast %cst_42 : f32 to vector<64x1xf32>
    %94 = arith.divf %92, %93 : vector<64x1xf32>
    %95 = vector.broadcast %87 : vector<64x1xf32> to vector<64x128xf32>
    %96 = arith.subf %79, %95 : vector<64x128xf32>
    %cst_43 = arith.constant 9.99999974E-6 : f32
    %97 = vector.broadcast %cst_43 : f32 to vector<64x1xf32>
    %98 = arith.addf %94, %97 : vector<64x1xf32>
    %99 = math.rsqrt %98 : vector<64x1xf32>
    %100 = vector.broadcast %99 : vector<64x1xf32> to vector<64x128xf32>
    %101 = arith.mulf %96, %100 : vector<64x128xf32>
    %102 = vector.shape_cast %81 : vector<128xf32> to vector<1x128xf32>
    %103 = vector.broadcast %102 : vector<1x128xf32> to vector<64x128xf32>
    %104 = arith.mulf %101, %103 : vector<64x128xf32>
    %105 = vector.shape_cast %83 : vector<128xf32> to vector<1x128xf32>
    %106 = vector.broadcast %105 : vector<1x128xf32> to vector<64x128xf32>
    %107 = arith.addf %104, %106 : vector<64x128xf32>
    %108 = arith.truncf %107 : vector<64x128xf32> to vector<64x128xbf16>
    %c0_44 = arith.constant 0 : index
    %c0_45 = arith.constant 0 : index
    %109 = vector.load %arg14[%c0_44, %c0_45] : memref<128x256xbf16, #tpu.memory_space<vmem>>, vector<128x256xbf16>
    %cst_46 = arith.constant dense<0.000000e+00> : vector<64x256xf32>
    %110 = tpu.matmul %108, %109, %cst_46 {dimension_numbers = #tpu.dot_dimension_numbers<[1], [0], [0], [1], [0, 0, 1, 1], [], []>} : vector<64x128xbf16>, vector<128x256xbf16>, vector<64x256xf32> -> vector<64x256xf32>
    %c0_47 = arith.constant 0 : index
    %c0_48 = arith.constant 0 : index
    %111 = vector.load %arg15[%c0_47, %c0_48] : memref<1x256xf32, #tpu.memory_space<vmem>>, vector<1x256xf32>
    %112 = vector.shape_cast %111 : vector<1x256xf32> to vector<256xf32>
    %113 = vector.shape_cast %112 : vector<256xf32> to vector<1x256xf32>
    %114 = vector.broadcast %113 : vector<1x256xf32> to vector<64x256xf32>
    %115 = arith.addf %110, %114 : vector<64x256xf32>
    %cst_49 = arith.constant 1.702000e+00 : f32
    %116 = vector.broadcast %cst_49 : f32 to vector<64x256xf32>
    %117 = arith.mulf %116, %115 : vector<64x256xf32>
    %118 = arith.negf %117 : vector<64x256xf32>
    %119 = math.exp %118 : vector<64x256xf32>
    %cst_50 = arith.constant 1.000000e+00 : f32
    %120 = vector.broadcast %cst_50 : f32 to vector<64x256xf32>
    %121 = arith.addf %120, %119 : vector<64x256xf32>
    %122 = arith.divf %120, %121 : vector<64x256xf32>
    %123 = arith.mulf %115, %122 : vector<64x256xf32>
    %124 = arith.truncf %123 : vector<64x256xf32> to vector<64x256xbf16>
    %c0_51 = arith.constant 0 : index
    %c0_52 = arith.constant 0 : index
    %125 = vector.load %arg16[%c0_51, %c0_52] : memref<256x128xbf16, #tpu.memory_space<vmem>>, vector<256x128xbf16>
    %cst_53 = arith.constant dense<0.000000e+00> : vector<64x128xf32>
    %126 = tpu.matmul %124, %125, %cst_53 {dimension_numbers = #tpu.dot_dimension_numbers<[1], [0], [0], [1], [0, 0, 1, 1], [], []>} : vector<64x256xbf16>, vector<256x128xbf16>, vector<64x128xf32> -> vector<64x128xf32>
    %c0_54 = arith.constant 0 : index
    %c0_55 = arith.constant 0 : index
    %127 = vector.load %arg17[%c0_54, %c0_55] : memref<1x128xf32, #tpu.memory_space<vmem>>, vector<1x128xf32>
    %128 = vector.shape_cast %127 : vector<1x128xf32> to vector<128xf32>
    %129 = vector.shape_cast %128 : vector<128xf32> to vector<1x128xf32>
    %130 = vector.broadcast %129 : vector<1x128xf32> to vector<64x128xf32>
    %131 = arith.addf %126, %130 : vector<64x128xf32>
    %132 = arith.addf %79, %131 : vector<64x128xf32>
    %c0_56 = arith.constant 0 : index
    %c0_57 = arith.constant 0 : index
    %c0_58 = arith.constant 0 : index
    %133 = vector.load %arg18[%c0_56, %c0_57, %c0_58] : memref<1x64x128xf32, #tpu.memory_space<vmem>>, vector<1x64x128xf32>
    %134 = vector.shape_cast %133 : vector<1x64x128xf32> to vector<64x128xf32>
    %135 = vector.shape_cast %132 : vector<64x128xf32> to vector<1x64x128xf32>
    tpu.vector_store %arg18[%c0_56, %c0_57, %c0_58], %135 {strides = array<i32>} : memref<1x64x128xf32, #tpu.memory_space<vmem>>, vector<1x64x128xf32>,
    return
  }
  func.func @transform_0(%arg0: i32, %arg1: i32) -> (i32, i32, i32) {
    %c0_i32 = arith.constant 0 : i32
    %c0_i32_0 = arith.constant 0 : i32
    %c0_i32_1 = arith.constant 0 : i32
    return %arg0, %c0_i32, %c0_i32_0 : i32, i32, i32
  }
  func.func @transform_1(%arg0: i32, %arg1: i32) -> (i32, i32, i32, i32) {
    %c0_i32 = arith.constant 0 : i32
    %c0_i32_0 = arith.constant 0 : i32
    %c0_i32_1 = arith.constant 0 : i32
    return %arg0, %c0_i32, %arg1, %c0_i32_0 : i32, i32, i32, i32
  }
  func.func @transform_2(%arg0: i32, %arg1: i32) -> (i32, i32) {
    %c0_i32 = arith.constant 0 : i32
    %c0_i32_0 = arith.constant 0 : i32
    %c0_i32_1 = arith.constant 0 : i32
    return %c0_i32, %c0_i32_0 : i32, i32
  }
  func.func @transform_3(%arg0: i32, %arg1: i32) -> (i32, i32) {
    %c0_i32 = arith.constant 0 : i32
    %c0_i32_0 = arith.constant 0 : i32
    %c0_i32_1 = arith.constant 0 : i32
    return %c0_i32, %c0_i32_0 : i32, i32
  }
  func.func @transform_4(%arg0: i32, %arg1: i32) -> (i32, i32) {
    %c0_i32 = arith.constant 0 : i32
    %c0_i32_0 = arith.constant 0 : i32
    %c0_i32_1 = arith.constant 0 : i32
    return %c0_i32, %c0_i32_0 : i32, i32
  }
  func.func @transform_5(%arg0: i32, %arg1: i32) -> (i32, i32) {
    %c0_i32 = arith.constant 0 : i32
    %c0_i32_0 = arith.constant 0 : i32
    %c0_i32_1 = arith.constant 0 : i32
    return %c0_i32, %c0_i32_0 : i32, i32
  }
  func.func @transform_6(%arg0: i32, %arg1: i32) -> (i32, i32) {
    %c0_i32 = arith.constant 0 : i32
    %c0_i32_0 = arith.constant 0 : i32
    %c0_i32_1 = arith.constant 0 : i32
    return %c0_i32, %c0_i32_0 : i32, i32
  }
  func.func @transform_7(%arg0: i32, %arg1: i32) -> (i32, i32) {
    %c0_i32 = arith.constant 0 : i32
    %c0_i32_0 = arith.constant 0 : i32
    %c0_i32_1 = arith.constant 0 : i32
    return %c0_i32, %c0_i32_0 : i32, i32
  }
  func.func @transform_8(%arg0: i32, %arg1: i32) -> (i32, i32) {
    %c0_i32 = arith.constant 0 : i32
    %c0_i32_0 = arith.constant 0 : i32
    %c0_i32_1 = arith.constant 0 : i32
    return %c0_i32, %c0_i32_0 : i32, i32
  }
  func.func @transform_9(%arg0: i32, %arg1: i32) -> (i32, i32) {
    %c0_i32 = arith.constant 0 : i32
    %c0_i32_0 = arith.constant 0 : i32
    %c0_i32_1 = arith.constant 0 : i32
    return %c0_i32, %c0_i32_0 : i32, i32
  }
  func.func @transform_10(%arg0: i32, %arg1: i32) -> (i32, i32) {
    %c0_i32 = arith.constant 0 : i32
    %c0_i32_0 = arith.constant 0 : i32
    %c0_i32_1 = arith.constant 0 : i32
    return %c0_i32, %c0_i32_0 : i32, i32
  }
  func.func @transform_11(%arg0: i32, %arg1: i32) -> (i32, i32) {
    %c0_i32 = arith.constant 0 : i32
    %c0_i32_0 = arith.constant 0 : i32
    %c0_i32_1 = arith.constant 0 : i32
    return %c0_i32, %c0_i32_0 : i32, i32
  }
  func.func @transform_12(%arg0: i32, %arg1: i32) -> (i32, i32) {
    %c0_i32 = arith.constant 0 : i32
    %c0_i32_0 = arith.constant 0 : i32
    %c0_i32_1 = arith.constant 0 : i32
    return %c0_i32, %c0_i32_0 : i32, i32
  }
  func.func @transform_13(%arg0: i32, %arg1: i32) -> (i32, i32) {
    %c0_i32 = arith.constant 0 : i32
    %c0_i32_0 = arith.constant 0 : i32
    %c0_i32_1 = arith.constant 0 : i32
    return %c0_i32, %c0_i32_0 : i32, i32
  }
  func.func @transform_14(%arg0: i32, %arg1: i32) -> (i32, i32) {
    %c0_i32 = arith.constant 0 : i32
    %c0_i32_0 = arith.constant 0 : i32
    %c0_i32_1 = arith.constant 0 : i32
    return %c0_i32, %c0_i32_0 : i32, i32
  }
  func.func @transform_15(%arg0: i32, %arg1: i32) -> (i32, i32) {
    %c0_i32 = arith.constant 0 : i32
    %c0_i32_0 = arith.constant 0 : i32
    %c0_i32_1 = arith.constant 0 : i32
    return %c0_i32, %c0_i32_0 : i32, i32
  }
  func.func @transform_16(%arg0: i32, %arg1: i32) -> (i32, i32, i32) {
    %c0_i32 = arith.constant 0 : i32
    %c0_i32_0 = arith.constant 0 : i32
    return %arg0, %arg1, %c0_i32 : i32, i32, i32
  }
}

</mosaic_0001>

<bundles_post_ra>
// kernel: tpu_custom_call.1
= control target key start
LH: loop header
LB: loop body
LE: loop exit
PB: predicated region body
PF: predicated region fallthrough
CT: control target
= control target key end

     0   :  { %s17376_s0 = inlined_call_operand.hbm [shape: f32[2,128,128], index: 0, kind: input, shape index: {}]   ;;  %s17377_s1 = inlined_call_operand.hbm [shape: f32[2,1,128,128], index: 1, kind: input, shape index: {}]   ;;  %s17378_s2 = inlined_call_operand.hbm [shape: bf16[128,128], index: 2, kind: input, shape index: {}]   ;;  %s17379_s3 = inlined_call_operand.hbm [shape: f32[1,128], index: 3, kind: input, shape index: {}]   ;;  %s17380_s4 = inlined_call_operand.hbm [shape: bf16[128,256], index: 4, kind: input, shape index: {}]   ;;  %s17381_s5 = inlined_call_operand.vmem [shape: f32[1,256], index: 5, kind: input, shape index: {}]   ;;  %s17382_s6 = inlined_call_operand.hbm [shape: bf16[128,128], index: 6, kind: input, shape index: {}]   ;;  %s17383_s7 = inlined_call_operand.vmem [shape: f32[1,128], index: 7, kind: input, shape index: {}]   ;;  %s17384_s8 = inlined_call_operand.vmem [shape: f32[1,128], index: 8, kind: input, shape index: {}]   ;;  %s17385_s9 = inlined_call_operand.vmem [shape: f32[1,128], index: 9, kind: input, shape index: {}]   ;;  %s17386_s10 = inlined_call_operand.vmem [shape: f32[1,128], index: 10, kind: input, shape index: {}]   ;;  %s17387_s11 = inlined_call_operand.vmem [shape: f32[1,128], index: 11, kind: input, shape index: {}]   ;;  %s17388_s12 = inlined_call_operand.hbm [shape: bf16[128,256], index: 12, kind: input, shape index: {}]   ;;  %s17389_s13 = inlined_call_operand.vmem [shape: f32[1,256], index: 13, kind: input, shape index: {}]   ;;  %s17390_s14 = inlined_call_operand.hbm [shape: bf16[256,128], index: 14, kind: input, shape index: {}]   ;;  %s17391_s15 = inlined_call_operand.vmem [shape: f32[1,128], index: 15, kind: input, shape index: {}]   ;;  %s17392_s16 = inlined_call_operand.hbm [shape: f32[2,128,128], index: 16, kind: output, shape index: {}]  }
   0x1   :  { %17407 = sst [smem:[#allocation34_spill]] %s17376_s0 }
   0x2   :  { %17408 = sst [smem:[#allocation35_spill]] %s17378_s2 }
   0x3   :  { %17409 = sst [smem:[#allocation36_spill]] %s17379_s3 }
   0x4   :  { %17410 = sst [smem:[#allocation37_spill]] %s17380_s4 }
   0x5   :  { %17411 = sst [smem:[#allocation38_spill]] %s17381_s5 }
   0x6   :  { %17412 = sst [smem:[#allocation39_spill]] %s17382_s6 }
   0x7   :  { %17413 = sst [smem:[#allocation40_spill]] %s17383_s7 }
   0x8   :  { %17414 = sst [smem:[#allocation41_spill]] %s17384_s8 }
   0x9   :  { %17415 = sst [smem:[#allocation42_spill]] %s17385_s9 }
   0xa   :  { %17416 = sst [smem:[#allocation43_spill]] %s17386_s10 }
   0xb   :  { %17417 = sst [smem:[#allocation44_spill]] %s17387_s11 }
   0xc   :  { %17418 = sst [smem:[#allocation45_spill]] %s17388_s12 }
   0xd   :  { %17419 = sst [smem:[#allocation46_spill]] %s17389_s13 }
   0xe   :  { %17420 = sst [smem:[#allocation47_spill]] %s17390_s14 }
   0xf   :  { %17421 = sst [smem:[#allocation48_spill]] %s17391_s15 }
  0x10   :  { %17422 = sst [smem:[#allocation49_spill]] %s17392_s16 }
  0x11   :  { %21 = vsyncpa [#allocation5], 0 }
  0x12   :  { %23 = vsyncpa [#allocation5 + $0x1], 0 }
  0x13   :  { %24 = vsyncpa [#allocation8], 0 }
  0x14   :  { %26 = vsyncpa [#allocation8 + $0x1], 0 }
  0x15   :  { %27 = vsyncpa [#allocation11], 0 }
  0x16   :  { %28 = vsyncpa [#allocation14], 0 }
  0x17   :  { %29 = vsyncpa [#allocation17], 0 }
  0x18   :  { %30 = vsyncpa [#allocation6], 0 }
  0x19   :  { %32 = vsyncpa [#allocation6 + $0x1], 0  ;;  %s12305_s21 = smov 0   ;;  %s12307_s22 = smov 0  }
  0x1a   :  { %s12309_s23 = smov 0   ;;  %s12311_s24 = smov 0  }
  0x1b   :  { %s12313_s25 = smov 0   ;;  %s12315_s26 = smov 0  }
  0x1c   :  { %s12317_s27 = smov 0   ;;  %s12319_s28 = smov 0  }
  0x1d   :  { %s12321_s29 = smov 0   ;;  %s12323_s30 = smov 0  }
  0x1e   :  { %s12325_s0 = smov 0  }
  0x1f LB: > { %17423 = sst [smem:[#allocation26_spill]] %s12154_s21  ;;  %s12361_s17 = sadd.s32 4294967295, %s12194_s0   ;;  %s12194_s0 = sphi %s12325_s0, %s38_s0   ;;  %s12190_s30 = sphi %s12323_s30, %s17558_s30   ;;  %s12186_s29 = sphi %s12321_s29, %s17557_s29   ;;  %s12182_s28 = sphi %s12319_s28, %s17556_s28   ;;  %s12178_s27 = sphi %s12317_s27, %s17555_s27   ;;  %s12174_s26 = sphi %s12315_s26, %s17554_s26   ;;  %s12170_s25 = sphi %s12313_s25, %s17553_s25   ;;  %s12166_s24 = sphi %s12311_s24, %s17552_s24   ;;  %s12162_s23 = sphi %s12309_s23, %s17551_s23   ;;  %s12158_s22 = sphi %s12307_s22, %s17550_s22   ;;  %s12154_s21 = sphi %s12305_s21, %s17549_s21  }
  0x20   : > { %17424 = sst [smem:[#allocation27_spill]] %s12178_s27  ;;  %p10259_p0 = scmp.ge.s32.totalorder %s12194_s0, 1 }
  0x21   : > { %17425 = sst [smem:[#allocation28_spill]] %s12182_s28  ;;  %p17396_p1 = scmp.eq.s32.totalorder %s12361_s17, 0 }
  0x22   : > { %p431_p2 = scmp.lt.s32.totalorder %s12194_s0, 5  ;;  %s17426_s2 = sld [smem:[#allocation35_spill]] }
  0x23   : > { %s12196_s28 = smov [#allocation9]   ;;  %s17430_s3 = sld [smem:[#allocation36_spill]] }
  0x24   : > { %p12369_p3 = pnand %p10259_p0, %p431_p2  ;;  %s444_s15 = sshll.u32 %s12196_s28, 4  ;;  %s445_s15 = int_to_ptr.vmem [resolvable:$true] %s444_s15 }
  0x25   : > { %s12197_s19 = smov 64   ;;  %s12199_s28 = smov [#allocation10]  }
  0x26   : > { %s17427_s16 = scalar_select %p12369_p3, 1, 0 }
  0x27   : > { %p11019_p4 = pneg %p12369_p3  ;;  %s459_s7 = sshll.u32 %s12199_s28, 4  ;;  %s460_s7 = int_to_ptr.vmem [resolvable:$true] %s459_s7 }
  0x28   : > { %s442_s20 = sshll.u32 %s17426_s2, 4  ;;  %17428 = sst [smem:[#allocation29_spill]] %s17427_s16  ;;  %s443_s20 = int_to_ptr.hbm [resolvable:$true] %s442_s20 }
  0x29   : > { %p12377_p5 = pnand %p11019_p4, %p17396_p1  ;;  %s457_s18 = sshll.u32 %s17430_s3, 4  ;;  %s458_s18 = int_to_ptr.hbm [resolvable:$true] %s457_s18 }
  0x2a   : > { %s12198_s2 = smov 4   ;;  %s17431_s6 = sld [smem:[#allocation39_spill]] }
  0x2b   : > { %11022 = dma.hbm_to_vmem [thread:$0]  (!%p12377_p5), %s443_s20, 1024, %s445_s15, [#allocation8], %s12197_s19, %s12197_s19, %s12198_s2  }
  0x2c   : > { %11025 = dma.hbm_to_vmem [thread:$0]  (!%p12377_p5), %s458_s18, 16, %s460_s7, [#allocation11]  }
  0x2d   : > { %s17432_s4 = sld [smem:[#allocation37_spill]]  ;;  %s12200_s27 = smov [#allocation13]  }
  0x2e   : > { %s487_s16 = sshll.u32 %s12200_s27, 4  ;;  %s12201_s5 = smov [#allocation12]   ;;  %s488_s16 = int_to_ptr.vmem [resolvable:$true] %s487_s16 }
  0x2f   : > { %s470_s9 = sshll.u32 %s12201_s5, 4  ;;  %s17397_s7 = smov 128   ;;  %s471_s9 = int_to_ptr.vmem [resolvable:$true] %s470_s9 }
  0x30   : > { %s485_s8 = sshll.u32 %s17431_s6, 4  ;;  %s17398_s15 = smov 8   ;;  %s486_s8 = int_to_ptr.hbm [resolvable:$true] %s485_s8 }
  0x31   : > { %11031 = dma.hbm_to_vmem [thread:$0]  (!%p12377_p5), %s486_s8, 1024, %s488_s16, [#allocation14], %s12197_s19, %s12197_s19, %s12198_s2  }
  0x32   : > { %s17433_s12 = sld [smem:[#allocation45_spill]]  ;;  %s12204_s16 = smov [#allocation15]  }
  0x33   : > { %s468_s3 = sshll.u32 %s17432_s4, 4  ;;  %s516_s18 = sshll.u32 %s12204_s16, 4  ;;  %s469_s3 = int_to_ptr.hbm [resolvable:$true] %s468_s3  ;;  %s517_s18 = int_to_ptr.vmem [resolvable:$true] %s516_s18 }
  0x34   : > { %11028 = dma.hbm_to_vmem [thread:$0]  (!%p12377_p5), %s469_s3, 2048, %s471_s9, [#allocation11], %s17397_s7, %s17397_s7, %s17398_s15  }
  0x35   : > { %s17434_s14 = sld [smem:[#allocation47_spill]]  ;;  %s12205_s3 = smov [#allocation16]  }
  0x36   : > { %s533_s5 = sshll.u32 %s12205_s3, 4  ;;  %s50_s9 = sadd.s32 1, %s12190_s30  ;;  %s534_s5 = int_to_ptr.vmem [resolvable:$true] %s533_s5 }
  0x37   : > { %s57_s27 = sadd.s32 1, %s12174_s26  ;;  %p64_p6 = scmp.ne.s32.totalorder %s12174_s26, %s12170_s25 }
  0x38   : > { %s514_s8 = sshll.u32 %s17433_s12, 4  ;;  %p65_p7 = scmp.eq.s32.totalorder %s12194_s0, 0  ;;  %s515_s8 = int_to_ptr.hbm [resolvable:$true] %s514_s8 }
  0x39   : > { %11034 = dma.hbm_to_vmem [thread:$0]  (!%p12377_p5), %s515_s8, 2048, %s517_s18, [#allocation14], %s17397_s7, %s17397_s7, %s17398_s15  }
  0x3a   : > { %p70_p8 = scmp.ne.s32.totalorder %s12170_s25, %s12166_s24  ;;  %p11055_p9 = scmp.lt.s32.totalorder %s12194_s0, 4 }
  0x3b   : > { %s531_s11 = sshll.u32 %s17434_s14, 4  ;;  %p66_p10 = por %p65_p7, %p64_p6  ;;  %s532_s11 = int_to_ptr.hbm [resolvable:$true] %s531_s11 }
  0x3c   : > { %11037 = dma.hbm_to_vmem [thread:$0]  (!%p12377_p5), %s532_s11, 2048, %s534_s5, [#allocation17], %s12197_s19, %s12197_s19, %s12198_s2  }
  0x3d   : > { %s550_s20 = sand.u32 1, %s12174_s26   ;;  %p12436_p11 = por %p17396_p1, %p70_p8 }
  0x3e   : > { %s10267_s2 = sshll.u32 %s550_s20, 7  ;;  %s10836_s19 = sshll.u32 %s12190_s30, 7 }
  0x3f   : > { %s17436_s16 = sld [smem:[#allocation34_spill]]  ;;  %s554_s10 = scalar_lea.vmem [#allocation4], %s10267_s2 }
  0x40   : > { %s562_s11 = sshll.u32 %s554_s10, 4  ;;  %p11039_p12 = pnand %p11055_p9, %p66_p10  ;;  %s563_s11 = int_to_ptr.vmem [resolvable:$true] %s562_s11 }
  0x41   : > { %s551_s3 = scalar_lea.sflag [#allocation5], %s550_s20  ;;  %s10258_s5 = sadd.s32 4294967294, %s12194_s0  }
  0x42   : > { %s47_s8 = sadd.s32 1, %s12186_s29  ;;  %p92_p0 = scmp.ne.s32.totalorder %s12162_s23, %s12158_s22 }
  0x43   : > { %p48_p13 = scmp.ge.s32.totalorder %s47_s8, 2  ;;  %p98_p2 = scmp.ne.s32.totalorder %s12158_s22, %s12154_s21 }
  0x44   : > { %p12463_p4 = por %p92_p0, %p65_p7  ;;  %p418_p8 = scmp.eq.s32.totalorder %s12361_s17, 3 }
  0x45   : > { %s559_s18 = scalar_lea.hbm %s17436_s16, %s10836_s19  ;;  %s85_s19 = sadd.s32 1, %s12162_s23 }
  0x46   : > { %s560_s28 = sshll.u32 %s559_s18, 4  ;;  %s17560_s8 = smov (%p48_p13, %s47_s8), 0  ;;  %s561_s28 = int_to_ptr.hbm [resolvable:$true] %s560_s28 }
  0x47   : > { %11041 = dma.hbm_to_vmem [thread:$0]  (!%p11039_p12), %s561_s28, 2048, %s563_s11, %s551_s3, %s17397_s7, %s17397_s7, %s17398_s15  }
  0x48   : > { %17437 = sst [smem:[#allocation30_spill]] %s17560_s8  ;;  %s17562_s9 = smov (!%p48_p13, %s50_s9), %s12190_s30 }
  0x49   : > { %s81_s20 = ssub.s32 %s12186_s29, %s17560_s8  ;;  %p52_p5 = scmp.ge.s32.totalorder %s17562_s9, 2 }
  0x4a   : > { %p12469_p6 = por %p98_p2, %p17396_p1  ;;  %p424_p10 = scmp.eq.s32.totalorder %s10258_s5, 3 }
  0x4b   : > { %s17564_s9 = smov (%p52_p5, %s17562_s9), 0  ;;  %p12476_p12 = por %p418_p8, %p92_p0 }
  0x4c   : > { %17440 = sst [smem:[#allocation31_spill]] %s17564_s9  ;;  %p12480_p7 = por %p424_p10, %p98_p2 }
  0x4d   : > { %s17441_s16 = scalar_select %p12476_p12, 1, 0 }
  0x4e   : > { %s17443_s18 = scalar_select %p12480_p7, 1, 0 }
  0x4f   : > { %17442 = sst [smem:[#allocation32_spill]] %s17441_s16  ;;  %s54_s28 = ssub.s32 %s12190_s30, %s17564_s9 }
  0x50   : > { %17444 = sst [smem:[#allocation33_spill]] %s17443_s18  ;;  %s572_s10 = sand.u32 1, %s12194_s0  }
  0x51   : > { %p55_p13 = scmp.eq.s32.totalorder %s54_s28, 0  ;;  %s82_s11 = sor.u32 %s81_s20, %s54_s28 }
  0x52   : > { %p83_p1 = scmp.eq.s32.totalorder %s82_s11, 0  ;;  %s574_s7 = sand.u32 1, %s12162_s23  }
  0x53   : > { %s12490_s3 = scalar_select %p55_p13, %s12174_s26, %s57_s27  }
  0x54   : > { %s12493_s5 = scalar_select %p83_p1, %s12162_s23, %s85_s19  }
  0x55   : > { %s10271_s15 = sshll.u32 %s12186_s29, 3  ;;  %s10270_s4 = sshll.u32 %s574_s7, 6 }
  0x56   : > { %s10272_s6 = sshll.u32 %s12190_s30, 4  ;;  %s576_s8 = scalar_lea.vmem [#allocation7], %s10270_s4 }
  0x57   : > { %s581_s12 = sadd.s32 %s10272_s6, %s10271_s15  ;;  %s586_s18 = sshll.u32 %s576_s8, 4  ;;  %s587_s18 = int_to_ptr.vmem [resolvable:$true] %s586_s18 }
  0x58   : > { %s10273_s14 = sshll.u32 %s581_s12, 3  ;;  %p11042_p0 = pnand %p11055_p9, %p12463_p4 }
  0x59   : > { %s583_s16 = scalar_lea.hbm %s17377_s1, %s10273_s14  ;;  %s573_s27 = scalar_lea.sflag [#allocation8], %s572_s10 }
  0x5a   : > { %s584_s20 = sshll.u32 %s583_s16, 4  ;;  %s17445_s19 = smov 8   ;;  %s585_s20 = int_to_ptr.hbm [resolvable:$true] %s584_s20 }
  0x5b   : > { %s17446_s28 = smov 128   ;;  %598 = sbr.rel (%p12369_p3) target bundleno = 3486 (0xd9e), region = 84 }
  0x5c   : > { %11044 = dma.hbm_to_vmem [thread:$0]  (!%p11042_p0), %s585_s20, 1024, %s587_s18, %s573_s27, %s17446_s28, %s17446_s28, %s17445_s19  }
  0x5d   : > { %s600_s4 = sand.u32 (!%p12369_p3), 1, %s12170_s25  }
  0x5e   : > { %s10275_s6 = sshll.u32 (!%p12369_p3), %s600_s4, 7  ;;  %s601_s12 = scalar_lea.sflag (!%p12369_p3), [#allocation5], %s600_s4 }
  0x5f   : > { %s12511_s14 = scalar_lea.vmem (!%p12369_p3), [#allocation4], %s10275_s6 }
  0x60   : > { %12125 = dma.done.wait (%p12436_p11), %s601_s12, 2048  }
  0x61   : > { %12127 = vsyncadd (%p12436_p11), %s601_s12, 4294965248  ;;  %s610_s21 = sand.u32 1, %s12361_s17   ;;  %s612_s15 = sand.u32 1, %s12158_s22  }
  0x62   : > { %s10276_s9 = sshll.u32 %s612_s15, 6  ;;  %s611_s8 = scalar_lea.sflag [#allocation8], %s610_s21 }
  0x63   : > { %s12521_s2 = scalar_lea.vmem [#allocation7], %s10276_s9 }
  0x64   : > { %12129 = dma.done.wait (%p12469_p6), %s611_s8, 1024  }
  0x65   : > { %12131 = vsyncadd (%p12469_p6), %s611_s8, 4294966272  ;;  %p17448_p1 = scmp.eq.s32.totalorder %s12361_s17, 0 }
  0x67   : > { %12133 = dma.done.wait (%p17448_p1), [#allocation8], 1024   ;;  %p17449_p3 = pmov %p17448_p1 }
  0x68   : > { %p17450_p9 = pmov %p17448_p1 }
  0x69   : > { %12135 = vsyncadd (%p17449_p3), [#allocation8], 4294966272 }
  0x6a   : > { %12137 = dma.done.wait (%p17450_p9), [#allocation11], 2064   ;;  %p17451_p11 = pmov %p17448_p1 }
  0x6b   : > { %p17452_p2 = pmov %p17448_p1 }
  0x6c   : > { %12139 = vsyncadd (%p17451_p11), [#allocation11], 4294965232 }
  0x6d   : > { %12141 = dma.done.wait (%p17452_p2), [#allocation14], 3072   ;;  %p17453_p4 = pmov %p17448_p1 }
  0x6e   : > { %p17454_p5 = pmov %p17448_p1 }
  0x6f   : > { %12143 = vsyncadd (%p17453_p4), [#allocation14], 4294964224 }
  0x70   : > { %12145 = dma.done.wait (%p17454_p5), [#allocation17], 2048   ;;  %p17455_p6 = pmov %p17448_p1 }
  0x71   : > { %s12543_s13 = scalar_lea.vmem [#allocation18], %s10276_s9  ;;  %s17456_s24 = sld [smem:[#allocation27_spill]] }
  0x72   : > { %12147 = vsyncadd (%p17455_p6), [#allocation17], 4294965248 }
  0x77   : > { %p10284_p8 = scmp.ne.s32.totalorder %s17456_s24, 0 }
  0x78   : > { %s17461_s18 = sld [smem:[#allocation41_spill]] (!%p10284_p8)  ;;  %s12207_s7 = smov (!%p10284_p8), 32  }
  0x79   : > { %704 = sbr.rel (%p10284_p8) target bundleno = 1215 (0x4bf), region = 120  ;;  %s17462_s20 = sld [smem:[#allocation42_spill]] (!%p10284_p8) }
  0x7a   : > { %s17485_s28 = sld [smem:[#allocation38_spill]] (!%p10284_p8)  ;;  %s12208_s4 = smov (!%p10284_p8), 96  }
  0x7b   : > { %s12209_s6 = smov (!%p10284_p8), 64  }
  0x7e   : > { %v12547_v0 = vld [vmem:[%s12511_s14 + $0x20] sm:$0xff]  ;;  %v707_v1 = vld [vmem:[%s12511_s14 + $0x10] sm:$0xff]  ;;  %v708_v4 = vld [vmem:[%s12511_s14 + $0x18] sm:$0xff]  ;;  %v12206_v16 = vmov 128.0  }
  0x7f   : > { %v705_v2 = vld [vmem:[%s12511_s14] sm:$0xff]  ;;  %731 = vadd.xlane.f32.xlu2 %v12547_v0  ;;  %727 = vadd.xlane.f32.xlu1 %v707_v1  ;;  %v706_v5 = vld [vmem:[%s12511_s14 + $0x8] sm:$0xff]  ;;  %v711_v6 = vld [vmem:[%s12511_s14 + $0x30] sm:$0xff]  ;;  %11417 = vrcp.f32 %v12206_v16 }
  0x80   : > { %723 = vadd.xlane.f32.xlu0 %v705_v2  ;;  %v713_v3 = vld [vmem:[%s12511_s14 + $0x40] sm:$0xff]  ;;  %v12557_v7 = vld [vmem:[%s12511_s14 + $0x28] sm:$0xff]  ;;  %v12562_v9 = vld [vmem:[%s12511_s14 + $0x58] sm:$0xff] }
  0x81   : > { %v714_v8 = vld [vmem:[%s12511_s14 + $0x48] sm:$0xff]  ;;  %v12565_v10 = vld [vmem:[%s12511_s14 + $0x50] sm:$0xff]  ;;  %v12568_v11 = vld [vmem:[%s12511_s14 + $0x38] sm:$0xff] }
  0x82   : > { %v12574_v12 = vld [vmem:[%s12511_s14 + $0x70] sm:$0xff]  ;;  %v12577_v13 = vld [vmem:[%s12511_s14 + $0x68] sm:$0xff]  ;;  %v12580_v14 = vld [vmem:[%s12511_s14 + $0x60] sm:$0xff] }
  0x83   : > { %v12586_v15 = vld [vmem:[%s12511_s14 + $0x78] sm:$0xff] }
  0x85   : > { %v11418_v17 = vpop.eup %11417 }
  0x86   : > { %v756_v18 = vmul.f32 128.0, %v11418_v17  ;;  %vm760_vm0 = vweird.f32 %v11418_v17 }
  0x87   : > { %739 = vadd.xlane.f32.xlu2 %v713_v3  ;;  %729 = vadd.xlane.f32.xlu1 %v708_v4 }
  0x88   : > { %725 = vadd.xlane.f32.xlu0 %v706_v5  ;;  %v757_v19 = vsub.f32 1.0, %v756_v18 }
  0x8a   : > { %v758_v20 = vmul.f32 %v11418_v17, %v757_v19 }
  0x8c   : > { %v759_v21 = vadd.f32 %v11418_v17, %v758_v20 }
  0x8e   : > { %v12589_v22 = vsel %vm760_vm0, %v11418_v17, %v759_v21 }
  0x8f   : > { %735 = vadd.xlane.f32.xlu2 %v711_v6  ;;  %733 = vadd.xlane.f32.xlu1 %v12557_v7 }
  0x90   : > { %741 = vadd.xlane.f32.xlu0 %v714_v8 }
  0x97   : > { %745 = vadd.xlane.f32.xlu2 %v12562_v9  ;;  %743 = vadd.xlane.f32.xlu1 %v12565_v10 }
  0x98   : > { %737 = vadd.xlane.f32.xlu0 %v12568_v11 }
  0x9f   : > { %751 = vadd.xlane.f32.xlu2 %v12574_v12  ;;  %749 = vadd.xlane.f32.xlu1 %v12577_v13 }
  0xa0   : > { %747 = vadd.xlane.f32.xlu0 %v12580_v14 }
  0xa8   : > { %753 = vadd.xlane.f32.xlu0 %v12586_v15 }
  0xf2   : > { %v732_v23 = vpop.xlane.xlu2 %731  ;;  %v728_v24 = vpop.xlane.xlu1 %727 }
  0xf3   : > { %v764_v25 = vmul.f32 %v12589_v22, %v728_v24  ;;  %v724_v26 = vpop.xlane.xlu0 %723  ;;  %v766_v43 = vmul.f32 %v12589_v22, %v732_v23 }
  0xf4   : > { %v762_v27 = vmul.f32 %v12589_v22, %v724_v26  ;;  %v10343_v26 = vld [vmem:[#allocation12 + $0x70] sm:$0xf] }
  0xf5   : > { %v12593_v28 = vsub.f32 %v707_v1, %v764_v25  ;;  %v12619_v49 = vsub.f32 %v12547_v0, %v766_v43  ;;  %v10847_v43 = vld [vmem:[#allocation12 + $0x54] sm:$0xf] }
  0xf6   : > { %v12595_v29 = vsub.f32 %v705_v2, %v762_v27  ;;  %v10852_v27 = vld [vmem:[#allocation12 + $0x74] sm:$0xf0] }
  0xf7   : > { %v796_v30 = vmul.f32 %v12593_v28, %v12593_v28  ;;  %v798_v55 = vmul.f32 %v12619_v49, %v12619_v49 }
  0xf8   : > { %v794_v31 = vmul.f32 %v12595_v29, %v12595_v29 }
  0xf9   : > { %814 = vadd.xlane.f32.xlu0 %v796_v30  ;;  %v10851_v30 = vld [vmem:[#allocation12 + $0x74] sm:$0xf] }
  0xfa   : > { %810 = vadd.xlane.f32.xlu1 %v794_v31  ;;  %v740_v32 = vpop.xlane.xlu2 %739  ;;  %v730_v33 = vpop.xlane.xlu1 %729  ;;  %v10344_v31 = vor.u32 %v10852_v27, %v10343_v26  ;;  %v10287_v26 = vld [vmem:[#allocation12] sm:$0xf]  ;;  %v10838_v27 = vld [vmem:[#allocation12 + $0x4] sm:$0xf0] }
  0xfb   : > { %v770_v34 = vmul.f32 %v12589_v22, %v740_v32  ;;  %v765_v35 = vmul.f32 %v12589_v22, %v730_v33  ;;  %v726_v36 = vpop.xlane.xlu0 %725  ;;  %v10850_v33 = vld [vmem:[#allocation12 + $0x64] sm:$0xf0] }
  0xfc   : > { %v763_v37 = vmul.f32 %v12589_v22, %v726_v36  ;;  %1198 = vmatpush.bf16.msra.mxu0 %v10344_v31  ;;  %10965 = vmatpush.bf16.msra.mxu2 %v10344_v31  ;;  %v10337_v36 = vld [vmem:[#allocation12 + $0x68] sm:$0xf0]  ;;  %v10288_v31 = vor.u32 %v10838_v27, %v10287_v26 }
  0xfd   : > { %v12604_v38 = vsub.f32 %v713_v3, %v770_v34  ;;  %v12606_v39 = vsub.f32 %v708_v4, %v765_v35  ;;  %v10849_v34 = vld [vmem:[#allocation12 + $0x64] sm:$0xf] }
  0xfe   : > { %v12608_v40 = vsub.f32 %v706_v5, %v763_v37  ;;  %v10340_v37 = vor.u32 %v10849_v34, %v10337_v36 }
  0xff   : > { %v802_v41 = vmul.f32 %v12604_v38, %v12604_v38  ;;  %v797_v42 = vmul.f32 %v12606_v39, %v12606_v39 }
 0x100   : > { %v795_v44 = vmul.f32 %v12608_v40, %v12608_v40 }
 0x101   : > { %826 = vadd.xlane.f32.xlu0 %v802_v41  ;;  %v10327_v41 = vld [vmem:[#allocation12 + $0x50] sm:$0xf] }
 0x102   : > { %816 = vadd.xlane.f32.xlu1 %v797_v42  ;;  %812 = vadd.xlane.f32.xlu2 %v795_v44  ;;  %v736_v45 = vpop.xlane.xlu2 %735  ;;  %v734_v46 = vpop.xlane.xlu1 %733  ;;  %v10848_v42 = vld [vmem:[#allocation12 + $0x54] sm:$0xf0] }
 0x103   : > { %v768_v47 = vmul.f32 %v12589_v22, %v736_v45  ;;  %v742_v48 = vpop.xlane.xlu0 %741  ;;  %v767_v53 = vmul.f32 %v12589_v22, %v734_v46  ;;  %v10328_v44 = vor.u32 %v10848_v42, %v10327_v41  ;;  %v10329_v45 = vld [vmem:[#allocation12 + $0x58] sm:$0xf0] }
 0x104   : > { %v771_v50 = vmul.f32 %v12589_v22, %v742_v48  ;;  %v10332_v46 = vor.u32 %v10847_v43, %v10329_v45  ;;  %v10846_v48 = vld [vmem:[#allocation12 + $0x44] sm:$0xf0] }
 0x105   : > { %v12622_v51 = vsub.f32 %v711_v6, %v768_v47  ;;  %v12634_v58 = vsub.f32 %v12557_v7, %v767_v53  ;;  %v10319_v47 = vld [vmem:[#allocation12 + $0x40] sm:$0xf] }
 0x106   : > { %v12624_v52 = vsub.f32 %v714_v8, %v771_v50  ;;  %v10845_v50 = vld [vmem:[#allocation12 + $0x44] sm:$0xf]  ;;  %v10320_v53 = vor.u32 %v10846_v48, %v10319_v47 }
 0x107   : > { %v800_v54 = vmul.f32 %v12622_v51, %v12622_v51  ;;  %v799_v1 = vmul.f32 %v12634_v58, %v12634_v58 }
 0x108   : > { %v803_v56 = vmul.f32 %v12624_v52, %v12624_v52 }
 0x109   : > { %822 = vadd.xlane.f32.xlu0 %v800_v54  ;;  %v10321_v54 = vld [vmem:[#allocation12 + $0x48] sm:$0xf0] }
 0x10a   : > { %818 = vadd.xlane.f32.xlu2 %v798_v55  ;;  %828 = vadd.xlane.f32.xlu1 %v803_v56  ;;  %v746_v57 = vpop.xlane.xlu2 %745  ;;  %v744_v59 = vpop.xlane.xlu1 %743  ;;  %v10324_v55 = vor.u32 %v10845_v50, %v10321_v54  ;;  %v10311_v56 = vld [vmem:[#allocation12 + $0x30] sm:$0xf] }
 0x10b   : > { %v773_v60 = vmul.f32 %v12589_v22, %v746_v57  ;;  %v738_v61 = vpop.xlane.xlu0 %737  ;;  %v772_v2 = vmul.f32 %v12589_v22, %v744_v59  ;;  %v10844_v57 = vld [vmem:[#allocation12 + $0x34] sm:$0xf0]  ;;  %v10843_v59 = vld [vmem:[#allocation12 + $0x34] sm:$0xf] }
 0x10c   : > { %v769_v62 = vmul.f32 %v12589_v22, %v738_v61  ;;  %v10313_v61 = vld [vmem:[#allocation12 + $0x38] sm:$0xf0] }
 0x10d   : > { %v12639_v63 = vsub.f32 %v12562_v9, %v773_v60  ;;  %v12652_v6 = vsub.f32 %v12565_v10, %v772_v2  ;;  %v10312_v60 = vor.u32 %v10844_v57, %v10311_v56  ;;  %v10842_v2 = vld [vmem:[#allocation12 + $0x24] sm:$0xf0] }
 0x10e   : > { %v12642_v0 = vsub.f32 %v12568_v11, %v769_v62  ;;  %v10316_v62 = vor.u32 %v10843_v59, %v10313_v61 }
 0x10f   : > { %v805_v3 = vmul.f32 %v12639_v63, %v12639_v63  ;;  %v804_v18 = vmul.f32 %v12652_v6, %v12652_v6 }
 0x110   : > { %v801_v4 = vmul.f32 %v12642_v0, %v12642_v0 }
 0x111   : > { %832 = vadd.xlane.f32.xlu0 %v805_v3  ;;  %v10841_v3 = vld [vmem:[#allocation12 + $0x24] sm:$0xf] }
 0x112   : > { %820 = vadd.xlane.f32.xlu2 %v799_v1  ;;  %824 = vadd.xlane.f32.xlu1 %v801_v4  ;;  %v752_v5 = vpop.xlane.xlu2 %751  ;;  %v750_v9 = vpop.xlane.xlu1 %749  ;;  %v10303_v1 = vld [vmem:[#allocation12 + $0x20] sm:$0xf] }
 0x113   : > { %v776_v7 = vmul.f32 %v12589_v22, %v752_v5  ;;  %v748_v8 = vpop.xlane.xlu0 %747  ;;  %v775_v19 = vmul.f32 %v12589_v22, %v750_v9  ;;  %v10304_v4 = vor.u32 %v10842_v2, %v10303_v1  ;;  %v10305_v5 = vld [vmem:[#allocation12 + $0x28] sm:$0xf0]  ;;  %v10295_v9 = vld [vmem:[#allocation12 + $0x10] sm:$0xf] }
 0x114   : > { %v774_v11 = vmul.f32 %v12589_v22, %v748_v8 }
 0x115   : > { %v12657_v16 = vsub.f32 %v12574_v12, %v776_v7  ;;  %v12670_v12 = vsub.f32 %v12577_v13, %v775_v19  ;;  %v10345_v13 = vld [vmem:[#allocation12 + $0x78] sm:$0xf0]  ;;  %v10308_v7 = vor.u32 %v10841_v3, %v10305_v5 }
 0x116   : > { %v12660_v17 = vsub.f32 %v12580_v14, %v774_v11  ;;  %v10348_v32 = vor.u32 %v10851_v30, %v10345_v13  ;;  %v10840_v11 = vld [vmem:[#allocation12 + $0x14] sm:$0xf0]  ;;  %v10837_v30 = vld [vmem:[#allocation12 + $0x4] sm:$0xf]  ;;  %v10289_v13 = vld [vmem:[#allocation12 + $0x8] sm:$0xf0] }
 0x117   : > { %v808_v10 = vmul.f32 %v12657_v16, %v12657_v16  ;;  %v807_v24 = vmul.f32 %v12670_v12, %v12670_v12 }
 0x118   : > { %v806_v20 = vmul.f32 %v12660_v17, %v12660_v17  ;;  %1247 = vmatpush.bf16.msra.mxu1 %v10348_v32  ;;  %10973 = vmatpush.bf16.msra.mxu3 %v10348_v32 }
 0x119   : > { %838 = vadd.xlane.f32.xlu0 %v808_v10  ;;  %v10296_v10 = vor.u32 %v10840_v11, %v10295_v9 }
 0x11a   : > { %830 = vadd.xlane.f32.xlu2 %v804_v18  ;;  %834 = vadd.xlane.f32.xlu1 %v806_v20  ;;  %v10839_v18 = vld [vmem:[#allocation12 + $0x14] sm:$0xf]  ;;  %v10297_v20 = vld [vmem:[#allocation12 + $0x18] sm:$0xf0] }
 0x11b   : > { %v754_v21 = vpop.xlane.xlu0 %753 }
 0x11c   : > { %v777_v14 = vmul.f32 %v12589_v22, %v754_v21  ;;  %1248 = vmatpush.bf16.msra.mxu1 %v10340_v37  ;;  %10974 = vmatpush.bf16.msra.mxu3 %v10340_v37 }
 0x11e   : > { %v12674_v23 = vsub.f32 %v12586_v15, %v777_v14  ;;  %v10335_v15 = vld [vmem:[#allocation12 + $0x60] sm:$0xf]  ;;  %v10300_v14 = vor.u32 %v10839_v18, %v10297_v20 }
 0x11f   : > { %v10336_v35 = vor.u32 %v10850_v33, %v10335_v15  ;;  %v10292_v15 = vor.u32 %v10837_v30, %v10289_v13 }
 0x120   : > { %v809_v25 = vmul.f32 %v12674_v23, %v12674_v23  ;;  %1249 = vmatpush.bf16.msra.mxu1 %v10332_v46  ;;  %10975 = vmatpush.bf16.msra.mxu3 %v10332_v46 }
 0x121   : > { %1199 = vmatpush.bf16.msra.mxu0 %v10336_v35  ;;  %10966 = vmatpush.bf16.msra.mxu2 %v10336_v35 }
 0x122   : > { %836 = vadd.xlane.f32.xlu2 %v807_v24  ;;  %840 = vadd.xlane.f32.xlu1 %v809_v25 }
 0x124   : > { %1250 = vmatpush.bf16.msra.mxu1 %v10324_v55  ;;  %10976 = vmatpush.bf16.msra.mxu3 %v10324_v55 }
 0x125   : > { %1200 = vmatpush.bf16.msra.mxu0 %v10328_v44  ;;  %10967 = vmatpush.bf16.msra.mxu2 %v10328_v44 }
 0x128   : > { %1251 = vmatpush.bf16.msra.mxu1 %v10316_v62  ;;  %10977 = vmatpush.bf16.msra.mxu3 %v10316_v62 }
 0x129   : > { %1201 = vmatpush.bf16.msra.mxu0 %v10320_v53  ;;  %10968 = vmatpush.bf16.msra.mxu2 %v10320_v53 }
 0x12c   : > { %1252 = vmatpush.bf16.msra.mxu1 %v10308_v7  ;;  %10978 = vmatpush.bf16.msra.mxu3 %v10308_v7 }
 0x12d   : > { %1202 = vmatpush.bf16.msra.mxu0 %v10312_v60  ;;  %10969 = vmatpush.bf16.msra.mxu2 %v10312_v60 }
 0x130   : > { %1253 = vmatpush.bf16.msra.mxu1 %v10300_v14  ;;  %10979 = vmatpush.bf16.msra.mxu3 %v10300_v14 }
 0x131   : > { %1203 = vmatpush.bf16.msra.mxu0 %v10304_v4  ;;  %10970 = vmatpush.bf16.msra.mxu2 %v10304_v4 }
 0x134   : > { %1254 = vmatpush.bf16.msra.mxu1 %v10292_v15  ;;  %10980 = vmatpush.bf16.msra.mxu3 %v10292_v15 }
 0x135   : > { %1204 = vmatpush.bf16.msra.mxu0 %v10296_v10  ;;  %10971 = vmatpush.bf16.msra.mxu2 %v10296_v10 }
 0x139   : > { %1205 = vmatpush.bf16.msra.mxu0 %v10288_v31  ;;  %10972 = vmatpush.bf16.msra.mxu2 %v10288_v31 }
 0x16c   : > { %v815_v8 = vpop.xlane.xlu0 %814 }
 0x16d   : > { %v811_v19 = vpop.xlane.xlu1 %810  ;;  %v844_v25 = vmul.f32 %v815_v8, %v12589_v22 }
 0x16e   : > { %v842_v21 = vmul.f32 %v811_v19, %v12589_v22 }
 0x16f   : > { %v12686_v36 = vadd.f32 1e-05, %v844_v25 }
 0x170   : > { %v12681_v24 = vadd.f32 1e-05, %v842_v21 }
 0x171   : > { %vm900_vm7 = vweird.f32 %v12686_v36 }
 0x172   : > { %11419 = vrsqrt.f32 %v12681_v24  ;;  %vm880_vm3 = vweird.f32 %v12681_v24 }
 0x173   : > { %11421 = vrsqrt.f32 %v12686_v36 }
 0x174   : > { %v827_v32 = vpop.xlane.xlu0 %826 }
 0x175   : > { %v817_v33 = vpop.xlane.xlu1 %816  ;;  %v813_v34 = vpop.xlane.xlu2 %812  ;;  %v850_v35 = vmul.f32 %v827_v32, %v12589_v22 }
 0x176   : > { %v843_v37 = vmul.f32 %v813_v34, %v12589_v22  ;;  %v845_v42 = vmul.f32 %v817_v33, %v12589_v22 }
 0x177   : > { %v12692_v44 = vadd.f32 1e-05, %v850_v35 }
 0x178   : > { %v12689_v41 = vpop.eup %11419  ;;  %v859_v43 = vadd.f32 1e-05, %v843_v37  ;;  %v12697_v46 = vadd.f32 1e-05, %v845_v42 }
 0x179   : > { %v875_v45 = vmul.f32 %v12689_v41, %v12681_v24  ;;  %v12702_v55 = vpop.eup %11421  ;;  %vm881_vm1 = vweird.f32 %v12689_v41  ;;  %vm960_vm9 = vweird.f32 %v12692_v44 }
 0x17a   : > { %11423 = vrsqrt.f32 %v859_v43  ;;  %v895_v62 = vmul.f32 %v12702_v55, %v12686_v36  ;;  %vm12737_vm4 = vmor %vm880_vm3, %vm881_vm1  ;;  %vm890_vm5 = vweird.f32 %v859_v43  ;;  %vm901_vm8 = vweird.f32 %v12702_v55 }
 0x17b   : > { %11425 = vrsqrt.f32 %v12692_v44  ;;  %v876_v48 = vmul.f32 %v12689_v41, %v875_v45  ;;  %vm910_vm10 = vweird.f32 %v12697_v46  ;;  %vm12829_vm1 = vmor %vm900_vm7, %vm901_vm8 }
 0x17c   : > { %v823_v47 = vpop.xlane.xlu0 %822  ;;  %11427 = vrsqrt.f32 %v12697_v46  ;;  %v896_v10 = vmul.f32 %v12702_v55, %v895_v62 }
 0x17d   : > { %v819_v50 = vpop.xlane.xlu2 %818  ;;  %v829_v53 = vpop.xlane.xlu1 %828  ;;  %v877_v57 = vmul.f32 0.5, %v876_v48 }
 0x17e   : > { %v851_v54 = vmul.f32 %v829_v53, %v12589_v22  ;;  %v846_v2 = vmul.f32 %v819_v50, %v12589_v22  ;;  %v897_v15 = vmul.f32 0.5, %v896_v10 }
 0x17f   : > { %v878_v4 = vsub.f32 1.5, %v877_v57 }
 0x180   : > { %v11424_v56 = vpop.eup %11423  ;;  %v12705_v59 = vadd.f32 1e-05, %v851_v54  ;;  %v12723_v14 = vadd.f32 1e-05, %v846_v2  ;;  %v898_v57 = vsub.f32 1.5, %v897_v15 }
 0x181   : > { %v12707_v60 = vpop.eup %11425  ;;  %v885_v61 = vmul.f32 %v11424_v56, %v859_v43  ;;  %v879_v26 = vmul.f32 %v12689_v41, %v878_v4  ;;  %vm891_vm2 = vweird.f32 %v11424_v56 }
 0x182   : > { %11429 = vrsqrt.f32 %v12705_v59  ;;  %v955_v5 = vmul.f32 %v12707_v60, %v12692_v44  ;;  %v12716_v11 = vpop.eup %11427  ;;  %vm12743_vm6 = vmor %vm890_vm5, %vm891_vm2  ;;  %vm961_vm11 = vweird.f32 %v12707_v60  ;;  %vm970_vm14 = vweird.f32 %v12705_v59 }
 0x183   : > { %v886_v1 = vmul.f32 %v11424_v56, %v885_v61  ;;  %v905_v27 = vmul.f32 %v12716_v11, %v12697_v46  ;;  %v883_v24 = vsel %vm12737_vm4, %v12689_v41, %v879_v26  ;;  %v848_v61 = vmul.f32 %v823_v47, %v12589_v22  ;;  %v12793_v26 = vld [vmem:[%s17462_s20] ss:$0 sm:$0xff]  ;;  %vm12804_vm15 = vmor %vm960_vm9, %vm961_vm11 }
 0x184   : > { %v833_v3 = vpop.xlane.xlu0 %832  ;;  %v956_v30 = vmul.f32 %v12707_v60, %v955_v5  ;;  %v1034_v2 = vmul.f32 %v883_v24, %v12595_v29  ;;  %v12776_v29 = vmul.f32 %v12702_v55, %v898_v57  ;;  %vm911_vm13 = vweird.f32 %v12716_v11 }
 0x185   : > { %v821_v7 = vpop.xlane.xlu2 %820  ;;  %v825_v8 = vpop.xlane.xlu1 %824  ;;  %v853_v9 = vmul.f32 %v833_v3, %v12589_v22  ;;  %v887_v18 = vmul.f32 0.5, %v886_v1  ;;  %v906_v35 = vmul.f32 %v12716_v11, %v905_v27  ;;  %v12767_v3 = vld [vmem:[%s17461_s18] ss:$0 sm:$0xff]  ;;  %vm912_vm3 = vmor %vm910_vm10, %vm911_vm13  ;;  %vm920_vm13 = vweird.f32 %v12723_v14 }
 0x186   : > { %v847_v19 = vmul.f32 %v821_v7, %v12589_v22  ;;  %v957_v42 = vmul.f32 0.5, %v956_v30 }
 0x187   : > { %v12720_v20 = vadd.f32 1e-05, %v853_v9  ;;  %v888_v21 = vsub.f32 1.5, %v887_v18  ;;  %v907_v47 = vmul.f32 0.5, %v906_v35  ;;  %v12779_v9 = vadd.f32 1e-05, %v848_v61 }
 0x188   : > { %v12725_v25 = vpop.eup %11429  ;;  %v12734_v32 = vadd.f32 1e-05, %v847_v19 }
 0x189   : > { %11431 = vrsqrt.f32 %v12720_v20  ;;  %v889_v31 = vmul.f32 %v11424_v56, %v888_v21  ;;  %v965_v13 = vmul.f32 %v12725_v25, %v12705_v59  ;;  %v1053_v21 = vmul.f32 %v12767_v3, %v1034_v2 }
 0x18a   : > { %11433 = vrsqrt.f32 %v12723_v14  ;;  %vm971_vm12 = vweird.f32 %v12725_v25  ;;  %v908_v15 = vsub.f32 1.5, %v907_v47  ;;  %vm990_vm2 = vweird.f32 %v12720_v20 }
 0x18b   : > { %v966_v34 = vmul.f32 %v12725_v25, %v965_v13  ;;  %11435 = vrsqrt.f32 %v12734_v32  ;;  %v893_v53 = vsel %vm12743_vm6, %v11424_v56, %v889_v31  ;;  %v958_v56 = vsub.f32 1.5, %v957_v42  ;;  %vm12815_vm0 = vmor %vm970_vm14, %vm971_vm12 }
 0x18c   : > { %v1035_v5 = vmul.f32 %v893_v53, %v12608_v40  ;;  %v849_v40 = vmul.f32 %v825_v8, %v12589_v22  ;;  %v909_v61 = vmul.f32 %v12716_v11, %v908_v15  ;;  %v839_v47 = vpop.xlane.xlu0 %838  ;;  %vm930_vm9 = vweird.f32 %v12734_v32 }
 0x18d   : > { %v831_v45 = vpop.xlane.xlu2 %830  ;;  %v835_v48 = vpop.xlane.xlu1 %834  ;;  %v967_v50 = vmul.f32 0.5, %v966_v34  ;;  %v959_v27 = vmul.f32 %v12707_v60, %v958_v56 }
 0x18e   : > { %v852_v43 = vmul.f32 %v831_v45, %v12589_v22  ;;  %v854_v41 = vmul.f32 %v835_v48, %v12589_v22  ;;  %v1054_v31 = vmul.f32 %v12767_v3, %v1035_v5  ;;  %v12819_v44 = vadd.f32 1e-05, %v849_v40 }
 0x18f   : > { %v12755_v54 = vpop.eup %11431  ;;  %v968_v4 = vsub.f32 1.5, %v967_v50  ;;  %v1072_v48 = vadd.f32 %v12793_v26, %v1053_v21  ;;  %v963_v53 = vsel %vm12804_vm15, %v12707_v60, %v959_v27  ;;  %v913_v40 = vsel %vm912_vm3, %v12716_v11, %v909_v61 }
 0x190   : > { %v985_v62 = vmul.f32 %v12755_v54, %v12720_v20  ;;  %v12760_v1 = vadd.f32 1e-05, %v852_v43  ;;  %v12773_v7 = vpop.eup %11433  ;;  %v12787_v10 = vadd.f32 1e-05, %v854_v41  ;;  %v1073_v42 = vadd.f32 %v12793_v26, %v1054_v31 }
 0x191   : > { %v12782_v19 = vpop.eup %11435  ;;  %v969_v30 = vmul.f32 %v12725_v25, %v968_v4  ;;  %v915_v34 = vmul.f32 %v12773_v7, %v12723_v14  ;;  %v903_v41 = vsel %vm12829_vm1, %v12702_v55, %v12776_v29  ;;  %vm991_vm4 = vweird.f32 %v12755_v54 }
 0x192   : > { %11437 = vrsqrt.f32 %v12760_v1  ;;  %v986_v18 = vmul.f32 %v12755_v54, %v985_v62  ;;  %v925_v35 = vmul.f32 %v12782_v19, %v12734_v32  ;;  %v1088_v36 = vpack.c.bf16 %v1073_v42, %v1072_v48  ;;  %vm12878_vm7 = vmor %vm990_vm2, %vm991_vm4 }
 0x193   : > { %11439 = vrsqrt.f32 %v12787_v10  ;;  %v973_v57 = vsel %vm12815_vm0, %v12725_v25, %v969_v30  ;;  %v916_v2 = vmul.f32 %v12773_v7, %v915_v34  ;;  %v1042_v25 = vmul.f32 %v963_v53, %v12604_v38 }
 0x194   : > { %v987_v37 = vmul.f32 0.5, %v986_v18  ;;  %11441 = vrsqrt.f32 %v12779_v9  ;;  %v926_v56 = vmul.f32 %v12782_v19, %v925_v35  ;;  %1206 = vmatmul.bf16.vlgmr.msra.gmra.mxu0 %v1088_v36  ;;  %1255 = vmatmul.bf16.vlgmr.msra.gmra.mxu1 %v1088_v36  ;;  %v1043_v5 = vmul.f32 %v973_v57, %v12624_v52 }
 0x195   : > { %v837_v13 = vpop.xlane.xlu2 %836  ;;  %v841_v62 = vpop.xlane.xlu1 %840  ;;  %vm980_vm5 = vweird.f32 %v12760_v1  ;;  %v1061_v38 = vmul.f32 %v12767_v3, %v1042_v25  ;;  %v1037_v31 = vmul.f32 %v913_v40, %v12606_v39  ;;  %v856_v11 = vmul.f32 %v839_v47, %v12589_v22 }
 0x196   : > { %v855_v8 = vmul.f32 %v837_v13, %v12589_v22  ;;  %v988_v60 = vsub.f32 1.5, %v987_v37  ;;  %v857_v29 = vmul.f32 %v841_v62, %v12589_v22  ;;  %v1062_v52 = vmul.f32 %v12767_v3, %v1043_v5 }
 0x197   : > { %v927_v21 = vmul.f32 0.5, %v926_v56  ;;  %v1036_v34 = vmul.f32 %v903_v41, %v12593_v28  ;;  %v917_v35 = vmul.f32 0.5, %v916_v2  ;;  %v1056_v48 = vmul.f32 %v12767_v3, %v1037_v31 }
 0x198   : > { %v12813_v45 = vpop.eup %11437  ;;  %v12823_v24 = vadd.f32 1e-05, %v855_v8  ;;  %v989_v27 = vmul.f32 %v12755_v54, %v988_v60  ;;  %v1080_v8 = vadd.f32 %v12793_v26, %v1061_v38  ;;  %v1081_v33 = vadd.f32 %v12793_v26, %v1062_v52 }
 0x199   : > { %v975_v43 = vmul.f32 %v12813_v45, %v12760_v1  ;;  %v12862_v18 = vpop.eup %11439  ;;  %vm981_vm6 = vweird.f32 %v12813_v45  ;;  %v12901_v28 = vadd.f32 1e-05, %v857_v29  ;;  %v928_v50 = vsub.f32 1.5, %v927_v21 }
 0x19a   : > { %11443 = vrsqrt.f32 %v12823_v24  ;;  %v12868_v46 = vpop.eup %11441  ;;  %vm12891_vm8 = vmor %vm980_vm5, %vm981_vm6  ;;  %v995_v22 = vmul.f32 %v12862_v18, %v12787_v10  ;;  %v1092_v59 = vpack.c.bf16 %v1081_v33, %v1080_v8  ;;  %v12909_v53 = vadd.f32 1e-05, %v856_v11 }
 0x19b   : > { %v976_v4 = vmul.f32 %v12813_v45, %v975_v43  ;;  %11445 = vrsqrt.f32 %v12819_v44  ;;  %v993_v43 = vsel %vm12878_vm7, %v12755_v54, %v989_v27  ;;  %v1055_v57 = vmul.f32 %v12767_v3, %v1036_v34 }
 0x19c   : > { %1226 = vmatmul.bf16.vlgmr.msra.gmra.mxu2 %v1092_v59  ;;  %1275 = vmatmul.bf16.vlgmr.msra.gmra.mxu3 %v1092_v59  ;;  %v918_v36 = vsub.f32 1.5, %v917_v35  ;;  %vm931_vm10 = vweird.f32 %v12782_v19  ;;  %v996_v62 = vmul.f32 %v12862_v18, %v995_v22  ;;  %11447 = vrsqrt.f32 %v12901_v28 }
 0x19d   : > { %v977_v55 = vmul.f32 0.5, %v976_v4  ;;  %v1075_v54 = vadd.f32 %v12793_v26, %v1056_v48  ;;  %v1045_v2 = vmul.f32 %v993_v43, %v12639_v63  ;;  %v929_v56 = vmul.f32 %v12782_v19, %v928_v50  ;;  %vm12928_vm11 = vmor %vm930_vm9, %vm931_vm10 }
 0x19e   : > { %11449 = vrsqrt.f32 %v12909_v53  ;;  %v919_v5 = vmul.f32 %v12773_v7, %v918_v36  ;;  %vm921_vm12 = vweird.f32 %v12773_v7  ;;  %vm1010_vm15 = vweird.f32 %v12823_v24 }
 0x19f   : > { %v978_v30 = vsub.f32 1.5, %v977_v55  ;;  %v997_v55 = vmul.f32 0.5, %v996_v62  ;;  %v1064_v29 = vmul.f32 %v12767_v3, %v1045_v2  ;;  %v933_v52 = vsel %vm12928_vm11, %v12782_v19, %v929_v56  ;;  %vm12945_vm14 = vmor %vm920_vm13, %vm921_vm12 }
 0x1a0   : > { %v12872_v13 = vpop.eup %11443  ;;  %v923_v19 = vsel %vm12945_vm14, %v12773_v7, %v919_v5  ;;  %vm1000_vm1 = vweird.f32 %v12787_v10  ;;  %v1039_v11 = vmul.f32 %v933_v52, %v12634_v58  ;;  %vm1001_vm2 = vweird.f32 %v12862_v18 }
 0x1a1   : > { %v979_v39 = vmul.f32 %v12813_v45, %v978_v30  ;;  %v1005_v37 = vmul.f32 %v12872_v13, %v12823_v24  ;;  %v12899_v42 = vpop.eup %11445  ;;  %v998_v14 = vsub.f32 1.5, %v997_v55  ;;  %vm1011_vm0 = vweird.f32 %v12872_v13  ;;  %vm12973_vm4 = vmor %vm1000_vm1, %vm1001_vm2 }
 0x1a2   : > { %v945_v60 = vmul.f32 %v12899_v42, %v12819_v44  ;;  %v12943_v40 = vpop.eup %11447  ;;  %v1083_v15 = vadd.f32 %v12793_v26, %v1064_v29  ;;  %vm12965_vm3 = vmor %vm1010_vm15, %vm1011_vm0  ;;  %v1038_v35 = vmul.f32 %v923_v19, %v12619_v49  ;;  %v1058_v22 = vmul.f32 %v12767_v3, %v1039_v11 }
 0x1a3   : > { %v1006_v1 = vmul.f32 %v12872_v13, %v1005_v37  ;;  %v983_v61 = vsel %vm12891_vm8, %v12813_v45, %v979_v39  ;;  %v935_v45 = vmul.f32 %v12868_v46, %v12779_v9  ;;  %v1025_v24 = vmul.f32 %v12943_v40, %v12901_v28 }
 0x1a4   : > { %v1044_v41 = vmul.f32 %v983_v61, %v12652_v6  ;;  %v1074_v6 = vadd.f32 %v12793_v26, %v1055_v57  ;;  %v946_v32 = vmul.f32 %v12899_v42, %v945_v60  ;;  %v12956_v31 = vpop.eup %11449  ;;  %v999_v39 = vmul.f32 %v12862_v18, %v998_v14 }
 0x1a5   : > { %v1007_v4 = vmul.f32 0.5, %v1006_v1  ;;  %v936_v27 = vmul.f32 %v12868_v46, %v935_v45  ;;  %v1015_v58 = vmul.f32 %v12956_v31, %v12909_v53  ;;  %v1026_v59 = vmul.f32 %v12943_v40, %v1025_v24 }
 0x1a6   : > { %v1063_v63 = vmul.f32 %v12767_v3, %v1044_v41  ;;  %v1089_v47 = vpack.c.bf16 %v1075_v54, %v1074_v6  ;;  %v947_v8 = vmul.f32 0.5, %v946_v32  ;;  %vm950_vm5 = vweird.f32 %v12819_v44 }
 0x1a7   : > { %v1008_v38 = vsub.f32 1.5, %v1007_v4  ;;  %v937_v10 = vmul.f32 0.5, %v936_v27  ;;  %v1057_v49 = vmul.f32 %v12767_v3, %v1038_v35  ;;  %vm951_vm6 = vweird.f32 %v12899_v42 }
 0x1a8   : > { %1211 = vmatmul.bf16.gmra.mxu0 %v1089_v47  ;;  %1260 = vmatmul.bf16.gmra.mxu1 %v1089_v47  ;;  %v1082_v30 = vadd.f32 %v12793_v26, %v1063_v63  ;;  %v948_v37 = vsub.f32 1.5, %v947_v8  ;;  %v1016_v1 = vmul.f32 %v12956_v31, %v1015_v58  ;;  %v1003_v43 = vsel %vm12973_vm4, %v12862_v18, %v999_v39  ;;  %vm12994_vm9 = vmor %vm950_vm5, %vm951_vm6 }
 0x1a9   : > { %v1009_v33 = vmul.f32 %v12872_v13, %v1008_v38  ;;  %v938_v50 = vsub.f32 1.5, %v937_v10  ;;  %v1077_v57 = vadd.f32 %v12793_v26, %v1058_v22  ;;  %vm940_vm7 = vweird.f32 %v12779_v9 }
 0x1aa   : > { %v1093_v7 = vpack.c.bf16 %v1083_v15, %v1082_v30  ;;  %vm941_vm8 = vweird.f32 %v12868_v46  ;;  %v949_v44 = vmul.f32 %v12899_v42, %v948_v37  ;;  %v1076_v62 = vadd.f32 %v12793_v26, %v1057_v49 }
 0x1ab   : > { %v1013_v48 = vsel %vm12965_vm3, %v12872_v13, %v1009_v33  ;;  %v1027_v13 = vmul.f32 0.5, %v1026_v59  ;;  %v1046_v41 = vmul.f32 %v1003_v43, %v12660_v17  ;;  %v939_v18 = vmul.f32 %v12868_v46, %v938_v50  ;;  %vm13001_vm10 = vmor %vm940_vm7, %vm941_vm8 }
 0x1ac   : > { %1231 = vmatmul.bf16.gmra.mxu2 %v1093_v7  ;;  %1280 = vmatmul.bf16.gmra.mxu3 %v1093_v7  ;;  %v1047_v61 = vmul.f32 %v1013_v48, %v12670_v12  ;;  %v1017_v54 = vmul.f32 0.5, %v1016_v1  ;;  %v1090_v9 = vpack.c.bf16 %v1077_v57, %v1076_v62  ;;  %v953_v60 = vsel %vm12994_vm9, %v12899_v42, %v949_v44 }
 0x1ad   : > { %v1028_v56 = vsub.f32 1.5, %v1027_v13  ;;  %v1065_v4 = vmul.f32 %v12767_v3, %v1046_v41  ;;  %vm1030_vm11 = vweird.f32 %v12901_v28  ;;  %vm1031_vm12 = vweird.f32 %v12943_v40 }
 0x1ae   : > { %v1066_v2 = vmul.f32 %v12767_v3, %v1047_v61  ;;  %v1018_v17 = vsub.f32 1.5, %v1017_v54  ;;  %v943_v45 = vsel %vm13001_vm10, %v12868_v46, %v939_v18  ;;  %v1041_v6 = vmul.f32 %v953_v60, %v12642_v0  ;;  %vm1032_vm15 = vmor %vm1030_vm11, %vm1031_vm12 }
 0x1af   : > { %vm1020_vm13 = vweird.f32 %v12909_v53  ;;  %vm1021_vm14 = vweird.f32 %v12956_v31  ;;  %v1029_v42 = vmul.f32 %v12943_v40, %v1028_v56  ;;  %v1084_v63 = vadd.f32 %v12793_v26, %v1065_v4 }
 0x1b0   : > { %v1085_v25 = vadd.f32 %v12793_v26, %v1066_v2  ;;  %v1040_v28 = vmul.f32 %v943_v45, %v12622_v51  ;;  %v1019_v5 = vmul.f32 %v12956_v31, %v1018_v17  ;;  %vm1022_vm0 = vmor %vm1020_vm13, %vm1021_vm14  ;;  %v1060_v46 = vmul.f32 %v12767_v3, %v1041_v6 }
 0x1b1   : > { %v1033_v47 = vsel %vm1032_vm15, %v12943_v40, %v1029_v42  ;;  %vm1457_vm1 = vcmask 1047556   ;;  %vm5201_vm2 = vcmask 257024  }
 0x1b2   : > { %v1094_v55 = vpack.c.bf16 %v1085_v25, %v1084_v63  ;;  %v1059_v0 = vmul.f32 %v12767_v3, %v1040_v28  ;;  %v1023_v53 = vsel %vm1022_vm0, %v12956_v31, %v1019_v5  ;;  %v1079_v29 = vadd.f32 %v12793_v26, %v1060_v46 }
 0x1b3   : > { %v1049_v32 = vmul.f32 %v1033_v47, %v12674_v23  ;;  %v1048_v38 = vmul.f32 %v1023_v53, %v12657_v16  ;;  %v1112_v16 = vld [vmem:[%s17485_s28] sm:$0x3] }
 0x1b4   : > { %v1078_v51 = vadd.f32 %v12793_v26, %v1059_v0  ;;  %v13038_v31 = vperm.slane %v1112_v16, 0  ;;  %v13040_v15 = vperm.slane %v1112_v16, 1 }
 0x1b5   : > { %v1068_v21 = vmul.f32 %v12767_v3, %v1049_v32  ;;  %v1067_v40 = vmul.f32 %v12767_v3, %v1048_v38 }
 0x1b6   : > { %v1091_v52 = vpack.c.bf16 %v1079_v29, %v1078_v51 }
 0x1b7   : > { %v1087_v27 = vadd.f32 %v12793_v26, %v1068_v21  ;;  %v1086_v30 = vadd.f32 %v12793_v26, %v1067_v40 }
 0x1b8   : > { %1216 = vmatmul.bf16.gmra.mxu0 %v1090_v9  ;;  %1265 = vmatmul.bf16.gmra.mxu1 %v1090_v9 }
 0x1b9   : > { %v1095_v14 = vpack.c.bf16 %v1087_v27, %v1086_v30 }
 0x1bc   : > { %1236 = vmatmul.bf16.gmra.mxu2 %v1094_v55  ;;  %1285 = vmatmul.bf16.gmra.mxu3 %v1094_v55 }
 0x1c8   : > { %1221 = vmatmul.bf16.gmra.mxu0 %v1091_v52  ;;  %1270 = vmatmul.bf16.gmra.mxu1 %v1091_v52 }
 0x1cc   : > { %1241 = vmatmul.bf16.gmra.mxu2 %v1095_v14  ;;  %1290 = vmatmul.bf16.gmra.mxu3 %v1095_v14 }
 0x211   : > { %v1207_v19 = vpop.f32.mrf.mxu0  ;;  %v1256_v23 = vpop.f32.mrf.mxu1 }
 0x212   : > { %v13043_v3 = vadd.f32 %v1207_v19, %v13038_v31  ;;  %v13046_v26 = vadd.f32 %v1256_v23, %v13040_v15 }
 0x219   : > { %v1209_v11 = vpop.f32.mrf.mxu0  ;;  %v1258_v8 = vpop.f32.mrf.mxu1 }
 0x21a   : > { %v13049_v33 = vadd.f32 %v1209_v11, %v13038_v31  ;;  %v13052_v24 = vadd.f32 %v1258_v8, %v13040_v15 }
 0x21c   : > { %v11185_v34 = vpack.i.bf16 %v13049_v33, %v13043_v3  ;;  %v11190_v7 = vpack.i.bf16 %v13052_v24, %v13046_v26 }
 0x21e   : > { %11186 = vrot.lane.b32.xlu0 %v11185_v34, %s12207_s7  ;;  %11176 = vrot.lane.b32.xlu2 %v11185_v34, %s12208_s4 }
 0x21f   : > { %11191 = vrot.lane.b32.xlu1 %v11190_v7, %s12208_s4  ;;  %v1227_v35 = vpop.f32.mrf.mxu2  ;;  %v1276_v10 = vpop.f32.mrf.mxu3 }
 0x220   : > { %v13064_v58 = vadd.f32 %v1227_v35, %v13038_v31  ;;  %v13078_v49 = vadd.f32 %v1276_v10, %v13040_v15 }
 0x225   : > { %v1212_v22 = vpop.f32.mrf.mxu0  ;;  %v1261_v50 = vpop.f32.mrf.mxu1 }
 0x226   : > { %11201 = vrot.lane.b32.xlu0 %v11190_v7, %s12207_s7  ;;  %11181 = vrot.lane.b32.xlu2 %v11185_v34, %s12209_s6  ;;  %v13089_v61 = vadd.f32 %v1212_v22, %v13038_v31  ;;  %v13100_v41 = vadd.f32 %v1261_v50, %v13040_v15 }
 0x227   : > { %v1229_v39 = vpop.f32.mrf.mxu2  ;;  %v1278_v59 = vpop.f32.mrf.mxu3 }
 0x228   : > { %v13067_v20 = vadd.f32 %v1229_v39, %v13038_v31  ;;  %v13073_v48 = vadd.f32 %v1278_v59, %v13040_v15 }
 0x22a   : > { %v11210_v37 = vpack.i.bf16 %v13067_v20, %v13064_v58  ;;  %v11225_v1 = vpack.i.bf16 %v13073_v48, %v13078_v49 }
 0x22c   : > { %11211 = vrot.lane.b32.xlu1 %v11210_v37, %s12209_s6 }
 0x22d   : > { %v1214_v43 = vpop.f32.mrf.mxu0  ;;  %v1263_v36 = vpop.f32.mrf.mxu1 }
 0x22e   : > { %11196 = vrot.lane.b32.xlu2 %v11190_v7, %s12209_s6  ;;  %11206 = vrot.lane.b32.xlu0 %v11210_v37, %s12208_s4  ;;  %v13084_v57 = vadd.f32 %v1214_v43, %v13038_v31  ;;  %v13095_v62 = vadd.f32 %v1263_v36, %v13040_v15 }
 0x22f   : > { %v1232_v44 = vpop.f32.mrf.mxu2  ;;  %v1281_v12 = vpop.f32.mrf.mxu3 }
 0x230   : > { %v11240_v13 = vpack.i.bf16 %v13084_v57, %v13089_v61  ;;  %v11255_v54 = vpack.i.bf16 %v13095_v62, %v13100_v41  ;;  %v13111_v56 = vadd.f32 %v1232_v44, %v13038_v31  ;;  %v13128_v63 = vadd.f32 %v1281_v12, %v13040_v15 }
 0x234   : > { %11226 = vrot.lane.b32.xlu1 %v11225_v1, %s12209_s6 }
 0x235   : > { %v1217_v18 = vpop.f32.mrf.mxu0  ;;  %v1266_v42 = vpop.f32.mrf.mxu1 }
 0x236   : > { %11216 = vrot.lane.b32.xlu2 %v11210_v37, %s12207_s7  ;;  %11221 = vrot.lane.b32.xlu0 %v11225_v1, %s12208_s4  ;;  %v13122_v25 = vadd.f32 %v1217_v18, %v13038_v31  ;;  %v13148_v0 = vadd.f32 %v1266_v42, %v13040_v15  ;;  %v1459_v18 = vrot.slane %v13043_v3, 4 }
 0x237   : > { %v1234_v9 = vpop.f32.mrf.mxu2  ;;  %v1283_v17 = vpop.f32.mrf.mxu3 }
 0x238   : > { %v13106_v2 = vadd.f32 %v1234_v9, %v13038_v31  ;;  %v13125_v6 = vadd.f32 %v1283_v17, %v13040_v15  ;;  %v3435_v17 = vrot.slane %v13052_v24, 4 }
 0x23a   : > { %v11275_v60 = vpack.i.bf16 %v13106_v2, %v13111_v56  ;;  %v13135_v5 = vpack.i.bf16 %v13125_v6, %v13128_v63 }
 0x23c   : > { %11241 = vrot.lane.b32.xlu1 %v11240_v13, %s12209_s6 }
 0x23d   : > { %v1219_v4 = vpop.f32.mrf.mxu0  ;;  %v1268_v46 = vpop.f32.mrf.mxu1 }
 0x23e   : > { %11231 = vrot.lane.b32.xlu2 %v11225_v1, %s12207_s7  ;;  %11236 = vrot.lane.b32.xlu0 %v11240_v13, %s12208_s4  ;;  %v13117_v45 = vadd.f32 %v1219_v4, %v13038_v31  ;;  %v13142_v47 = vadd.f32 %v1268_v46, %v13040_v15  ;;  %v3379_v4 = vrot.slane %v13046_v26, 4 }
 0x23f   : > { %v1237_v55 = vpop.f32.mrf.mxu2  ;;  %v1286_v53 = vpop.f32.mrf.mxu3 }
 0x240   : > { %v11290_v28 = vpack.i.bf16 %v13117_v45, %v13122_v25  ;;  %v11315_v29 = vpack.i.bf16 %v13142_v47, %v13148_v0  ;;  %v13159_v52 = vadd.f32 %v1237_v55, %v13038_v31  ;;  %v13170_v19 = vadd.f32 %v1286_v53, %v13040_v15 }
 0x244   : > { %11256 = vrot.lane.b32.xlu1 %v11255_v54, %s12209_s6 }
 0x245   : > { %v1222_v32 = vpop.f32.mrf.mxu0  ;;  %v1271_v21 = vpop.f32.mrf.mxu1 }
 0x246   : > { %11246 = vrot.lane.b32.xlu2 %v11240_v13, %s12207_s7  ;;  %11251 = vrot.lane.b32.xlu0 %v11255_v54, %s12208_s4  ;;  %v13176_v11 = vadd.f32 %v1222_v32, %v13038_v31  ;;  %v13193_v10 = vadd.f32 %v1271_v21, %v13040_v15 }
 0x247   : > { %v1239_v51 = vpop.f32.mrf.mxu2  ;;  %v1288_v27 = vpop.f32.mrf.mxu3 }
 0x248   : > { %v13154_v38 = vadd.f32 %v1239_v51, %v13038_v31  ;;  %v13165_v14 = vadd.f32 %v1288_v27, %v13040_v15 }
 0x24a   : > { %v11320_v40 = vpack.i.bf16 %v13154_v38, %v13159_v52  ;;  %v13180_v8 = vpack.i.bf16 %v13165_v14, %v13170_v19 }
 0x24c   : > { %11276 = vrot.lane.b32.xlu1 %v11275_v60, %s12207_s7 }
 0x24d   : > { %v1224_v30 = vpop.f32.mrf.mxu0  ;;  %v1273_v34 = vpop.f32.mrf.mxu1 }
 0x24e   : > { %11261 = vrot.lane.b32.xlu2 %v11255_v54, %s12207_s7  ;;  %11271 = vrot.lane.b32.xlu0 %v11275_v60, %s12209_s6  ;;  %v13173_v23 = vadd.f32 %v1224_v30, %v13038_v31  ;;  %v13187_v35 = vadd.f32 %v1273_v34, %v13040_v15  ;;  %v12210_v54 = vmov 1983009808  }
 0x24f   : > { %v1242_v16 = vpop.f32.mrf.mxu2  ;;  %v1291_v22 = vpop.f32.mrf.mxu3  ;;  %v1462_v12 = vunpack.c.l.s4 %v12210_v54  ;;  %v12211_v54 = vmov 1934713408  }
 0x250   : > { %v11355_v7 = vpack.i.bf16 %v13173_v23, %v13176_v11  ;;  %v11360_v37 = vpack.i.bf16 %v13187_v35, %v13193_v10  ;;  %v13206_v1 = vadd.f32 %v1242_v16, %v13038_v31  ;;  %v13227_v55 = vadd.f32 %v1291_v22, %v13040_v15 }
 0x251   : > { %v13231_v51 = vunpack.c.0.s8 %v1462_v12  ;;  %v1486_v12 = vunpack.c.l.s4 %v12211_v54 }
 0x254   : > { %11291 = vrot.lane.b32.xlu1 %v11290_v28, %s12208_s4 }
 0x256   : > { %11286 = vrot.lane.b32.xlu0 %v13135_v5, %s12209_s6  ;;  %11266 = vrot.lane.b32.xlu2 %v11275_v60, %s12208_s4 }
 0x257   : > { %v1244_v59 = vpop.f32.mrf.mxu2  ;;  %v1293_v13 = vpop.f32.mrf.mxu3 }
 0x258   : > { %v13201_v50 = vadd.f32 %v1244_v59, %v13038_v31  ;;  %v13216_v60 = vadd.f32 %v1293_v13, %v13040_v15  ;;  %v1515_v31 = vrot.slane %v13049_v33, 4 }
 0x25a   : > { %v13210_v44 = vpack.i.bf16 %v13201_v50, %v13206_v1  ;;  %v13236_v16 = vpack.i.bf16 %v13216_v60, %v13227_v55 }
 0x25c   : > { %11301 = vrot.lane.b32.xlu1 %v11290_v28, %s12207_s7 }
 0x25e   : > { %11296 = vrot.lane.b32.xlu0 %v11290_v28, %s12209_s6  ;;  %11281 = vrot.lane.b32.xlu2 %v13135_v5, %s12208_s4 }
 0x264   : > { %11316 = vrot.lane.b32.xlu1 %v11315_v29, %s12207_s7 }
 0x266   : > { %11311 = vrot.lane.b32.xlu0 %v11315_v29, %s12209_s6  ;;  %11306 = vrot.lane.b32.xlu2 %v11315_v29, %s12208_s4 }
 0x26c   : > { %11321 = vrot.lane.b32.xlu1 %v11320_v40, %s12208_s4 }
 0x26e   : > { %11331 = vrot.lane.b32.xlu0 %v11320_v40, %s12207_s7  ;;  %11326 = vrot.lane.b32.xlu2 %v11320_v40, %s12209_s6 }
 0x274   : > { %11336 = vrot.lane.b32.xlu1 %v13180_v8, %s12208_s4 }
 0x276   : > { %11356 = vrot.lane.b32.xlu0 %v11355_v7, %s12207_s7  ;;  %11341 = vrot.lane.b32.xlu2 %v13180_v8, %s12209_s6 }
 0x278   : > { %v13195_v39 = vpop.permute.xlu2 %11176 }
 0x27c   : > { %11361 = vrot.lane.b32.xlu1 %v11360_v37, %s12208_s4 }
 0x27e   : > { %11371 = vrot.lane.b32.xlu0 %v11360_v37, %s12207_s7  ;;  %11346 = vrot.lane.b32.xlu2 %v11355_v7, %s12208_s4 }
 0x280   : > { %v11182_v43 = vpop.permute.xlu2 %11181 }
 0x281   : > { %v11184_v36 = vunpack.i.h.bf16 %v11182_v43  ;;  %v11183_v9 = vunpack.i.l.bf16 %v11182_v43 }
 0x283   : > { %v1513_v46 = vrot.slane %v11184_v36, 4  ;;  %v1456_v21 = vrot.slane %v11183_v9, 4  ;;  %v1516_v30 = vsel %vm1457_vm1, %v11184_v36, %v1515_v31  ;;  %v1460_v15 = vsel %vm1457_vm1, %v11183_v9, %v1459_v18 }
 0x284   : > { %11381 = vrot.lane.b32.xlu1 %v13210_v44, %s12209_s6  ;;  %v1524_v43 = vperm.slane %v1516_v30, %v13231_v51  ;;  %v11178_v18 = vunpack.i.l.bf16 %v13195_v39  ;;  %v13250_v9 = vperm.slane %v1460_v15, %v13231_v51 }
 0x285   : > { %v1514_v22 = vsel %vm1457_vm1, %v1513_v46, %v13049_v33  ;;  %v1458_v13 = vsel %vm1457_vm1, %v1456_v21, %v13043_v3 }
 0x286   : > { %11351 = vrot.lane.b32.xlu2 %v11355_v7, %s12209_s6  ;;  %11376 = vrot.lane.b32.xlu0 %v13210_v44, %s12208_s4  ;;  %v11179_v7 = vunpack.i.h.bf16 %v13195_v39  ;;  %v1520_v3 = vperm.slane %v1514_v22, %v13231_v51  ;;  %v1471_v15 = vrot.slane %v11178_v18, 4  ;;  %v1495_v22 = vrot.slane %v13250_v9, 4 }
 0x288   : > { %v11197_v53 = vpop.permute.xlu2 %11196  ;;  %v1527_v39 = vrot.slane %v11179_v7, 4 }
 0x289   : > { %v11199_v40 = vunpack.i.h.bf16 %v11197_v53  ;;  %v11198_v27 = vunpack.i.l.bf16 %v11197_v53  ;;  %v1464_v53 = vperm.slane %v1458_v13, %v13231_v51  ;;  %v13274_v13 = vunpack.c.0.s8 %v1486_v12 }
 0x28b   : > { %v3433_v34 = vrot.slane %v11199_v40, 4  ;;  %v3377_v59 = vrot.slane %v11198_v27, 4  ;;  %v3436_v36 = vsel %vm1457_vm1, %v11199_v40, %v3435_v17  ;;  %v3380_v31 = vsel %vm1457_vm1, %v11198_v27, %v3379_v4 }
 0x28c   : > { %11396 = vrot.lane.b32.xlu1 %v13236_v16, %s12209_s6  ;;  %v13263_v21 = vperm.slane %v3436_v36, %v13231_v51  ;;  %v13271_v40 = vperm.slane %v3380_v31, %v13231_v51  ;;  %v1539_v36 = vrot.slane %v1520_v3, 4 }
 0x28d   : > { %v3434_v33 = vsel %vm1457_vm1, %v3433_v34, %v13052_v24  ;;  %v3378_v24 = vsel %vm1457_vm1, %v3377_v59, %v13046_v26  ;;  %v1551_v34 = vrot.slane %v1524_v43, 4 }
 0x28e   : > { %11366 = vrot.lane.b32.xlu2 %v11360_v37, %s12209_s6  ;;  %11391 = vrot.lane.b32.xlu0 %v13236_v16, %s12208_s4  ;;  %v13268_v37 = vperm.slane %v3434_v33, %v13231_v51  ;;  %v13277_v54 = vperm.slane %v3378_v24, %v13231_v51  ;;  %v1483_v33 = vrot.slane %v1464_v53, 4 }
 0x290   : > { %v11187_v4 = vpop.permute.xlu0 %11186 }
 0x291   : > { %v11189_v27 = vunpack.i.h.bf16 %v11187_v4  ;;  %v11188_v30 = vunpack.i.l.bf16 %v11187_v4  ;;  %v13286_v29 = vpop.permute.xlu1 %11191 }
 0x293   : > { %v1525_v26 = vrot.slane %v11189_v27, 4  ;;  %v1528_v59 = vsel %vm1457_vm1, %v11189_v27, %v1527_v39  ;;  %v1469_v46 = vrot.slane %v11188_v30, 4  ;;  %v1472_v32 = vsel %vm1457_vm1, %v11188_v30, %v1471_v15 }
 0x294   : > { %v1536_v31 = vperm.slane %v1528_v59, %v13231_v51  ;;  %11401 = vrot.lane.b32.xlu1 %v13135_v5, %s12207_s7  ;;  %v1480_v30 = vperm.slane %v1472_v32, %v13231_v51  ;;  %v11194_v15 = vunpack.i.h.bf16 %v13286_v29 }
 0x295   : > { %v1526_v24 = vsel %vm1457_vm1, %v1525_v26, %v11179_v7  ;;  %v1470_v59 = vsel %vm1457_vm1, %v1469_v46, %v11178_v18 }
 0x296   : > { %v1532_v39 = vperm.slane %v1526_v24, %v13231_v51  ;;  %v1549_v27 = vrot.slane %v1536_v31, 4  ;;  %v1552_v28 = vsel %vm1457_vm1, %v1536_v31, %v1551_v34  ;;  %11386 = vrot.lane.b32.xlu2 %v13210_v44, %s12207_s7  ;;  %11406 = vrot.lane.b32.xlu0 %v13180_v8, %s12207_s7  ;;  %v1476_v7 = vperm.slane %v1470_v59, %v13231_v51 }
 0x297   : > { %v1560_v42 = vperm.slane %v1552_v28, %v13274_v13  ;;  %v1493_v59 = vrot.slane %v1480_v30, 4  ;;  %v1496_v32 = vsel %vm1457_vm1, %v1480_v30, %v1495_v22 }
 0x298   : > { %v1537_v26 = vrot.slane %v1532_v39, 4  ;;  %v1540_v34 = vsel %vm1457_vm1, %v1532_v39, %v1539_v36  ;;  %v1550_v18 = vsel %vm1457_vm1, %v1549_v27, %v1524_v43  ;;  %v1481_v31 = vrot.slane %v1476_v7, 4 }
 0x299   : > { %v1548_v44 = vperm.slane %v1540_v34, %v13274_v13  ;;  %v1556_v46 = vperm.slane %v1550_v18, %v13274_v13  ;;  %v1567_v8 = vrot.slane %v1560_v42, 4  ;;  %v1484_v28 = vsel %vm1457_vm1, %v1476_v7, %v1483_v33 }
 0x29a   : > { %v1538_v24 = vsel %vm1457_vm1, %v1537_v26, %v1520_v3  ;;  %v1482_v27 = vsel %vm1457_vm1, %v1481_v31, %v1464_v53  ;;  %v1492_v42 = vperm.slane %v1484_v28, %v13274_v13 }
 0x29b   : > { %v1544_v12 = vperm.slane %v1538_v24, %v13274_v13  ;;  %v1563_v5 = vrot.slane %v1548_v44, 4  ;;  %v1565_v4 = vrot.slane %v1556_v46, 4  ;;  %v1568_v36 = vsel %vm1457_vm1, 0.0, %v1567_v8 }
 0x29c   : > { %v2418_v43 = vsel %vm1457_vm1, %v1567_v8, %v1556_v46  ;;  %v2423_v39 = vrot.slane %v1568_v36, 4  ;;  %v1488_v46 = vperm.slane %v1482_v27, %v13274_v13  ;;  %v1507_v27 = vrot.slane %v1492_v42, 4 }
 0x29d   : > { %v1561_v34 = vrot.slane %v1544_v12, 4  ;;  %v1564_v3 = vsel %vm1457_vm1, 0.0, %v1563_v5  ;;  %v1566_v33 = vsel %vm1457_vm1, 0.0, %v1565_v4  ;;  %v2407_v22 = vsel %vm1457_vm1, %v1563_v5, %v1544_v12 }
 0x29e   : > { %v2411_v7 = vperm.slane %v2407_v22, %v13231_v51  ;;  %v2412_v30 = vrot.slane %v1564_v3, 4  ;;  %v2422_v26 = vperm.slane %v2418_v43, %v13231_v51  ;;  %v2424_v18 = vsel %vm1457_vm1, %v2423_v39, %v1566_v33  ;;  %11411 = vrot.lane.b32.xlu2 %v13236_v16, %s12207_s7 }
 0x29f   : > { %v1562_v53 = vsel %vm1457_vm1, 0.0, %v1561_v34  ;;  %v2428_v44 = vperm.slane %v2424_v18, %v13231_v51  ;;  %v1494_v4 = vsel %vm1457_vm1, %v1493_v59, %v13250_v9  ;;  %v1504_v16 = vperm.slane %v1496_v32, %v13274_v13 }
 0x2a0   : > { %v2413_v12 = vsel %vm1457_vm1, %v2412_v30, %v1562_v53  ;;  %v2431_v5 = vrot.slane %v2411_v7, 4  ;;  %v2443_v8 = vrot.slane %v2422_v26, 4  ;;  %v1500_v31 = vperm.slane %v1494_v4, %v13274_v13 }
 0x2a1   : > { %v2417_v24 = vperm.slane %v2413_v12, %v13231_v51  ;;  %v2441_v28 = vrot.slane %v2428_v44, 4  ;;  %v1505_v36 = vrot.slane %v1488_v46, 4  ;;  %v11193_v43 = vunpack.i.l.bf16 %v13286_v29 }
 0x2a2   : > { %v2444_v39 = vsel %vm1457_vm1, %v2428_v44, %v2443_v8  ;;  %v1509_v34 = vrot.slane %v1500_v31, 4  ;;  %v1508_v18 = vsel %vm1457_vm1, 0.0, %v1507_v27  ;;  %v1511_v4 = vrot.slane %v1504_v16, 4 }
 0x2a3   : > { %v2429_v3 = vrot.slane %v2417_v24, 4  ;;  %v2432_v9 = vsel %vm1457_vm1, %v2417_v24, %v2431_v5  ;;  %v2442_v59 = vsel %vm1457_vm1, %v2441_v28, %v2422_v26  ;;  %v2452_v33 = vperm.slane %v2444_v39, %v13274_v13 }
 0x2a4   : > { %v2440_v22 = vperm.slane %v2432_v9, %v13274_v13  ;;  %v2448_v30 = vperm.slane %v2442_v59, %v13274_v13  ;;  %v1506_v32 = vsel %vm1457_vm1, 0.0, %v1505_v36  ;;  %v1510_v42 = vsel %vm1457_vm1, 0.0, %v1509_v34  ;;  %v13347_v9 = vpop.permute.xlu2 %11216 }
 0x2a5   : > { %v2430_v53 = vsel %vm1457_vm1, %v2429_v3, %v2411_v7  ;;  %v2457_v44 = vrot.slane %v2452_v33, 4  ;;  %v2353_v8 = vsel %vm1457_vm1, %v1507_v27, %v1488_v46  ;;  %v1512_v28 = vsel %vm1457_vm1, 0.0, %v1511_v4  ;;  %v13353_v27 = vpop.permute.xlu0 %11201 }
 0x2a6   : > { %v2436_v12 = vperm.slane %v2430_v53, %v13274_v13  ;;  %v2453_v5 = vrot.slane %v2448_v30, 4  ;;  %v2459_v26 = vrot.slane %v2440_v22, 4  ;;  %v2357_v36 = vperm.slane %v2353_v8, %v13231_v51 }
 0x2a7   : > { %v2458_v24 = vsel %vm1457_vm1, %v2457_v44, %v2440_v22  ;;  %v2358_v39 = vrot.slane %v1508_v18, 4  ;;  %v2364_v46 = vsel %vm1457_vm1, %v1511_v4, %v1500_v31  ;;  %v3391_v8 = vrot.slane %v11193_v43, 4 }
 0x2a8   : > { %v2454_v7 = vsel %vm1457_vm1, %v2453_v5, %v2436_v12  ;;  %v2455_v3 = vrot.slane %v2436_v12, 4  ;;  %v2460_v16 = vsel %vm1457_vm1, %v2452_v33, %v2459_v26  ;;  %v5170_v34 = vpack.c.bf16 %v2458_v24, %v2458_v24 }
 0x2a9   : > { %v5138_v59 = vpack.c.bf16 %v2454_v7, %v2454_v7  ;;  %v5186_v53 = vpack.c.bf16 %v2460_v16, %v2460_v16  ;;  %v2359_v17 = vsel %vm1457_vm1, %v2358_v39, %v1506_v32  ;;  %v2368_v44 = vperm.slane %v2364_v46, %v13231_v51 }
 0x2aa   : > { %v2456_v22 = vsel %vm1457_vm1, %v2448_v30, %v2455_v3  ;;  %5235 = vst.msk [vmem:[#allocation2 + $0x84] sm:$0xf] %vm5201_vm2, %v5170_v34  ;;  %v2363_v18 = vperm.slane %v2359_v17, %v13231_v51  ;;  %v2369_v12 = vrot.slane %v1512_v28, 4  ;;  %v3447_v33 = vrot.slane %v11194_v15, 4 }
 0x2ab   : > { %v11219_v5 = vunpack.i.h.bf16 %v13347_v9  ;;  %v5154_v26 = vpack.c.bf16 %v2456_v22, %v2456_v22  ;;  %5203 = vst.msk [vmem:[#allocation2 + $0x4] sm:$0xf] %vm5201_vm2, %v5138_v59  ;;  %v2377_v31 = vrot.slane %v2357_v36, 4  ;;  %v2389_v4 = vrot.slane %v2368_v44, 4 }
 0x2ac   : > { %5251 = vst.msk [vmem:[#allocation2 + $0xc4] sm:$0xf] %vm5201_vm2, %v5186_v53  ;;  %v2370_v30 = vsel %vm1457_vm1, %v2369_v12, %v1510_v42  ;;  %v2375_v32 = vrot.slane %v2363_v18, 4  ;;  %v11204_v17 = vunpack.i.h.bf16 %v13353_v27  ;;  %v11203_v39 = vunpack.i.l.bf16 %v13353_v27 }
 0x2ad   : > { %5219 = vst.msk [vmem:[#allocation2 + $0x44] sm:$0xf] %vm5201_vm2, %v5154_v26  ;;  %v2374_v24 = vperm.slane %v2370_v30, %v13231_v51  ;;  %v2378_v28 = vsel %vm1457_vm1, %v2363_v18, %v2377_v31 }
 0x2ae   : > { %v2376_v7 = vsel %vm1457_vm1, %v2375_v32, %v2357_v36  ;;  %v2386_v3 = vperm.slane %v2378_v28, %v13274_v13  ;;  %v3445_v42 = vrot.slane %v11204_v17, 4  ;;  %v3448_v16 = vsel %vm1457_vm1, %v11204_v17, %v3447_v33 }
 0x2af   : > { %v2382_v34 = vperm.slane %v2376_v7, %v13274_v13  ;;  %v2387_v59 = vrot.slane %v2374_v24, 4  ;;  %v2390_v53 = vsel %vm1457_vm1, %v2374_v24, %v2389_v4  ;;  %v3456_v46 = vperm.slane %v3448_v16, %v13231_v51 }
 0x2b0   : > { %v2398_v22 = vperm.slane %v2390_v53, %v13274_v13  ;;  %v2405_v12 = vrot.slane %v2386_v3, 4  ;;  %v3446_v27 = vsel %vm1457_vm1, %v3445_v42, %v11194_v15  ;;  %v3389_v36 = vrot.slane %v11203_v39, 4 }
 0x2b1   : > { %v2388_v18 = vsel %vm1457_vm1, %v2387_v59, %v2368_v44  ;;  %v2401_v26 = vrot.slane %v2382_v34, 4  ;;  %v3452_v33 = vperm.slane %v3446_v27, %v13231_v51  ;;  %v3469_v31 = vrot.slane %v3456_v46, 4 }
 0x2b2   : > { %v2394_v30 = vperm.slane %v2388_v18, %v13274_v13  ;;  %v2403_v32 = vrot.slane %v2398_v22, 4  ;;  %v2406_v4 = vsel %vm1457_vm1, %v2398_v22, %v2405_v12  ;;  %v17486_v17 = vrot.slane %v13263_v21, 4 }
 0x2b3   : > { %v5185_v28 = vpack.c.bf16 %v2406_v4, %v2406_v4  ;;  %v3457_v7 = vrot.slane %v3452_v33, 4  ;;  %v17487_v15 = vrot.slane %v13268_v37, 4  ;;  %v3470_v44 = vsel %vm1457_vm1, %v3469_v31, %v13263_v21 }
 0x2b4   : > { %v3472_v24 = vsel %vm1457_vm1, %v3456_v46, %v17486_v17  ;;  %v2399_v16 = vrot.slane %v2394_v30, 4  ;;  %v2402_v59 = vsel %vm1457_vm1, %v2394_v30, %v2401_v26  ;;  %v2404_v53 = vsel %vm1457_vm1, %v2403_v32, %v2386_v3 }
 0x2b5   : > { %v3460_v42 = vsel %vm1457_vm1, %v3452_v33, %v17487_v15  ;;  %v5153_v12 = vpack.c.bf16 %v2402_v59, %v2402_v59  ;;  %v5169_v27 = vpack.c.bf16 %v2404_v53, %v2404_v53  ;;  %5250 = vst.msk [vmem:[#allocation2 + $0xc0] sm:$0xf] %vm5201_vm2, %v5185_v28  ;;  %v3458_v46 = vsel %vm1457_vm1, %v3457_v7, %v13268_v37 }
 0x2b6   : > { %v3468_v22 = vperm.slane %v3460_v42, %v13274_v13  ;;  %v3476_v18 = vperm.slane %v3470_v44, %v13274_v13  ;;  %v2400_v33 = vsel %vm1457_vm1, %v2399_v16, %v2382_v34  ;;  %v3464_v21 = vperm.slane %v3458_v46, %v13274_v13 }
 0x2b7   : > { %v3480_v31 = vperm.slane %v3472_v24, %v13274_v13  ;;  %v5137_v30 = vpack.c.bf16 %v2400_v33, %v2400_v33  ;;  %5218 = vst.msk [vmem:[#allocation2 + $0x40] sm:$0xf] %vm5201_vm2, %v5153_v12  ;;  %v3390_v32 = vsel %vm1457_vm1, %v3389_v36, %v11193_v43  ;;  %v3392_v4 = vsel %vm1457_vm1, %v11203_v39, %v3391_v8 }
 0x2b8   : > { %v3483_v26 = vrot.slane %v3468_v22, 4  ;;  %v3485_v3 = vrot.slane %v3476_v18, 4  ;;  %5234 = vst.msk [vmem:[#allocation2 + $0x80] sm:$0xf] %vm5201_vm2, %v5169_v27  ;;  %v3481_v37 = vrot.slane %v3464_v21, 4  ;;  %v3396_v29 = vperm.slane %v3390_v32, %v13231_v51 }
 0x2b9   : > { %v3487_v17 = vrot.slane %v3480_v31, 4  ;;  %5202 = vst.msk [vmem:[#allocation2] sm:$0xf] %vm5201_vm2, %v5137_v30  ;;  %v3400_v36 = vperm.slane %v3392_v4, %v13231_v51  ;;  %v17488_v12 = vrot.slane %v13277_v54, 4  ;;  %v17489_v31 = vrot.slane %v13271_v40, 4 }
 0x2ba   : > { %v3484_v34 = vsel %vm1457_vm1, 0.0, %v3483_v26  ;;  %v4327_v28 = vsel %vm1457_vm1, %v3483_v26, %v3464_v21  ;;  %v3486_v24 = vsel %vm1457_vm1, 0.0, %v3485_v3  ;;  %v3482_v43 = vsel %vm1457_vm1, 0.0, %v3481_v37 }
 0x2bb   : > { %v4331_v7 = vperm.slane %v4327_v28, %v13231_v51  ;;  %v4332_v15 = vrot.slane %v3484_v34, 4  ;;  %v3488_v8 = vsel %vm1457_vm1, 0.0, %v3487_v17  ;;  %v4338_v39 = vsel %vm1457_vm1, %v3487_v17, %v3476_v18 }
 0x2bc   : > { %v4342_v44 = vperm.slane %v4338_v39, %v13231_v51  ;;  %v4343_v16 = vrot.slane %v3488_v8, 4  ;;  %v3401_v22 = vrot.slane %v3396_v29, 4  ;;  %v3404_v27 = vsel %vm1457_vm1, %v3396_v29, %v17488_v12 }
 0x2bd   : > { %v4333_v42 = vsel %vm1457_vm1, %v4332_v15, %v3482_v43  ;;  %v4351_v59 = vrot.slane %v4331_v7, 4  ;;  %v3413_v46 = vrot.slane %v3400_v36, 4  ;;  %v3412_v18 = vperm.slane %v3404_v27, %v13274_v13 }
 0x2be   : > { %v4337_v53 = vperm.slane %v4333_v42, %v13231_v51  ;;  %v4344_v33 = vsel %vm1457_vm1, %v4343_v16, %v3486_v24  ;;  %v4363_v21 = vrot.slane %v4342_v44, 4  ;;  %v3416_v26 = vsel %vm1457_vm1, %v3400_v36, %v17489_v31 }
 0x2bf   : > { %v4348_v30 = vperm.slane %v4344_v33, %v13231_v51  ;;  %v3402_v4 = vsel %vm1457_vm1, %v3401_v22, %v13277_v54  ;;  %v3414_v17 = vsel %vm1457_vm1, %v3413_v46, %v13271_v40  ;;  %v3424_v28 = vperm.slane %v3416_v26, %v13274_v13 }
 0x2c0   : > { %v4349_v3 = vrot.slane %v4337_v53, 4  ;;  %v4352_v32 = vsel %vm1457_vm1, %v4337_v53, %v4351_v59  ;;  %v3408_v34 = vperm.slane %v3402_v4, %v13274_v13  ;;  %v3420_v43 = vperm.slane %v3414_v17, %v13274_v13 }
 0x2c1   : > { %v4360_v37 = vperm.slane %v4352_v32, %v13274_v13  ;;  %v4361_v15 = vrot.slane %v4348_v30, 4  ;;  %v4364_v29 = vsel %vm1457_vm1, %v4348_v30, %v4363_v21  ;;  %v3427_v16 = vrot.slane %v3412_v18, 4  ;;  %v11212_v30 = vpop.permute.xlu1 %11211 }
 0x2c2   : > { %v4350_v24 = vsel %vm1457_vm1, %v4349_v3, %v4331_v7  ;;  %v4372_v54 = vperm.slane %v4364_v29, %v13274_v13  ;;  %v3425_v36 = vrot.slane %v3408_v34, 4  ;;  %v3429_v59 = vrot.slane %v3420_v43, 4 }
 0x2c3   : > { %v4356_v8 = vperm.slane %v4350_v24, %v13274_v13  ;;  %v4379_v39 = vrot.slane %v4360_v37, 4  ;;  %v4362_v42 = vsel %vm1457_vm1, %v4361_v15, %v4342_v44  ;;  %v3431_v40 = vrot.slane %v3424_v28, 4 }
 0x2c4   : > { %v4368_v53 = vperm.slane %v4362_v42, %v13274_v13  ;;  %v4377_v7 = vrot.slane %v4372_v54, 4  ;;  %v3426_v46 = vsel %vm1457_vm1, 0.0, %v3425_v36  ;;  %v3428_v33 = vsel %vm1457_vm1, 0.0, %v3427_v16 }
 0x2c5   : > { %v4375_v22 = vrot.slane %v4356_v8, 4  ;;  %v4380_v12 = vsel %vm1457_vm1, %v4372_v54, %v4379_v39  ;;  %v3430_v21 = vsel %vm1457_vm1, 0.0, %v3429_v59  ;;  %v3432_v18 = vsel %vm1457_vm1, 0.0, %v3431_v40 }
 0x2c6   : > { %v5315_v27 = vpack.c.bf16 %v4380_v12, %v4380_v12  ;;  %v4373_v31 = vrot.slane %v4368_v53, 4  ;;  %v4378_v44 = vsel %vm1457_vm1, %v4377_v7, %v4360_v37  ;;  %v4273_v4 = vsel %vm1457_vm1, %v3427_v16, %v3408_v34 }
 0x2c7   : > { %v4376_v26 = vsel %vm1457_vm1, %v4368_v53, %v4375_v22  ;;  %v5299_v32 = vpack.c.bf16 %v4378_v44, %v4378_v44  ;;  %v4278_v17 = vrot.slane %v3428_v33, 4  ;;  %v4277_v24 = vperm.slane %v4273_v4, %v13231_v51 }
 0x2c8   : > { %v5283_v3 = vpack.c.bf16 %v4376_v26, %v4376_v26  ;;  %5379 = vst.msk [vmem:[#allocation3 + $0xc4] sm:$0xf] %vm5201_vm2, %v5315_v27  ;;  %v4374_v28 = vsel %vm1457_vm1, %v4373_v31, %v4356_v8  ;;  %v4284_v15 = vsel %vm1457_vm1, %v3431_v40, %v3420_v43  ;;  %v4289_v29 = vrot.slane %v3432_v18, 4  ;;  %v13466_v43 = vpop.permute.xlu2 %11231 }
 0x2c9   : > { %v5267_v54 = vpack.c.bf16 %v4374_v28, %v4374_v28  ;;  %v4279_v37 = vsel %vm1457_vm1, %v4278_v17, %v3426_v46  ;;  %v4288_v39 = vperm.slane %v4284_v15, %v13231_v51  ;;  %v11214_v36 = vunpack.i.h.bf16 %v11212_v30  ;;  %5363 = vst.msk [vmem:[#allocation3 + $0x84] sm:$0xf] %vm5201_vm2, %v5299_v32 }
 0x2ca   : > { %5347 = vst.msk [vmem:[#allocation3 + $0x44] sm:$0xf] %vm5201_vm2, %v5283_v3  ;;  %v4283_v34 = vperm.slane %v4279_v37, %v13231_v51  ;;  %v4290_v42 = vsel %vm1457_vm1, %v4289_v29, %v3430_v21  ;;  %v4297_v8 = vrot.slane %v4277_v24, 4  ;;  %v11213_v16 = vunpack.i.l.bf16 %v11212_v30 }
 0x2cb   : > { %v11218_v59 = vunpack.i.l.bf16 %v13347_v9  ;;  %5331 = vst.msk [vmem:[#allocation3 + $0x4] sm:$0xf] %vm5201_vm2, %v5267_v54  ;;  %v4294_v40 = vperm.slane %v4290_v42, %v13231_v51  ;;  %v4309_v53 = vrot.slane %v4288_v39, 4  ;;  %v1961_v22 = vrot.slane %v11214_v36, 4 }
 0x2cc   : > { %v1973_v7 = vrot.slane %v11219_v5, 4  ;;  %v4295_v12 = vrot.slane %v4283_v34, 4  ;;  %v4298_v27 = vsel %vm1457_vm1, %v4283_v34, %v4297_v8  ;;  %v1905_v46 = vrot.slane %v11213_v16, 4 }
 0x2cd   : > { %v4306_v33 = vperm.slane %v4298_v27, %v13274_v13  ;;  %v4307_v21 = vrot.slane %v4294_v40, 4  ;;  %v4310_v31 = vsel %vm1457_vm1, %v4294_v40, %v4309_v53  ;;  %v17490_v26 = vrot.slane %v13067_v20, 4  ;;  %v13497_v27 = vpop.permute.xlu1 %11226 }
 0x2ce   : > { %v11234_v18 = vunpack.i.h.bf16 %v13466_v43  ;;  %v4296_v30 = vsel %vm1457_vm1, %v4295_v12, %v4277_v24  ;;  %v4318_v3 = vperm.slane %v4310_v31, %v13274_v13  ;;  %v1962_v32 = vsel %vm1457_vm1, %v1961_v22, %v13067_v20  ;;  %v11207_v12 = vpop.permute.xlu0 %11206 }
 0x2cf   : > { %v1964_v44 = vsel %vm1457_vm1, %v11214_v36, %v17490_v26  ;;  %v4302_v4 = vperm.slane %v4296_v30, %v13274_v13  ;;  %v4308_v17 = vsel %vm1457_vm1, %v4307_v21, %v4288_v39  ;;  %v4325_v28 = vrot.slane %v4306_v33, 4 }
 0x2d0   : > { %v1906_v15 = vsel %vm1457_vm1, %v1905_v46, %v13064_v58  ;;  %v11233_v29 = vunpack.i.l.bf16 %v13466_v43  ;;  %v4314_v54 = vperm.slane %v4308_v17, %v13274_v13  ;;  %v4323_v37 = vrot.slane %v4318_v3, 4 }
 0x2d1   : > { %v1972_v24 = vperm.slane %v1964_v44, %v13231_v51  ;;  %v4321_v36 = vrot.slane %v4302_v4, 4  ;;  %v4326_v34 = vsel %vm1457_vm1, %v4318_v3, %v4325_v28  ;;  %v1968_v20 = vperm.slane %v1962_v32, %v13231_v51 }
 0x2d2   : > { %v17491_v42 = vrot.slane %v13064_v58, 4  ;;  %v4319_v8 = vrot.slane %v4314_v54, 4  ;;  %v4324_v40 = vsel %vm1457_vm1, %v4323_v37, %v4306_v33  ;;  %v5314_v53 = vpack.c.bf16 %v4326_v34, %v4326_v34 }
 0x2d3   : > { %v1912_v22 = vperm.slane %v1906_v15, %v13231_v51  ;;  %v1917_v46 = vrot.slane %v11218_v59, 4  ;;  %v13503_v21 = vrot.slane %v11234_v18, 4  ;;  %v4322_v58 = vsel %vm1457_vm1, %v4314_v54, %v4321_v36 }
 0x2d4   : > { %v1908_v39 = vsel %vm1457_vm1, %v11213_v16, %v17491_v42  ;;  %v5298_v31 = vpack.c.bf16 %v4324_v40, %v4324_v40  ;;  %v13508_v16 = vrot.slane %v11233_v29, 4  ;;  %v4320_v33 = vsel %vm1457_vm1, %v4319_v8, %v4302_v4  ;;  %5378 = vst.msk [vmem:[#allocation3 + $0xc0] sm:$0xf] %vm5201_vm2, %v5314_v53 }
 0x2d5   : > { %v5282_v26 = vpack.c.bf16 %v4322_v58, %v4322_v58  ;;  %v1916_v44 = vperm.slane %v1908_v39, %v13231_v51  ;;  %v5266_v30 = vpack.c.bf16 %v4320_v33, %v4320_v33  ;;  %v11209_v3 = vunpack.i.h.bf16 %v11207_v12 }
 0x2d6   : > { %5362 = vst.msk [vmem:[#allocation3 + $0x80] sm:$0xf] %vm5201_vm2, %v5298_v31  ;;  %v11208_v32 = vunpack.i.l.bf16 %v11207_v12  ;;  %v11229_v17 = vunpack.i.h.bf16 %v13497_v27  ;;  %v1987_v28 = vrot.slane %v1968_v20, 4  ;;  %v1999_v15 = vrot.slane %v1972_v24, 4 }
 0x2d7   : > { %5346 = vst.msk [vmem:[#allocation3 + $0x40] sm:$0xf] %vm5201_vm2, %v5282_v26  ;;  %v1931_v54 = vrot.slane %v1912_v22, 4  ;;  %v11228_v37 = vunpack.i.l.bf16 %v13497_v27  ;;  %v1974_v4 = vsel %vm1457_vm1, %v1973_v7, %v11209_v3  ;;  %v1975_v36 = vrot.slane %v11209_v3, 4 }
 0x2d8   : > { %5330 = vst.msk [vmem:[#allocation3] sm:$0xf] %vm5201_vm2, %v5266_v30  ;;  %v1918_v34 = vsel %vm1457_vm1, %v1917_v46, %v11208_v32  ;;  %v1919_v42 = vrot.slane %v11208_v32, 4  ;;  %v1943_v39 = vrot.slane %v1916_v44, 4  ;;  %v1980_v8 = vperm.slane %v1974_v4, %v13231_v51 }
 0x2d9   : > { %v1924_v40 = vperm.slane %v1918_v34, %v13231_v51  ;;  %v3881_v53 = vrot.slane %v11229_v17, 4  ;;  %v1976_v12 = vsel %vm1457_vm1, %v11219_v5, %v1975_v36  ;;  %v17492_v7 = vrot.slane %v13073_v48, 4 }
 0x2da   : > { %v1920_v58 = vsel %vm1457_vm1, %v11218_v59, %v1919_v42  ;;  %v13535_v46 = vrot.slane %v11228_v37, 4  ;;  %v1984_v33 = vperm.slane %v1976_v12, %v13231_v51  ;;  %v1985_v26 = vrot.slane %v1980_v8, 4 }
 0x2db   : > { %v13531_v31 = vsel %vm1457_vm1, %v11229_v17, %v17492_v7  ;;  %v1988_v30 = vsel %vm1457_vm1, %v1980_v8, %v1987_v28  ;;  %v1928_v5 = vperm.slane %v1920_v58, %v13231_v51  ;;  %v1929_v3 = vrot.slane %v1924_v40, 4 }
 0x2dc   : > { %v1996_v9 = vperm.slane %v1988_v30, %v13274_v13  ;;  %v1932_v59 = vsel %vm1457_vm1, %v1924_v40, %v1931_v54  ;;  %v13544_v32 = vsel %vm1457_vm1, %v3881_v53, %v13073_v48  ;;  %v1986_v17 = vsel %vm1457_vm1, %v1985_v26, %v1968_v20 }
 0x2dd   : > { %v1997_v4 = vrot.slane %v1984_v33, 4  ;;  %v2000_v36 = vsel %vm1457_vm1, %v1984_v33, %v1999_v15  ;;  %v1940_v34 = vperm.slane %v1932_v59, %v13274_v13  ;;  %v1992_v28 = vperm.slane %v1986_v17, %v13274_v13 }
 0x2de   : > { %v2008_v42 = vperm.slane %v2000_v36, %v13274_v13  ;;  %v2011_v8 = vrot.slane %v1996_v9, 4  ;;  %v1930_v12 = vsel %vm1457_vm1, %v1929_v3, %v1912_v22  ;;  %v1941_v48 = vrot.slane %v1928_v5, 4 }
 0x2df   : > { %v1998_v54 = vsel %vm1457_vm1, %v1997_v4, %v1972_v24  ;;  %v1936_v40 = vperm.slane %v1930_v12, %v13274_v13  ;;  %v1944_v53 = vsel %vm1457_vm1, %v1928_v5, %v1943_v39  ;;  %v2009_v58 = vrot.slane %v1992_v28, 4 }
 0x2e0   : > { %v2004_v20 = vperm.slane %v1998_v54, %v13274_v13  ;;  %v2012_v15 = vsel %vm1457_vm1, 0.0, %v2011_v8  ;;  %v2015_v7 = vrot.slane %v2008_v42, 4  ;;  %v2839_v33 = vsel %vm1457_vm1, %v2011_v8, %v1992_v28 }
 0x2e1   : > { %v2844_v26 = vrot.slane %v2012_v15, 4  ;;  %v1942_v30 = vsel %vm1457_vm1, %v1941_v48, %v1916_v44  ;;  %v1952_v22 = vperm.slane %v1944_v53, %v13274_v13  ;;  %v2010_v24 = vsel %vm1457_vm1, 0.0, %v2009_v58 }
 0x2e2   : > { %v2013_v9 = vrot.slane %v2004_v20, 4  ;;  %v2016_v3 = vsel %vm1457_vm1, 0.0, %v2015_v7  ;;  %v2843_v39 = vperm.slane %v2839_v33, %v13231_v51  ;;  %v2850_v59 = vsel %vm1457_vm1, %v2015_v7, %v2004_v20 }
 0x2e3   : > { %v2845_v5 = vsel %vm1457_vm1, %v2844_v26, %v2010_v24  ;;  %v2855_v17 = vrot.slane %v2016_v3, 4  ;;  %v1948_v4 = vperm.slane %v1942_v30, %v13274_v13  ;;  %v2854_v28 = vperm.slane %v2850_v59, %v13231_v51 }
 0x2e4   : > { %v2014_v36 = vsel %vm1457_vm1, 0.0, %v2013_v9  ;;  %v2849_v44 = vperm.slane %v2845_v5, %v13231_v51  ;;  %v2863_v42 = vrot.slane %v2843_v39, 4  ;;  %v1953_v12 = vrot.slane %v1936_v40, 4 }
 0x2e5   : > { %v2856_v8 = vsel %vm1457_vm1, %v2855_v17, %v2014_v36  ;;  %v1955_v54 = vrot.slane %v1940_v34, 4  ;;  %v1957_v48 = vrot.slane %v1948_v4, 4  ;;  %v2875_v15 = vrot.slane %v2854_v28, 4 }
 0x2e6   : > { %v2860_v53 = vperm.slane %v2856_v8, %v13231_v51  ;;  %v2861_v58 = vrot.slane %v2849_v44, 4  ;;  %v2864_v20 = vsel %vm1457_vm1, %v2849_v44, %v2863_v42  ;;  %v1954_v33 = vsel %vm1457_vm1, 0.0, %v1953_v12 }
 0x2e7   : > { %v2872_v7 = vperm.slane %v2864_v20, %v13274_v13  ;;  %v1956_v26 = vsel %vm1457_vm1, 0.0, %v1955_v54  ;;  %v1958_v30 = vsel %vm1457_vm1, 0.0, %v1957_v48  ;;  %v1959_v3 = vrot.slane %v1952_v22, 4 }
 0x2e8   : > { %v2862_v24 = vsel %vm1457_vm1, %v2861_v58, %v2843_v39  ;;  %v2873_v9 = vrot.slane %v2860_v53, 4  ;;  %v2876_v34 = vsel %vm1457_vm1, %v2860_v53, %v2875_v15  ;;  %v2785_v36 = vsel %vm1457_vm1, %v1955_v54, %v1936_v40 }
 0x2e9   : > { %v2868_v5 = vperm.slane %v2862_v24, %v13274_v13  ;;  %v2884_v59 = vperm.slane %v2876_v34, %v13274_v13  ;;  %v2891_v17 = vrot.slane %v2872_v7, 4  ;;  %v1960_v42 = vsel %vm1457_vm1, 0.0, %v1959_v3 }
 0x2ea   : > { %v2874_v44 = vsel %vm1457_vm1, %v2873_v9, %v2854_v28  ;;  %v2789_v8 = vperm.slane %v2785_v36, %v13231_v51  ;;  %v2790_v12 = vrot.slane %v1956_v26, 4  ;;  %v2796_v15 = vsel %vm1457_vm1, %v1959_v3, %v1948_v4 }
 0x2eb   : > { %v2880_v39 = vperm.slane %v2874_v44, %v13274_v13  ;;  %v2887_v48 = vrot.slane %v2868_v5, 4  ;;  %v2889_v58 = vrot.slane %v2884_v59, 4  ;;  %v2892_v22 = vsel %vm1457_vm1, %v2884_v59, %v2891_v17  ;;  %v13594_v17 = vpop.permute.xlu2 %11246 }
 0x2ec   : > { %v5194_v53 = vpack.c.bf16 %v2892_v22, %v2892_v22  ;;  %v2791_v20 = vsel %vm1457_vm1, %v2790_v12, %v1954_v33  ;;  %v2801_v24 = vrot.slane %v1960_v42, 4  ;;  %v2800_v36 = vperm.slane %v2796_v15, %v13231_v51 }
 0x2ed   : > { %v2885_v40 = vrot.slane %v2880_v39, 4  ;;  %v2888_v28 = vsel %vm1457_vm1, %v2880_v39, %v2887_v48  ;;  %v2890_v54 = vsel %vm1457_vm1, %v2889_v58, %v2872_v7  ;;  %v2795_v9 = vperm.slane %v2791_v20, %v13231_v51 }
 0x2ee   : > { %v5162_v26 = vpack.c.bf16 %v2888_v28, %v2888_v28  ;;  %v5178_v34 = vpack.c.bf16 %v2890_v54, %v2890_v54  ;;  %5259 = vst.msk [vmem:[#allocation2 + $0xe4] sm:$0xf] %vm5201_vm2, %v5194_v53  ;;  %v2802_v59 = vsel %vm1457_vm1, %v2801_v24, %v1958_v30  ;;  %v2809_v44 = vrot.slane %v2789_v8, 4 }
 0x2ef   : > { %v2886_v4 = vsel %vm1457_vm1, %v2885_v40, %v2868_v5  ;;  %v2806_v33 = vperm.slane %v2802_v59, %v13231_v51  ;;  %v2807_v3 = vrot.slane %v2795_v9, 4  ;;  %v2821_v7 = vrot.slane %v2800_v36, 4 }
 0x2f0   : > { %v5146_v42 = vpack.c.bf16 %v2886_v4, %v2886_v4  ;;  %5227 = vst.msk [vmem:[#allocation2 + $0x64] sm:$0xf] %vm5201_vm2, %v5162_v26  ;;  %v13601_v12 = vperm.slane %v13544_v32, %v13231_v51  ;;  %v13605_v39 = vperm.slane %v13531_v31, %v13231_v51  ;;  %v2810_v5 = vsel %vm1457_vm1, %v2795_v9, %v2809_v44  ;;  %v11222_v26 = vpop.permute.xlu0 %11221  ;;  %v13631_v4 = vpop.permute.xlu1 %11241 }
 0x2f1   : > { %5243 = vst.msk [vmem:[#allocation2 + $0xa4] sm:$0xf] %vm5201_vm2, %v5178_v34  ;;  %v2808_v30 = vsel %vm1457_vm1, %v2807_v3, %v2789_v8  ;;  %v2819_v48 = vrot.slane %v2806_v33, 4  ;;  %v3826_v58 = vsel %vm1457_vm1, %v13535_v46, %v13078_v49  ;;  %v11249_v22 = vunpack.i.h.bf16 %v13594_v17 }
 0x2f2   : > { %5211 = vst.msk [vmem:[#allocation2 + $0x24] sm:$0xf] %vm5201_vm2, %v5146_v42  ;;  %v2814_v32 = vperm.slane %v2808_v30, %v13274_v13  ;;  %v2818_v31 = vperm.slane %v2810_v5, %v13274_v13  ;;  %v2822_v53 = vsel %vm1457_vm1, %v2806_v33, %v2821_v7  ;;  %v17493_v15 = vrot.slane %v13078_v49, 4 }
 0x2f3   : > { %v2820_v20 = vsel %vm1457_vm1, %v2819_v48, %v2800_v36  ;;  %v2830_v8 = vperm.slane %v2822_v53, %v13274_v13  ;;  %v3832_v24 = vperm.slane %v3826_v58, %v13231_v51  ;;  %v11248_v40 = vunpack.i.l.bf16 %v13594_v17 }
 0x2f4   : > { %v3828_v46 = vsel %vm1457_vm1, %v11228_v37, %v17493_v15  ;;  %v2826_v28 = vperm.slane %v2820_v20, %v13274_v13  ;;  %v2833_v54 = vrot.slane %v2814_v32, 4  ;;  %v2837_v9 = vrot.slane %v2818_v31, 4 }
 0x2f5   : > { %v2835_v34 = vrot.slane %v2830_v8, 4  ;;  %v3907_v36 = vrot.slane %v13601_v12, 4  ;;  %v3919_v59 = vrot.slane %v13605_v39, 4  ;;  %v3836_v49 = vperm.slane %v3828_v46, %v13231_v51 }
 0x2f6   : > { %v2831_v27 = vrot.slane %v2826_v28, 4  ;;  %v2834_v37 = vsel %vm1457_vm1, %v2826_v28, %v2833_v54  ;;  %v2838_v33 = vsel %vm1457_vm1, %v2830_v8, %v2837_v9  ;;  %v3851_v3 = vrot.slane %v3832_v24, 4 }
 0x2f7   : > { %v2836_v44 = vsel %vm1457_vm1, %v2835_v34, %v2818_v31  ;;  %v5161_v42 = vpack.c.bf16 %v2834_v37, %v2834_v37  ;;  %v5193_v7 = vpack.c.bf16 %v2838_v33, %v2838_v33  ;;  %v11224_v30 = vunpack.i.h.bf16 %v11222_v26 }
 0x2f8   : > { %v2832_v5 = vsel %vm1457_vm1, %v2831_v27, %v2814_v32  ;;  %v5177_v48 = vpack.c.bf16 %v2836_v44, %v2836_v44  ;;  %v11223_v58 = vunpack.i.l.bf16 %v11222_v26  ;;  %v11244_v53 = vunpack.i.h.bf16 %v13631_v4 }
 0x2f9   : > { %v5145_v20 = vpack.c.bf16 %v2832_v5, %v2832_v5  ;;  %5226 = vst.msk [vmem:[#allocation2 + $0x60] sm:$0xf] %vm5201_vm2, %v5161_v42  ;;  %v3894_v15 = vsel %vm1457_vm1, %v13503_v21, %v11224_v30  ;;  %v3895_v46 = vrot.slane %v11224_v30, 4  ;;  %v11243_v8 = vunpack.i.l.bf16 %v13631_v4 }
 0x2fa   : > { %5242 = vst.msk [vmem:[#allocation2 + $0xa0] sm:$0xf] %vm5201_vm2, %v5177_v48  ;;  %v3863_v31 = vrot.slane %v3836_v49, 4  ;;  %v3900_v28 = vperm.slane %v3894_v15, %v13231_v51  ;;  %v3838_v32 = vsel %vm1457_vm1, %v13508_v16, %v11223_v58  ;;  %v3839_v54 = vrot.slane %v11223_v58, 4 }
 0x2fb   : > { %5210 = vst.msk [vmem:[#allocation2 + $0x20] sm:$0xf] %vm5201_vm2, %v5145_v20  ;;  %v3896_v9 = vsel %vm1457_vm1, %v11234_v18, %v3895_v46  ;;  %v3844_v21 = vperm.slane %v3838_v32, %v13231_v51  ;;  %v13653_v26 = vrot.slane %v11244_v53, 4  ;;  %v13657_v34 = vrot.slane %v11243_v8, 4 }
 0x2fc   : > { %5258 = vst.msk [vmem:[#allocation2 + $0xe0] sm:$0xf] %vm5201_vm2, %v5193_v7  ;;  %v3904_v16 = vperm.slane %v3896_v9, %v13231_v51  ;;  %v3905_v27 = vrot.slane %v3900_v28, 4  ;;  %v3908_v37 = vsel %vm1457_vm1, %v3900_v28, %v3907_v36  ;;  %v3840_v18 = vsel %vm1457_vm1, %v11233_v29, %v3839_v54 }
 0x2fd   : > { %v3916_v33 = vperm.slane %v3908_v37, %v13274_v13  ;;  %v3848_v44 = vperm.slane %v3840_v18, %v13231_v51  ;;  %v3849_v42 = vrot.slane %v3844_v21, 4  ;;  %v3852_v30 = vsel %vm1457_vm1, %v3844_v21, %v3851_v3 }
 0x2fe   : > { %v3906_v5 = vsel %vm1457_vm1, %v3905_v27, %v13601_v12  ;;  %v3917_v7 = vrot.slane %v3904_v16, 4  ;;  %v3920_v48 = vsel %vm1457_vm1, %v3904_v16, %v3919_v59  ;;  %v3860_v58 = vperm.slane %v3852_v30, %v13274_v13 }
 0x2ff   : > { %v3912_v36 = vperm.slane %v3906_v5, %v13274_v13  ;;  %v3928_v43 = vperm.slane %v3920_v48, %v13274_v13  ;;  %v3931_v29 = vrot.slane %v3916_v33, 4  ;;  %v3850_v20 = vsel %vm1457_vm1, %v3849_v42, %v3832_v24 }
 0x300   : > { %v3918_v15 = vsel %vm1457_vm1, %v3917_v7, %v13605_v39  ;;  %v3856_v3 = vperm.slane %v3850_v20, %v13274_v13  ;;  %v3861_v46 = vrot.slane %v3848_v44, 4  ;;  %v3864_v12 = vsel %vm1457_vm1, %v3848_v44, %v3863_v31 }
 0x301   : > { %v3924_v28 = vperm.slane %v3918_v15, %v13274_v13  ;;  %v3929_v59 = vrot.slane %v3912_v36, 4  ;;  %v3932_v32 = vsel %vm1457_vm1, 0.0, %v3931_v29  ;;  %v3935_v54 = vrot.slane %v3928_v43, 4 }
 0x302   : > { %v4759_v9 = vsel %vm1457_vm1, %v3931_v29, %v3912_v36  ;;  %v4764_v21 = vrot.slane %v3932_v32, 4  ;;  %v3862_v16 = vsel %vm1457_vm1, %v3861_v46, %v3836_v49  ;;  %v3872_v24 = vperm.slane %v3864_v12, %v13274_v13 }
 0x303   : > { %v3930_v39 = vsel %vm1457_vm1, 0.0, %v3929_v59  ;;  %v3933_v27 = vrot.slane %v3924_v28, 4  ;;  %v3936_v37 = vsel %vm1457_vm1, 0.0, %v3935_v54  ;;  %v4763_v31 = vperm.slane %v4759_v9, %v13231_v51 }
 0x304   : > { %v4765_v18 = vsel %vm1457_vm1, %v4764_v21, %v3930_v39  ;;  %v4770_v33 = vsel %vm1457_vm1, %v3935_v54, %v3924_v28  ;;  %v4775_v44 = vrot.slane %v3936_v37, 4  ;;  %v3868_v42 = vperm.slane %v3862_v16, %v13274_v13 }
 0x305   : > { %v3934_v30 = vsel %vm1457_vm1, 0.0, %v3933_v27  ;;  %v4769_v49 = vperm.slane %v4765_v18, %v13231_v51  ;;  %v4774_v5 = vperm.slane %v4770_v33, %v13231_v51  ;;  %v4783_v7 = vrot.slane %v4763_v31, 4 }
 0x306   : > { %v4776_v48 = vsel %vm1457_vm1, %v4775_v44, %v3934_v30  ;;  %v3873_v36 = vrot.slane %v3856_v3, 4  ;;  %v3875_v43 = vrot.slane %v3860_v58, 4  ;;  %v3877_v29 = vrot.slane %v3868_v42, 4 }
 0x307   : > { %v4780_v20 = vperm.slane %v4776_v48, %v13231_v51  ;;  %v4781_v15 = vrot.slane %v4769_v49, 4  ;;  %v4784_v46 = vsel %vm1457_vm1, %v4769_v49, %v4783_v7  ;;  %v4795_v12 = vrot.slane %v4774_v5, 4 }
 0x308   : > { %v4792_v28 = vperm.slane %v4784_v46, %v13274_v13  ;;  %v3874_v59 = vsel %vm1457_vm1, 0.0, %v3873_v36  ;;  %v3876_v32 = vsel %vm1457_vm1, 0.0, %v3875_v43  ;;  %v3878_v54 = vsel %vm1457_vm1, 0.0, %v3877_v29 }
 0x309   : > { %v4782_v9 = vsel %vm1457_vm1, %v4781_v15, %v4763_v31  ;;  %v4793_v21 = vrot.slane %v4780_v20, 4  ;;  %v4796_v58 = vsel %vm1457_vm1, %v4780_v20, %v4795_v12  ;;  %v3879_v16 = vrot.slane %v3872_v24, 4 }
 0x30a   : > { %v4788_v39 = vperm.slane %v4782_v9, %v13274_v13  ;;  %v4804_v27 = vperm.slane %v4796_v58, %v13274_v13  ;;  %v4811_v37 = vrot.slane %v4792_v28, 4  ;;  %v4705_v18 = vsel %vm1457_vm1, %v3875_v43, %v3856_v3 }
 0x30b   : > { %v4794_v33 = vsel %vm1457_vm1, %v4793_v21, %v4774_v5  ;;  %v3880_v44 = vsel %vm1457_vm1, 0.0, %v3879_v16  ;;  %v4709_v30 = vperm.slane %v4705_v18, %v13231_v51  ;;  %v4710_v49 = vrot.slane %v3876_v32, 4 }
 0x30c   : > { %v4800_v31 = vperm.slane %v4794_v33, %v13274_v13  ;;  %v4807_v7 = vrot.slane %v4788_v39, 4  ;;  %v4809_v48 = vrot.slane %v4804_v27, 4  ;;  %v4812_v24 = vsel %vm1457_vm1, %v4804_v27, %v4811_v37 }
 0x30d   : > { %v5323_v36 = vpack.c.bf16 %v4812_v24, %v4812_v24  ;;  %v4711_v29 = vsel %vm1457_vm1, %v4710_v49, %v3874_v59  ;;  %v4716_v20 = vsel %vm1457_vm1, %v3879_v16, %v3868_v42  ;;  %v4721_v15 = vrot.slane %v3880_v44, 4  ;;  %v13728_v49 = vpop.permute.xlu2 %11261 }
 0x30e   : > { %v4805_v3 = vrot.slane %v4800_v31, 4  ;;  %v4808_v5 = vsel %vm1457_vm1, %v4800_v31, %v4807_v7  ;;  %v4810_v43 = vsel %vm1457_vm1, %v4809_v48, %v4792_v28  ;;  %v4715_v46 = vperm.slane %v4711_v29, %v13231_v51 }
 0x30f   : > { %v5291_v12 = vpack.c.bf16 %v4808_v5, %v4808_v5  ;;  %v5307_v32 = vpack.c.bf16 %v4810_v43, %v4810_v43  ;;  %5387 = vst.msk [vmem:[#allocation3 + $0xe4] sm:$0xf] %vm5201_vm2, %v5323_v36  ;;  %v4720_v9 = vperm.slane %v4716_v20, %v13231_v51  ;;  %v4722_v21 = vsel %vm1457_vm1, %v4721_v15, %v3878_v54 }
 0x310   : > { %v4806_v59 = vsel %vm1457_vm1, %v4805_v3, %v4788_v39  ;;  %v4726_v42 = vperm.slane %v4722_v21, %v13231_v51  ;;  %v4727_v58 = vrot.slane %v4715_v46, 4  ;;  %v4729_v16 = vrot.slane %v4709_v30, 4 }
 0x311   : > { %v5275_v27 = vpack.c.bf16 %v4806_v59, %v4806_v59  ;;  %5355 = vst.msk [vmem:[#allocation3 + $0x64] sm:$0xf] %vm5201_vm2, %v5291_v12  ;;  %v4741_v28 = vrot.slane %v4720_v9, 4  ;;  %v3491_v37 = vrot.slane %v13100_v41, 4  ;;  %v3547_v18 = vrot.slane %v13095_v62, 4 }
 0x312   : > { %v1637_v33 = vrot.slane %v11249_v22, 4  ;;  %5371 = vst.msk [vmem:[#allocation3 + $0xa4] sm:$0xf] %vm5201_vm2, %v5307_v32  ;;  %v4728_v54 = vsel %vm1457_vm1, %v4727_v58, %v4709_v30  ;;  %v4730_v39 = vsel %vm1457_vm1, %v4715_v46, %v4729_v16  ;;  %v4739_v44 = vrot.slane %v4726_v42, 4  ;;  %v11237_v58 = vpop.permute.xlu0 %11236 }
 0x313   : > { %5339 = vst.msk [vmem:[#allocation3 + $0x24] sm:$0xf] %vm5201_vm2, %v5275_v27  ;;  %v4734_v31 = vperm.slane %v4728_v54, %v13274_v13  ;;  %v4738_v7 = vperm.slane %v4730_v39, %v13274_v13  ;;  %v4742_v48 = vsel %vm1457_vm1, %v4726_v42, %v4741_v28  ;;  %v1626_v24 = vsel %vm1457_vm1, %v13653_v26, %v13084_v57 }
 0x314   : > { %v1581_v30 = vrot.slane %v11248_v40, 4  ;;  %v4740_v36 = vsel %vm1457_vm1, %v4739_v44, %v4720_v9  ;;  %v4750_v29 = vperm.slane %v4742_v48, %v13274_v13  ;;  %v1570_v20 = vsel %vm1457_vm1, %v13657_v34, %v13089_v61 }
 0x315   : > { %v4746_v15 = vperm.slane %v4740_v36, %v13274_v13  ;;  %v4753_v3 = vrot.slane %v4734_v31, 4  ;;  %v4757_v5 = vrot.slane %v4738_v7, 4  ;;  %v17494_v43 = vrot.slane %v13084_v57, 4 }
 0x316   : > { %v11264_v46 = vunpack.i.h.bf16 %v13728_v49  ;;  %v4755_v12 = vrot.slane %v4750_v29, 4  ;;  %v1632_v32 = vperm.slane %v1626_v24, %v13231_v51  ;;  %v17495_v9 = vrot.slane %v13089_v61, 4  ;;  %v13763_v61 = vpop.permute.xlu1 %11256 }
 0x317   : > { %v1628_v26 = vsel %vm1457_vm1, %v11244_v53, %v17494_v43  ;;  %v4751_v21 = vrot.slane %v4746_v15, 4  ;;  %v4754_v59 = vsel %vm1457_vm1, %v4746_v15, %v4753_v3  ;;  %v4758_v57 = vsel %vm1457_vm1, %v4750_v29, %v4757_v5 }
 0x318   : > { %v1572_v34 = vsel %vm1457_vm1, %v11243_v8, %v17495_v9  ;;  %v1576_v42 = vperm.slane %v1570_v20, %v13231_v51  ;;  %v11263_v53 = vunpack.i.l.bf16 %v13728_v49  ;;  %v4756_v16 = vsel %vm1457_vm1, %v4755_v12, %v4738_v7 }
 0x319   : > { %v5290_v27 = vpack.c.bf16 %v4754_v59, %v4754_v59  ;;  %v1636_v28 = vperm.slane %v1628_v26, %v13231_v51  ;;  %v4752_v4 = vsel %vm1457_vm1, %v4751_v21, %v4734_v31  ;;  %v5306_v8 = vpack.c.bf16 %v4756_v16, %v4756_v16 }
 0x31a   : > { %v5322_v54 = vpack.c.bf16 %v4758_v57, %v4758_v57  ;;  %v1580_v39 = vperm.slane %v1572_v34, %v13231_v51  ;;  %v13769_v44 = vrot.slane %v11264_v46, 4  ;;  %v5274_v48 = vpack.c.bf16 %v4752_v4, %v4752_v4 }
 0x31b   : > { %5354 = vst.msk [vmem:[#allocation3 + $0x60] sm:$0xf] %vm5201_vm2, %v5290_v27  ;;  %v11239_v24 = vunpack.i.h.bf16 %v11237_v58  ;;  %v11238_v7 = vunpack.i.l.bf16 %v11237_v58  ;;  %v1651_v36 = vrot.slane %v1632_v32, 4  ;;  %v1595_v29 = vrot.slane %v1576_v42, 4 }
 0x31c   : > { %5370 = vst.msk [vmem:[#allocation3 + $0xa0] sm:$0xf] %vm5201_vm2, %v5306_v8  ;;  %v11259_v20 = vunpack.i.h.bf16 %v13763_v61  ;;  %v11258_v31 = vunpack.i.l.bf16 %v13763_v61  ;;  %v1663_v26 = vrot.slane %v1636_v28, 4  ;;  %v1607_v12 = vrot.slane %v1580_v39, 4 }
 0x31d   : > { %5338 = vst.msk [vmem:[#allocation3 + $0x20] sm:$0xf] %vm5201_vm2, %v5274_v48  ;;  %v1638_v15 = vsel %vm1457_vm1, %v1637_v33, %v11239_v24  ;;  %v1639_v3 = vrot.slane %v11239_v24, 4  ;;  %v1582_v5 = vsel %vm1457_vm1, %v1581_v30, %v11238_v7  ;;  %v1583_v43 = vrot.slane %v11238_v7, 4 }
 0x31e   : > { %5386 = vst.msk [vmem:[#allocation3 + $0xe0] sm:$0xf] %vm5201_vm2, %v5322_v54  ;;  %v1644_v9 = vperm.slane %v1638_v15, %v13231_v51  ;;  %v1588_v34 = vperm.slane %v1582_v5, %v13231_v51  ;;  %v13787_v59 = vrot.slane %v11259_v20, 4  ;;  %v13790_v30 = vsel %vm1457_vm1, %v11259_v20, %v3547_v18 }
 0x31f   : > { %v1640_v21 = vsel %vm1457_vm1, %v11249_v22, %v1639_v3  ;;  %v1584_v33 = vsel %vm1457_vm1, %v11248_v40, %v1583_v43  ;;  %v13799_v17 = vrot.slane %v11258_v31, 4 }
 0x320   : > { %v1648_v57 = vperm.slane %v1640_v21, %v13231_v51  ;;  %v1649_v58 = vrot.slane %v1644_v9, 4  ;;  %v1652_v16 = vsel %vm1457_vm1, %v1644_v9, %v1651_v36  ;;  %v1592_v27 = vperm.slane %v1584_v33, %v13231_v51 }
 0x321   : > { %v1660_v4 = vperm.slane %v1652_v16, %v13274_v13  ;;  %v1593_v8 = vrot.slane %v1588_v34, 4  ;;  %v1596_v22 = vsel %vm1457_vm1, %v1588_v34, %v1595_v29 }
 0x322   : > { %v1650_v40 = vsel %vm1457_vm1, %v1649_v58, %v1632_v32  ;;  %v1661_v18 = vrot.slane %v1648_v57, 4  ;;  %v1664_v54 = vsel %vm1457_vm1, %v1648_v57, %v1663_v26  ;;  %v1604_v48 = vperm.slane %v1596_v22, %v13274_v13 }
 0x323   : > { %v1656_v24 = vperm.slane %v1650_v40, %v13274_v13  ;;  %v1672_v7 = vperm.slane %v1664_v54, %v13274_v13  ;;  %v1675_v36 = vrot.slane %v1660_v4, 4  ;;  %v1594_v20 = vsel %vm1457_vm1, %v1593_v8, %v1576_v42 }
 0x324   : > { %v1662_v29 = vsel %vm1457_vm1, %v1661_v18, %v1636_v28  ;;  %v1600_v15 = vperm.slane %v1594_v20, %v13274_v13  ;;  %v1605_v3 = vrot.slane %v1592_v27, 4  ;;  %v1608_v5 = vsel %vm1457_vm1, %v1592_v27, %v1607_v12 }
 0x325   : > { %v1668_v32 = vperm.slane %v1662_v29, %v13274_v13  ;;  %v1673_v43 = vrot.slane %v1656_v24, 4  ;;  %v1676_v26 = vsel %vm1457_vm1, 0.0, %v1675_v36  ;;  %v1679_v9 = vrot.slane %v1672_v7, 4 }
 0x326   : > { %v2515_v34 = vsel %vm1457_vm1, %v1675_v36, %v1656_v24  ;;  %v2520_v21 = vrot.slane %v1676_v26, 4  ;;  %v1606_v33 = vsel %vm1457_vm1, %v1605_v3, %v1580_v39  ;;  %v1616_v42 = vperm.slane %v1608_v5, %v13274_v13 }
 0x327   : > { %v1674_v28 = vsel %vm1457_vm1, 0.0, %v1673_v43  ;;  %v1677_v57 = vrot.slane %v1668_v32, 4  ;;  %v1680_v58 = vsel %vm1457_vm1, 0.0, %v1679_v9  ;;  %v2519_v12 = vperm.slane %v2515_v34, %v13231_v51 }
 0x328   : > { %v2521_v16 = vsel %vm1457_vm1, %v2520_v21, %v1674_v28  ;;  %v2526_v27 = vsel %vm1457_vm1, %v1679_v9, %v1668_v32  ;;  %v2531_v4 = vrot.slane %v1680_v58, 4  ;;  %v1612_v8 = vperm.slane %v1606_v33, %v13274_v13 }
 0x329   : > { %v1678_v22 = vsel %vm1457_vm1, 0.0, %v1677_v57  ;;  %v2525_v39 = vperm.slane %v2521_v16, %v13231_v51  ;;  %v2530_v40 = vperm.slane %v2526_v27, %v13231_v51  ;;  %v2539_v18 = vrot.slane %v2519_v12, 4 }
 0x32a   : > { %v2532_v54 = vsel %vm1457_vm1, %v2531_v4, %v1678_v22  ;;  %v1617_v24 = vrot.slane %v1600_v15, 4  ;;  %v1619_v7 = vrot.slane %v1604_v48, 4  ;;  %v1621_v36 = vrot.slane %v1612_v8, 4 }
 0x32b   : > { %v2536_v20 = vperm.slane %v2532_v54, %v13231_v51  ;;  %v2537_v29 = vrot.slane %v2525_v39, 4  ;;  %v2540_v3 = vsel %vm1457_vm1, %v2525_v39, %v2539_v18  ;;  %v2551_v5 = vrot.slane %v2530_v40, 4 }
 0x32c   : > { %v2548_v32 = vperm.slane %v2540_v3, %v13274_v13  ;;  %v1618_v43 = vsel %vm1457_vm1, 0.0, %v1617_v24  ;;  %v1620_v26 = vsel %vm1457_vm1, 0.0, %v1619_v7  ;;  %v1622_v9 = vsel %vm1457_vm1, 0.0, %v1621_v36 }
 0x32d   : > { %v2538_v34 = vsel %vm1457_vm1, %v2537_v29, %v2519_v12  ;;  %v2549_v21 = vrot.slane %v2536_v20, 4  ;;  %v2552_v48 = vsel %vm1457_vm1, %v2536_v20, %v2551_v5  ;;  %v1623_v33 = vrot.slane %v1616_v42, 4 }
 0x32e   : > { %v2544_v28 = vperm.slane %v2538_v34, %v13274_v13  ;;  %v2560_v57 = vperm.slane %v2552_v48, %v13274_v13  ;;  %v2567_v58 = vrot.slane %v2548_v32, 4  ;;  %v2461_v16 = vsel %vm1457_vm1, %v1619_v7, %v1600_v15 }
 0x32f   : > { %v2550_v27 = vsel %vm1457_vm1, %v2549_v21, %v2530_v40  ;;  %v1624_v4 = vsel %vm1457_vm1, 0.0, %v1623_v33  ;;  %v2465_v22 = vperm.slane %v2461_v16, %v13231_v51  ;;  %v2466_v39 = vrot.slane %v1620_v26, 4 }
 0x330   : > { %v2556_v12 = vperm.slane %v2550_v27, %v13274_v13  ;;  %v2563_v18 = vrot.slane %v2544_v28, 4  ;;  %v2565_v54 = vrot.slane %v2560_v57, 4  ;;  %v2568_v42 = vsel %vm1457_vm1, %v2560_v57, %v2567_v58  ;;  %v13857_v27 = vpop.permute.xlu2 %11266 }
 0x331   : > { %v5188_v24 = vpack.c.bf16 %v2568_v42, %v2568_v42  ;;  %v2467_v36 = vsel %vm1457_vm1, %v2466_v39, %v1618_v43  ;;  %v2472_v20 = vsel %vm1457_vm1, %v1623_v33, %v1612_v8  ;;  %v2477_v29 = vrot.slane %v1624_v4, 4 }
 0x332   : > { %v2561_v15 = vrot.slane %v2556_v12, 4  ;;  %v2564_v40 = vsel %vm1457_vm1, %v2556_v12, %v2563_v18  ;;  %v2566_v7 = vsel %vm1457_vm1, %v2565_v54, %v2548_v32  ;;  %v2471_v3 = vperm.slane %v2467_v36, %v13231_v51 }
 0x333   : > { %v5156_v5 = vpack.c.bf16 %v2564_v40, %v2564_v40  ;;  %v5172_v26 = vpack.c.bf16 %v2566_v7, %v2566_v7  ;;  %5253 = vst.msk [vmem:[#allocation2 + $0xcc] sm:$0xf] %vm5201_vm2, %v5188_v24  ;;  %v2476_v34 = vperm.slane %v2472_v20, %v13231_v51  ;;  %v2478_v21 = vsel %vm1457_vm1, %v2477_v29, %v1622_v9 }
 0x334   : > { %v2562_v43 = vsel %vm1457_vm1, %v2561_v15, %v2544_v28  ;;  %v2482_v8 = vperm.slane %v2478_v21, %v13231_v51  ;;  %v2483_v48 = vrot.slane %v2471_v3, 4  ;;  %v2485_v33 = vrot.slane %v2465_v22, 4  ;;  %v11252_v15 = vpop.permute.xlu0 %11251 }
 0x335   : > { %v3501_v57 = vrot.slane %v11263_v53, 4  ;;  %v5140_v32 = vpack.c.bf16 %v2562_v43, %v2562_v43  ;;  %5221 = vst.msk [vmem:[#allocation2 + $0x4c] sm:$0xf] %vm5201_vm2, %v5156_v5  ;;  %v2497_v58 = vrot.slane %v2476_v34, 4  ;;  %v3546_v16 = vsel %vm1457_vm1, %v13787_v59, %v13095_v62 }
 0x336   : > { %5237 = vst.msk [vmem:[#allocation2 + $0x8c] sm:$0xf] %vm5201_vm2, %v5172_v26  ;;  %v2484_v9 = vsel %vm1457_vm1, %v2483_v48, %v2465_v22  ;;  %v2486_v28 = vsel %vm1457_vm1, %v2471_v3, %v2485_v33  ;;  %v2495_v4 = vrot.slane %v2482_v8, 4  ;;  %v13864_v39 = vperm.slane %v13790_v30, %v13231_v51 }
 0x337   : > { %5205 = vst.msk [vmem:[#allocation2 + $0xc] sm:$0xf] %vm5201_vm2, %v5140_v32  ;;  %v2490_v12 = vperm.slane %v2484_v9, %v13274_v13  ;;  %v2494_v18 = vperm.slane %v2486_v28, %v13274_v13  ;;  %v2498_v62 = vsel %vm1457_vm1, %v2482_v8, %v2497_v58  ;;  %v3490_v59 = vsel %vm1457_vm1, %v13799_v17, %v13100_v41  ;;  %v13891_v32 = vpop.permute.xlu1 %11276 }
 0x338   : > { %v2496_v22 = vsel %vm1457_vm1, %v2495_v4, %v2476_v34  ;;  %v2506_v54 = vperm.slane %v2498_v62, %v13274_v13  ;;  %v3552_v42 = vperm.slane %v3546_v16, %v13231_v51  ;;  %v3492_v30 = vsel %vm1457_vm1, %v11258_v31, %v3491_v37 }
 0x339   : > { %v11269_v24 = vunpack.i.h.bf16 %v13857_v27  ;;  %v2502_v36 = vperm.slane %v2496_v22, %v13274_v13  ;;  %v2509_v20 = vrot.slane %v2490_v12, 4  ;;  %v2513_v29 = vrot.slane %v2494_v18, 4 }
 0x33a   : > { %v11268_v17 = vunpack.i.l.bf16 %v13857_v27  ;;  %v2511_v40 = vrot.slane %v2506_v54, 4  ;;  %v3583_v7 = vrot.slane %v13864_v39, 4  ;;  %v3496_v3 = vperm.slane %v3490_v59, %v13231_v51 }
 0x33b   : > { %v2507_v5 = vrot.slane %v2502_v36, 4  ;;  %v2510_v41 = vsel %vm1457_vm1, %v2502_v36, %v2509_v20  ;;  %v2514_v61 = vsel %vm1457_vm1, %v2506_v54, %v2513_v29  ;;  %v3500_v37 = vperm.slane %v3492_v30, %v13231_v51 }
 0x33c   : > { %v2512_v31 = vsel %vm1457_vm1, %v2511_v40, %v2494_v18  ;;  %v5155_v26 = vpack.c.bf16 %v2510_v41, %v2510_v41  ;;  %v3571_v34 = vrot.slane %v3552_v42, 4  ;;  %v11254_v21 = vunpack.i.h.bf16 %v11252_v15 }
 0x33d   : > { %v2508_v43 = vsel %vm1457_vm1, %v2507_v5, %v2490_v12  ;;  %v5171_v8 = vpack.c.bf16 %v2512_v31, %v2512_v31  ;;  %v5187_v48 = vpack.c.bf16 %v2514_v61, %v2514_v61  ;;  %v11253_v33 = vunpack.i.l.bf16 %v11252_v15 }
 0x33e   : > { %v5139_v58 = vpack.c.bf16 %v2508_v43, %v2508_v43  ;;  %5220 = vst.msk [vmem:[#allocation2 + $0x48] sm:$0xf] %vm5201_vm2, %v5155_v26  ;;  %v3515_v16 = vrot.slane %v3496_v3, 4  ;;  %v3558_v9 = vsel %vm1457_vm1, %v13769_v44, %v11254_v21  ;;  %v3559_v28 = vrot.slane %v11254_v21, 4 }
 0x33f   : > { %5236 = vst.msk [vmem:[#allocation2 + $0x88] sm:$0xf] %vm5201_vm2, %v5171_v8  ;;  %v3527_v4 = vrot.slane %v3500_v37, 4  ;;  %v3564_v18 = vperm.slane %v3558_v9, %v13231_v51  ;;  %v3502_v12 = vsel %vm1457_vm1, %v3501_v57, %v11253_v33  ;;  %v3503_v62 = vrot.slane %v11253_v33, 4 }
 0x340   : > { %5204 = vst.msk [vmem:[#allocation2 + $0x8] sm:$0xf] %vm5201_vm2, %v5139_v58  ;;  %v3560_v59 = vsel %vm1457_vm1, %v11264_v46, %v3559_v28  ;;  %v3508_v22 = vperm.slane %v3502_v12, %v13231_v51  ;;  %v11279_v54 = vunpack.i.h.bf16 %v13891_v32  ;;  %v11278_v44 = vunpack.i.l.bf16 %v13891_v32 }
 0x341   : > { %5252 = vst.msk [vmem:[#allocation2 + $0xc8] sm:$0xf] %vm5201_vm2, %v5187_v48  ;;  %v3568_v30 = vperm.slane %v3560_v59, %v13231_v51  ;;  %v3569_v36 = vrot.slane %v3564_v18, 4  ;;  %v3572_v57 = vsel %vm1457_vm1, %v3564_v18, %v3571_v34  ;;  %v3504_v20 = vsel %vm1457_vm1, %v11263_v53, %v3503_v62 }
 0x342   : > { %v3580_v29 = vperm.slane %v3572_v57, %v13274_v13  ;;  %v3512_v46 = vperm.slane %v3504_v20, %v13231_v51  ;;  %v3513_v15 = vrot.slane %v3508_v22, 4  ;;  %v3516_v40 = vsel %vm1457_vm1, %v3508_v22, %v3515_v16 }
 0x343   : > { %v3570_v5 = vsel %vm1457_vm1, %v3569_v36, %v3552_v42  ;;  %v3581_v41 = vrot.slane %v3568_v30, 4  ;;  %v3584_v61 = vsel %vm1457_vm1, %v3568_v30, %v3583_v7  ;;  %v3524_v31 = vperm.slane %v3516_v40, %v13274_v13 }
 0x344   : > { %v3576_v26 = vperm.slane %v3570_v5, %v13274_v13  ;;  %v3592_v49 = vperm.slane %v3584_v61, %v13274_v13  ;;  %v3595_v34 = vrot.slane %v3580_v29, 4  ;;  %v3514_v53 = vsel %vm1457_vm1, %v3513_v15, %v3496_v3 }
 0x345   : > { %v3582_v21 = vsel %vm1457_vm1, %v3581_v41, %v13864_v39  ;;  %v3520_v43 = vperm.slane %v3514_v53, %v13274_v13  ;;  %v3525_v8 = vrot.slane %v3512_v46, 4  ;;  %v3528_v42 = vsel %vm1457_vm1, %v3512_v46, %v3527_v4 }
 0x346   : > { %v3588_v48 = vperm.slane %v3582_v21, %v13274_v13  ;;  %v3593_v7 = vrot.slane %v3576_v26, 4  ;;  %v3596_v33 = vsel %vm1457_vm1, 0.0, %v3595_v34  ;;  %v3599_v58 = vrot.slane %v3592_v49, 4 }
 0x347   : > { %v4435_v16 = vsel %vm1457_vm1, %v3595_v34, %v3576_v26  ;;  %v4440_v9 = vrot.slane %v3596_v33, 4  ;;  %v3526_v28 = vsel %vm1457_vm1, %v3525_v8, %v3500_v37  ;;  %v3536_v3 = vperm.slane %v3528_v42, %v13274_v13 }
 0x348   : > { %v3594_v39 = vsel %vm1457_vm1, 0.0, %v3593_v7  ;;  %v3597_v18 = vrot.slane %v3588_v48, 4  ;;  %v3600_v12 = vsel %vm1457_vm1, 0.0, %v3599_v58  ;;  %v4439_v4 = vperm.slane %v4435_v16, %v13231_v51 }
 0x349   : > { %v4441_v62 = vsel %vm1457_vm1, %v4440_v9, %v3594_v39  ;;  %v4446_v59 = vsel %vm1457_vm1, %v3599_v58, %v3588_v48  ;;  %v4451_v22 = vrot.slane %v3600_v12, 4  ;;  %v3532_v30 = vperm.slane %v3526_v28, %v13274_v13 }
 0x34a   : > { %v3598_v36 = vsel %vm1457_vm1, 0.0, %v3597_v18  ;;  %v4445_v37 = vperm.slane %v4441_v62, %v13231_v51  ;;  %v4450_v57 = vperm.slane %v4446_v59, %v13231_v51  ;;  %v4459_v20 = vrot.slane %v4439_v4, 4 }
 0x34b   : > { %v4452_v29 = vsel %vm1457_vm1, %v4451_v22, %v3598_v36  ;;  %v3537_v46 = vrot.slane %v3520_v43, 4  ;;  %v3539_v15 = vrot.slane %v3524_v31, 4  ;;  %v3541_v40 = vrot.slane %v3532_v30, 4 }
 0x34c   : > { %v4456_v5 = vperm.slane %v4452_v29, %v13231_v51  ;;  %v4457_v41 = vrot.slane %v4445_v37, 4  ;;  %v4460_v61 = vsel %vm1457_vm1, %v4445_v37, %v4459_v20  ;;  %v4471_v26 = vrot.slane %v4450_v57, 4 }
 0x34d   : > { %v4468_v49 = vperm.slane %v4460_v61, %v13274_v13  ;;  %v3538_v34 = vsel %vm1457_vm1, 0.0, %v3537_v46  ;;  %v3540_v53 = vsel %vm1457_vm1, 0.0, %v3539_v15  ;;  %v3542_v21 = vsel %vm1457_vm1, 0.0, %v3541_v40 }
 0x34e   : > { %v4458_v8 = vsel %vm1457_vm1, %v4457_v41, %v4439_v4  ;;  %v4469_v42 = vrot.slane %v4456_v5, 4  ;;  %v4472_v31 = vsel %vm1457_vm1, %v4456_v5, %v4471_v26  ;;  %v3543_v48 = vrot.slane %v3536_v3, 4 }
 0x34f   : > { %v4464_v7 = vperm.slane %v4458_v8, %v13274_v13  ;;  %v4480_v33 = vperm.slane %v4472_v31, %v13274_v13  ;;  %v4487_v58 = vrot.slane %v4468_v49, 4  ;;  %v4381_v16 = vsel %vm1457_vm1, %v3539_v15, %v3520_v43 }
 0x350   : > { %v4470_v9 = vsel %vm1457_vm1, %v4469_v42, %v4450_v57  ;;  %v3544_v28 = vsel %vm1457_vm1, 0.0, %v3543_v48  ;;  %v4385_v39 = vperm.slane %v4381_v16, %v13231_v51  ;;  %v4386_v18 = vrot.slane %v3540_v53, 4 }
 0x351   : > { %v4476_v12 = vperm.slane %v4470_v9, %v13274_v13  ;;  %v4483_v4 = vrot.slane %v4464_v7, 4  ;;  %v4485_v62 = vrot.slane %v4480_v33, 4  ;;  %v4488_v3 = vsel %vm1457_vm1, %v4480_v33, %v4487_v58 }
 0x352   : > { %v5317_v59 = vpack.c.bf16 %v4488_v3, %v4488_v3  ;;  %v4387_v22 = vsel %vm1457_vm1, %v4386_v18, %v3538_v34  ;;  %v4392_v36 = vsel %vm1457_vm1, %v3543_v48, %v3532_v30  ;;  %v4397_v37 = vrot.slane %v3544_v28, 4 }
 0x353   : > { %v4481_v43 = vrot.slane %v4476_v12, 4  ;;  %v4484_v57 = vsel %vm1457_vm1, %v4476_v12, %v4483_v4  ;;  %v4486_v20 = vsel %vm1457_vm1, %v4485_v62, %v4468_v49  ;;  %v4391_v29 = vperm.slane %v4387_v22, %v13231_v51 }
 0x354   : > { %v5285_v46 = vpack.c.bf16 %v4484_v57, %v4484_v57  ;;  %v5301_v15 = vpack.c.bf16 %v4486_v20, %v4486_v20  ;;  %5381 = vst.msk [vmem:[#allocation3 + $0xcc] sm:$0xf] %vm5201_vm2, %v5317_v59  ;;  %v4396_v40 = vperm.slane %v4392_v36, %v13231_v51  ;;  %v4398_v5 = vsel %vm1457_vm1, %v4397_v37, %v3542_v21  ;;  %v11272_v20 = vpop.permute.xlu0 %11271 }
 0x355   : > { %v4482_v41 = vsel %vm1457_vm1, %v4481_v43, %v4464_v7  ;;  %v4402_v30 = vperm.slane %v4398_v5, %v13231_v51  ;;  %v4403_v61 = vrot.slane %v4391_v29, 4  ;;  %v4405_v26 = vrot.slane %v4385_v39, 4 }
 0x356   : > { %v2087_v34 = vrot.slane %v11269_v24, 4  ;;  %v2031_v49 = vrot.slane %v11268_v17, 4  ;;  %v5269_v53 = vpack.c.bf16 %v4482_v41, %v4482_v41  ;;  %5349 = vst.msk [vmem:[#allocation3 + $0x4c] sm:$0xf] %vm5201_vm2, %v5285_v46  ;;  %v4417_v8 = vrot.slane %v4396_v40, 4 }
 0x357   : > { %5365 = vst.msk [vmem:[#allocation3 + $0x8c] sm:$0xf] %vm5201_vm2, %v5301_v15  ;;  %v4404_v21 = vsel %vm1457_vm1, %v4403_v61, %v4385_v39  ;;  %v4406_v42 = vsel %vm1457_vm1, %v4391_v29, %v4405_v26  ;;  %v4415_v31 = vrot.slane %v4402_v30, 4  ;;  %v2029_v48 = vrot.slane %v11278_v44, 4 }
 0x358   : > { %5333 = vst.msk [vmem:[#allocation3 + $0xc] sm:$0xf] %vm5201_vm2, %v5269_v53  ;;  %v4410_v7 = vperm.slane %v4404_v21, %v13274_v13  ;;  %v4414_v33 = vperm.slane %v4406_v42, %v13274_v13  ;;  %v4418_v58 = vsel %vm1457_vm1, %v4402_v30, %v4417_v8  ;;  %v2085_v16 = vrot.slane %v11279_v54, 4 }
 0x359   : > { %v4416_v9 = vsel %vm1457_vm1, %v4415_v31, %v4396_v40  ;;  %v4426_v28 = vperm.slane %v4418_v58, %v13274_v13  ;;  %v2032_v39 = vsel %vm1457_vm1, %v11278_v44, %v2031_v49  ;;  %v2088_v62 = vsel %vm1457_vm1, %v11279_v54, %v2087_v34 }
 0x35a   : > { %v4422_v18 = vperm.slane %v4416_v9, %v13274_v13  ;;  %v4429_v12 = vrot.slane %v4410_v7, 4  ;;  %v4433_v4 = vrot.slane %v4414_v33, 4  ;;  %v2030_v59 = vsel %vm1457_vm1, %v2029_v48, %v11268_v17 }
 0x35b   : > { %v4431_v3 = vrot.slane %v4426_v28, 4  ;;  %v2086_v44 = vsel %vm1457_vm1, %v2085_v16, %v11269_v24  ;;  %v2040_v32 = vperm.slane %v2032_v39, %v13231_v51  ;;  %v2096_v54 = vperm.slane %v2088_v62, %v13231_v51 }
 0x35c   : > { %v4427_v22 = vrot.slane %v4422_v18, 4  ;;  %v4430_v36 = vsel %vm1457_vm1, %v4422_v18, %v4429_v12  ;;  %v4434_v37 = vsel %vm1457_vm1, %v4426_v28, %v4433_v4  ;;  %v2036_v40 = vperm.slane %v2030_v59, %v13231_v51  ;;  %v14024_v4 = vpop.permute.xlu2 %11281 }
 0x35d   : > { %v4432_v43 = vsel %vm1457_vm1, %v4431_v3, %v4414_v33  ;;  %v5284_v57 = vpack.c.bf16 %v4430_v36, %v4430_v36  ;;  %v5316_v46 = vpack.c.bf16 %v4434_v37, %v4434_v37  ;;  %v2092_v27 = vperm.slane %v2086_v44, %v13231_v51 }
 0x35e   : > { %v4428_v29 = vsel %vm1457_vm1, %v4427_v22, %v4410_v7  ;;  %v5300_v17 = vpack.c.bf16 %v4432_v43, %v4432_v43  ;;  %v2019_v24 = vrot.slane %v13111_v56, 4  ;;  %v2075_v5 = vrot.slane %v13106_v2, 4 }
 0x35f   : > { %v5268_v15 = vpack.c.bf16 %v4428_v29, %v4428_v29  ;;  %5348 = vst.msk [vmem:[#allocation3 + $0x48] sm:$0xf] %vm5201_vm2, %v5284_v57  ;;  %v11274_v41 = vunpack.i.h.bf16 %v11272_v20  ;;  %v11273_v30 = vunpack.i.l.bf16 %v11272_v20  ;;  %v2053_v61 = vrot.slane %v2040_v32, 4 }
 0x360   : > { %5364 = vst.msk [vmem:[#allocation3 + $0x88] sm:$0xf] %vm5201_vm2, %v5300_v17  ;;  %v2109_v26 = vrot.slane %v2096_v54, 4  ;;  %v2041_v21 = vrot.slane %v2036_v40, 4  ;;  %v2097_v42 = vrot.slane %v2092_v27, 4 }
 0x361   : > { %5332 = vst.msk [vmem:[#allocation3 + $0x8] sm:$0xf] %vm5201_vm2, %v5268_v15  ;;  %v2073_v34 = vrot.slane %v11274_v41, 4  ;;  %v2076_v49 = vsel %vm1457_vm1, %v11274_v41, %v2075_v5  ;;  %v2017_v53 = vrot.slane %v11273_v30, 4  ;;  %v2020_v8 = vsel %vm1457_vm1, %v11273_v30, %v2019_v24 }
 0x362   : > { %5380 = vst.msk [vmem:[#allocation3 + $0xc8] sm:$0xf] %vm5201_vm2, %v5316_v46  ;;  %v2084_v31 = vperm.slane %v2076_v49, %v13231_v51  ;;  %v2028_v48 = vperm.slane %v2020_v8, %v13231_v51 }
 0x363   : > { %v2074_v7 = vsel %vm1457_vm1, %v2073_v34, %v13106_v2  ;;  %v2018_v33 = vsel %vm1457_vm1, %v2017_v53, %v13111_v56 }
 0x364   : > { %v2080_v58 = vperm.slane %v2074_v7, %v13231_v51  ;;  %v2110_v16 = vsel %vm1457_vm1, %v2109_v26, %v2084_v31  ;;  %v2111_v9 = vrot.slane %v2084_v31, 4  ;;  %v2024_v28 = vperm.slane %v2018_v33, %v13231_v51 }
 0x365   : > { %v2116_v39 = vperm.slane %v2110_v16, %v13274_v13  ;;  %v2054_v18 = vsel %vm1457_vm1, %v2053_v61, %v2028_v48  ;;  %v2055_v12 = vrot.slane %v2028_v48, 4 }
 0x366   : > { %v2098_v62 = vsel %vm1457_vm1, %v2097_v42, %v2080_v58  ;;  %v2099_v2 = vrot.slane %v2080_v58, 4  ;;  %v2112_v3 = vsel %vm1457_vm1, %v2096_v54, %v2111_v9  ;;  %v2042_v56 = vsel %vm1457_vm1, %v2041_v21, %v2024_v28 }
 0x367   : > { %v2104_v59 = vperm.slane %v2098_v62, %v13274_v13  ;;  %v2120_v22 = vperm.slane %v2112_v3, %v13274_v13  ;;  %v2125_v36 = vrot.slane %v2116_v39, 4  ;;  %v2043_v37 = vrot.slane %v2024_v28, 4 }
 0x368   : > { %v2100_v44 = vsel %vm1457_vm1, %v2092_v27, %v2099_v2  ;;  %v2048_v43 = vperm.slane %v2042_v56, %v13274_v13  ;;  %v2056_v57 = vsel %vm1457_vm1, %v2040_v32, %v2055_v12  ;;  %v2060_v20 = vperm.slane %v2054_v18, %v13274_v13 }
 0x369   : > { %v2108_v29 = vperm.slane %v2100_v44, %v13274_v13  ;;  %v2121_v17 = vrot.slane %v2104_v59, 4  ;;  %v2126_v54 = vsel %vm1457_vm1, 0.0, %v2125_v36  ;;  %v2127_v46 = vrot.slane %v2120_v22, 4 }
 0x36a   : > { %v2044_v15 = vsel %vm1457_vm1, %v2036_v40, %v2043_v37  ;;  %v2064_v24 = vperm.slane %v2056_v57, %v13274_v13  ;;  %v2065_v5 = vrot.slane %v2048_v43, 4  ;;  %v2069_v41 = vrot.slane %v2060_v20, 4 }
 0x36b   : > { %v2122_v27 = vsel %vm1457_vm1, 0.0, %v2121_v17  ;;  %v2123_v30 = vrot.slane %v2108_v29, 4  ;;  %v2128_v61 = vsel %vm1457_vm1, 0.0, %v2127_v46  ;;  %v2958_v32 = vsel %vm1457_vm1, %v2127_v46, %v2116_v39  ;;  %v14053_v39 = vpop.permute.xlu2 %11306 }
 0x36c   : > { %v2962_v26 = vperm.slane %v2958_v32, %v13231_v51  ;;  %v2963_v34 = vrot.slane %v2128_v61, 4  ;;  %v2052_v49 = vperm.slane %v2044_v15, %v13274_v13  ;;  %v2066_v53 = vsel %vm1457_vm1, 0.0, %v2065_v5 }
 0x36d   : > { %v2124_v40 = vsel %vm1457_vm1, 0.0, %v2123_v30  ;;  %v2947_v8 = vsel %vm1457_vm1, %v2123_v30, %v2104_v59  ;;  %v2070_v21 = vsel %vm1457_vm1, 0.0, %v2069_v41  ;;  %v2071_v42 = vrot.slane %v2064_v24, 4 }
 0x36e   : > { %v2951_v31 = vperm.slane %v2947_v8, %v13231_v51  ;;  %v2952_v48 = vrot.slane %v2124_v40, 4  ;;  %v2964_v7 = vsel %vm1457_vm1, %v2963_v34, %v2126_v54  ;;  %v2983_v33 = vrot.slane %v2962_v26, 4 }
 0x36f   : > { %v2968_v58 = vperm.slane %v2964_v7, %v13231_v51  ;;  %v2067_v16 = vrot.slane %v2052_v49, 4  ;;  %v2072_v9 = vsel %vm1457_vm1, 0.0, %v2071_v42  ;;  %v2904_v28 = vsel %vm1457_vm1, %v2071_v42, %v2060_v20  ;;  %v14078_v7 = vpop.permute.xlu1 %11291 }
 0x370   : > { %v2953_v18 = vsel %vm1457_vm1, %v2952_v48, %v2122_v27  ;;  %v2971_v12 = vrot.slane %v2951_v31, 4  ;;  %v2908_v62 = vperm.slane %v2904_v28, %v13231_v51  ;;  %v2909_v2 = vrot.slane %v2072_v9, 4 }
 0x371   : > { %v2957_v3 = vperm.slane %v2953_v18, %v13231_v51  ;;  %v2981_v56 = vrot.slane %v2968_v58, 4  ;;  %v2984_v59 = vsel %vm1457_vm1, %v2968_v58, %v2983_v33  ;;  %v2068_v22 = vsel %vm1457_vm1, 0.0, %v2067_v16 }
 0x372   : > { %v2992_v36 = vperm.slane %v2984_v59, %v13274_v13  ;;  %v2893_v37 = vsel %vm1457_vm1, %v2067_v16, %v2048_v43  ;;  %v2898_v44 = vrot.slane %v2068_v22, 4  ;;  %v2910_v57 = vsel %vm1457_vm1, %v2909_v2, %v2070_v21 }
 0x373   : > { %v2969_v20 = vrot.slane %v2957_v3, 4  ;;  %v2972_v29 = vsel %vm1457_vm1, %v2957_v3, %v2971_v12  ;;  %v2982_v17 = vsel %vm1457_vm1, %v2981_v56, %v2962_v26  ;;  %v2897_v54 = vperm.slane %v2893_v37, %v13231_v51  ;;  %v11327_v3 = vpop.permute.xlu2 %11326 }
 0x374   : > { %v2980_v46 = vperm.slane %v2972_v29, %v13274_v13  ;;  %v2988_v15 = vperm.slane %v2982_v17, %v13274_v13  ;;  %v2997_v24 = vrot.slane %v2992_v36, 4  ;;  %v2899_v5 = vsel %vm1457_vm1, %v2898_v44, %v2066_v53  ;;  %v14094_v17 = vpop.permute.xlu0 %11286 }
 0x375   : > { %v2970_v41 = vsel %vm1457_vm1, %v2969_v20, %v2951_v31  ;;  %v2903_v43 = vperm.slane %v2899_v5, %v13231_v51  ;;  %v2914_v27 = vperm.slane %v2910_v57, %v13231_v51  ;;  %v2917_v30 = vrot.slane %v2897_v54, 4 }
 0x376   : > { %v2976_v61 = vperm.slane %v2970_v41, %v13274_v13  ;;  %v2993_v32 = vrot.slane %v2988_v15, 4  ;;  %v2998_v26 = vsel %vm1457_vm1, %v2997_v24, %v2980_v46  ;;  %v2999_v34 = vrot.slane %v2980_v46, 4 }
 0x377   : > { %v5180_v49 = vpack.c.bf16 %v2998_v26, %v2998_v26  ;;  %v2915_v40 = vrot.slane %v2903_v43, 4  ;;  %v2918_v8 = vsel %vm1457_vm1, %v2903_v43, %v2917_v30  ;;  %v2927_v21 = vrot.slane %v2914_v27, 4 }
 0x378   : > { %v2994_v53 = vsel %vm1457_vm1, %v2993_v32, %v2976_v61  ;;  %v2995_v42 = vrot.slane %v2976_v61, 4  ;;  %v3000_v31 = vsel %vm1457_vm1, %v2992_v36, %v2999_v34  ;;  %v2926_v48 = vperm.slane %v2918_v8, %v13274_v13 }
 0x379   : > { %v5148_v33 = vpack.c.bf16 %v2994_v53, %v2994_v53  ;;  %v5196_v58 = vpack.c.bf16 %v3000_v31, %v3000_v31  ;;  %5245 = vst.msk [vmem:[#allocation2 + $0xac] sm:$0xf] %vm5201_vm2, %v5180_v49  ;;  %v2916_v16 = vsel %vm1457_vm1, %v2915_v40, %v2897_v54  ;;  %v2928_v9 = vsel %vm1457_vm1, %v2927_v21, %v2908_v62  ;;  %v11302_v53 = vpop.permute.xlu1 %11301 }
 0x37a   : > { %v2996_v28 = vsel %vm1457_vm1, %v2988_v15, %v2995_v42  ;;  %v2922_v18 = vperm.slane %v2916_v16, %v13274_v13  ;;  %v2929_v12 = vrot.slane %v2908_v62, 4  ;;  %v2934_v2 = vperm.slane %v2928_v9, %v13274_v13 }
 0x37b   : > { %v5164_v56 = vpack.c.bf16 %v2996_v28, %v2996_v28  ;;  %5213 = vst.msk [vmem:[#allocation2 + $0x2c] sm:$0xf] %vm5201_vm2, %v5148_v33  ;;  %v2945_v59 = vrot.slane %v2926_v48, 4  ;;  %v17406_v22 = vunpack.i.h.bf16 %v14024_v4  ;;  %v17405_v57 = vunpack.i.l.bf16 %v14024_v4 }
 0x37c   : > { %5261 = vst.msk [vmem:[#allocation2 + $0xec] sm:$0xf] %vm5201_vm2, %v5196_v58  ;;  %v2930_v36 = vsel %vm1457_vm1, %v2914_v27, %v2929_v12  ;;  %v2939_v37 = vrot.slane %v2934_v2, 4  ;;  %v2941_v44 = vrot.slane %v2922_v18, 4  ;;  %v11309_v20 = vunpack.i.h.bf16 %v14053_v39 }
 0x37d   : > { %5229 = vst.msk [vmem:[#allocation2 + $0x6c] sm:$0xf] %vm5201_vm2, %v5164_v56  ;;  %v2938_v62 = vperm.slane %v2930_v36, %v13274_v13  ;;  %v11329_v29 = vunpack.i.h.bf16 %v11327_v3  ;;  %v11308_v54 = vunpack.i.l.bf16 %v14053_v39  ;;  %v11328_v24 = vunpack.i.l.bf16 %v11327_v3 }
 0x37e   : > { %v2940_v46 = vsel %vm1457_vm1, %v2939_v37, %v2922_v18  ;;  %v2942_v15 = vsel %vm1457_vm1, %v2934_v2, %v2941_v44  ;;  %v11289_v61 = vunpack.i.h.bf16 %v14094_v17  ;;  %v14103_v32 = vrot.slane %v17406_v22, 4 }
 0x37f   : > { %v2943_v5 = vrot.slane %v2938_v62, 4  ;;  %v2946_v41 = vsel %vm1457_vm1, %v2938_v62, %v2945_v59  ;;  %v5147_v43 = vpack.c.bf16 %v2940_v46, %v2940_v46  ;;  %v5163_v27 = vpack.c.bf16 %v2942_v15, %v2942_v15 }
 0x380   : > { %v5195_v30 = vpack.c.bf16 %v2946_v41, %v2946_v41  ;;  %v2185_v34 = vrot.slane %v11329_v29, 4  ;;  %v14109_v49 = vrot.slane %v17405_v57, 4  ;;  %v14113_v40 = vrot.slane %v11309_v20, 4 }
 0x381   : > { %v2944_v26 = vsel %vm1457_vm1, %v2943_v5, %v2926_v48  ;;  %5212 = vst.msk [vmem:[#allocation2 + $0x28] sm:$0xf] %vm5201_vm2, %v5147_v43  ;;  %v11294_v21 = vunpack.i.h.bf16 %v14078_v7  ;;  %v14119_v42 = vrot.slane %v11308_v54, 4  ;;  %v11293_v31 = vunpack.i.l.bf16 %v14078_v7 }
 0x382   : > { %v5179_v8 = vpack.c.bf16 %v2944_v26, %v2944_v26  ;;  %5228 = vst.msk [vmem:[#allocation2 + $0x68] sm:$0xf] %vm5201_vm2, %v5163_v27  ;;  %v2187_v48 = vrot.slane %v13154_v38, 4  ;;  %v2129_v33 = vrot.slane %v11328_v24, 4  ;;  %v2131_v58 = vrot.slane %v13159_v52, 4 }
 0x383   : > { %5260 = vst.msk [vmem:[#allocation2 + $0xe8] sm:$0xf] %vm5201_vm2, %v5195_v30  ;;  %v3939_v16 = vrot.slane %v13128_v63, 4  ;;  %v3995_v9 = vrot.slane %v13125_v6, 4  ;;  %v3993_v28 = vrot.slane %v11289_v61, 4  ;;  %v2186_v18 = vsel %vm1457_vm1, %v2185_v34, %v13154_v38  ;;  %v11297_v34 = vpop.permute.xlu0 %11296 }
 0x384   : > { %5244 = vst.msk [vmem:[#allocation2 + $0xa8] sm:$0xf] %vm5201_vm2, %v5179_v8  ;;  %v2188_v12 = vsel %vm1457_vm1, %v11329_v29, %v2187_v48  ;;  %v11304_v2 = vunpack.i.h.bf16 %v11302_v53  ;;  %v11303_v3 = vunpack.i.l.bf16 %v11302_v53  ;;  %v1751_v7 = vrot.slane %v11294_v21, 4 }
 0x385   : > { %v2132_v56 = vsel %vm1457_vm1, %v11328_v24, %v2131_v58  ;;  %v4107_v36 = vrot.slane %v13165_v14, 4  ;;  %v1695_v37 = vrot.slane %v11293_v31, 4  ;;  %v2130_v44 = vsel %vm1457_vm1, %v2129_v33, %v13159_v52 }
 0x386   : > { %v1749_v62 = vrot.slane %v11304_v2, 4  ;;  %v1693_v46 = vrot.slane %v11303_v3, 4  ;;  %v14137_v15 = vperm.slane %v2186_v18, %v13231_v51  ;;  %v14140_v38 = vperm.slane %v2188_v12, %v13231_v51 }
 0x387   : > { %v3994_v29 = vsel %vm1457_vm1, %v3993_v28, %v13125_v6  ;;  %v1752_v24 = vsel %vm1457_vm1, %v11304_v2, %v1751_v7  ;;  %v14146_v5 = vperm.slane %v2132_v56, %v13231_v51  ;;  %v3996_v41 = vsel %vm1457_vm1, %v11289_v61, %v3995_v9  ;;  %v14169_v28 = vpop.permute.xlu2 %11341 }
 0x388   : > { %v1750_v52 = vsel %vm1457_vm1, %v1749_v62, %v11294_v21  ;;  %v1683_v43 = vrot.slane %v13122_v25, 4  ;;  %v14152_v27 = vperm.slane %v2130_v44, %v13231_v51  ;;  %v1696_v30 = vsel %vm1457_vm1, %v11303_v3, %v1695_v37 }
 0x389   : > { %v1760_v26 = vperm.slane %v1752_v24, %v13231_v51  ;;  %v1739_v6 = vrot.slane %v13117_v45, 4  ;;  %v14158_v8 = vperm.slane %v3994_v29, %v13231_v51  ;;  %v1694_v53 = vsel %vm1457_vm1, %v1693_v46, %v11293_v31 }
 0x38a   : > { %v3603_v61 = vrot.slane %v13148_v0, 4  ;;  %v3659_v21 = vrot.slane %v13142_v47, 4  ;;  %v14166_v58 = vperm.slane %v3996_v41, %v13231_v51  ;;  %v1756_v9 = vperm.slane %v1750_v52, %v13231_v51 }
 0x38b   : > { %v11288_v12 = vunpack.i.l.bf16 %v14094_v17  ;;  %v1704_v31 = vperm.slane %v1696_v30, %v13231_v51  ;;  %v11299_v2 = vunpack.i.h.bf16 %v11297_v34  ;;  %v1700_v7 = vperm.slane %v1694_v53, %v13231_v51 }
 0x38c   : > { %v1773_v56 = vrot.slane %v1760_v26, 4  ;;  %v11298_v37 = vunpack.i.l.bf16 %v11297_v34  ;;  %v11344_v62 = vunpack.i.h.bf16 %v14169_v28  ;;  %v1761_v41 = vrot.slane %v1756_v9, 4 }
 0x38d   : > { %v1737_v46 = vrot.slane %v11299_v2, 4  ;;  %v1740_v29 = vsel %vm1457_vm1, %v11299_v2, %v1739_v6  ;;  %v14181_v30 = vrot.slane %v11288_v12, 4  ;;  %v1717_v57 = vrot.slane %v1704_v31, 4 }
 0x38e   : > { %v1748_v17 = vperm.slane %v1740_v29, %v13231_v51  ;;  %v1681_v52 = vrot.slane %v11298_v37, 4  ;;  %v1684_v34 = vsel %vm1457_vm1, %v11298_v37, %v1683_v43  ;;  %v1705_v44 = vrot.slane %v1700_v7, 4 }
 0x38f   : > { %v1738_v53 = vsel %vm1457_vm1, %v1737_v46, %v13117_v45  ;;  %v14189_v2 = vsel %vm1457_vm1, %v11288_v12, %v3939_v16  ;;  %v1692_v3 = vperm.slane %v1684_v34, %v13231_v51 }
 0x390   : > { %v1744_v22 = vperm.slane %v1738_v53, %v13231_v51  ;;  %v1774_v18 = vsel %vm1457_vm1, %v1773_v56, %v1748_v17  ;;  %v1775_v6 = vrot.slane %v1748_v17, 4  ;;  %v1682_v24 = vsel %vm1457_vm1, %v1681_v52, %v13122_v25 }
 0x391   : > { %v1780_v29 = vperm.slane %v1774_v18, %v13274_v13  ;;  %v1688_v37 = vperm.slane %v1682_v24, %v13231_v51  ;;  %v1718_v12 = vsel %vm1457_vm1, %v1717_v57, %v1692_v3  ;;  %v1719_v53 = vrot.slane %v1692_v3, 4 }
 0x392   : > { %v1762_v45 = vsel %vm1457_vm1, %v1761_v41, %v1744_v22  ;;  %v1763_v46 = vrot.slane %v1744_v22, 4  ;;  %v1776_v43 = vsel %vm1457_vm1, %v1760_v26, %v1775_v6  ;;  %v1724_v57 = vperm.slane %v1718_v12, %v13274_v13 }
 0x393   : > { %v1768_v56 = vperm.slane %v1762_v45, %v13274_v13  ;;  %v1784_v17 = vperm.slane %v1776_v43, %v13274_v13  ;;  %v1789_v16 = vrot.slane %v1780_v29, 4  ;;  %v1706_v25 = vsel %vm1457_vm1, %v1705_v44, %v1688_v37 }
 0x394   : > { %v1764_v18 = vsel %vm1457_vm1, %v1756_v9, %v1763_v46  ;;  %v1707_v52 = vrot.slane %v1688_v37, 4  ;;  %v1712_v6 = vperm.slane %v1706_v25, %v13274_v13  ;;  %v1720_v45 = vsel %vm1457_vm1, %v1704_v31, %v1719_v53  ;;  %v14217_v25 = vpop.permute.xlu1 %11316 }
 0x395   : > { %v1772_v41 = vperm.slane %v1764_v18, %v13274_v13  ;;  %v1785_v22 = vrot.slane %v1768_v56, 4  ;;  %v1790_v26 = vsel %vm1457_vm1, 0.0, %v1789_v16  ;;  %v1791_v34 = vrot.slane %v1784_v17, 4 }
 0x396   : > { %v1708_v24 = vsel %vm1457_vm1, %v1700_v7, %v1707_v52  ;;  %v1728_v7 = vperm.slane %v1720_v45, %v13274_v13  ;;  %v1729_v18 = vrot.slane %v1712_v6, 4  ;;  %v1733_v12 = vrot.slane %v1724_v57, 4 }
 0x397   : > { %v1786_v9 = vsel %vm1457_vm1, 0.0, %v1785_v22  ;;  %v1787_v46 = vrot.slane %v1772_v41, 4  ;;  %v1792_v44 = vsel %vm1457_vm1, 0.0, %v1791_v34  ;;  %v2634_v3 = vsel %vm1457_vm1, %v1791_v34, %v1780_v29 }
 0x398   : > { %v2638_v43 = vperm.slane %v2634_v3, %v13231_v51  ;;  %v2639_v37 = vrot.slane %v1792_v44, 4  ;;  %v1716_v17 = vperm.slane %v1708_v24, %v13274_v13  ;;  %v1730_v34 = vsel %vm1457_vm1, 0.0, %v1729_v18 }
 0x399   : > { %v1788_v16 = vsel %vm1457_vm1, 0.0, %v1787_v46  ;;  %v2623_v31 = vsel %vm1457_vm1, %v1787_v46, %v1768_v56  ;;  %v1734_v45 = vsel %vm1457_vm1, 0.0, %v1733_v12  ;;  %v1735_v46 = vrot.slane %v1728_v7, 4 }
 0x39a   : > { %v2627_v52 = vperm.slane %v2623_v31, %v13231_v51  ;;  %v2628_v53 = vrot.slane %v1788_v16, 4  ;;  %v2640_v29 = vsel %vm1457_vm1, %v2639_v37, %v1790_v26  ;;  %v2659_v41 = vrot.slane %v2638_v43, 4 }
 0x39b   : > { %v2644_v22 = vperm.slane %v2640_v29, %v13231_v51  ;;  %v1731_v24 = vrot.slane %v1716_v17, 4  ;;  %v11319_v3 = vunpack.i.h.bf16 %v14217_v25  ;;  %v1736_v18 = vsel %vm1457_vm1, 0.0, %v1735_v46 }
 0x39c   : > { %v2629_v44 = vsel %vm1457_vm1, %v2628_v53, %v1786_v9  ;;  %v2647_v56 = vrot.slane %v2627_v52, 4 }
 0x39d   : > { %v2633_v48 = vperm.slane %v2629_v44, %v13231_v51  ;;  %v2657_v31 = vrot.slane %v2644_v22, 4  ;;  %v2660_v16 = vsel %vm1457_vm1, %v2644_v22, %v2659_v41  ;;  %v1732_v26 = vsel %vm1457_vm1, 0.0, %v1731_v24 }
 0x39e   : > { %v2668_v37 = vperm.slane %v2660_v16, %v13274_v13  ;;  %v2569_v17 = vsel %vm1457_vm1, %v1731_v24, %v1712_v6  ;;  %v2574_v12 = vrot.slane %v1732_v26, 4  ;;  %v2580_v6 = vsel %vm1457_vm1, %v1735_v46, %v1724_v57 }
 0x39f   : > { %v2645_v29 = vrot.slane %v2633_v48, 4  ;;  %v2648_v9 = vsel %vm1457_vm1, %v2633_v48, %v2647_v56  ;;  %v2658_v7 = vsel %vm1457_vm1, %v2657_v31, %v2638_v43  ;;  %v2573_v53 = vperm.slane %v2569_v17, %v13231_v51 }
 0x3a0   : > { %v2656_v44 = vperm.slane %v2648_v9, %v13274_v13  ;;  %v2664_v41 = vperm.slane %v2658_v7, %v13274_v13  ;;  %v2673_v22 = vrot.slane %v2668_v37, 4  ;;  %v2575_v33 = vsel %vm1457_vm1, %v2574_v12, %v1730_v34 }
 0x3a1   : > { %v2646_v16 = vsel %vm1457_vm1, %v2645_v29, %v2627_v52  ;;  %v2579_v59 = vperm.slane %v2575_v33, %v13231_v51  ;;  %v2585_v24 = vrot.slane %v1736_v18, 4  ;;  %v2584_v17 = vperm.slane %v2580_v6, %v13231_v51 }
 0x3a2   : > { %v2652_v48 = vperm.slane %v2646_v16, %v13274_v13  ;;  %v2669_v56 = vrot.slane %v2664_v41, 4  ;;  %v2674_v43 = vsel %vm1457_vm1, %v2673_v22, %v2656_v44  ;;  %v2675_v31 = vrot.slane %v2656_v44, 4 }
 0x3a3   : > { %v5174_v26 = vpack.c.bf16 %v2674_v43, %v2674_v43  ;;  %v2586_v9 = vsel %vm1457_vm1, %v2585_v24, %v1734_v45  ;;  %v2591_v7 = vrot.slane %v2579_v59, 4  ;;  %v2593_v29 = vrot.slane %v2573_v53, 4 }
 0x3a4   : > { %v2670_v34 = vsel %vm1457_vm1, %v2669_v56, %v2652_v48  ;;  %v2671_v52 = vrot.slane %v2652_v48, 4  ;;  %v2676_v33 = vsel %vm1457_vm1, %v2668_v37, %v2675_v31  ;;  %v2590_v57 = vperm.slane %v2586_v9, %v13231_v51 }
 0x3a5   : > { %v5142_v46 = vpack.c.bf16 %v2670_v34, %v2670_v34  ;;  %v5190_v18 = vpack.c.bf16 %v2676_v33, %v2676_v33  ;;  %5239 = vst.msk [vmem:[#allocation2 + $0x94] sm:$0xf] %vm5201_vm2, %v5174_v26  ;;  %v2592_v12 = vsel %vm1457_vm1, %v2591_v7, %v2573_v53  ;;  %v2605_v16 = vrot.slane %v2584_v17, 4 }
 0x3a6   : > { %v2672_v44 = vsel %vm1457_vm1, %v2664_v41, %v2671_v52  ;;  %v2598_v22 = vperm.slane %v2592_v12, %v13274_v13  ;;  %v2603_v45 = vrot.slane %v2590_v57, 4  ;;  %v2594_v37 = vsel %vm1457_vm1, %v2579_v59, %v2593_v29 }
 0x3a7   : > { %v5158_v6 = vpack.c.bf16 %v2672_v44, %v2672_v44  ;;  %5207 = vst.msk [vmem:[#allocation2 + $0x14] sm:$0xf] %vm5201_vm2, %v5142_v46  ;;  %v3669_v24 = vrot.slane %v11319_v3, 4  ;;  %v11318_v48 = vunpack.i.l.bf16 %v14217_v25  ;;  %v2602_v53 = vperm.slane %v2594_v37, %v13274_v13 }
 0x3a8   : > { %5255 = vst.msk [vmem:[#allocation2 + $0xd4] sm:$0xf] %vm5201_vm2, %v5190_v18  ;;  %v2604_v41 = vsel %vm1457_vm1, %v2603_v45, %v2584_v17  ;;  %v2606_v56 = vsel %vm1457_vm1, %v2590_v57, %v2605_v16  ;;  %v2617_v43 = vrot.slane %v2598_v22, 4  ;;  %v14263_v31 = vperm.slane %v14189_v2, %v13231_v51 }
 0x3a9   : > { %5223 = vst.msk [vmem:[#allocation2 + $0x54] sm:$0xf] %vm5201_vm2, %v5158_v6  ;;  %v2610_v59 = vperm.slane %v2604_v41, %v13274_v13  ;;  %v2614_v26 = vperm.slane %v2606_v56, %v13274_v13  ;;  %v3613_v9 = vrot.slane %v11318_v48, 4  ;;  %v3938_v7 = vsel %vm1457_vm1, %v14181_v30, %v13128_v63 }
 0x3aa   : > { %v2621_v34 = vrot.slane %v2602_v53, 4  ;;  %v3616_v17 = vsel %vm1457_vm1, %v11318_v48, %v14119_v42  ;;  %v3670_v2 = vsel %vm1457_vm1, %v3669_v24, %v11309_v20  ;;  %v3672_v46 = vsel %vm1457_vm1, %v11319_v3, %v14113_v40  ;;  %v11312_v20 = vpop.permute.xlu0 %11311 }
 0x3ab   : > { %v2615_v52 = vrot.slane %v2610_v59, 4  ;;  %v2618_v33 = vsel %vm1457_vm1, %v2610_v59, %v2617_v43  ;;  %v2619_v57 = vrot.slane %v2614_v26, 4  ;;  %v4105_v63 = vrot.slane %v11344_v62, 4 }
 0x3ac   : > { %v2622_v30 = vsel %vm1457_vm1, %v2614_v26, %v2621_v34  ;;  %v5157_v18 = vpack.c.bf16 %v2618_v33, %v2618_v33  ;;  %v3614_v42 = vsel %vm1457_vm1, %v3613_v9, %v11308_v54  ;;  %v3624_v25 = vperm.slane %v3616_v17, %v13231_v51 }
 0x3ad   : > { %v2616_v12 = vsel %vm1457_vm1, %v2615_v52, %v2598_v22  ;;  %v2620_v29 = vsel %vm1457_vm1, %v2619_v57, %v2602_v53  ;;  %v5189_v44 = vpack.c.bf16 %v2622_v30, %v2622_v30  ;;  %v3676_v3 = vperm.slane %v3670_v2, %v13231_v51 }
 0x3ae   : > { %v5141_v45 = vpack.c.bf16 %v2616_v12, %v2616_v12  ;;  %v5173_v40 = vpack.c.bf16 %v2620_v29, %v2620_v29  ;;  %5222 = vst.msk [vmem:[#allocation2 + $0x50] sm:$0xf] %vm5201_vm2, %v5157_v18  ;;  %v3680_v16 = vperm.slane %v3672_v46, %v13231_v51  ;;  %v14294_v39 = vperm.slane %v3938_v7, %v13231_v51 }
 0x3af   : > { %v11343_v54 = vunpack.i.l.bf16 %v14169_v28  ;;  %5254 = vst.msk [vmem:[#allocation2 + $0xd0] sm:$0xf] %vm5201_vm2, %v5189_v44  ;;  %v3620_v22 = vperm.slane %v3614_v42, %v13231_v51  ;;  %v11314_v6 = vunpack.i.h.bf16 %v11312_v20  ;;  %v3975_v37 = vrot.slane %v14263_v31, 4 }
 0x3b0   : > { %v14302_v24 = vsel %vm1457_vm1, %v4105_v63, %v13165_v14  ;;  %5206 = vst.msk [vmem:[#allocation2 + $0x10] sm:$0xf] %vm5201_vm2, %v5141_v45  ;;  %v3693_v48 = vrot.slane %v3680_v16, 4  ;;  %v11313_v53 = vunpack.i.l.bf16 %v11312_v20  ;;  %v14310_v41 = vsel %vm1457_vm1, %v11344_v62, %v4107_v36 }
 0x3b1   : > { %5238 = vst.msk [vmem:[#allocation2 + $0x90] sm:$0xf] %vm5201_vm2, %v5173_v40  ;;  %v3637_v56 = vrot.slane %v3624_v25, 4  ;;  %v3657_v43 = vrot.slane %v11314_v6, 4  ;;  %v3660_v59 = vsel %vm1457_vm1, %v11314_v6, %v3659_v21  ;;  %v3681_v26 = vrot.slane %v3676_v3, 4 }
 0x3b2   : > { %v3668_v9 = vperm.slane %v3660_v59, %v13231_v51  ;;  %v3601_v7 = vrot.slane %v11313_v53, 4  ;;  %v3604_v14 = vsel %vm1457_vm1, %v11313_v53, %v3603_v61  ;;  %v14322_v36 = vrot.slane %v11343_v54, 4 }
 0x3b3   : > { %v3625_v62 = vrot.slane %v3620_v22, 4  ;;  %v3658_v34 = vsel %vm1457_vm1, %v3657_v43, %v13142_v47  ;;  %v3612_v17 = vperm.slane %v3604_v14, %v13231_v51 }
 0x3b4   : > { %v3664_v21 = vperm.slane %v3658_v34, %v13231_v51  ;;  %v3694_v2 = vsel %vm1457_vm1, %v3693_v48, %v3668_v9  ;;  %v3695_v52 = vrot.slane %v3668_v9, 4  ;;  %v3602_v33 = vsel %vm1457_vm1, %v3601_v7, %v13148_v0 }
 0x3b5   : > { %v3700_v61 = vperm.slane %v3694_v2, %v13274_v13  ;;  %v3608_v57 = vperm.slane %v3602_v33, %v13231_v51  ;;  %v3638_v46 = vsel %vm1457_vm1, %v3637_v56, %v3612_v17  ;;  %v3639_v63 = vrot.slane %v3612_v17, 4 }
 0x3b6   : > { %v3682_v30 = vsel %vm1457_vm1, %v3681_v26, %v3664_v21  ;;  %v3683_v47 = vrot.slane %v3664_v21, 4  ;;  %v3696_v18 = vsel %vm1457_vm1, %v3680_v16, %v3695_v52  ;;  %v3644_v42 = vperm.slane %v3638_v46, %v13274_v13 }
 0x3b7   : > { %v3688_v20 = vperm.slane %v3682_v30, %v13274_v13  ;;  %v3704_v12 = vperm.slane %v3696_v18, %v13274_v13  ;;  %v3709_v29 = vrot.slane %v3700_v61, 4  ;;  %v3626_v0 = vsel %vm1457_vm1, %v3625_v62, %v3608_v57 }
 0x3b8   : > { %v3684_v44 = vsel %vm1457_vm1, %v3676_v3, %v3683_v47  ;;  %v3627_v45 = vrot.slane %v3608_v57, 4  ;;  %v3632_v40 = vperm.slane %v3626_v0, %v13274_v13  ;;  %v3640_v6 = vsel %vm1457_vm1, %v3624_v25, %v3639_v63 }
 0x3b9   : > { %v3692_v48 = vperm.slane %v3684_v44, %v13274_v13  ;;  %v3705_v53 = vrot.slane %v3688_v20, 4  ;;  %v3710_v16 = vsel %vm1457_vm1, 0.0, %v3709_v29  ;;  %v3711_v56 = vrot.slane %v3704_v12, 4 }
 0x3ba   : > { %v3628_v43 = vsel %vm1457_vm1, %v3620_v22, %v3627_v45  ;;  %v3648_v59 = vperm.slane %v3640_v6, %v13274_v13  ;;  %v3649_v26 = vrot.slane %v3632_v40, 4  ;;  %v3653_v9 = vrot.slane %v3644_v42, 4 }
 0x3bb   : > { %v3706_v7 = vsel %vm1457_vm1, 0.0, %v3705_v53  ;;  %v3707_v3 = vrot.slane %v3692_v48, 4  ;;  %v3712_v14 = vsel %vm1457_vm1, 0.0, %v3711_v56  ;;  %v4554_v62 = vsel %vm1457_vm1, %v3711_v56, %v3700_v61 }
 0x3bc   : > { %v4558_v25 = vperm.slane %v4554_v62, %v13231_v51  ;;  %v4559_v34 = vrot.slane %v3712_v14, 4  ;;  %v3636_v17 = vperm.slane %v3628_v43, %v13274_v13  ;;  %v3650_v21 = vsel %vm1457_vm1, 0.0, %v3649_v26 }
 0x3bd   : > { %v3708_v22 = vsel %vm1457_vm1, 0.0, %v3707_v3  ;;  %v4543_v2 = vsel %vm1457_vm1, %v3707_v3, %v3688_v20  ;;  %v3654_v52 = vsel %vm1457_vm1, 0.0, %v3653_v9  ;;  %v3655_v33 = vrot.slane %v3648_v59, 4 }
 0x3be   : > { %v4547_v57 = vperm.slane %v4543_v2, %v13231_v51  ;;  %v4548_v46 = vrot.slane %v3708_v22, 4  ;;  %v4560_v63 = vsel %vm1457_vm1, %v4559_v34, %v3710_v16  ;;  %v4579_v61 = vrot.slane %v4558_v25, 4 }
 0x3bf   : > { %v4564_v30 = vperm.slane %v4560_v63, %v13231_v51  ;;  %v3651_v47 = vrot.slane %v3636_v17, 4  ;;  %v3656_v18 = vsel %vm1457_vm1, 0.0, %v3655_v33  ;;  %v4500_v12 = vsel %vm1457_vm1, %v3655_v33, %v3644_v42 }
 0x3c0   : > { %v4549_v29 = vsel %vm1457_vm1, %v4548_v46, %v3706_v7  ;;  %v4567_v0 = vrot.slane %v4547_v57, 4  ;;  %v4504_v20 = vperm.slane %v4500_v12, %v13231_v51  ;;  %v4505_v44 = vrot.slane %v3656_v18, 4 }
 0x3c1   : > { %v4553_v45 = vperm.slane %v4549_v29, %v13231_v51  ;;  %v4577_v6 = vrot.slane %v4564_v30, 4  ;;  %v4580_v48 = vsel %vm1457_vm1, %v4564_v30, %v4579_v61  ;;  %v3652_v53 = vsel %vm1457_vm1, 0.0, %v3651_v47 }
 0x3c2   : > { %v4588_v16 = vperm.slane %v4580_v48, %v13274_v13  ;;  %v4489_v56 = vsel %vm1457_vm1, %v3651_v47, %v3632_v40  ;;  %v4494_v43 = vrot.slane %v3652_v53, 4  ;;  %v4506_v42 = vsel %vm1457_vm1, %v4505_v44, %v3654_v52  ;;  %v14378_v52 = vpop.permute.xlu2 %11346 }
 0x3c3   : > { %v4565_v59 = vrot.slane %v4553_v45, 4  ;;  %v4568_v26 = vsel %vm1457_vm1, %v4553_v45, %v4567_v0  ;;  %v4578_v9 = vsel %vm1457_vm1, %v4577_v6, %v4558_v25  ;;  %v4493_v7 = vperm.slane %v4489_v56, %v13231_v51  ;;  %v14386_v0 = vpop.permute.xlu1 %11321 }
 0x3c4   : > { %v4576_v3 = vperm.slane %v4568_v26, %v13274_v13  ;;  %v4584_v14 = vperm.slane %v4578_v9, %v13274_v13  ;;  %v4593_v62 = vrot.slane %v4588_v16, 4  ;;  %v4495_v34 = vsel %vm1457_vm1, %v4494_v43, %v3650_v21 }
 0x3c5   : > { %v4566_v17 = vsel %vm1457_vm1, %v4565_v59, %v4547_v57  ;;  %v4499_v40 = vperm.slane %v4495_v34, %v13231_v51  ;;  %v4510_v22 = vperm.slane %v4506_v42, %v13231_v51  ;;  %v4513_v2 = vrot.slane %v4493_v7, 4 }
 0x3c6   : > { %v4572_v25 = vperm.slane %v4566_v17, %v13274_v13  ;;  %v4589_v33 = vrot.slane %v4584_v14, 4  ;;  %v4594_v46 = vsel %vm1457_vm1, %v4593_v62, %v4576_v3  ;;  %v4595_v63 = vrot.slane %v4576_v3, 4 }
 0x3c7   : > { %v5303_v61 = vpack.c.bf16 %v4594_v46, %v4594_v46  ;;  %v4511_v30 = vrot.slane %v4499_v40, 4  ;;  %v4514_v47 = vsel %vm1457_vm1, %v4499_v40, %v4513_v2  ;;  %v4523_v21 = vrot.slane %v4510_v22, 4 }
 0x3c8   : > { %v4590_v57 = vsel %vm1457_vm1, %v4589_v33, %v4572_v25  ;;  %v4591_v18 = vrot.slane %v4572_v25, 4  ;;  %v4596_v12 = vsel %vm1457_vm1, %v4588_v16, %v4595_v63  ;;  %v4522_v29 = vperm.slane %v4514_v47, %v13274_v13  ;;  %v11332_v33 = vpop.permute.xlu0 %11331 }
 0x3c9   : > { %v5271_v44 = vpack.c.bf16 %v4590_v57, %v4590_v57  ;;  %v5319_v45 = vpack.c.bf16 %v4596_v12, %v4596_v12  ;;  %5367 = vst.msk [vmem:[#allocation3 + $0x94] sm:$0xf] %vm5201_vm2, %v5303_v61  ;;  %v4512_v6 = vsel %vm1457_vm1, %v4511_v30, %v4493_v7  ;;  %v4524_v48 = vsel %vm1457_vm1, %v4523_v21, %v4504_v20 }
 0x3ca   : > { %v4592_v53 = vsel %vm1457_vm1, %v4584_v14, %v4591_v18  ;;  %v4518_v56 = vperm.slane %v4512_v6, %v13274_v13  ;;  %v4525_v43 = vrot.slane %v4504_v20, 4  ;;  %v4530_v42 = vperm.slane %v4524_v48, %v13274_v13  ;;  %v14426_v47 = vpop.permute.xlu2 %11351 }
 0x3cb   : > { %v3963_v16 = vrot.slane %v14294_v39, 4  ;;  %v5287_v59 = vpack.c.bf16 %v4592_v53, %v4592_v53  ;;  %5335 = vst.msk [vmem:[#allocation3 + $0x14] sm:$0xf] %vm5201_vm2, %v5271_v44  ;;  %v4541_v26 = vrot.slane %v4522_v29, 4  ;;  %v11324_v9 = vunpack.i.h.bf16 %v14386_v0 }
 0x3cc   : > { %v14399_v7 = vperm.slane %v14302_v24, %v13231_v51  ;;  %5383 = vst.msk [vmem:[#allocation3 + $0xd4] sm:$0xf] %vm5201_vm2, %v5319_v45  ;;  %v4526_v3 = vsel %vm1457_vm1, %v4510_v22, %v4525_v43  ;;  %v4535_v14 = vrot.slane %v4530_v42, 4  ;;  %v4537_v20 = vrot.slane %v4518_v56, 4 }
 0x3cd   : > { %v14405_v62 = vperm.slane %v14310_v41, %v13231_v51  ;;  %v4050_v34 = vsel %vm1457_vm1, %v14322_v36, %v13170_v19  ;;  %v17496_v17 = vrot.slane %v13170_v19, 4  ;;  %5351 = vst.msk [vmem:[#allocation3 + $0x54] sm:$0xf] %vm5201_vm2, %v5287_v59  ;;  %v4534_v40 = vperm.slane %v4526_v3, %v13274_v13 }
 0x3ce   : > { %v4536_v22 = vsel %vm1457_vm1, %v4535_v14, %v4518_v56  ;;  %v4538_v2 = vsel %vm1457_vm1, %v4530_v42, %v4537_v20  ;;  %v2199_v41 = vrot.slane %v11324_v9, 4  ;;  %v11323_v25 = vunpack.i.l.bf16 %v14386_v0 }
 0x3cf   : > { %v4052_v24 = vsel %vm1457_vm1, %v11343_v54, %v17496_v17  ;;  %v4539_v46 = vrot.slane %v4534_v40, 4  ;;  %v4542_v36 = vsel %vm1457_vm1, %v4534_v40, %v4541_v26  ;;  %v5270_v19 = vpack.c.bf16 %v4536_v22, %v4536_v22 }
 0x3d0   : > { %v5286_v63 = vpack.c.bf16 %v4538_v2, %v4538_v2  ;;  %v14423_v54 = vperm.slane %v4052_v24, %v13231_v51  ;;  %v5318_v61 = vpack.c.bf16 %v4542_v36, %v4542_v36  ;;  %v1795_v30 = vrot.slane %v13176_v11, 4 }
 0x3d1   : > { %v4143_v21 = vrot.slane %v14405_v62, 4  ;;  %v14430_v57 = vperm.slane %v4050_v34, %v13231_v51  ;;  %v4540_v18 = vsel %vm1457_vm1, %v4539_v46, %v4522_v29  ;;  %5334 = vst.msk [vmem:[#allocation3 + $0x10] sm:$0xf] %vm5201_vm2, %v5270_v19  ;;  %v11334_v12 = vunpack.i.h.bf16 %v11332_v33 }
 0x3d2   : > { %v11349_v0 = vunpack.i.h.bf16 %v14378_v52  ;;  %v5302_v44 = vpack.c.bf16 %v4540_v18, %v4540_v18  ;;  %5350 = vst.msk [vmem:[#allocation3 + $0x50] sm:$0xf] %vm5201_vm2, %v5286_v63  ;;  %v1851_v45 = vrot.slane %v13173_v23, 4  ;;  %v3715_v6 = vrot.slane %v13193_v10, 4 }
 0x3d3   : > { %5382 = vst.msk [vmem:[#allocation3 + $0xd0] sm:$0xf] %vm5201_vm2, %v5318_v61  ;;  %v2143_v48 = vrot.slane %v11323_v25, 4  ;;  %v11354_v53 = vunpack.i.h.bf16 %v14426_v47  ;;  %v2197_v56 = vrot.slane %v11334_v12, 4  ;;  %v2200_v29 = vsel %vm1457_vm1, %v11334_v12, %v2199_v41 }
 0x3d4   : > { %v11348_v43 = vunpack.i.l.bf16 %v14378_v52  ;;  %5366 = vst.msk [vmem:[#allocation3 + $0x90] sm:$0xf] %vm5201_vm2, %v5302_v44  ;;  %v2208_v42 = vperm.slane %v2200_v29, %v13231_v51  ;;  %v11333_v59 = vunpack.i.l.bf16 %v11332_v33  ;;  %v3771_v26 = vrot.slane %v13187_v35, 4 }
 0x3d5   : > { %v11353_v3 = vunpack.i.l.bf16 %v14426_v47  ;;  %v2198_v14 = vsel %vm1457_vm1, %v2197_v56, %v11324_v9  ;;  %v2299_v20 = vrot.slane %v13201_v50, 4  ;;  %v2243_v34 = vrot.slane %v13206_v1, 4 }
 0x3d6   : > { %v2204_v17 = vperm.slane %v2198_v14, %v13231_v51  ;;  %v2221_v24 = vrot.slane %v2208_v42, 4  ;;  %v17497_v40 = vrot.slane %v14140_v38, 4  ;;  %v2141_v2 = vrot.slane %v11333_v59, 4 }
 0x3d7   : > { %v14455_v41 = vrot.slane %v11349_v0, 4  ;;  %v14457_v33 = vrot.slane %v11354_v53, 4  ;;  %v2144_v46 = vsel %vm1457_vm1, %v11333_v59, %v2143_v48  ;;  %v17498_v19 = vrot.slane %v14137_v15, 4 }
 0x3d8   : > { %v2224_v22 = vsel %vm1457_vm1, %v2208_v42, %v17497_v40  ;;  %v2209_v36 = vrot.slane %v2204_v17, 4  ;;  %v2222_v61 = vsel %vm1457_vm1, %v2221_v24, %v14140_v38  ;;  %v2142_v18 = vsel %vm1457_vm1, %v2141_v2, %v11323_v25 }
 0x3d9   : > { %v2232_v9 = vperm.slane %v2224_v22, %v13274_v13  ;;  %v2212_v63 = vsel %vm1457_vm1, %v2204_v17, %v17498_v19  ;;  %v2228_v44 = vperm.slane %v2222_v61, %v13274_v13  ;;  %v2148_v29 = vperm.slane %v2142_v18, %v13231_v51 }
 0x3da   : > { %v2220_v12 = vperm.slane %v2212_v63, %v13274_v13  ;;  %v14471_v42 = vsel %vm1457_vm1, %v11354_v53, %v1851_v45  ;;  %v14475_v48 = vrot.slane %v11353_v3, 4  ;;  %v2210_v59 = vsel %vm1457_vm1, %v2209_v36, %v14137_v15 }
 0x3db   : > { %v2239_v56 = vrot.slane %v2232_v9, 4  ;;  %v2152_v38 = vperm.slane %v2144_v46, %v13231_v51  ;;  %v2216_v25 = vperm.slane %v2210_v59, %v13274_v13  ;;  %v2237_v17 = vrot.slane %v2228_v44, 4 }
 0x3dc   : > { %v2235_v14 = vrot.slane %v2220_v12, 4  ;;  %v2153_v45 = vrot.slane %v2148_v29, 4  ;;  %v17499_v53 = vrot.slane %v14152_v27, 4 }
 0x3dd   : > { %v2240_v24 = vsel %vm1457_vm1, 0.0, %v2239_v56  ;;  %v3066_v40 = vsel %vm1457_vm1, %v2239_v56, %v2228_v44  ;;  %v2233_v9 = vrot.slane %v2216_v25, 4  ;;  %v2238_v15 = vsel %vm1457_vm1, 0.0, %v2237_v17 }
 0x3de   : > { %v3071_v22 = vrot.slane %v2240_v24, 4  ;;  %v2156_v2 = vsel %vm1457_vm1, %v2148_v29, %v17499_v53  ;;  %v2236_v19 = vsel %vm1457_vm1, 0.0, %v2235_v14  ;;  %v3055_v46 = vsel %vm1457_vm1, %v2235_v14, %v2216_v25 }
 0x3df   : > { %v3059_v36 = vperm.slane %v3055_v46, %v13231_v51  ;;  %v3060_v63 = vrot.slane %v2236_v19, 4  ;;  %v3070_v61 = vperm.slane %v3066_v40, %v13231_v51  ;;  %v2234_v12 = vsel %vm1457_vm1, 0.0, %v2233_v9 }
 0x3e0   : > { %v3072_v18 = vsel %vm1457_vm1, %v3071_v22, %v2238_v15  ;;  %v2154_v56 = vsel %vm1457_vm1, %v2153_v45, %v14152_v27  ;;  %v2164_v29 = vperm.slane %v2156_v2, %v13274_v13  ;;  %v2165_v53 = vrot.slane %v2152_v38, 4 }
 0x3e1   : > { %v3076_v44 = vperm.slane %v3072_v18, %v13231_v51  ;;  %v3061_v59 = vsel %vm1457_vm1, %v3060_v63, %v2234_v12  ;;  %v3079_v17 = vrot.slane %v3059_v36, 4  ;;  %v3091_v25 = vrot.slane %v3070_v61, 4 }
 0x3e2   : > { %v2160_v14 = vperm.slane %v2154_v56, %v13274_v13  ;;  %v3065_v24 = vperm.slane %v3061_v59, %v13231_v51  ;;  %v17500_v22 = vrot.slane %v14146_v5, 4  ;;  %v2179_v2 = vrot.slane %v2164_v29, 4 }
 0x3e3   : > { %v3089_v40 = vrot.slane %v3076_v44, 4  ;;  %v3092_v19 = vsel %vm1457_vm1, %v3076_v44, %v3091_v25 }
 0x3e4   : > { %v2168_v9 = vsel %vm1457_vm1, %v2152_v38, %v17500_v22  ;;  %v2177_v45 = vrot.slane %v2160_v14, 4  ;;  %v3077_v15 = vrot.slane %v3065_v24, 4  ;;  %v3080_v46 = vsel %vm1457_vm1, %v3065_v24, %v3079_v17 }
 0x3e5   : > { %v2176_v27 = vperm.slane %v2168_v9, %v13274_v13  ;;  %v3090_v63 = vsel %vm1457_vm1, %v3089_v40, %v3070_v61  ;;  %v3100_v18 = vperm.slane %v3092_v19, %v13274_v13  ;;  %v3088_v12 = vperm.slane %v3080_v46, %v13274_v13 }
 0x3e6   : > { %v3096_v56 = vperm.slane %v3090_v63, %v13274_v13  ;;  %v2166_v38 = vsel %vm1457_vm1, %v2165_v53, %v14146_v5  ;;  %v2178_v44 = vsel %vm1457_vm1, 0.0, %v2177_v45  ;;  %v3078_v59 = vsel %vm1457_vm1, %v3077_v15, %v3059_v36 }
 0x3e7   : > { %v3105_v25 = vrot.slane %v3100_v18, 4  ;;  %v2172_v29 = vperm.slane %v2166_v38, %v13274_v13  ;;  %v2180_v17 = vsel %vm1457_vm1, 0.0, %v2179_v2  ;;  %v3084_v61 = vperm.slane %v3078_v59, %v13274_v13 }
 0x3e8   : > { %v3101_v24 = vrot.slane %v3096_v56, 4  ;;  %v3107_v40 = vrot.slane %v3088_v12, 4  ;;  %v2183_v22 = vrot.slane %v2176_v27, 4  ;;  %v3001_v46 = vsel %vm1457_vm1, %v2179_v2, %v2160_v14 }
 0x3e9   : > { %v3106_v9 = vsel %vm1457_vm1, %v3105_v25, %v3088_v12  ;;  %v2181_v19 = vrot.slane %v2172_v29, 4  ;;  %v3006_v5 = vrot.slane %v2180_v17, 4  ;;  %v3103_v45 = vrot.slane %v3084_v61, 4 }
 0x3ea   : > { %v3102_v53 = vsel %vm1457_vm1, %v3101_v24, %v3084_v61  ;;  %v3108_v36 = vsel %vm1457_vm1, %v3100_v18, %v3107_v40  ;;  %v5182_v15 = vpack.c.bf16 %v3106_v9, %v3106_v9  ;;  %v2184_v59 = vsel %vm1457_vm1, 0.0, %v2183_v22  ;;  %v14531_v24 = vpop.permute.xlu2 %11366 }
 0x3eb   : > { %v5150_v63 = vpack.c.bf16 %v3102_v53, %v3102_v53  ;;  %v5198_v38 = vpack.c.bf16 %v3108_v36, %v3108_v36  ;;  %v2182_v28 = vsel %vm1457_vm1, 0.0, %v2181_v19  ;;  %v3104_v27 = vsel %vm1457_vm1, %v3096_v56, %v3103_v45 }
 0x3ec   : > { %5247 = vst.msk [vmem:[#allocation2 + $0xb4] sm:$0xf] %vm5201_vm2, %v5182_v15  ;;  %v3005_v12 = vperm.slane %v3001_v46, %v13231_v51  ;;  %v3007_v14 = vsel %vm1457_vm1, %v3006_v5, %v2178_v44  ;;  %v3012_v2 = vsel %vm1457_vm1, %v2183_v22, %v2172_v29  ;;  %v5166_v25 = vpack.c.bf16 %v3104_v27, %v3104_v27 }
 0x3ed   : > { %5215 = vst.msk [vmem:[#allocation2 + $0x34] sm:$0xf] %vm5201_vm2, %v5150_v63  ;;  %v3011_v18 = vperm.slane %v3007_v14, %v13231_v51  ;;  %v3016_v17 = vperm.slane %v3012_v2, %v13231_v51  ;;  %v3017_v61 = vrot.slane %v2184_v59, 4  ;;  %v14535_v56 = vrot.slane %v11348_v43, 4 }
 0x3ee   : > { %v1850_v44 = vsel %vm1457_vm1, %v14457_v33, %v13173_v23  ;;  %v1796_v29 = vsel %vm1457_vm1, %v11353_v3, %v1795_v30  ;;  %5263 = vst.msk [vmem:[#allocation2 + $0xf4] sm:$0xf] %vm5201_vm2, %v5198_v38  ;;  %v3025_v40 = vrot.slane %v3005_v12, 4  ;;  %v1794_v22 = vsel %vm1457_vm1, %v14475_v48, %v13176_v11 }
 0x3ef   : > { %5231 = vst.msk [vmem:[#allocation2 + $0x74] sm:$0xf] %vm5201_vm2, %v5166_v25  ;;  %v3018_v9 = vsel %vm1457_vm1, %v3017_v61, %v2182_v28  ;;  %v3023_v19 = vrot.slane %v3011_v18, 4  ;;  %v3037_v46 = vrot.slane %v3016_v17, 4  ;;  %v14553_v23 = vperm.slane %v14471_v42, %v13231_v51 }
 0x3f0   : > { %v3022_v47 = vperm.slane %v3018_v9, %v13231_v51  ;;  %v3026_v30 = vsel %vm1457_vm1, %v3011_v18, %v3025_v40  ;;  %v11369_v3 = vunpack.i.h.bf16 %v14531_v24  ;;  %v14559_v33 = vperm.slane %v1850_v44, %v13231_v51  ;;  %v11357_v44 = vpop.permute.xlu0 %11356 }
 0x3f1   : > { %v14562_v11 = vperm.slane %v1796_v29, %v13231_v51  ;;  %v3024_v28 = vsel %vm1457_vm1, %v3023_v19, %v3005_v12  ;;  %v3034_v48 = vperm.slane %v3026_v30, %v13274_v13  ;;  %v14567_v5 = vperm.slane %v1794_v22, %v13231_v51 }
 0x3f2   : > { %v3030_v42 = vperm.slane %v3024_v28, %v13274_v13  ;;  %v3035_v53 = vrot.slane %v3022_v47, 4  ;;  %v3038_v45 = vsel %vm1457_vm1, %v3022_v47, %v3037_v46  ;;  %v4163_v63 = vrot.slane %v13227_v55, 4 }
 0x3f3   : > { %v3046_v36 = vperm.slane %v3038_v45, %v13274_v13  ;;  %v3053_v15 = vrot.slane %v3034_v48, 4  ;;  %v4219_v38 = vrot.slane %v13216_v60, 4  ;;  %v1887_v59 = vrot.slane %v14553_v23, 4 }
 0x3f4   : > { %v3036_v27 = vsel %vm1457_vm1, %v3035_v53, %v3016_v17  ;;  %v3049_v12 = vrot.slane %v3030_v42, 4  ;;  %v3769_v14 = vrot.slane %v11369_v3, 4  ;;  %v3772_v61 = vsel %vm1457_vm1, %v11369_v3, %v3771_v26  ;;  %v14584_v17 = vpop.permute.xlu1 %11336 }
 0x3f5   : > { %v3042_v2 = vperm.slane %v3036_v27, %v13274_v13  ;;  %v3051_v25 = vrot.slane %v3046_v36, 4  ;;  %v3054_v18 = vsel %vm1457_vm1, %v3046_v36, %v3053_v15  ;;  %v1875_v29 = vrot.slane %v14559_v33, 4 }
 0x3f6   : > { %v1819_v40 = vrot.slane %v14567_v5, 4  ;;  %v1831_v22 = vrot.slane %v14562_v11, 4  ;;  %v5197_v9 = vpack.c.bf16 %v3054_v18, %v3054_v18  ;;  %v11368_v30 = vunpack.i.l.bf16 %v14531_v24 }
 0x3f7   : > { %v3047_v19 = vrot.slane %v3042_v2, 4  ;;  %v3050_v46 = vsel %vm1457_vm1, %v3042_v2, %v3049_v12  ;;  %v3052_v47 = vsel %vm1457_vm1, %v3051_v25, %v3034_v48  ;;  %v14591_v26 = vperm.slane %v3772_v61, %v13231_v51 }
 0x3f8   : > { %v5165_v28 = vpack.c.bf16 %v3050_v46, %v3050_v46  ;;  %v5181_v53 = vpack.c.bf16 %v3052_v47, %v3052_v47  ;;  %5262 = vst.msk [vmem:[#allocation2 + $0xf0] sm:$0xf] %vm5201_vm2, %v5197_v9  ;;  %v11359_v3 = vunpack.i.h.bf16 %v11357_v44  ;;  %v11339_v36 = vunpack.i.h.bf16 %v14584_v17 }
 0x3f9   : > { %v3048_v45 = vsel %vm1457_vm1, %v3047_v19, %v3030_v42  ;;  %v3770_v15 = vsel %vm1457_vm1, %v3769_v14, %v13187_v35  ;;  %v11358_v27 = vunpack.i.l.bf16 %v11357_v44  ;;  %v11338_v48 = vunpack.i.l.bf16 %v14584_v17 }
 0x3fa   : > { %v5149_v12 = vpack.c.bf16 %v3048_v45, %v3048_v45  ;;  %5230 = vst.msk [vmem:[#allocation2 + $0x70] sm:$0xf] %vm5201_vm2, %v5165_v28  ;;  %v1861_v2 = vrot.slane %v11359_v3, 4  ;;  %v1864_v25 = vsel %vm1457_vm1, %v11359_v3, %v14455_v41  ;;  %v14604_v42 = vrot.slane %v11368_v30, 4 }
 0x3fb   : > { %5246 = vst.msk [vmem:[#allocation2 + $0xb0] sm:$0xf] %vm5201_vm2, %v5181_v53  ;;  %v1872_v18 = vperm.slane %v1864_v25, %v13231_v51  ;;  %v1805_v61 = vrot.slane %v11358_v27, 4  ;;  %v1808_v35 = vsel %vm1457_vm1, %v11358_v27, %v14535_v56  ;;  %v14611_v14 = vperm.slane %v3770_v15, %v13231_v51 }
 0x3fc   : > { %5214 = vst.msk [vmem:[#allocation2 + $0x30] sm:$0xf] %vm5201_vm2, %v5149_v12  ;;  %v3807_v44 = vrot.slane %v14591_v26, 4  ;;  %v1862_v41 = vsel %vm1457_vm1, %v1861_v2, %v11349_v0  ;;  %v1816_v9 = vperm.slane %v1808_v35, %v13231_v51  ;;  %v17505_v17 = vrot.slane %v14399_v7, 4 }
 0x3fd   : > { %v1868_v19 = vperm.slane %v1862_v41, %v13231_v51  ;;  %v1885_v46 = vrot.slane %v1872_v18, 4  ;;  %v1888_v47 = vsel %vm1457_vm1, %v1872_v18, %v1887_v59  ;;  %v1806_v56 = vsel %vm1457_vm1, %v1805_v61, %v11348_v43 }
 0x3fe   : > { %v1896_v28 = vperm.slane %v1888_v47, %v13274_v13  ;;  %v1812_v53 = vperm.slane %v1806_v56, %v13231_v51  ;;  %v1829_v3 = vrot.slane %v1816_v9, 4  ;;  %v1832_v45 = vsel %vm1457_vm1, %v1816_v9, %v1831_v22 }
 0x3ff   : > { %v1873_v15 = vrot.slane %v1868_v19, 4  ;;  %v1876_v0 = vsel %vm1457_vm1, %v1868_v19, %v1875_v29  ;;  %v1886_v27 = vsel %vm1457_vm1, %v1885_v46, %v14553_v23  ;;  %v1840_v12 = vperm.slane %v1832_v45, %v13274_v13 }
 0x400   : > { %v1884_v59 = vperm.slane %v1876_v0, %v13274_v13  ;;  %v1892_v52 = vperm.slane %v1886_v27, %v13274_v13  ;;  %v1903_v43 = vrot.slane %v1896_v28, 4  ;;  %v1817_v2 = vrot.slane %v1812_v53, 4 }
 0x401   : > { %v1874_v25 = vsel %vm1457_vm1, %v1873_v15, %v14559_v33  ;;  %v1820_v18 = vsel %vm1457_vm1, %v1812_v53, %v1819_v40  ;;  %v1830_v22 = vsel %vm1457_vm1, %v1829_v3, %v14562_v11  ;;  %v1847_v29 = vrot.slane %v1840_v12, 4 }
 0x402   : > { %v1880_v61 = vperm.slane %v1874_v25, %v13274_v13  ;;  %v1899_v23 = vrot.slane %v1884_v59, 4  ;;  %v1901_v35 = vrot.slane %v1892_v52, 4  ;;  %v1904_v41 = vsel %vm1457_vm1, 0.0, %v1903_v43 }
 0x403   : > { %v2742_v9 = vsel %vm1457_vm1, %v1903_v43, %v1892_v52  ;;  %v2747_v19 = vrot.slane %v1904_v41, 4  ;;  %v1818_v46 = vsel %vm1457_vm1, %v1817_v2, %v14567_v5  ;;  %v1828_v33 = vperm.slane %v1820_v18, %v13274_v13 }
 0x404   : > { %v1897_v47 = vrot.slane %v1880_v61, 4  ;;  %v1900_v40 = vsel %vm1457_vm1, 0.0, %v1899_v23  ;;  %v1902_v11 = vsel %vm1457_vm1, 0.0, %v1901_v35  ;;  %v2731_v56 = vsel %vm1457_vm1, %v1899_v23, %v1880_v61 }
 0x405   : > { %v2735_v28 = vperm.slane %v2731_v56, %v13231_v51  ;;  %v2736_v53 = vrot.slane %v1900_v40, 4  ;;  %v2746_v3 = vperm.slane %v2742_v9, %v13231_v51  ;;  %v2748_v45 = vsel %vm1457_vm1, %v2747_v19, %v1902_v11 }
 0x406   : > { %v1898_v15 = vsel %vm1457_vm1, 0.0, %v1897_v47  ;;  %v2752_v5 = vperm.slane %v2748_v45, %v13231_v51  ;;  %v1824_v0 = vperm.slane %v1818_v46, %v13274_v13  ;;  %v1836_v27 = vperm.slane %v1830_v22, %v13274_v13 }
 0x407   : > { %v2737_v12 = vsel %vm1457_vm1, %v2736_v53, %v1898_v15  ;;  %v2755_v59 = vrot.slane %v2735_v28, 4  ;;  %v2767_v52 = vrot.slane %v2746_v3, 4  ;;  %v1843_v43 = vrot.slane %v1828_v33, 4 }
 0x408   : > { %v2741_v2 = vperm.slane %v2737_v12, %v13231_v51  ;;  %v2765_v25 = vrot.slane %v2752_v5, 4  ;;  %v1841_v18 = vrot.slane %v1824_v0, 4  ;;  %v1845_v61 = vrot.slane %v1836_v27, 4 }
 0x409   : > { %v2768_v23 = vsel %vm1457_vm1, %v2752_v5, %v2767_v52  ;;  %v1844_v35 = vsel %vm1457_vm1, 0.0, %v1843_v43  ;;  %v1848_v41 = vsel %vm1457_vm1, 0.0, %v1847_v29  ;;  %v2677_v9 = vsel %vm1457_vm1, %v1843_v43, %v1824_v0 }
 0x40a   : > { %v2753_v19 = vrot.slane %v2741_v2, 4  ;;  %v2756_v22 = vsel %vm1457_vm1, %v2741_v2, %v2755_v59  ;;  %v2766_v46 = vsel %vm1457_vm1, %v2765_v25, %v2746_v3  ;;  %v2776_v33 = vperm.slane %v2768_v23, %v13274_v13 }
 0x40b   : > { %v2764_v47 = vperm.slane %v2756_v22, %v13274_v13  ;;  %v2772_v40 = vperm.slane %v2766_v46, %v13274_v13  ;;  %v1842_v11 = vsel %vm1457_vm1, 0.0, %v1841_v18  ;;  %v1846_v56 = vsel %vm1457_vm1, 0.0, %v1845_v61 }
 0x40c   : > { %v2754_v53 = vsel %vm1457_vm1, %v2753_v19, %v2735_v28  ;;  %v2781_v45 = vrot.slane %v2776_v33, 4  ;;  %v2681_v15 = vperm.slane %v2677_v9, %v13231_v51  ;;  %v2682_v5 = vrot.slane %v1844_v35, 4  ;;  %v11362_v35 = vpop.permute.xlu1 %11361 }
 0x40d   : > { %v2760_v0 = vperm.slane %v2754_v53, %v13274_v13  ;;  %v2777_v12 = vrot.slane %v2772_v40, 4  ;;  %v2783_v3 = vrot.slane %v2764_v47, 4  ;;  %v2688_v59 = vsel %vm1457_vm1, %v1847_v29, %v1836_v27 }
 0x40e   : > { %v2782_v52 = vsel %vm1457_vm1, %v2781_v45, %v2764_v47  ;;  %v2683_v43 = vsel %vm1457_vm1, %v2682_v5, %v1842_v11  ;;  %v2692_v2 = vperm.slane %v2688_v59, %v13231_v51  ;;  %v2693_v25 = vrot.slane %v1848_v41, 4 }
 0x40f   : > { %v2778_v18 = vsel %vm1457_vm1, %v2777_v12, %v2760_v0  ;;  %v2779_v28 = vrot.slane %v2760_v0, 4  ;;  %v2784_v61 = vsel %vm1457_vm1, %v2776_v33, %v2783_v3  ;;  %v5176_v23 = vpack.c.bf16 %v2782_v52, %v2782_v52  ;;  %v11372_v52 = vpop.permute.xlu0 %11371 }
 0x410   : > { %v5144_v9 = vpack.c.bf16 %v2778_v18, %v2778_v18  ;;  %v5192_v19 = vpack.c.bf16 %v2784_v61, %v2784_v61  ;;  %v2687_v22 = vperm.slane %v2683_v43, %v13231_v51  ;;  %v2694_v29 = vsel %vm1457_vm1, %v2693_v25, %v1846_v56 }
 0x411   : > { %v2780_v27 = vsel %vm1457_vm1, %v2772_v40, %v2779_v28  ;;  %5241 = vst.msk [vmem:[#allocation2 + $0x9c] sm:$0xf] %vm5201_vm2, %v5176_v23  ;;  %v2698_v46 = vperm.slane %v2694_v29, %v13231_v51  ;;  %v2701_v41 = vrot.slane %v2681_v15, 4  ;;  %v2713_v47 = vrot.slane %v2692_v2, 4 }
 0x412   : > { %v3714_v33 = vsel %vm1457_vm1, %v14604_v42, %v13193_v10  ;;  %v5160_v11 = vpack.c.bf16 %v2780_v27, %v2780_v27  ;;  %5209 = vst.msk [vmem:[#allocation2 + $0x1c] sm:$0xf] %vm5201_vm2, %v5144_v9  ;;  %v2699_v53 = vrot.slane %v2687_v22, 4  ;;  %v11364_v45 = vunpack.i.h.bf16 %v11362_v35 }
 0x413   : > { %5257 = vst.msk [vmem:[#allocation2 + $0xdc] sm:$0xf] %vm5201_vm2, %v5192_v19  ;;  %v2702_v56 = vsel %vm1457_vm1, %v2687_v22, %v2701_v41  ;;  %v2711_v40 = vrot.slane %v2698_v46, 4  ;;  %v2714_v5 = vsel %vm1457_vm1, %v2698_v46, %v2713_v47  ;;  %v11363_v0 = vunpack.i.l.bf16 %v11362_v35 }
 0x414   : > { %v3795_v12 = vrot.slane %v14611_v14, 4  ;;  %5225 = vst.msk [vmem:[#allocation2 + $0x5c] sm:$0xf] %vm5201_vm2, %v5160_v11  ;;  %v2700_v3 = vsel %vm1457_vm1, %v2699_v53, %v2681_v15  ;;  %v2710_v42 = vperm.slane %v2702_v56, %v13274_v13  ;;  %v2722_v59 = vperm.slane %v2714_v5, %v13274_v13 }
 0x415   : > { %v3716_v43 = vsel %vm1457_vm1, %v11368_v30, %v3715_v6  ;;  %v3720_v25 = vperm.slane %v3714_v33, %v13231_v51  ;;  %v2706_v18 = vperm.slane %v2700_v3, %v13274_v13  ;;  %v2712_v28 = vsel %vm1457_vm1, %v2711_v40, %v2692_v2 }
 0x416   : > { %v2718_v61 = vperm.slane %v2712_v28, %v13274_v13  ;;  %v2727_v15 = vrot.slane %v2722_v59, 4  ;;  %v2729_v23 = vrot.slane %v2710_v42, 4  ;;  %v3783_v35 = vrot.slane %v11364_v45, 4 }
 0x417   : > { %v2725_v9 = vrot.slane %v2706_v18, 4  ;;  %v3727_v19 = vrot.slane %v11363_v0, 4  ;;  %v11374_v22 = vunpack.i.h.bf16 %v11372_v52  ;;  %v11373_v29 = vunpack.i.l.bf16 %v11372_v52 }
 0x418   : > { %v3724_v10 = vperm.slane %v3716_v43, %v13231_v51  ;;  %v2723_v24 = vrot.slane %v2718_v61, 4  ;;  %v2728_v6 = vsel %vm1457_vm1, %v2727_v15, %v2710_v42  ;;  %v2730_v30 = vsel %vm1457_vm1, %v2722_v59, %v2729_v23 }
 0x419   : > { %v2726_v27 = vsel %vm1457_vm1, %v2718_v61, %v2725_v9  ;;  %v5175_v46 = vpack.c.bf16 %v2728_v6, %v2728_v6  ;;  %v5191_v2 = vpack.c.bf16 %v2730_v30, %v2730_v30  ;;  %v3781_v41 = vrot.slane %v11374_v22, 4 }
 0x41a   : > { %v2724_v47 = vsel %vm1457_vm1, %v2723_v24, %v2706_v18  ;;  %v5159_v33 = vpack.c.bf16 %v2726_v27, %v2726_v27  ;;  %v3784_v11 = vsel %vm1457_vm1, %v11374_v22, %v3783_v35  ;;  %v3725_v53 = vrot.slane %v11373_v29, 4 }
 0x41b   : > { %v5143_v56 = vpack.c.bf16 %v2724_v47, %v2724_v47  ;;  %5240 = vst.msk [vmem:[#allocation2 + $0x98] sm:$0xf] %vm5201_vm2, %v5175_v46  ;;  %v3782_v40 = vsel %vm1457_vm1, %v3781_v41, %v11364_v45  ;;  %v3792_v5 = vperm.slane %v3784_v11, %v13231_v51  ;;  %v3728_v3 = vsel %vm1457_vm1, %v11373_v29, %v3727_v19 }
 0x41c   : > { %v3739_v42 = vrot.slane %v3720_v25, 4  ;;  %5224 = vst.msk [vmem:[#allocation2 + $0x58] sm:$0xf] %vm5201_vm2, %v5159_v33  ;;  %v3788_v59 = vperm.slane %v3782_v40, %v13231_v51  ;;  %v3726_v52 = vsel %vm1457_vm1, %v3725_v53, %v11363_v0  ;;  %v3736_v43 = vperm.slane %v3728_v3, %v13231_v51 }
 0x41d   : > { %v3751_v18 = vrot.slane %v3724_v10, 4  ;;  %5208 = vst.msk [vmem:[#allocation2 + $0x18] sm:$0xf] %vm5201_vm2, %v5143_v56  ;;  %v3805_v28 = vrot.slane %v3792_v5, 4  ;;  %v3808_v45 = vsel %vm1457_vm1, %v3792_v5, %v3807_v44  ;;  %v3732_v61 = vperm.slane %v3726_v52, %v13231_v51 }
 0x41e   : > { %5256 = vst.msk [vmem:[#allocation2 + $0xd8] sm:$0xf] %vm5201_vm2, %v5191_v2  ;;  %v3793_v15 = vrot.slane %v3788_v59, 4  ;;  %v3796_v23 = vsel %vm1457_vm1, %v3788_v59, %v3795_v12  ;;  %v3816_v35 = vperm.slane %v3808_v45, %v13274_v13  ;;  %v3749_v0 = vrot.slane %v3736_v43, 4 }
 0x41f   : > { %v3804_v9 = vperm.slane %v3796_v23, %v13274_v13  ;;  %v3806_v19 = vsel %vm1457_vm1, %v3805_v28, %v14591_v26  ;;  %v3737_v22 = vrot.slane %v3732_v61, 4  ;;  %v3740_v29 = vsel %vm1457_vm1, %v3732_v61, %v3739_v42  ;;  %v14745_v28 = vpop.permute.xlu1 %11381 }
 0x420   : > { %v3794_v44 = vsel %vm1457_vm1, %v3793_v15, %v14611_v14  ;;  %v3812_v24 = vperm.slane %v3806_v19, %v13274_v13  ;;  %v3823_v6 = vrot.slane %v3816_v35, 4  ;;  %v3748_v30 = vperm.slane %v3740_v29, %v13274_v13 }
 0x421   : > { %v3800_v12 = vperm.slane %v3794_v44, %v13274_v13  ;;  %v3819_v27 = vrot.slane %v3804_v9, 4  ;;  %v3738_v46 = vsel %vm1457_vm1, %v3737_v22, %v3720_v25  ;;  %v3750_v2 = vsel %vm1457_vm1, %v3749_v0, %v3724_v10 }
 0x422   : > { %v3821_v41 = vrot.slane %v3812_v24, 4  ;;  %v3824_v26 = vsel %vm1457_vm1, 0.0, %v3823_v6  ;;  %v4662_v47 = vsel %vm1457_vm1, %v3823_v6, %v3812_v24  ;;  %v3744_v33 = vperm.slane %v3738_v46, %v13274_v13 }
 0x423   : > { %v3817_v14 = vrot.slane %v3800_v12, 4  ;;  %v3820_v11 = vsel %vm1457_vm1, 0.0, %v3819_v27  ;;  %v4651_v53 = vsel %vm1457_vm1, %v3819_v27, %v3800_v12  ;;  %v4666_v56 = vperm.slane %v4662_v47, %v13231_v51 }
 0x424   : > { %v3822_v40 = vsel %vm1457_vm1, 0.0, %v3821_v41  ;;  %v4655_v25 = vperm.slane %v4651_v53, %v13231_v51  ;;  %v4656_v5 = vrot.slane %v3820_v11, 4  ;;  %v4667_v10 = vrot.slane %v3824_v26, 4 }
 0x425   : > { %v3818_v3 = vsel %vm1457_vm1, 0.0, %v3817_v14  ;;  %v4687_v42 = vrot.slane %v4666_v56, 4  ;;  %v3752_v59 = vsel %vm1457_vm1, %v3736_v43, %v3751_v18  ;;  %v3756_v52 = vperm.slane %v3750_v2, %v13274_v13 }
 0x426   : > { %v4657_v45 = vsel %vm1457_vm1, %v4656_v5, %v3818_v3  ;;  %v4668_v61 = vsel %vm1457_vm1, %v4667_v10, %v3822_v40  ;;  %v4675_v15 = vrot.slane %v4655_v25, 4  ;;  %v3760_v23 = vperm.slane %v3752_v59, %v13274_v13 }
 0x427   : > { %v4661_v35 = vperm.slane %v4657_v45, %v13231_v51  ;;  %v4672_v0 = vperm.slane %v4668_v61, %v13231_v51  ;;  %v3761_v9 = vrot.slane %v3744_v33, 4  ;;  %v3763_v19 = vrot.slane %v3748_v30, 4  ;;  %v14768_v45 = vpop.permute.xlu2 %11386 }
 0x428   : > { %v3765_v22 = vrot.slane %v3756_v52, 4  ;;  %v3767_v29 = vrot.slane %v3760_v23, 4  ;;  %v11384_v43 = vunpack.i.h.bf16 %v14745_v28  ;;  %v11383_v18 = vunpack.i.l.bf16 %v14745_v28 }
 0x429   : > { %v4673_v44 = vrot.slane %v4661_v35, 4  ;;  %v4676_v24 = vsel %vm1457_vm1, %v4661_v35, %v4675_v15  ;;  %v4685_v6 = vrot.slane %v4672_v0, 4  ;;  %v4688_v12 = vsel %vm1457_vm1, %v4672_v0, %v4687_v42 }
 0x42a   : > { %v4684_v27 = vperm.slane %v4676_v24, %v13274_v13  ;;  %v4696_v46 = vperm.slane %v4688_v12, %v13274_v13  ;;  %v3762_v2 = vsel %vm1457_vm1, 0.0, %v3761_v9  ;;  %v3764_v30 = vsel %vm1457_vm1, 0.0, %v3763_v19 }
 0x42b   : > { %v4674_v41 = vsel %vm1457_vm1, %v4673_v44, %v4655_v25  ;;  %v4686_v26 = vsel %vm1457_vm1, %v4685_v6, %v4666_v56  ;;  %v3766_v47 = vsel %vm1457_vm1, 0.0, %v3765_v22  ;;  %v3768_v14 = vsel %vm1457_vm1, 0.0, %v3767_v29 }
 0x42c   : > { %v4680_v11 = vperm.slane %v4674_v41, %v13274_v13  ;;  %v4692_v53 = vperm.slane %v4686_v26, %v13274_v13  ;;  %v4701_v40 = vrot.slane %v4696_v46, 4  ;;  %v4703_v5 = vrot.slane %v4684_v27, 4 }
 0x42d   : > { %v4597_v10 = vsel %vm1457_vm1, %v3763_v19, %v3744_v33  ;;  %v4602_v3 = vrot.slane %v3764_v30, 4  ;;  %v4608_v42 = vsel %vm1457_vm1, %v3767_v29, %v3756_v52  ;;  %v4613_v59 = vrot.slane %v3768_v14, 4 }
 0x42e   : > { %v4697_v25 = vrot.slane %v4692_v53, 4  ;;  %v4699_v56 = vrot.slane %v4680_v11, 4  ;;  %v4702_v61 = vsel %vm1457_vm1, %v4701_v40, %v4684_v27  ;;  %v4704_v15 = vsel %vm1457_vm1, %v4696_v46, %v4703_v5 }
 0x42f   : > { %v5305_v23 = vpack.c.bf16 %v4702_v61, %v4702_v61  ;;  %v5321_v35 = vpack.c.bf16 %v4704_v15, %v4704_v15  ;;  %v4601_v0 = vperm.slane %v4597_v10, %v13231_v51  ;;  %v4603_v9 = vsel %vm1457_vm1, %v4602_v3, %v3762_v2 }
 0x430   : > { %v4698_v33 = vsel %vm1457_vm1, %v4697_v25, %v4680_v11  ;;  %v4700_v19 = vsel %vm1457_vm1, %v4692_v53, %v4699_v56  ;;  %v4607_v52 = vperm.slane %v4603_v9, %v13231_v51  ;;  %v4612_v22 = vperm.slane %v4608_v42, %v13231_v51  ;;  %v14816_v9 = vpop.permute.xlu2 %11411 }
 0x431   : > { %v5273_v29 = vpack.c.bf16 %v4698_v33, %v4698_v33  ;;  %v5289_v44 = vpack.c.bf16 %v4700_v19, %v4700_v19  ;;  %5369 = vst.msk [vmem:[#allocation3 + $0x9c] sm:$0xf] %vm5201_vm2, %v5305_v23  ;;  %v4614_v24 = vsel %vm1457_vm1, %v4613_v59, %v3766_v47  ;;  %v4621_v6 = vrot.slane %v4601_v0, 4  ;;  %v11377_v33 = vpop.permute.xlu0 %11376 }
 0x432   : > { %5385 = vst.msk [vmem:[#allocation3 + $0xdc] sm:$0xf] %vm5201_vm2, %v5321_v35  ;;  %v4618_v12 = vperm.slane %v4614_v24, %v13231_v51  ;;  %v4619_v27 = vrot.slane %v4607_v52, 4  ;;  %v4633_v46 = vrot.slane %v4612_v22, 4  ;;  %v2297_v2 = vrot.slane %v11384_v43, 4 }
 0x433   : > { %v14784_v30 = vrot.slane %v11339_v36, 4  ;;  %v11389_v41 = vunpack.i.h.bf16 %v14768_v45  ;;  %5337 = vst.msk [vmem:[#allocation3 + $0x1c] sm:$0xf] %vm5201_vm2, %v5273_v29  ;;  %v4622_v26 = vsel %vm1457_vm1, %v4607_v52, %v4621_v6  ;;  %v2241_v47 = vrot.slane %v11383_v18, 4 }
 0x434   : > { %5353 = vst.msk [vmem:[#allocation3 + $0x5c] sm:$0xf] %vm5201_vm2, %v5289_v44  ;;  %v4620_v14 = vsel %vm1457_vm1, %v4619_v27, %v4601_v0  ;;  %v4630_v11 = vperm.slane %v4622_v26, %v13274_v13  ;;  %v4631_v53 = vrot.slane %v4618_v12, 4  ;;  %v4634_v40 = vsel %vm1457_vm1, %v4618_v12, %v4633_v46 }
 0x435   : > { %v4626_v5 = vperm.slane %v4620_v14, %v13274_v13  ;;  %v4642_v10 = vperm.slane %v4634_v40, %v13274_v13  ;;  %v2298_v3 = vsel %vm1457_vm1, %v2297_v2, %v13201_v50  ;;  %v2300_v42 = vsel %vm1457_vm1, %v11384_v43, %v2299_v20 }
 0x436   : > { %v11388_v59 = vunpack.i.l.bf16 %v14768_v45  ;;  %v4632_v25 = vsel %vm1457_vm1, %v4631_v53, %v4612_v22  ;;  %v4649_v56 = vrot.slane %v4630_v11, 4  ;;  %v2242_v61 = vsel %vm1457_vm1, %v2241_v47, %v13206_v1 }
 0x437   : > { %v4638_v15 = vperm.slane %v4632_v25, %v13274_v13  ;;  %v4645_v23 = vrot.slane %v4626_v5, 4  ;;  %v4647_v35 = vrot.slane %v4642_v10, 4  ;;  %v2244_v50 = vsel %vm1457_vm1, %v11383_v18, %v2243_v34 }
 0x438   : > { %v4650_v20 = vsel %vm1457_vm1, %v4642_v10, %v4649_v56  ;;  %v2304_v43 = vperm.slane %v2298_v3, %v13231_v51  ;;  %v2308_v45 = vperm.slane %v2300_v42, %v13231_v51  ;;  %v2248_v0 = vperm.slane %v2242_v61, %v13231_v51 }
 0x439   : > { %v4643_v19 = vrot.slane %v4638_v15, 4  ;;  %v4646_v52 = vsel %vm1457_vm1, %v4638_v15, %v4645_v23  ;;  %v4648_v1 = vsel %vm1457_vm1, %v4647_v35, %v4630_v11  ;;  %v5320_v22 = vpack.c.bf16 %v4650_v20, %v4650_v20 }
 0x43a   : > { %v14822_v34 = vrot.slane %v11338_v48, 4  ;;  %v5288_v28 = vpack.c.bf16 %v4646_v52, %v4646_v52  ;;  %v5304_v18 = vpack.c.bf16 %v4648_v1, %v4648_v1  ;;  %v2252_v29 = vperm.slane %v2244_v50, %v13231_v51 }
 0x43b   : > { %v2309_v44 = vrot.slane %v11389_v41, 4  ;;  %v4644_v24 = vsel %vm1457_vm1, %v4643_v19, %v4626_v5  ;;  %5384 = vst.msk [vmem:[#allocation3 + $0xd8] sm:$0xf] %vm5201_vm2, %v5320_v22  ;;  %v11414_v6 = vunpack.i.h.bf16 %v14816_v9  ;;  %v11379_v12 = vunpack.i.h.bf16 %v11377_v33 }
 0x43c   : > { %v2253_v27 = vrot.slane %v11388_v59, 4  ;;  %v5272_v46 = vpack.c.bf16 %v4644_v24, %v4644_v24  ;;  %5352 = vst.msk [vmem:[#allocation3 + $0x58] sm:$0xf] %vm5201_vm2, %v5288_v28  ;;  %v2323_v2 = vrot.slane %v2304_v43, 4  ;;  %v11378_v26 = vunpack.i.l.bf16 %v11377_v33 }
 0x43d   : > { %5368 = vst.msk [vmem:[#allocation3 + $0x98] sm:$0xf] %vm5201_vm2, %v5304_v18  ;;  %v2335_v47 = vrot.slane %v2308_v45, 4  ;;  %v2267_v14 = vrot.slane %v2248_v0, 4  ;;  %v2310_v11 = vsel %vm1457_vm1, %v2309_v44, %v11379_v12  ;;  %v2311_v53 = vrot.slane %v11379_v12, 4 }
 0x43e   : > { %5336 = vst.msk [vmem:[#allocation3 + $0x18] sm:$0xf] %vm5201_vm2, %v5272_v46  ;;  %v2279_v40 = vrot.slane %v2252_v29, 4  ;;  %v2316_v5 = vperm.slane %v2310_v11, %v13231_v51  ;;  %v2254_v10 = vsel %vm1457_vm1, %v2253_v27, %v11378_v26  ;;  %v2255_v3 = vrot.slane %v11378_v26, 4 }
 0x43f   : > { %v14836_v42 = vrot.slane %v11414_v6, 4  ;;  %v11413_v25 = vunpack.i.l.bf16 %v14816_v9  ;;  %v2312_v56 = vsel %vm1457_vm1, %v11389_v41, %v2311_v53  ;;  %v2260_v61 = vperm.slane %v2254_v10, %v13231_v51 }
 0x440   : > { %v2320_v15 = vperm.slane %v2312_v56, %v13231_v51  ;;  %v2321_v23 = vrot.slane %v2316_v5, 4  ;;  %v2324_v35 = vsel %vm1457_vm1, %v2316_v5, %v2323_v2  ;;  %v2256_v50 = vsel %vm1457_vm1, %v11388_v59, %v2255_v3 }
 0x441   : > { %v2332_v20 = vperm.slane %v2324_v35, %v13274_v13  ;;  %v2264_v33 = vperm.slane %v2256_v50, %v13231_v51  ;;  %v2265_v19 = vrot.slane %v2260_v61, 4  ;;  %v2268_v52 = vsel %vm1457_vm1, %v2260_v61, %v2267_v14 }
 0x442   : > { %v2322_v1 = vsel %vm1457_vm1, %v2321_v23, %v2304_v43  ;;  %v2333_v22 = vrot.slane %v2320_v15, 4  ;;  %v2336_v41 = vsel %vm1457_vm1, %v2320_v15, %v2335_v47  ;;  %v2276_v28 = vperm.slane %v2268_v52, %v13274_v13 }
 0x443   : > { %v2328_v18 = vperm.slane %v2322_v1, %v13274_v13  ;;  %v2344_v44 = vperm.slane %v2336_v41, %v13274_v13  ;;  %v2347_v24 = vrot.slane %v2332_v20, 4  ;;  %v2266_v59 = vsel %vm1457_vm1, %v2265_v19, %v2248_v0 }
 0x444   : > { %v2334_v12 = vsel %vm1457_vm1, %v2333_v22, %v2308_v45  ;;  %v2272_v27 = vperm.slane %v2266_v59, %v13274_v13  ;;  %v2277_v46 = vrot.slane %v2264_v33, 4  ;;  %v2280_v2 = vsel %vm1457_vm1, %v2264_v33, %v2279_v40 }
 0x445   : > { %v2340_v43 = vperm.slane %v2334_v12, %v13274_v13  ;;  %v2345_v26 = vrot.slane %v2328_v18, 4  ;;  %v2348_v47 = vsel %vm1457_vm1, 0.0, %v2347_v24  ;;  %v2351_v14 = vrot.slane %v2344_v44, 4 }
 0x446   : > { %v3163_v11 = vsel %vm1457_vm1, %v2347_v24, %v2328_v18  ;;  %v3168_v53 = vrot.slane %v2348_v47, 4  ;;  %v2278_v5 = vsel %vm1457_vm1, %v2277_v46, %v2252_v29  ;;  %v2288_v0 = vperm.slane %v2280_v2, %v13274_v13 }
 0x447   : > { %v2346_v45 = vsel %vm1457_vm1, 0.0, %v2345_v26  ;;  %v2349_v10 = vrot.slane %v2340_v43, 4  ;;  %v2352_v3 = vsel %vm1457_vm1, 0.0, %v2351_v14  ;;  %v3167_v40 = vperm.slane %v3163_v11, %v13231_v51 }
 0x448   : > { %v3169_v56 = vsel %vm1457_vm1, %v3168_v53, %v2346_v45  ;;  %v3174_v61 = vsel %vm1457_vm1, %v2351_v14, %v2340_v43  ;;  %v3179_v15 = vrot.slane %v2352_v3, 4  ;;  %v2284_v23 = vperm.slane %v2278_v5, %v13274_v13 }
 0x449   : > { %v2350_v35 = vsel %vm1457_vm1, 0.0, %v2349_v10  ;;  %v3173_v29 = vperm.slane %v3169_v56, %v13231_v51  ;;  %v3178_v50 = vperm.slane %v3174_v61, %v13231_v51  ;;  %v3187_v20 = vrot.slane %v3167_v40, 4 }
 0x44a   : > { %v3180_v33 = vsel %vm1457_vm1, %v3179_v15, %v2350_v35  ;;  %v2289_v19 = vrot.slane %v2272_v27, 4  ;;  %v2291_v52 = vrot.slane %v2276_v28, 4  ;;  %v2293_v1 = vrot.slane %v2284_v23, 4 }
 0x44b   : > { %v3184_v22 = vperm.slane %v3180_v33, %v13231_v51  ;;  %v3185_v41 = vrot.slane %v3173_v29, 4  ;;  %v3188_v18 = vsel %vm1457_vm1, %v3173_v29, %v3187_v20  ;;  %v3199_v44 = vrot.slane %v3178_v50, 4 }
 0x44c   : > { %v3196_v24 = vperm.slane %v3188_v18, %v13274_v13  ;;  %v2290_v59 = vsel %vm1457_vm1, 0.0, %v2289_v19  ;;  %v2292_v12 = vsel %vm1457_vm1, 0.0, %v2291_v52  ;;  %v2294_v46 = vsel %vm1457_vm1, 0.0, %v2293_v1 }
 0x44d   : > { %v3186_v2 = vsel %vm1457_vm1, %v3185_v41, %v3167_v40  ;;  %v3197_v43 = vrot.slane %v3184_v22, 4  ;;  %v3200_v28 = vsel %vm1457_vm1, %v3184_v22, %v3199_v44  ;;  %v2295_v26 = vrot.slane %v2288_v0, 4  ;;  %v14895_v44 = vpop.permute.xlu0 %11391 }
 0x44e   : > { %v3192_v47 = vperm.slane %v3186_v2, %v13274_v13  ;;  %v3208_v14 = vperm.slane %v3200_v28, %v13274_v13  ;;  %v3215_v11 = vrot.slane %v3196_v24, 4  ;;  %v3109_v53 = vsel %vm1457_vm1, %v2291_v52, %v2272_v27  ;;  %v11397_v52 = vpop.permute.xlu1 %11396 }
 0x44f   : > { %v3198_v5 = vsel %vm1457_vm1, %v3197_v43, %v3178_v50  ;;  %v2296_v45 = vsel %vm1457_vm1, 0.0, %v2295_v26  ;;  %v3113_v10 = vperm.slane %v3109_v53, %v13231_v51  ;;  %v3114_v3 = vrot.slane %v2292_v12, 4 }
 0x450   : > { %v3204_v40 = vperm.slane %v3198_v5, %v13274_v13  ;;  %v3211_v56 = vrot.slane %v3192_v47, 4  ;;  %v3213_v61 = vrot.slane %v3208_v14, 4  ;;  %v3216_v0 = vsel %vm1457_vm1, %v3208_v14, %v3215_v11 }
 0x451   : > { %v5200_v15 = vpack.c.bf16 %v3216_v0, %v3216_v0  ;;  %v3115_v35 = vsel %vm1457_vm1, %v3114_v3, %v2290_v59  ;;  %v3120_v29 = vsel %vm1457_vm1, %v2295_v26, %v2284_v23  ;;  %v3125_v20 = vrot.slane %v2296_v45, 4 }
 0x452   : > { %v3209_v27 = vrot.slane %v3204_v40, 4  ;;  %v3212_v50 = vsel %vm1457_vm1, %v3204_v40, %v3211_v56  ;;  %v3214_v33 = vsel %vm1457_vm1, %v3213_v61, %v3196_v24  ;;  %v3119_v19 = vperm.slane %v3115_v35, %v13231_v51 }
 0x453   : > { %v5168_v1 = vpack.c.bf16 %v3212_v50, %v3212_v50  ;;  %v5184_v22 = vpack.c.bf16 %v3214_v33, %v3214_v33  ;;  %5265 = vst.msk [vmem:[#allocation2 + $0xfc] sm:$0xf] %vm5201_vm2, %v5200_v15  ;;  %v3124_v41 = vperm.slane %v3120_v29, %v13231_v51  ;;  %v3126_v18 = vsel %vm1457_vm1, %v3125_v20, %v2294_v46 }
 0x454   : > { %v3210_v23 = vsel %vm1457_vm1, %v3209_v27, %v3192_v47  ;;  %v3130_v59 = vperm.slane %v3126_v18, %v13231_v51  ;;  %v3131_v12 = vrot.slane %v3119_v19, 4  ;;  %v3133_v2 = vrot.slane %v3113_v10, 4 }
 0x455   : > { %v5152_v24 = vpack.c.bf16 %v3210_v23, %v3210_v23  ;;  %5233 = vst.msk [vmem:[#allocation2 + $0x7c] sm:$0xf] %vm5201_vm2, %v5168_v1  ;;  %v3145_v43 = vrot.slane %v3124_v41, 4  ;;  %v11399_v28 = vunpack.i.h.bf16 %v11397_v52  ;;  %v11398_v26 = vunpack.i.l.bf16 %v11397_v52 }
 0x456   : > { %5249 = vst.msk [vmem:[#allocation2 + $0xbc] sm:$0xf] %vm5201_vm2, %v5184_v22  ;;  %v3132_v14 = vsel %vm1457_vm1, %v3131_v12, %v3113_v10  ;;  %v3134_v46 = vsel %vm1457_vm1, %v3119_v19, %v3133_v2  ;;  %v3143_v11 = vrot.slane %v3130_v59, 4  ;;  %v11394_v53 = vunpack.i.h.bf16 %v14895_v44  ;;  %v14928_v23 = vpop.permute.xlu1 %11401 }
 0x457   : > { %5217 = vst.msk [vmem:[#allocation2 + $0x3c] sm:$0xf] %vm5201_vm2, %v5152_v24  ;;  %v3138_v47 = vperm.slane %v3132_v14, %v13274_v13  ;;  %v3142_v5 = vperm.slane %v3134_v46, %v13274_v13  ;;  %v3146_v45 = vsel %vm1457_vm1, %v3130_v59, %v3145_v43  ;;  %v4217_v3 = vrot.slane %v11399_v28, 4 }
 0x458   : > { %v3144_v40 = vsel %vm1457_vm1, %v3143_v11, %v3124_v41  ;;  %v3154_v56 = vperm.slane %v3146_v45, %v13274_v13  ;;  %v4220_v10 = vsel %vm1457_vm1, %v11399_v28, %v4219_v38  ;;  %v4161_v61 = vrot.slane %v11398_v26, 4 }
 0x459   : > { %v3150_v0 = vperm.slane %v3144_v40, %v13274_v13  ;;  %v3157_v15 = vrot.slane %v3138_v47, 4  ;;  %v3161_v35 = vrot.slane %v3142_v5, 4  ;;  %v4218_v29 = vsel %vm1457_vm1, %v4217_v3, %v13216_v60 }
 0x45a   : > { %v3159_v20 = vrot.slane %v3154_v56, 4  ;;  %v4224_v27 = vperm.slane %v4218_v29, %v13231_v51  ;;  %v4228_v50 = vperm.slane %v4220_v10, %v13231_v51  ;;  %v4162_v33 = vsel %vm1457_vm1, %v4161_v61, %v13227_v55 }
 0x45b   : > { %v3155_v19 = vrot.slane %v3150_v0, 4  ;;  %v3158_v52 = vsel %vm1457_vm1, %v3150_v0, %v3157_v15  ;;  %v3162_v38 = vsel %vm1457_vm1, %v3154_v56, %v3161_v35  ;;  %v4164_v1 = vsel %vm1457_vm1, %v11398_v26, %v4163_v63 }
 0x45c   : > { %v4173_v60 = vrot.slane %v11413_v25, 4  ;;  %v3160_v22 = vsel %vm1457_vm1, %v3159_v20, %v3142_v5  ;;  %v5167_v41 = vpack.c.bf16 %v3158_v52, %v3158_v52  ;;  %v5199_v18 = vpack.c.bf16 %v3162_v38, %v3162_v38 }
 0x45d   : > { %v3156_v59 = vsel %vm1457_vm1, %v3155_v19, %v3138_v47  ;;  %v5183_v12 = vpack.c.bf16 %v3160_v22, %v3160_v22  ;;  %v4243_v2 = vrot.slane %v4224_v27, 4  ;;  %v4168_v24 = vperm.slane %v4162_v33, %v13231_v51 }
 0x45e   : > { %v5151_v43 = vpack.c.bf16 %v3156_v59, %v3156_v59  ;;  %5232 = vst.msk [vmem:[#allocation2 + $0x78] sm:$0xf] %vm5201_vm2, %v5167_v41  ;;  %v14934_v55 = vperm.slane %v4164_v1, %v13231_v51  ;;  %v4230_v63 = vsel %vm1457_vm1, %v14836_v42, %v11394_v53  ;;  %v4231_v28 = vrot.slane %v11394_v53, 4 }
 0x45f   : > { %5248 = vst.msk [vmem:[#allocation2 + $0xb8] sm:$0xf] %vm5201_vm2, %v5183_v12  ;;  %v4255_v26 = vrot.slane %v4228_v50, 4  ;;  %v4236_v14 = vperm.slane %v4230_v63, %v13231_v51  ;;  %v11393_v46 = vunpack.i.l.bf16 %v14895_v44  ;;  %v11404_v11 = vunpack.i.h.bf16 %v14928_v23 }
 0x460   : > { %5216 = vst.msk [vmem:[#allocation2 + $0x38] sm:$0xf] %vm5201_vm2, %v5151_v43  ;;  %v4187_v47 = vrot.slane %v4168_v24, 4  ;;  %v4199_v5 = vrot.slane %v14934_v55, 4  ;;  %v4232_v45 = vsel %vm1457_vm1, %v11414_v6, %v4231_v28  ;;  %v11403_v42 = vunpack.i.l.bf16 %v14928_v23 }
 0x461   : > { %5264 = vst.msk [vmem:[#allocation2 + $0xf8] sm:$0xf] %vm5201_vm2, %v5199_v18  ;;  %v4240_v53 = vperm.slane %v4232_v45, %v13231_v51  ;;  %v4241_v3 = vrot.slane %v4236_v14, 4  ;;  %v4244_v44 = vsel %vm1457_vm1, %v4236_v14, %v4243_v2  ;;  %v4174_v40 = vsel %vm1457_vm1, %v4173_v60, %v11393_v46 }
 0x462   : > { %v4252_v56 = vperm.slane %v4244_v44, %v13274_v13  ;;  %v4175_v10 = vrot.slane %v11393_v46, 4  ;;  %v4180_v61 = vperm.slane %v4174_v40, %v13231_v51  ;;  %v4005_v0 = vrot.slane %v11404_v11, 4 }
 0x463   : > { %v4242_v15 = vsel %vm1457_vm1, %v4241_v3, %v4224_v27  ;;  %v4253_v6 = vrot.slane %v4240_v53, 4  ;;  %v4256_v35 = vsel %vm1457_vm1, %v4240_v53, %v4255_v26  ;;  %v14958_v29 = vsel %vm1457_vm1, %v11404_v11, %v14103_v32 }
 0x464   : > { %v4248_v20 = vperm.slane %v4242_v15, %v13274_v13  ;;  %v4264_v33 = vperm.slane %v4256_v35, %v13274_v13  ;;  %v4267_v19 = vrot.slane %v4252_v56, 4  ;;  %v4176_v52 = vsel %vm1457_vm1, %v11413_v25, %v4175_v10 }
 0x465   : > { %v4254_v38 = vsel %vm1457_vm1, %v4253_v6, %v4228_v50  ;;  %v4184_v27 = vperm.slane %v4176_v52, %v13231_v51  ;;  %v4185_v1 = vrot.slane %v4180_v61, 4  ;;  %v4188_v60 = vsel %vm1457_vm1, %v4180_v61, %v4187_v47 }
 0x466   : > { %v4260_v22 = vperm.slane %v4254_v38, %v13274_v13  ;;  %v4265_v32 = vrot.slane %v4248_v20, 4  ;;  %v4268_v41 = vsel %vm1457_vm1, 0.0, %v4267_v19  ;;  %v4271_v18 = vrot.slane %v4264_v33, 4 }
 0x467   : > { %v5083_v59 = vsel %vm1457_vm1, %v4267_v19, %v4248_v20  ;;  %v5088_v12 = vrot.slane %v4268_v41, 4  ;;  %v4186_v9 = vsel %vm1457_vm1, %v4185_v1, %v4168_v24  ;;  %v4196_v25 = vperm.slane %v4188_v60, %v13274_v13 }
 0x468   : > { %v4266_v50 = vsel %vm1457_vm1, 0.0, %v4265_v32  ;;  %v4269_v2 = vrot.slane %v4260_v22, 4  ;;  %v4272_v43 = vsel %vm1457_vm1, 0.0, %v4271_v18  ;;  %v5087_v63 = vperm.slane %v5083_v59, %v13231_v51 }
 0x469   : > { %v5089_v28 = vsel %vm1457_vm1, %v5088_v12, %v4266_v50  ;;  %v5094_v26 = vsel %vm1457_vm1, %v4271_v18, %v4260_v22  ;;  %v5099_v14 = vrot.slane %v4272_v43, 4  ;;  %v4192_v46 = vperm.slane %v4186_v9, %v13274_v13 }
 0x46a   : > { %v4270_v11 = vsel %vm1457_vm1, 0.0, %v4269_v2  ;;  %v5093_v24 = vperm.slane %v5089_v28, %v13231_v51  ;;  %v5098_v47 = vperm.slane %v5094_v26, %v13231_v51  ;;  %v5107_v45 = vrot.slane %v5087_v63, 4 }
 0x46b   : > { %v5100_v53 = vsel %vm1457_vm1, %v5099_v14, %v4270_v11  ;;  %v4197_v3 = vrot.slane %v4184_v27, 4  ;;  %v4200_v44 = vsel %vm1457_vm1, %v4184_v27, %v4199_v5  ;;  %v4209_v40 = vrot.slane %v4192_v46, 4 }
 0x46c   : > { %v5104_v56 = vperm.slane %v5100_v53, %v13231_v51  ;;  %v5105_v10 = vrot.slane %v5093_v24, 4  ;;  %v5108_v61 = vsel %vm1457_vm1, %v5093_v24, %v5107_v45  ;;  %v5119_v15 = vrot.slane %v5098_v47, 4 }
 0x46d   : > { %v5116_v6 = vperm.slane %v5108_v61, %v13274_v13  ;;  %v4198_v35 = vsel %vm1457_vm1, %v4197_v3, %v14934_v55  ;;  %v4208_v20 = vperm.slane %v4200_v44, %v13274_v13  ;;  %v4210_v33 = vsel %vm1457_vm1, 0.0, %v4209_v40 }
 0x46e   : > { %v5106_v19 = vsel %vm1457_vm1, %v5105_v10, %v5087_v63  ;;  %v5117_v52 = vrot.slane %v5104_v56, 4  ;;  %v5120_v5 = vsel %vm1457_vm1, %v5104_v56, %v5119_v15  ;;  %v4204_v38 = vperm.slane %v4198_v35, %v13274_v13 }
 0x46f   : > { %v5112_v27 = vperm.slane %v5106_v19, %v13274_v13  ;;  %v5128_v1 = vperm.slane %v5120_v5, %v13274_v13  ;;  %v5135_v60 = vrot.slane %v5116_v6, 4  ;;  %v4211_v22 = vrot.slane %v4196_v25, 4 }
 0x470   : > { %v5118_v32 = vsel %vm1457_vm1, %v5117_v52, %v5098_v47  ;;  %v4213_v55 = vrot.slane %v4204_v38, 4  ;;  %v4215_v41 = vrot.slane %v4208_v20, 4  ;;  %v17501_v18 = vunpack.i.h.bf16 %v14024_v4 }
 0x471   : > { %v5124_v12 = vperm.slane %v5118_v32, %v13274_v13  ;;  %v5131_v9 = vrot.slane %v5112_v27, 4  ;;  %v5133_v50 = vrot.slane %v5128_v1, 4  ;;  %v5136_v2 = vsel %vm1457_vm1, %v5128_v1, %v5135_v60 }
 0x472   : > { %v4006_v59 = vsel %vm1457_vm1, %v4005_v0, %v17501_v18  ;;  %v5329_v43 = vpack.c.bf16 %v5136_v2, %v5136_v2  ;;  %v4212_v63 = vsel %vm1457_vm1, 0.0, %v4211_v22  ;;  %v4214_v28 = vsel %vm1457_vm1, 0.0, %v4213_v55 }
 0x473   : > { %v4216_v25 = vsel %vm1457_vm1, 0.0, %v4215_v41  ;;  %v5129_v26 = vrot.slane %v5124_v12, 4  ;;  %v5132_v14 = vsel %vm1457_vm1, %v5124_v12, %v5131_v9  ;;  %v5134_v11 = vsel %vm1457_vm1, %v5133_v50, %v5116_v6 }
 0x474   : > { %v5029_v0 = vsel %vm1457_vm1, %v4211_v22, %v4192_v46  ;;  %v5297_v24 = vpack.c.bf16 %v5132_v14, %v5132_v14  ;;  %v5313_v47 = vpack.c.bf16 %v5134_v11, %v5134_v11  ;;  %5393 = vst.msk [vmem:[#allocation3 + $0xfc] sm:$0xf] %vm5201_vm2, %v5329_v43  ;;  %v5034_v53 = vrot.slane %v4212_v63, 4 }
 0x475   : > { %v5033_v45 = vperm.slane %v5029_v0, %v13231_v51  ;;  %v5130_v3 = vsel %vm1457_vm1, %v5129_v26, %v5112_v27  ;;  %v5040_v44 = vsel %vm1457_vm1, %v4215_v41, %v4204_v38  ;;  %v5045_v40 = vrot.slane %v4216_v25, 4 }
 0x476   : > { %v4012_v56 = vperm.slane %v4006_v59, %v13231_v51  ;;  %v5281_v10 = vpack.c.bf16 %v5130_v3, %v5130_v3  ;;  %5361 = vst.msk [vmem:[#allocation3 + $0x7c] sm:$0xf] %vm5201_vm2, %v5297_v24  ;;  %v5035_v61 = vsel %vm1457_vm1, %v5034_v53, %v4210_v33  ;;  %v5044_v46 = vperm.slane %v5040_v44, %v13231_v51 }
 0x477   : > { %v5053_v15 = vrot.slane %v5033_v45, 4  ;;  %5377 = vst.msk [vmem:[#allocation3 + $0xbc] sm:$0xf] %vm5201_vm2, %v5313_v47  ;;  %v5039_v6 = vperm.slane %v5035_v61, %v13231_v51  ;;  %v5046_v35 = vsel %vm1457_vm1, %v5045_v40, %v4214_v28  ;;  %v4016_v20 = vperm.slane %v14958_v29, %v13231_v51 }
 0x478   : > { %v4017_v19 = vrot.slane %v4012_v56, 4  ;;  %5345 = vst.msk [vmem:[#allocation3 + $0x3c] sm:$0xf] %vm5201_vm2, %v5281_v10  ;;  %v5050_v52 = vperm.slane %v5046_v35, %v13231_v51  ;;  %v5065_v5 = vrot.slane %v5044_v46, 4  ;;  %v3949_v33 = vrot.slane %v11403_v42, 4 }
 0x479   : > { %v3952_v38 = vsel %vm1457_vm1, %v11403_v42, %v14109_v49  ;;  %v5051_v27 = vrot.slane %v5039_v6, 4  ;;  %v5054_v1 = vsel %vm1457_vm1, %v5039_v6, %v5053_v15  ;;  %v4029_v60 = vrot.slane %v4016_v20, 4 }
 0x47a   : > { %v3960_v29 = vperm.slane %v3952_v38, %v13231_v51  ;;  %v5062_v22 = vperm.slane %v5054_v1, %v13274_v13  ;;  %v5063_v32 = vrot.slane %v5050_v52, 4  ;;  %v5066_v55 = vsel %vm1457_vm1, %v5050_v52, %v5065_v5 }
 0x47b   : > { %v17502_v41 = vunpack.i.l.bf16 %v14024_v4  ;;  %v5052_v59 = vsel %vm1457_vm1, %v5051_v27, %v5033_v45  ;;  %v5074_v23 = vperm.slane %v5066_v55, %v13274_v13  ;;  %v4018_v15 = vsel %vm1457_vm1, %v4017_v19, %v14158_v8 }
 0x47c   : > { %v3973_v42 = vrot.slane %v3960_v29, 4  ;;  %v5058_v12 = vperm.slane %v5052_v59, %v13274_v13  ;;  %v5064_v9 = vsel %vm1457_vm1, %v5063_v32, %v5044_v46  ;;  %v5081_v50 = vrot.slane %v5062_v22, 4 }
 0x47d   : > { %v3950_v18 = vsel %vm1457_vm1, %v3949_v33, %v17502_v41  ;;  %v3976_v2 = vsel %vm1457_vm1, %v3960_v29, %v3975_v37  ;;  %v5070_v4 = vperm.slane %v5064_v9, %v13274_v13  ;;  %v5079_v43 = vrot.slane %v5074_v23, 4 }
 0x47e   : > { %v3956_v49 = vperm.slane %v3950_v18, %v13231_v51  ;;  %v5077_v25 = vrot.slane %v5058_v12, 4  ;;  %v5082_v26 = vsel %vm1457_vm1, %v5074_v23, %v5081_v50  ;;  %v3974_v11 = vsel %vm1457_vm1, %v3973_v42, %v14263_v31 }
 0x47f   : > { %v5075_v0 = vrot.slane %v5070_v4, 4  ;;  %v5080_v24 = vsel %vm1457_vm1, %v5079_v43, %v5062_v22  ;;  %v5328_v37 = vpack.c.bf16 %v5082_v26, %v5082_v26  ;;  %v3980_v3 = vperm.slane %v3974_v11, %v13274_v13 }
 0x480   : > { %v3961_v63 = vrot.slane %v3956_v49, 4  ;;  %v3964_v28 = vsel %vm1457_vm1, %v3956_v49, %v3963_v16  ;;  %v5078_v45 = vsel %vm1457_vm1, %v5070_v4, %v5077_v25  ;;  %v5312_v53 = vpack.c.bf16 %v5080_v24, %v5080_v24 }
 0x481   : > { %v3972_v14 = vperm.slane %v3964_v28, %v13274_v13  ;;  %v5076_v44 = vsel %vm1457_vm1, %v5075_v0, %v5058_v12  ;;  %v5296_v40 = vpack.c.bf16 %v5078_v45, %v5078_v45  ;;  %5392 = vst.msk [vmem:[#allocation3 + $0xf8] sm:$0xf] %vm5201_vm2, %v5328_v37  ;;  %v3984_v31 = vperm.slane %v3976_v2, %v13274_v13 }
 0x482   : > { %v3962_v47 = vsel %vm1457_vm1, %v3961_v63, %v14294_v39  ;;  %v5280_v61 = vpack.c.bf16 %v5076_v44, %v5076_v44  ;;  %5376 = vst.msk [vmem:[#allocation3 + $0xb8] sm:$0xf] %vm5201_vm2, %v5312_v53  ;;  %v3989_v39 = vrot.slane %v3980_v3, 4  ;;  %v17503_v52 = vrot.slane %v14158_v8, 4 }
 0x483   : > { %v3968_v16 = vperm.slane %v3962_v47, %v13274_v13  ;;  %v3987_v10 = vrot.slane %v3972_v14, 4  ;;  %5360 = vst.msk [vmem:[#allocation3 + $0x78] sm:$0xf] %vm5201_vm2, %v5296_v40  ;;  %v3991_v35 = vrot.slane %v3984_v31, 4  ;;  %v4024_v33 = vperm.slane %v4018_v15, %v13274_v13 }
 0x484   : > { %v4020_v5 = vsel %vm1457_vm1, %v4012_v56, %v17503_v52  ;;  %5344 = vst.msk [vmem:[#allocation3 + $0x38] sm:$0xf] %vm5201_vm2, %v5280_v61  ;;  %v3990_v27 = vsel %vm1457_vm1, 0.0, %v3989_v39  ;;  %v4030_v19 = vsel %vm1457_vm1, %v4029_v60, %v14166_v58  ;;  %v17504_v22 = vrot.slane %v14166_v58, 4 }
 0x485   : > { %v3985_v46 = vrot.slane %v3968_v16, 4  ;;  %v3988_v6 = vsel %vm1457_vm1, 0.0, %v3987_v10  ;;  %v4028_v1 = vperm.slane %v4020_v5, %v13274_v13  ;;  %v3992_v29 = vsel %vm1457_vm1, 0.0, %v3991_v35 }
 0x486   : > { %v4032_v8 = vsel %vm1457_vm1, %v4016_v20, %v17504_v22  ;;  %v4036_v56 = vperm.slane %v4030_v19, %v13274_v13  ;;  %v4041_v32 = vrot.slane %v4024_v33, 4  ;;  %v4813_v18 = vsel %vm1457_vm1, %v3987_v10, %v3968_v16 }
 0x487   : > { %v3986_v38 = vsel %vm1457_vm1, 0.0, %v3985_v46  ;;  %v4040_v55 = vperm.slane %v4032_v8, %v13274_v13  ;;  %v4043_v41 = vrot.slane %v4028_v1, 4  ;;  %v4818_v59 = vrot.slane %v3988_v6, 4 }
 0x488   : > { %v4042_v23 = vsel %vm1457_vm1, 0.0, %v4041_v32  ;;  %v4045_v49 = vrot.slane %v4036_v56, 4  ;;  %v4817_v60 = vperm.slane %v4813_v18, %v13231_v51  ;;  %v4824_v42 = vsel %vm1457_vm1, %v3991_v35, %v3980_v3 }
 0x489   : > { %v4044_v58 = vsel %vm1457_vm1, 0.0, %v4043_v41  ;;  %v4047_v12 = vrot.slane %v4040_v55, 4  ;;  %v4819_v20 = vsel %vm1457_vm1, %v4818_v59, %v3986_v38  ;;  %v4828_v9 = vperm.slane %v4824_v42, %v13231_v51 }
 0x48a   : > { %v4046_v50 = vsel %vm1457_vm1, 0.0, %v4045_v49  ;;  %v4823_v2 = vperm.slane %v4819_v20, %v13231_v51  ;;  %v4829_v4 = vrot.slane %v3992_v29, 4  ;;  %v4837_v43 = vrot.slane %v4817_v60, 4 }
 0x48b   : > { %v4048_v63 = vsel %vm1457_vm1, 0.0, %v4047_v12  ;;  %v4849_v28 = vrot.slane %v4828_v9, 4  ;;  %v4867_v25 = vsel %vm1457_vm1, %v4043_v41, %v4024_v33  ;;  %v4872_v26 = vrot.slane %v4044_v58, 4 }
 0x48c   : > { %v4830_v14 = vsel %vm1457_vm1, %v4829_v4, %v3990_v27  ;;  %v4835_v11 = vrot.slane %v4823_v2, 4  ;;  %v4838_v0 = vsel %vm1457_vm1, %v4823_v2, %v4837_v43  ;;  %v4871_v24 = vperm.slane %v4867_v25, %v13231_v51 }
 0x48d   : > { %v4834_v37 = vperm.slane %v4830_v14, %v13231_v51  ;;  %v4846_v47 = vperm.slane %v4838_v0, %v13274_v13  ;;  %v4873_v45 = vsel %vm1457_vm1, %v4872_v26, %v4042_v23  ;;  %v4878_v53 = vsel %vm1457_vm1, %v4047_v12, %v4036_v56  ;;  %v11407_v23 = vpop.permute.xlu0 %11406 }
 0x48e   : > { %v4836_v16 = vsel %vm1457_vm1, %v4835_v11, %v4817_v60  ;;  %v4877_v3 = vperm.slane %v4873_v45, %v13231_v51  ;;  %v4882_v44 = vperm.slane %v4878_v53, %v13231_v51  ;;  %v4883_v40 = vrot.slane %v4048_v63, 4 }
 0x48f   : > { %v4842_v31 = vperm.slane %v4836_v16, %v13274_v13  ;;  %v4847_v10 = vrot.slane %v4834_v37, 4  ;;  %v4850_v61 = vsel %vm1457_vm1, %v4834_v37, %v4849_v28  ;;  %v4865_v46 = vrot.slane %v4846_v47, 4 }
 0x490   : > { %v4858_v39 = vperm.slane %v4850_v61, %v13274_v13  ;;  %v4884_v15 = vsel %vm1457_vm1, %v4883_v40, %v4046_v50  ;;  %v4889_v6 = vrot.slane %v4877_v3, 4  ;;  %v4891_v35 = vrot.slane %v4871_v24, 4 }
 0x491   : > { %v4848_v52 = vsel %vm1457_vm1, %v4847_v10, %v4828_v9  ;;  %v4861_v5 = vrot.slane %v4842_v31, 4  ;;  %v4888_v33 = vperm.slane %v4884_v15, %v13231_v51  ;;  %v4903_v38 = vrot.slane %v4882_v44, 4 }
 0x492   : > { %v4854_v27 = vperm.slane %v4848_v52, %v13274_v13  ;;  %v4863_v1 = vrot.slane %v4858_v39, 4  ;;  %v4866_v19 = vsel %vm1457_vm1, %v4858_v39, %v4865_v46  ;;  %v4890_v29 = vsel %vm1457_vm1, %v4889_v6, %v4871_v24 }
 0x493   : > { %v4892_v22 = vsel %vm1457_vm1, %v4877_v3, %v4891_v35  ;;  %v4896_v8 = vperm.slane %v4890_v29, %v13274_v13  ;;  %v4901_v56 = vrot.slane %v4888_v33, 4  ;;  %v4904_v32 = vsel %vm1457_vm1, %v4888_v33, %v4903_v38 }
 0x494   : > { %v4859_v55 = vrot.slane %v4854_v27, 4  ;;  %v4862_v41 = vsel %vm1457_vm1, %v4854_v27, %v4861_v5  ;;  %v4864_v18 = vsel %vm1457_vm1, %v4863_v1, %v4846_v47  ;;  %v4900_v59 = vperm.slane %v4892_v22, %v13274_v13 }
 0x495   : > { %v4902_v49 = vsel %vm1457_vm1, %v4901_v56, %v4882_v44  ;;  %v4912_v60 = vperm.slane %v4904_v32, %v13274_v13  ;;  %v4915_v42 = vrot.slane %v4896_v8, 4  ;;  %v5292_v58 = vpack.c.bf16 %v4862_v41, %v4862_v41 }
 0x496   : > { %v4860_v12 = vsel %vm1457_vm1, %v4859_v55, %v4842_v31  ;;  %v4908_v20 = vperm.slane %v4902_v49, %v13274_v13  ;;  %v4919_v9 = vrot.slane %v4900_v59, 4  ;;  %v5308_v50 = vpack.c.bf16 %v4864_v18, %v4864_v18 }
 0x497   : > { %v4917_v2 = vrot.slane %v4912_v60, 4  ;;  %v5276_v4 = vpack.c.bf16 %v4860_v12, %v4860_v12  ;;  %v5324_v43 = vpack.c.bf16 %v4866_v19, %v4866_v19  ;;  %5356 = vst.msk [vmem:[#allocation3 + $0x68] sm:$0xf] %vm5201_vm2, %v5292_v58  ;;  %v11409_v63 = vunpack.i.h.bf16 %v11407_v23 }
 0x498   : > { %v4913_v28 = vrot.slane %v4908_v20, 4  ;;  %v4916_v25 = vsel %vm1457_vm1, %v4908_v20, %v4915_v42  ;;  %v4920_v26 = vsel %vm1457_vm1, %v4912_v60, %v4919_v9  ;;  %5372 = vst.msk [vmem:[#allocation3 + $0xa8] sm:$0xf] %vm5201_vm2, %v5308_v50  ;;  %v11408_v14 = vunpack.i.l.bf16 %v11407_v23 }
 0x499   : > { %v4918_v11 = vsel %vm1457_vm1, %v4917_v2, %v4900_v59  ;;  %v5293_v0 = vpack.c.bf16 %v4916_v25, %v4916_v25  ;;  %v5325_v24 = vpack.c.bf16 %v4920_v26, %v4920_v26  ;;  %5340 = vst.msk [vmem:[#allocation3 + $0x28] sm:$0xf] %vm5201_vm2, %v5276_v4  ;;  %v4117_v37 = vrot.slane %v11409_v63, 4 }
 0x49a   : > { %v4914_v47 = vsel %vm1457_vm1, %v4913_v28, %v4896_v8  ;;  %v5309_v45 = vpack.c.bf16 %v4918_v11, %v4918_v11  ;;  %5388 = vst.msk [vmem:[#allocation3 + $0xe8] sm:$0xf] %vm5201_vm2, %v5324_v43  ;;  %v4120_v53 = vsel %vm1457_vm1, %v11409_v63, %v14784_v30  ;;  %v4061_v16 = vrot.slane %v11408_v14, 4 }
 0x49b   : > { %v5277_v3 = vpack.c.bf16 %v4914_v47, %v4914_v47  ;;  %5357 = vst.msk [vmem:[#allocation3 + $0x6c] sm:$0xf] %vm5201_vm2, %v5293_v0  ;;  %v4118_v44 = vsel %vm1457_vm1, %v4117_v37, %v11339_v36  ;;  %v4128_v40 = vperm.slane %v4120_v53, %v13231_v51  ;;  %v4064_v31 = vsel %vm1457_vm1, %v11408_v14, %v14822_v34 }
 0x49c   : > { %v4087_v10 = vrot.slane %v14423_v54, 4  ;;  %5373 = vst.msk [vmem:[#allocation3 + $0xac] sm:$0xf] %vm5201_vm2, %v5309_v45  ;;  %v4124_v61 = vperm.slane %v4118_v44, %v13231_v51  ;;  %v4062_v30 = vsel %vm1457_vm1, %v4061_v16, %v11338_v48  ;;  %v4072_v46 = vperm.slane %v4064_v31, %v13231_v51 }
 0x49d   : > { %v4075_v39 = vrot.slane %v14430_v57, 4  ;;  %5341 = vst.msk [vmem:[#allocation3 + $0x2c] sm:$0xf] %vm5201_vm2, %v5277_v3  ;;  %v4141_v36 = vrot.slane %v4128_v40, 4  ;;  %v4144_v34 = vsel %vm1457_vm1, %v4128_v40, %v4143_v21  ;;  %v4068_v15 = vperm.slane %v4062_v30, %v13231_v51 }
 0x49e   : > { %5389 = vst.msk [vmem:[#allocation3 + $0xec] sm:$0xf] %vm5201_vm2, %v5325_v24  ;;  %v4129_v6 = vrot.slane %v4124_v61, 4  ;;  %v4132_v48 = vsel %vm1457_vm1, %v4124_v61, %v17505_v17  ;;  %v4152_v35 = vperm.slane %v4144_v34, %v13274_v13  ;;  %v4085_v52 = vrot.slane %v4072_v46, 4 }
 0x49f   : > { %v4140_v5 = vperm.slane %v4132_v48, %v13274_v13  ;;  %v4142_v33 = vsel %vm1457_vm1, %v4141_v36, %v14405_v62  ;;  %v4073_v38 = vrot.slane %v4068_v15, 4  ;;  %v4076_v21 = vsel %vm1457_vm1, %v4068_v15, %v4075_v39 }
 0x4a0   : > { %v4130_v27 = vsel %vm1457_vm1, %v4129_v6, %v14399_v7  ;;  %v4148_v1 = vperm.slane %v4142_v33, %v13274_v13  ;;  %v4159_v19 = vrot.slane %v4152_v35, 4  ;;  %v4084_v29 = vperm.slane %v4076_v21, %v13274_v13 }
 0x4a1   : > { %v4136_v22 = vperm.slane %v4130_v27, %v13274_v13  ;;  %v4155_v8 = vrot.slane %v4140_v5, 4  ;;  %v4074_v56 = vsel %vm1457_vm1, %v4073_v38, %v14430_v57  ;;  %v4086_v62 = vsel %vm1457_vm1, %v4085_v52, %v14423_v54 }
 0x4a2   : > { %v4157_v32 = vrot.slane %v4148_v1, 4  ;;  %v4160_v55 = vsel %vm1457_vm1, 0.0, %v4159_v19  ;;  %v4986_v41 = vsel %vm1457_vm1, %v4159_v19, %v4148_v1  ;;  %v4080_v7 = vperm.slane %v4074_v56, %v13274_v13 }
 0x4a3   : > { %v4153_v18 = vrot.slane %v4136_v22, 4  ;;  %v4156_v59 = vsel %vm1457_vm1, 0.0, %v4155_v8  ;;  %v4975_v23 = vsel %vm1457_vm1, %v4155_v8, %v4136_v22  ;;  %v4990_v49 = vperm.slane %v4986_v41, %v13231_v51 }
 0x4a4   : > { %v4158_v60 = vsel %vm1457_vm1, 0.0, %v4157_v32  ;;  %v4979_v57 = vperm.slane %v4975_v23, %v13231_v51  ;;  %v4980_v42 = vrot.slane %v4156_v59, 4  ;;  %v4991_v54 = vrot.slane %v4160_v55, 4 }
 0x4a5   : > { %v4154_v58 = vsel %vm1457_vm1, 0.0, %v4153_v18  ;;  %v5011_v12 = vrot.slane %v4990_v49, 4  ;;  %v4088_v20 = vsel %vm1457_vm1, %v4072_v46, %v4087_v10  ;;  %v4092_v9 = vperm.slane %v4086_v62, %v13274_v13 }
 0x4a6   : > { %v4981_v50 = vsel %vm1457_vm1, %v4980_v42, %v4154_v58  ;;  %v4992_v2 = vsel %vm1457_vm1, %v4991_v54, %v4158_v60  ;;  %v4999_v4 = vrot.slane %v4979_v57, 4  ;;  %v4096_v43 = vperm.slane %v4088_v20, %v13274_v13 }
 0x4a7   : > { %v4985_v63 = vperm.slane %v4981_v50, %v13231_v51  ;;  %v4996_v28 = vperm.slane %v4992_v2, %v13231_v51  ;;  %v4097_v25 = vrot.slane %v4080_v7, 4  ;;  %v4099_v26 = vrot.slane %v4084_v29, 4 }
 0x4a8   : > { %v4101_v14 = vrot.slane %v4092_v9, 4  ;;  %v4103_v11 = vrot.slane %v4096_v43, 4 }
 0x4a9   : > { %v4997_v0 = vrot.slane %v4985_v63, 4  ;;  %v5000_v24 = vsel %vm1457_vm1, %v4985_v63, %v4999_v4  ;;  %v5009_v37 = vrot.slane %v4996_v28, 4  ;;  %v5012_v47 = vsel %vm1457_vm1, %v4996_v28, %v5011_v12 }
 0x4aa   : > { %v5008_v45 = vperm.slane %v5000_v24, %v13274_v13  ;;  %v5020_v53 = vperm.slane %v5012_v47, %v13274_v13  ;;  %v4098_v16 = vsel %vm1457_vm1, 0.0, %v4097_v25  ;;  %v4100_v3 = vsel %vm1457_vm1, 0.0, %v4099_v26 }
 0x4ab   : > { %v4998_v44 = vsel %vm1457_vm1, %v4997_v0, %v4979_v57  ;;  %v5010_v40 = vsel %vm1457_vm1, %v5009_v37, %v4990_v49  ;;  %v4102_v31 = vsel %vm1457_vm1, 0.0, %v4101_v14  ;;  %v4104_v10 = vsel %vm1457_vm1, 0.0, %v4103_v11 }
 0x4ac   : > { %v5004_v61 = vperm.slane %v4998_v44, %v13274_v13  ;;  %v5016_v30 = vperm.slane %v5010_v40, %v13274_v13  ;;  %v5025_v46 = vrot.slane %v5020_v53, 4  ;;  %v5027_v39 = vrot.slane %v5008_v45, 4 }
 0x4ad   : > { %v4921_v36 = vsel %vm1457_vm1, %v4099_v26, %v4080_v7  ;;  %v4926_v34 = vrot.slane %v4100_v3, 4  ;;  %v4932_v15 = vsel %vm1457_vm1, %v4103_v11, %v4092_v9  ;;  %v4937_v6 = vrot.slane %v4104_v10, 4 }
 0x4ae   : > { %v5021_v17 = vrot.slane %v5016_v30, 4  ;;  %v5023_v48 = vrot.slane %v5004_v61, 4  ;;  %v5026_v35 = vsel %vm1457_vm1, %v5025_v46, %v5008_v45  ;;  %v5028_v52 = vsel %vm1457_vm1, %v5020_v53, %v5027_v39 }
 0x4af   : > { %v5311_v5 = vpack.c.bf16 %v5026_v35, %v5026_v35  ;;  %v5327_v33 = vpack.c.bf16 %v5028_v52, %v5028_v52  ;;  %v4925_v38 = vperm.slane %v4921_v36, %v13231_v51  ;;  %v4927_v21 = vsel %vm1457_vm1, %v4926_v34, %v4098_v16 }
 0x4b0   : > { %v5022_v27 = vsel %vm1457_vm1, %v5021_v17, %v5004_v61  ;;  %v5024_v1 = vsel %vm1457_vm1, %v5016_v30, %v5023_v48  ;;  %v4931_v19 = vperm.slane %v4927_v21, %v13231_v51  ;;  %v4936_v29 = vperm.slane %v4932_v15, %v13231_v51 }
 0x4b1   : > { %v5279_v22 = vpack.c.bf16 %v5022_v27, %v5022_v27  ;;  %v5295_v8 = vpack.c.bf16 %v5024_v1, %v5024_v1  ;;  %5375 = vst.msk [vmem:[#allocation3 + $0xb4] sm:$0xf] %vm5201_vm2, %v5311_v5  ;;  %v4938_v56 = vsel %vm1457_vm1, %v4937_v6, %v4102_v31  ;;  %v4945_v62 = vrot.slane %v4925_v38, 4 }
 0x4b2   : > { %5391 = vst.msk [vmem:[#allocation3 + $0xf4] sm:$0xf] %vm5201_vm2, %v5327_v33  ;;  %v4942_v32 = vperm.slane %v4938_v56, %v13231_v51  ;;  %v4943_v55 = vrot.slane %v4931_v19, 4  ;;  %v4957_v41 = vrot.slane %v4936_v29, 4 }
 0x4b3   : > { %5343 = vst.msk [vmem:[#allocation3 + $0x34] sm:$0xf] %vm5201_vm2, %v5279_v22  ;;  %v4946_v7 = vsel %vm1457_vm1, %v4931_v19, %v4945_v62 }
 0x4b4   : > { %5359 = vst.msk [vmem:[#allocation3 + $0x74] sm:$0xf] %vm5201_vm2, %v5295_v8  ;;  %v4944_v18 = vsel %vm1457_vm1, %v4943_v55, %v4925_v38  ;;  %v4954_v59 = vperm.slane %v4946_v7, %v13274_v13  ;;  %v4955_v23 = vrot.slane %v4942_v32, 4  ;;  %v4958_v49 = vsel %vm1457_vm1, %v4942_v32, %v4957_v41 }
 0x4b5   : > { %v4950_v60 = vperm.slane %v4944_v18, %v13274_v13  ;;  %v4966_v57 = vperm.slane %v4958_v49, %v13274_v13 }
 0x4b6   : > { %v4956_v51 = vsel %vm1457_vm1, %v4955_v23, %v4936_v29  ;;  %v4973_v42 = vrot.slane %v4954_v59, 4 }
 0x4b7   : > { %v4962_v54 = vperm.slane %v4956_v51, %v13274_v13  ;;  %v4969_v58 = vrot.slane %v4950_v60, 4  ;;  %v4971_v12 = vrot.slane %v4966_v57, 4 }
 0x4b8   : > { %v4974_v20 = vsel %vm1457_vm1, %v4966_v57, %v4973_v42 }
 0x4b9   : > { %v4967_v9 = vrot.slane %v4962_v54, 4  ;;  %v4970_v50 = vsel %vm1457_vm1, %v4962_v54, %v4969_v58  ;;  %v4972_v2 = vsel %vm1457_vm1, %v4971_v12, %v4954_v59  ;;  %v5326_v4 = vpack.c.bf16 %v4974_v20, %v4974_v20 }
 0x4ba   : > { %v5294_v43 = vpack.c.bf16 %v4970_v50, %v4970_v50  ;;  %v5310_v63 = vpack.c.bf16 %v4972_v2, %v4972_v2 }
 0x4bb   : > { %v4968_v28 = vsel %vm1457_vm1, %v4967_v9, %v4950_v60  ;;  %5390 = vst.msk [vmem:[#allocation3 + $0xf0] sm:$0xf] %vm5201_vm2, %v5326_v4 }
 0x4bc   : > { %v5278_v25 = vpack.c.bf16 %v4968_v28, %v4968_v28  ;;  %5358 = vst.msk [vmem:[#allocation3 + $0x70] sm:$0xf] %vm5201_vm2, %v5294_v43 }
 0x4bd   : > { %5374 = vst.msk [vmem:[#allocation3 + $0xb0] sm:$0xf] %vm5201_vm2, %v5310_v63 }
 0x4be   : > { %5342 = vst.msk [vmem:[#allocation3 + $0x30] sm:$0xf] %vm5201_vm2, %v5278_v25 }
 0x4bf PF: > { %s17506_s12 = sld [smem:[#allocation27_spill]]  ;;  %v12212_v47 = vmov 128.0   ;;  %v10860_v7 = vld [vmem:[#allocation9 + $0x38] sm:$0xff]  ;;  %v10859_v18 = vld [vmem:[#allocation9 + $0x30] sm:$0xff]  ;;  %v10858_v59 = vld [vmem:[#allocation9 + $0x28] sm:$0xff]  ;;  %s12213_s10 = smov 64  }
 0x4c0   : > { %11578 = vrcp.f32 %v12212_v47  ;;  %5675 = vmatpush.bf16.msra.mxu0 %v10860_v7  ;;  %v10857_v23 = vld [vmem:[#allocation9 + $0x20] sm:$0xff]  ;;  %v10856_v49 = vld [vmem:[#allocation9 + $0x18] sm:$0xff]  ;;  %v10855_v60 = vld [vmem:[#allocation9 + $0x10] sm:$0xff]  ;;  %s17507_s24 = sld [smem:[#allocation41_spill]]  ;;  %s12214_s11 = smov 96  }
 0x4c1   : > { %v10854_v57 = vld [vmem:[#allocation9 + $0x8] sm:$0xff]  ;;  %v10853_v58 = vld [vmem:[#allocation9] sm:$0xff]  ;;  %s17508_s18 = sld [smem:[#allocation42_spill]]  ;;  %s12215_s20 = smov 32  }
 0x4c2   : > { %s17509_s19 = sld [smem:[#allocation40_spill]] }
 0x4c3   : > { %s17510_s4 = sld [smem:[#allocation43_spill]] }
 0x4c4   : > { %5676 = vmatpush.bf16.msra.mxu0 %v10859_v18  ;;  %s17543_s7 = sld [smem:[#allocation49_spill]] }
 0x4c5   : > { %s10349_s21 = sshll.u32 %s17506_s12, 6 }
 0x4c6   : > { %s15232_s9 = scalar_lea.vmem %s12511_s14, %s10349_s21 [#allocation4]  ;;  %v11579_v45 = vpop.eup %11578 }
 0x4c7   : > { %v5400_v13 = vld [vmem:[%s15232_s9 + $0x20] sm:$0xff]  ;;  %v5398_v26 = vld [vmem:[%s15232_s9 + $0x10] sm:$0xff]  ;;  %v5401_v11 = vld [vmem:[%s15232_s9 + $0x28] sm:$0xff]  ;;  %v5431_v53 = vmul.f32 128.0, %v11579_v45  ;;  %vm5435_vm3 = vweird.f32 %v11579_v45 }
 0x4c8   : > { %v5396_v14 = vld [vmem:[%s15232_s9] sm:$0xff]  ;;  %5422 = vadd.xlane.f32.xlu2 %v5400_v13  ;;  %5418 = vadd.xlane.f32.xlu1 %v5398_v26  ;;  %v5399_v0 = vld [vmem:[%s15232_s9 + $0x18] sm:$0xff]  ;;  %v5397_v24 = vld [vmem:[%s15232_s9 + $0x8] sm:$0xff] }
 0x4c9   : > { %5414 = vadd.xlane.f32.xlu0 %v5396_v14  ;;  %v5402_v37 = vld [vmem:[%s15232_s9 + $0x30] sm:$0xff]  ;;  %v5432_v16 = vsub.f32 1.0, %v5431_v53  ;;  %v5403_v38 = vld [vmem:[%s15232_s9 + $0x38] sm:$0xff]  ;;  %5677 = vmatpush.bf16.msra.mxu0 %v10858_v59 }
 0x4ca   : > { %s12072_s16 = scalar_lea.hbm %s17543_s7, 256 }
 0x4cb   : > { %v5433_v3 = vmul.f32 %v11579_v45, %v5432_v16 }
 0x4cd   : > { %v5434_v44 = vadd.f32 %v11579_v45, %v5433_v3  ;;  %5678 = vmatpush.bf16.msra.mxu0 %v10857_v23 }
 0x4cf   : > { %v15241_v40 = vsel %vm5435_vm3, %v11579_v45, %v5434_v44 }
 0x4d0   : > { %5424 = vadd.xlane.f32.xlu2 %v5401_v11  ;;  %5420 = vadd.xlane.f32.xlu1 %v5399_v0 }
 0x4d1   : > { %5416 = vadd.xlane.f32.xlu0 %v5397_v24  ;;  %5679 = vmatpush.bf16.msra.mxu0 %v10856_v49 }
 0x4d5   : > { %5680 = vmatpush.bf16.msra.mxu0 %v10855_v60 }
 0x4d8   : > { %5426 = vadd.xlane.f32.xlu2 %v5402_v37 }
 0x4d9   : > { %5681 = vmatpush.bf16.msra.mxu0 %v10854_v57 }
 0x4dd   : > { %5682 = vmatpush.bf16.msra.mxu0 %v10853_v58 }
 0x53b   : > { %v5423_v31 = vpop.xlane.xlu2 %5422  ;;  %v5419_v10 = vpop.xlane.xlu1 %5418 }
 0x53c   : > { %v5415_v61 = vpop.xlane.xlu0 %5414  ;;  %v5441_v35 = vmul.f32 %v15241_v40, %v5423_v31  ;;  %v5439_v52 = vmul.f32 %v15241_v40, %v5419_v10 }
 0x53d   : > { %v5437_v30 = vmul.f32 %v15241_v40, %v5415_v61 }
 0x53e   : > { %v15261_v27 = vsub.f32 %v5400_v13, %v5441_v35  ;;  %v15263_v1 = vsub.f32 %v5398_v26, %v5439_v52 }
 0x53f   : > { %v15244_v46 = vsub.f32 %v5396_v14, %v5437_v30 }
 0x540   : > { %v5457_v56 = vmul.f32 %v15261_v27, %v15261_v27  ;;  %v5455_v62 = vmul.f32 %v15263_v1, %v15263_v1 }
 0x541   : > { %v5453_v39 = vmul.f32 %v15244_v46, %v15244_v46 }
 0x543   : > { %5461 = vadd.xlane.f32.xlu0 %v5453_v39  ;;  %v5425_v36 = vpop.xlane.xlu2 %5424  ;;  %v5421_v34 = vpop.xlane.xlu1 %5420 }
 0x544   : > { %v5440_v15 = vmul.f32 %v15241_v40, %v5421_v34  ;;  %v5417_v6 = vpop.xlane.xlu0 %5416  ;;  %v5442_v8 = vmul.f32 %v15241_v40, %v5425_v36 }
 0x545   : > { %v5438_v17 = vmul.f32 %v15241_v40, %v5417_v6 }
 0x546   : > { %v15250_v48 = vsub.f32 %v5399_v0, %v5440_v15  ;;  %v15275_v55 = vsub.f32 %v5401_v11, %v5442_v8 }
 0x547   : > { %v15254_v5 = vsub.f32 %v5397_v24, %v5438_v17 }
 0x548   : > { %v5456_v33 = vmul.f32 %v15250_v48, %v15250_v48  ;;  %v5458_v41 = vmul.f32 %v15275_v55, %v15275_v55 }
 0x549   : > { %v5454_v21 = vmul.f32 %v15254_v5, %v15254_v5 }
 0x54a   : > { %5467 = vadd.xlane.f32.xlu2 %v5456_v33 }
 0x54b   : > { %5428 = vadd.xlane.f32.xlu0 %v5403_v38  ;;  %5463 = vadd.xlane.f32.xlu1 %v5454_v21  ;;  %v5427_v19 = vpop.xlane.xlu2 %5426 }
 0x54c   : > { %v5443_v29 = vmul.f32 %v15241_v40, %v5427_v19 }
 0x54e   : > { %v15266_v22 = vsub.f32 %v5402_v37, %v5443_v29 }
 0x550   : > { %v5459_v32 = vmul.f32 %v15266_v22, %v15266_v22 }
 0x552   : > { %5473 = vadd.xlane.f32.xlu2 %v5459_v32 }
 0x553   : > { %5469 = vadd.xlane.f32.xlu0 %v5457_v56  ;;  %5465 = vadd.xlane.f32.xlu1 %v5455_v62 }
 0x55b   : > { %5471 = vadd.xlane.f32.xlu1 %v5458_v41  ;;  %v15312_v41 = vld [vmem:[%s17508_s18] ss:$0 sm:$0xff]  ;;  %s17541_s18 = sld [smem:[#allocation48_spill]] }
 0x5b6   : > { %v5462_v51 = vpop.xlane.xlu0 %5461 }
 0x5b7   : > { %v5477_v42 = vmul.f32 %v5462_v51, %v15241_v40 }
 0x5b9   : > { %v5485_v54 = vadd.f32 1e-05, %v5477_v42 }
 0x5bb   : > { %11580 = vrsqrt.f32 %v5485_v54  ;;  %vm5499_vm5 = vweird.f32 %v5485_v54 }
 0x5bd   : > { %v5468_v12 = vpop.xlane.xlu2 %5467 }
 0x5be   : > { %v5480_v20 = vmul.f32 %v5468_v12, %v15241_v40  ;;  %v5464_v9 = vpop.xlane.xlu1 %5463  ;;  %v5429_v50 = vpop.xlane.xlu0 %5428 }
 0x5bf   : > { %v5478_v2 = vmul.f32 %v5464_v9, %v15241_v40  ;;  %v5444_v4 = vmul.f32 %v15241_v40, %v5429_v50 }
 0x5c0   : > { %v15283_v43 = vadd.f32 1e-05, %v5480_v20 }
 0x5c1   : > { %v11581_v63 = vpop.eup %11580  ;;  %v5486_v28 = vadd.f32 1e-05, %v5478_v2  ;;  %v15285_v25 = vsub.f32 %v5403_v38, %v5444_v4  ;;  %v15305_v38 = vld [vmem:[%s17507_s24] ss:$0 sm:$0xff]  ;;  %s17512_s24 = sld [smem:[#allocation46_spill]] }
 0x5c2   : > { %v5494_v13 = vmul.f32 %v11581_v63, %v5485_v54  ;;  %11582 = vrsqrt.f32 %v15283_v43  ;;  %vm5500_vm4 = vweird.f32 %v11581_v63  ;;  %vm5529_vm12 = vweird.f32 %v15283_v43 }
 0x5c3   : > { %11584 = vrsqrt.f32 %v5486_v28  ;;  %v5460_v26 = vmul.f32 %v15285_v25, %v15285_v25  ;;  %vm5501_vm6 = vmor %vm5499_vm5, %vm5500_vm4  ;;  %vm5509_vm7 = vweird.f32 %v5486_v28 }
 0x5c4   : > { %v5495_v14 = vmul.f32 %v11581_v63, %v5494_v13 }
 0x5c5   : > { %5475 = vadd.xlane.f32.xlu0 %v5460_v26 }
 0x5c6   : > { %v5496_v11 = vmul.f32 0.5, %v5495_v14  ;;  %v5466_v0 = vpop.xlane.xlu1 %5465  ;;  %v5470_v24 = vpop.xlane.xlu0 %5469 }
 0x5c7   : > { %v5479_v37 = vmul.f32 %v5466_v0, %v15241_v40  ;;  %v5481_v3 = vmul.f32 %v5470_v24, %v15241_v40 }
 0x5c8   : > { %v15291_v47 = vpop.eup %11582  ;;  %v5497_v45 = vsub.f32 1.5, %v5496_v11 }
 0x5c9   : > { %v11585_v53 = vpop.eup %11584  ;;  %v5487_v16 = vadd.f32 1e-05, %v5479_v37  ;;  %v5524_v31 = vmul.f32 %v15291_v47, %v15283_v43  ;;  %v15296_v30 = vadd.f32 1e-05, %v5481_v3  ;;  %vm5530_vm13 = vweird.f32 %v15291_v47 }
 0x5ca   : > { %v5498_v44 = vmul.f32 %v11581_v63, %v5497_v45  ;;  %v5504_v10 = vmul.f32 %v11585_v53, %v5486_v28  ;;  %vm5510_vm8 = vweird.f32 %v11585_v53  ;;  %vm5531_vm15 = vmor %vm5529_vm12, %vm5530_vm13  ;;  %vm6829_vm12 = vcmask 261120  }
 0x5cb   : > { %11586 = vrsqrt.f32 %v5487_v16  ;;  %v5525_v39 = vmul.f32 %v15291_v47, %v5524_v31  ;;  %vm5511_vm9 = vmor %vm5509_vm7, %vm5510_vm8  ;;  %vm5519_vm10 = vweird.f32 %v5487_v16  ;;  %vm5539_vm2 = vweird.f32 %v15296_v30 }
 0x5cc   : > { %v5505_v61 = vmul.f32 %v11585_v53, %v5504_v10  ;;  %v5502_v15 = vsel %vm5501_vm6, %v11581_v63, %v5498_v44  ;;  %11588 = vrsqrt.f32 %v15296_v30  ;;  %vm5793_vm13 = vcmask 1047556  }
 0x5cd   : > { %v5573_v33 = vmul.f32 %v5502_v15, %v15244_v46  ;;  %v5526_v21 = vmul.f32 0.5, %v5525_v39 }
 0x5ce   : > { %v5506_v36 = vmul.f32 0.5, %v5505_v61  ;;  %v5472_v34 = vpop.xlane.xlu1 %5471  ;;  %v5474_v61 = vpop.xlane.xlu2 %5473 }
 0x5cf   : > { %v5482_v6 = vmul.f32 %v5472_v34, %v15241_v40  ;;  %v5584_v32 = vmul.f32 %v15305_v38, %v5573_v33  ;;  %v5527_v46 = vsub.f32 1.5, %v5526_v21 }
 0x5d0   : > { %v5507_v17 = vsub.f32 1.5, %v5506_v36 }
 0x5d1   : > { %v11587_v35 = vpop.eup %11586  ;;  %v5490_v52 = vadd.f32 1e-05, %v5482_v6  ;;  %v5595_v49 = vadd.f32 %v15312_v41, %v5584_v32  ;;  %v5528_v57 = vmul.f32 %v15291_v47, %v5527_v46 }
 0x5d2   : > { %v5508_v19 = vmul.f32 %v11585_v53, %v5507_v17  ;;  %v5514_v29 = vmul.f32 %v11587_v35, %v5487_v16  ;;  %vm5520_vm11 = vweird.f32 %v11587_v35  ;;  %v11589_v18 = vpop.eup %11588 }
 0x5d3   : > { %11590 = vrsqrt.f32 %v5490_v52  ;;  %vm5521_vm14 = vmor %vm5519_vm10, %vm5520_vm11  ;;  %v5534_v42 = vmul.f32 %v11589_v18, %v15296_v30  ;;  %v5532_v50 = vsel %vm5531_vm15, %v15291_v47, %v5528_v57  ;;  %vm5549_vm0 = vweird.f32 %v5490_v52  ;;  %v15343_v57 = vld [vmem:[#allocation10] ss:$0 sm:$0xff] }
 0x5d4   : > { %v5515_v8 = vmul.f32 %v11587_v35, %v5514_v29  ;;  %v5512_v56 = vsel %vm5511_vm9, %v11585_v53, %v5508_v19  ;;  %v5576_v43 = vmul.f32 %v5532_v50, %v15250_v48  ;;  %vm5540_vm3 = vweird.f32 %v11589_v18 }
 0x5d5   : > { %v5574_v62 = vmul.f32 %v5512_v56, %v15254_v5  ;;  %v5535_v9 = vmul.f32 %v11589_v18, %v5534_v42  ;;  %vm5541_vm5 = vmor %vm5539_vm2, %vm5540_vm3  ;;  %v5483_v30 = vmul.f32 %v5474_v61, %v15241_v40  ;;  %vm9051_vm15 = vcmask 785408  }
 0x5d6   : > { %v5516_v7 = vmul.f32 0.5, %v5515_v8  ;;  %v5587_v26 = vmul.f32 %v15305_v38, %v5576_v43 }
 0x5d7   : > { %v5585_v59 = vmul.f32 %v15305_v38, %v5574_v62  ;;  %v5536_v63 = vmul.f32 0.5, %v5535_v9  ;;  %v5491_v39 = vadd.f32 1e-05, %v5483_v30  ;;  %v10876_v9 = vld [vmem:[#allocation2 + $0x78] sm:$0xff] }
 0x5d8   : > { %v5517_v23 = vsub.f32 1.5, %v5516_v7  ;;  %v6989_v43 = vsel %vm6829_vm12, %v10876_v9, 0 }
 0x5d9   : > { %v11591_v5 = vpop.eup %11590  ;;  %v5596_v60 = vadd.f32 %v15312_v41, %v5585_v59  ;;  %v5537_v14 = vsub.f32 1.5, %v5536_v63  ;;  %11592 = vrsqrt.f32 %v5491_v39  ;;  %vm5559_vm6 = vweird.f32 %v5491_v39  ;;  %6991 = vmatpush.bf16.xpose.msra.mxu2 %v6989_v43  ;;  %v10883_v63 = vld [vmem:[#allocation2 + $0xb0] sm:$0xff]  ;;  %v10886_v43 = vld [vmem:[#allocation2 + $0xc8] sm:$0xff] }
 0x5da   : > { %v5518_v51 = vmul.f32 %v11587_v35, %v5517_v23  ;;  %v5544_v54 = vmul.f32 %v11591_v5, %v5490_v52  ;;  %vm5550_vm1 = vweird.f32 %v11591_v5 }
 0x5db   : > { %v5603_v58 = vpack.c.bf16 %v5596_v60, %v5595_v49  ;;  %vm5551_vm4 = vmor %vm5549_vm0, %vm5550_vm1  ;;  %v5538_v24 = vmul.f32 %v11589_v18, %v5537_v14  ;;  %v7111_v14 = vsel %vm6829_vm12, %v10883_v63, 0 }
 0x5dc   : > { %v5545_v12 = vmul.f32 %v11591_v5, %v5544_v54  ;;  %v5522_v20 = vsel %vm5521_vm14, %v11587_v35, %v5518_v51  ;;  %vm9042_vm14 = vcmask 523264  }
 0x5dd   : > { %5683 = vmatmul.bf16.vlgmr.msra.gmra.mxu0 %v5603_v58  ;;  %v5575_v2 = vmul.f32 %v5522_v20, %v15263_v1  ;;  %v5598_v1 = vadd.f32 %v15312_v41, %v5587_v26  ;;  %v5542_v47 = vsel %vm5541_vm5, %v11589_v18, %v5538_v24  ;;  %v10884_v58 = vld [vmem:[#allocation2 + $0xb8] sm:$0xff] }
 0x5de   : > { %v5546_v4 = vmul.f32 0.5, %v5545_v12  ;;  %v5577_v53 = vmul.f32 %v5542_v47, %v15261_v27  ;;  %v10892_v12 = vld [vmem:[#allocation2 + $0xf8] sm:$0xff]  ;;  %v7114_v50 = vsel %vm6829_vm12, %v10884_v58, 0  ;;  %v10863_v58 = vld [vmem:[#allocation2 + $0x10] sm:$0xff] }
 0x5df   : > { %v5586_v28 = vmul.f32 %v15305_v38, %v5575_v2  ;;  %v11593_v36 = vpop.eup %11592  ;;  %v10868_v20 = vld [vmem:[#allocation2 + $0x38] sm:$0xff]  ;;  %v7239_v2 = vsel %vm6829_vm12, %v10892_v12, 0  ;;  %7116 = vmatpush.bf16.xpose.msra.mxu3 %v7114_v50  ;;  %v10871_v12 = vld [vmem:[#allocation2 + $0x50] sm:$0xff]  ;;  %v6849_v50 = vsel %vm6829_vm12, %v10863_v58, 0 }
 0x5e0   : > { %v5547_v13 = vsub.f32 1.5, %v5546_v4  ;;  %v5588_v3 = vmul.f32 %v15305_v38, %v5577_v53  ;;  %v5554_v34 = vmul.f32 %v11593_v36, %v5491_v39  ;;  %vm5560_vm7 = vweird.f32 %v11593_v36  ;;  %7241 = vmatpush.bf16.xpose.msrb.mxu0 %v7239_v2  ;;  %v10882_v39 = vld [vmem:[#allocation2 + $0xa8] sm:$0xff] }
 0x5e1   : > { %v5597_v11 = vadd.f32 %v15312_v41, %v5586_v28  ;;  %vm5561_vm8 = vmor %vm5559_vm6, %vm5560_vm7  ;;  %v6864_v4 = vsel %vm6829_vm12, %v10868_v20, 0  ;;  %v10891_v28 = vld [vmem:[#allocation2 + $0xf0] sm:$0xff]  ;;  %v12216_v20 = vmov 1983009808   ;;  %v6974_v2 = vsel %vm6829_vm12, %v10871_v12, 0 }
 0x5e2   : > { %v5548_v0 = vmul.f32 %v11591_v5, %v5547_v13  ;;  %v5599_v31 = vadd.f32 %v15312_v41, %v5588_v3  ;;  %6866 = vmatpush.bf16.xpose.msra.mxu1 %v6864_v4  ;;  %v5798_v9 = vunpack.c.l.s4 %v12216_v20  ;;  %v10878_v4 = vld [vmem:[#allocation2 + $0x88] sm:$0xff] }
 0x5e3   : > { %v5604_v48 = vpack.c.bf16 %v5598_v1, %v5597_v11  ;;  %v7236_v11 = vsel %vm6829_vm12, %v10891_v28, 0 }
 0x5e4   : > { %v5552_v37 = vsel %vm5551_vm4, %v11591_v5, %v5548_v0 }
 0x5e5   : > { %v5578_v45 = vmul.f32 %v5552_v37, %v15275_v55  ;;  %v5555_v55 = vmul.f32 %v11593_v36, %v5554_v34  ;;  %v7108_v34 = vsel %vm6829_vm12, %v10882_v39, 0  ;;  %v12217_v39 = vmov 1934713408  }
 0x5e7   : > { %v5589_v16 = vmul.f32 %v15305_v38, %v5578_v45  ;;  %v5556_v17 = vmul.f32 0.5, %v5555_v55  ;;  %7117 = vmatpush.bf16.xpose.msra.mxu3 %v7111_v14  ;;  %v7096_v14 = vsel %vm6829_vm12, %v10878_v4, 0 }
 0x5e8   : > { %7242 = vmatpush.bf16.xpose.msrb.mxu0 %v7236_v11  ;;  %v7221_v11 = vsel %vm6829_vm12, %v10886_v43, 0 }
 0x5e9   : > { %v5600_v44 = vadd.f32 %v15312_v41, %v5589_v16  ;;  %v5557_v35 = vsub.f32 1.5, %v5556_v17 }
 0x5eb   : > { %v5605_v10 = vpack.c.bf16 %v5600_v44, %v5599_v31  ;;  %v5558_v33 = vmul.f32 %v11593_v36, %v5557_v35  ;;  %v10867_v31 = vld [vmem:[#allocation2 + $0x30] sm:$0xff]  ;;  %v10881_v35 = vld [vmem:[#allocation2 + $0xa0] sm:$0xff] }
 0x5ec   : > { %v6861_v61 = vsel %vm6829_vm12, %v10867_v31, 0  ;;  %v10862_v31 = vld [vmem:[#allocation2 + $0x8] sm:$0xff] }
 0x5ed   : > { %5688 = vmatmul.bf16.gmra.mxu0 %v5604_v48  ;;  %v5562_v8 = vsel %vm5561_vm8, %v11593_v36, %v5558_v33  ;;  %6867 = vmatpush.bf16.xpose.msra.mxu1 %v6861_v61  ;;  %v10890_v36 = vld [vmem:[#allocation2 + $0xe8] sm:$0xff]  ;;  %v7105_v33 = vsel %vm6829_vm12, %v10881_v35, 0 }
 0x5ee   : > { %v5579_v62 = vmul.f32 %v5562_v8, %v15266_v22  ;;  %v7233_v55 = vsel %vm6829_vm12, %v10890_v36, 0  ;;  %v5822_v36 = vunpack.c.l.s4 %v12217_v39 }
 0x5ef   : > { %7118 = vmatpush.bf16.xpose.msra.mxu3 %v7108_v34 }
 0x5f0   : > { %v5590_v18 = vmul.f32 %v15305_v38, %v5579_v62  ;;  %7243 = vmatpush.bf16.xpose.msrb.mxu0 %v7233_v55  ;;  %v10880_v62 = vld [vmem:[#allocation2 + $0x98] sm:$0xff]  ;;  %v15434_v35 = vunpack.c.0.s8 %v5822_v36 }
 0x5f2   : > { %v5601_v23 = vadd.f32 %v15312_v41, %v5590_v18  ;;  %v10864_v18 = vld [vmem:[#allocation2 + $0x18] sm:$0xff] }
 0x5f7   : > { %7119 = vmatpush.bf16.xpose.msra.mxu3 %v7105_v33 }
 0x5fd   : > { %5693 = vmatmul.bf16.gmra.mxu0 %v5605_v10  ;;  %v10875_v10 = vld [vmem:[#allocation2 + $0x70] sm:$0xff] }
 0x5fe   : > { %v6986_v30 = vsel %vm6829_vm12, %v10875_v10, 0  ;;  %v10870_v10 = vld [vmem:[#allocation2 + $0x48] sm:$0xff] }
 0x5ff   : > { %6992 = vmatpush.bf16.xpose.msra.mxu2 %v6986_v30  ;;  %v6971_v55 = vsel %vm6829_vm12, %v10870_v10, 0 }
 0x638   : > { %v5476_v15 = vpop.xlane.xlu0 %5475 }
 0x639   : > { %v5484_v27 = vmul.f32 %v5476_v15, %v15241_v40  ;;  %v10866_v15 = vld [vmem:[#allocation2 + $0x28] sm:$0xff] }
 0x63b   : > { %v5492_v6 = vadd.f32 1e-05, %v5484_v27  ;;  %v10874_v27 = vld [vmem:[#allocation2 + $0x68] sm:$0xff] }
 0x63c   : > { %v6983_v17 = vsel %vm6829_vm12, %v10874_v27, 0 }
 0x63d   : > { %11594 = vrsqrt.f32 %v5492_v6  ;;  %vm5569_vm10 = vweird.f32 %v5492_v6  ;;  %6993 = vmatpush.bf16.xpose.msra.mxu2 %v6983_v17 }
 0x643   : > { %v11595_v52 = vpop.eup %11594 }
 0x644   : > { %v5564_v21 = vmul.f32 %v11595_v52, %v5492_v6  ;;  %vm5570_vm9 = vweird.f32 %v11595_v52  ;;  %v6858_v6 = vsel %vm6829_vm12, %v10866_v15, 0 }
 0x645   : > { %vm5571_vm11 = vmor %vm5569_vm10, %vm5570_vm9  ;;  %6868 = vmatpush.bf16.xpose.msra.mxu1 %v6858_v6 }
 0x646   : > { %v5565_v19 = vmul.f32 %v11595_v52, %v5564_v21 }
 0x648   : > { %v5566_v29 = vmul.f32 0.5, %v5565_v19  ;;  %v10865_v19 = vld [vmem:[#allocation2 + $0x20] sm:$0xff] }
 0x649   : > { %v6855_v8 = vsel %vm6829_vm12, %v10865_v19, 0 }
 0x64a   : > { %v5567_v56 = vsub.f32 1.5, %v5566_v29  ;;  %v10873_v29 = vld [vmem:[#allocation2 + $0x60] sm:$0xff] }
 0x64c   : > { %v5568_v32 = vmul.f32 %v11595_v52, %v5567_v56  ;;  %v6980_v56 = vsel %vm6829_vm12, %v10873_v29, 0 }
 0x64d   : > { %6869 = vmatpush.bf16.xpose.msra.mxu1 %v6855_v8  ;;  %6994 = vmatpush.bf16.xpose.msra.mxu2 %v6980_v56 }
 0x64e   : > { %v5572_v46 = vsel %vm5571_vm11, %v11595_v52, %v5568_v32  ;;  %v10889_v52 = vld [vmem:[#allocation2 + $0xe0] sm:$0xff]  ;;  %v10888_v32 = vld [vmem:[#allocation2 + $0xd8] sm:$0xff] }
 0x64f   : > { %v5580_v7 = vmul.f32 %v5572_v46, %v15285_v25  ;;  %v7230_v21 = vsel %vm6829_vm12, %v10889_v52, 0  ;;  %v7102_v46 = vsel %vm6829_vm12, %v10880_v62, 0  ;;  %v10877_v62 = vld [vmem:[#allocation2 + $0x80] sm:$0xff] }
 0x650   : > { %7244 = vmatpush.bf16.xpose.msrb.mxu0 %v7230_v21  ;;  %7120 = vmatpush.bf16.xpose.msra.mxu3 %v7102_v46 }
 0x651   : > { %v5591_v59 = vmul.f32 %v15305_v38, %v5580_v7  ;;  %v7227_v7 = vsel %vm6829_vm12, %v10888_v32, 0  ;;  %v10885_v32 = vld [vmem:[#allocation2 + $0xc0] sm:$0xff] }
 0x652   : > { %v7218_v20 = vsel %vm6829_vm12, %v10885_v32, 0 }
 0x653   : > { %v5602_v5 = vadd.f32 %v15312_v41, %v5591_v59  ;;  %v10872_v59 = vld [vmem:[#allocation2 + $0x58] sm:$0xff] }
 0x655   : > { %v5606_v49 = vpack.c.bf16 %v5602_v5, %v5601_v23  ;;  %v6852_v23 = vsel %vm6829_vm12, %v10864_v18, 0  ;;  %v6977_v5 = vsel %vm6829_vm12, %v10872_v59, 0 }
 0x656   : > { %6870 = vmatpush.bf16.xpose.msra.mxu1 %v6852_v23  ;;  %6995 = vmatpush.bf16.xpose.msra.mxu2 %v6977_v5 }
 0x657   : > { %5698 = vmatmul.bf16.gmra.mxu0 %v5606_v49  ;;  %v10879_v49 = vld [vmem:[#allocation2 + $0x90] sm:$0xff] }
 0x658   : > { %7245 = vmatpush.bf16.xpose.msrb.mxu0 %v7227_v7 }
 0x65a   : > { %v5684_v60 = vpop.f32.mrf.mxu0 }
 0x65b   : > { %v5685_v22 = vadd.f32 %v15343_v57, %v5684_v60  ;;  %v10887_v60 = vld [vmem:[#allocation2 + $0xd0] sm:$0xff] }
 0x65d   : > { %v15347_v54 = vmul.f32 0.17677669, %v5685_v22  ;;  %v7099_v22 = vsel %vm6829_vm12, %v10879_v49, 0 }
 0x65e   : > { %7121 = vmatpush.bf16.xpose.msra.mxu3 %v7099_v22  ;;  %6871 = vmatpush.bf16.xpose.msra.mxu1 %v6849_v50 }
 0x65f   : > { %6996 = vmatpush.bf16.xpose.msra.mxu2 %v6974_v2 }
 0x662   : > { %v5686_v51 = vpop.f32.mrf.mxu0 }
 0x663   : > { %v5687_v42 = vadd.f32 %v15343_v57, %v5686_v51  ;;  %v7224_v51 = vsel %vm6829_vm12, %v10887_v60, 0 }
 0x664   : > { %7246 = vmatpush.bf16.xpose.msrb.mxu0 %v7224_v51  ;;  %v7093_v51 = vsel %vm6829_vm12, %v10877_v62, 0 }
 0x665   : > { %v15349_v25 = vmul.f32 0.17677669, %v5687_v42 }
 0x666   : > { %7122 = vmatpush.bf16.xpose.msra.mxu3 %v7096_v14 }
 0x667   : > { %v11456_v38 = vpack.i.bf16 %v15349_v25, %v15347_v54  ;;  %6997 = vmatpush.bf16.xpose.msra.mxu2 %v6971_v55 }
 0x669   : > { %11457 = vrot.lane.b32.xlu2 %v11456_v38, %s12213_s10  ;;  %11452 = vrot.lane.b32.xlu1 %v11456_v38, %s12214_s11 }
 0x66a   : > { %11462 = vrot.lane.b32.xlu0 %v11456_v38, %s12215_s20  ;;  %v5689_v41 = vpop.f32.mrf.mxu0 }
 0x66b   : > { %v5690_v13 = vadd.f32 %v15343_v57, %v5689_v41 }
 0x66c   : > { %7247 = vmatpush.bf16.xpose.msrb.mxu0 %v7221_v11 }
 0x66d   : > { %v15364_v1 = vmul.f32 0.17677669, %v5690_v13  ;;  %v5851_v13 = vrot.slane %v15349_v25, 4 }
 0x66e   : > { %7123 = vmatpush.bf16.xpose.msra.mxu3 %v7093_v51 }
 0x66f   : > { %v5907_v27 = vrot.slane %v15364_v1, 4 }
 0x672   : > { %v5691_v26 = vpop.f32.mrf.mxu0 }
 0x673   : > { %v5692_v0 = vadd.f32 %v15343_v57, %v5691_v26  ;;  %v5795_v26 = vrot.slane %v15347_v54, 4 }
 0x674   : > { %7248 = vmatpush.bf16.xpose.msrb.mxu0 %v7218_v20 }
 0x675   : > { %v15366_v24 = vmul.f32 0.17677669, %v5692_v0  ;;  %v15406_v0 = vunpack.c.0.s8 %v5798_v9 }
 0x677   : > { %v11466_v48 = vpack.i.bf16 %v15366_v24, %v15364_v1  ;;  %v5963_v6 = vrot.slane %v15366_v24, 4 }
 0x679   : > { %11467 = vrot.lane.b32.xlu2 %v11466_v48, %s12214_s11  ;;  %11472 = vrot.lane.b32.xlu1 %v11466_v48, %s12213_s10 }
 0x67a   : > { %11477 = vrot.lane.b32.xlu0 %v11466_v48, %s12215_s20  ;;  %v5694_v37 = vpop.f32.mrf.mxu0 }
 0x67b   : > { %v5695_v47 = vadd.f32 %v15343_v57, %v5694_v37 }
 0x67d   : > { %v15375_v16 = vmul.f32 0.17677669, %v5695_v47 }
 0x67f   : > { %v6019_v33 = vrot.slane %v15375_v16, 4 }
 0x682   : > { %v5696_v45 = vpop.f32.mrf.mxu0 }
 0x683   : > { %v5697_v53 = vadd.f32 %v15343_v57, %v5696_v45 }
 0x685   : > { %v15377_v3 = vmul.f32 0.17677669, %v5697_v53 }
 0x687   : > { %v11491_v44 = vpack.i.bf16 %v15377_v3, %v15375_v16  ;;  %v6075_v52 = vrot.slane %v15377_v3, 4 }
 0x689   : > { %11492 = vrot.lane.b32.xlu0 %v11491_v44, %s12215_s20  ;;  %11487 = vrot.lane.b32.xlu1 %v11491_v44, %s12213_s10 }
 0x68a   : > { %11482 = vrot.lane.b32.xlu2 %v11491_v44, %s12214_s11 }
 0x6c3   : > { %v11458_v42 = vpop.permute.xlu2 %11457 }
 0x6c4   : > { %v11460_v38 = vunpack.i.h.bf16 %v11458_v42  ;;  %v11459_v41 = vunpack.i.l.bf16 %v11458_v42  ;;  %v10861_v42 = vld [vmem:[#allocation2] sm:$0xff] }
 0x6c6   : > { %v5849_v63 = vrot.slane %v11460_v38, 4  ;;  %v5792_v28 = vrot.slane %v11459_v41, 4  ;;  %v5852_v48 = vsel %vm5793_vm13, %v11460_v38, %v5851_v13  ;;  %v5796_v37 = vsel %vm5793_vm13, %v11459_v41, %v5795_v26  ;;  %v10869_v38 = vld [vmem:[#allocation2 + $0x40] sm:$0xff] }
 0x6c7   : > { %v15417_v61 = vperm.slane %v5852_v48, %v15406_v0  ;;  %v15420_v30 = vperm.slane %v5796_v37, %v15406_v0 }
 0x6c8   : > { %v5850_v47 = vsel %vm5793_vm13, %v5849_v63, %v15349_v25  ;;  %v5794_v45 = vsel %vm5793_vm13, %v5792_v28, %v15347_v54  ;;  %v6846_v54 = vsel %vm6829_vm12, %v10862_v31, 0  ;;  %v6968_v28 = vsel %vm6829_vm12, %v10869_v38, 0 }
 0x6c9   : > { %v15423_v34 = vperm.slane %v5850_v47, %v15406_v0  ;;  %v15426_v25 = vperm.slane %v5794_v45, %v15406_v0  ;;  %6872 = vmatpush.bf16.xpose.msra.mxu1 %v6846_v54  ;;  %v5887_v19 = vrot.slane %v15417_v61, 4  ;;  %v5831_v8 = vrot.slane %v15420_v30, 4  ;;  %6998 = vmatpush.bf16.xpose.msra.mxu2 %v6968_v28 }
 0x6cb   : > { %v5875_v21 = vrot.slane %v15423_v34, 4  ;;  %v5819_v29 = vrot.slane %v15426_v25, 4 }
 0x6d3   : > { %v15414_v44 = vpop.permute.xlu2 %11467 }
 0x6d4   : > { %v5699_v53 = vpop.f32.mrf.mxu0  ;;  %v11470_v15 = vunpack.i.h.bf16 %v15414_v44  ;;  %v11469_v17 = vunpack.i.l.bf16 %v15414_v44 }
 0x6d5   : > { %v5700_v7 = vadd.f32 %v15343_v57, %v5699_v53 }
 0x6d6   : > { %v15444_v46 = vrot.slane %v11470_v15, 4  ;;  %v15451_v41 = vrot.slane %v11469_v17, 4 }
 0x6d7   : > { %v15457_v4 = vmul.f32 0.17677669, %v5700_v7 }
 0x6db   : > { %v11453_v56 = vpop.permute.xlu1 %11452 }
 0x6dc   : > { %v11455_v18 = vunpack.i.h.bf16 %v11453_v56  ;;  %v11454_v59 = vunpack.i.l.bf16 %v11453_v56  ;;  %v11463_v23 = vpop.permute.xlu0 %11462  ;;  %v5701_v5 = vpop.f32.mrf.mxu0 }
 0x6dd   : > { %v11465_v49 = vunpack.i.h.bf16 %v11463_v23  ;;  %v11464_v60 = vunpack.i.l.bf16 %v11463_v23  ;;  %v5702_v22 = vadd.f32 %v15343_v57, %v5701_v5  ;;  %v6843_v57 = vsel %vm6829_vm12, %v10861_v42, 0 }
 0x6de   : > { %v5863_v58 = vrot.slane %v11455_v18, 4  ;;  %v5807_v12 = vrot.slane %v11454_v59, 4  ;;  %6873 = vmatpush.bf16.xpose.msra.mxu1 %v6843_v57 }
 0x6df   : > { %v5861_v9 = vrot.slane %v11465_v49, 4  ;;  %v5805_v50 = vrot.slane %v11464_v60, 4  ;;  %v15454_v2 = vmul.f32 0.17677669, %v5702_v22 }
 0x6e0   : > { %v5864_v43 = vsel %vm5793_vm13, %v11465_v49, %v5863_v58  ;;  %v5808_v63 = vsel %vm5793_vm13, %v11464_v60, %v5807_v12 }
 0x6e1   : > { %v5862_v13 = vsel %vm5793_vm13, %v5861_v9, %v11455_v18  ;;  %v5872_v26 = vperm.slane %v5864_v43, %v15406_v0  ;;  %v5806_v14 = vsel %vm5793_vm13, %v5805_v50, %v11454_v59  ;;  %v5816_v11 = vperm.slane %v5808_v63, %v15406_v0 }
 0x6e2   : > { %v5868_v48 = vperm.slane %v5862_v13, %v15406_v0  ;;  %v5812_v37 = vperm.slane %v5806_v14, %v15406_v0  ;;  %v11506_v47 = vpack.i.bf16 %v15454_v2, %v15457_v4 }
 0x6e3   : > { %v5885_v45 = vrot.slane %v5872_v26, 4  ;;  %v5888_v53 = vsel %vm5793_vm13, %v5872_v26, %v5887_v19  ;;  %v5829_v31 = vrot.slane %v5816_v11, 4  ;;  %v5832_v10 = vsel %vm5793_vm13, %v5816_v11, %v5831_v8 }
 0x6e4   : > { %v5873_v39 = vrot.slane %v5868_v48, 4  ;;  %v5876_v36 = vsel %vm5793_vm13, %v5868_v48, %v5875_v21  ;;  %v5896_v54 = vperm.slane %v5888_v53, %v15434_v35  ;;  %v5817_v55 = vrot.slane %v5812_v37, 4  ;;  %11507 = vrot.lane.b32.xlu0 %v11506_v47, %s12215_s20  ;;  %11502 = vrot.lane.b32.xlu1 %v11506_v47, %s12213_s10  ;;  %v15501_v60 = vpop.permute.xlu2 %11482 }
 0x6e5   : > { %v5884_v56 = vperm.slane %v5876_v36, %v15434_v35  ;;  %v5886_v62 = vsel %vm5793_vm13, %v5885_v45, %v15417_v61  ;;  %v5820_v19 = vsel %vm5793_vm13, %v5812_v37, %v5819_v29  ;;  %v5830_v8 = vsel %vm5793_vm13, %v5829_v31, %v15420_v30  ;;  %11497 = vrot.lane.b32.xlu2 %v11506_v47, %s12214_s11 }
 0x6e6   : > { %v5874_v21 = vsel %vm5793_vm13, %v5873_v39, %v15423_v34  ;;  %v5892_v32 = vperm.slane %v5886_v62, %v15434_v35  ;;  %v5903_v7 = vrot.slane %v5896_v54, 4  ;;  %v5818_v18 = vsel %vm5793_vm13, %v5817_v55, %v15426_v25 }
 0x6e7   : > { %v15488_v59 = vperm.slane %v5874_v21, %v15434_v35  ;;  %v15490_v23 = vrot.slane %v5884_v56, 4  ;;  %v15493_v61 = vperm.slane %v5818_v18, %v15434_v35  ;;  %v5828_v29 = vperm.slane %v5820_v19, %v15434_v35 }
 0x6e8   : > { %v5901_v30 = vrot.slane %v5892_v32, 4  ;;  %v15497_v5 = vsel %vm5793_vm13, 0.0, %v5903_v7  ;;  %v6306_v34 = vsel %vm5793_vm13, %v5903_v7, %v5892_v32  ;;  %v5836_v49 = vperm.slane %v5830_v8, %v15434_v35 }
 0x6e9   : > { %v5897_v25 = vrot.slane %v15488_v59, 4  ;;  %v15506_v22 = vsel %vm5793_vm13, 0.0, %v15490_v23  ;;  %v15509_v51 = vperm.slane %v6306_v34, %v15406_v0  ;;  %v6311_v42 = vrot.slane %v15497_v5, 4 }
 0x6ea   : > { %v15513_v38 = vsel %vm5793_vm13, 0.0, %v5901_v30  ;;  %v6300_v58 = vrot.slane %v15506_v22, 4  ;;  %v5840_v12 = vperm.slane %v5832_v10, %v15434_v35  ;;  %v5841_v20 = vrot.slane %v15493_v61, 4 }
 0x6eb   : > { %v5843_v9 = vrot.slane %v5828_v29, 4  ;;  %v5845_v50 = vrot.slane %v5836_v49, 4  ;;  %v11485_v57 = vunpack.i.h.bf16 %v15501_v60  ;;  %v11484_v43 = vunpack.i.l.bf16 %v15501_v60  ;;  %v11473_v63 = vpop.permute.xlu1 %11472 }
 0x6ec   : > { %v5847_v28 = vrot.slane %v5840_v12, 4  ;;  %v11475_v13 = vunpack.i.h.bf16 %v11473_v63  ;;  %v11474_v26 = vunpack.i.l.bf16 %v11473_v63  ;;  %v11478_v45 = vpop.permute.xlu0 %11477 }
 0x6ed   : > { %v15521_v14 = vsel %vm5793_vm13, 0.0, %v5843_v9  ;;  %v15524_v11 = vsel %vm5793_vm13, 0.0, %v5845_v50  ;;  %v15528_v48 = vrot.slane %v11485_v57, 4  ;;  %v15532_v37 = vrot.slane %v11484_v43, 4 }
 0x6ee   : > { %v15535_v53 = vsel %vm5793_vm13, 0.0, %v5847_v28  ;;  %v6246_v31 = vrot.slane %v15521_v14, 4  ;;  %v6252_v10 = vsel %vm5793_vm13, %v5847_v28, %v5836_v49  ;;  %v5961_v39 = vrot.slane %v11475_v13, 4 }
 0x6ef   : > { %v15541_v36 = vperm.slane %v6252_v10, %v15406_v0  ;;  %v6257_v54 = vrot.slane %v15535_v53, 4  ;;  %v5964_v55 = vsel %vm5793_vm13, %v11475_v13, %v5963_v6  ;;  %v5905_v56 = vrot.slane %v11474_v26, 4 }
 0x6f0   : > { %v5962_v62 = vsel %vm5793_vm13, %v5961_v39, %v15366_v24  ;;  %v5972_v19 = vperm.slane %v5964_v55, %v15406_v0  ;;  %v5908_v47 = vsel %vm5793_vm13, %v11474_v26, %v5907_v27  ;;  %v11480_v8 = vunpack.i.h.bf16 %v11478_v45 }
 0x6f1   : > { %v5968_v21 = vperm.slane %v5962_v62, %v15406_v0  ;;  %v5906_v32 = vsel %vm5793_vm13, %v5905_v56, %v15364_v1  ;;  %v5916_v7 = vperm.slane %v5908_v47, %v15406_v0  ;;  %v11479_v18 = vunpack.i.l.bf16 %v11478_v45 }
 0x6f2   : > { %v5999_v6 = vrot.slane %v5972_v19, 4  ;;  %v5912_v29 = vperm.slane %v5906_v32, %v15406_v0  ;;  %v5973_v30 = vrot.slane %v11480_v8, 4  ;;  %v5976_v24 = vsel %vm5793_vm13, %v11480_v8, %v15444_v46 }
 0x6f3   : > { %v5987_v34 = vrot.slane %v5968_v21, 4  ;;  %v5943_v49 = vrot.slane %v5916_v7, 4  ;;  %v5984_v27 = vperm.slane %v5976_v24, %v15406_v0  ;;  %v5917_v12 = vrot.slane %v11479_v18, 4 }
 0x6f4   : > { %v5931_v50 = vrot.slane %v5912_v29, 4  ;;  %v5974_v1 = vsel %vm5793_vm13, %v5973_v30, %v11470_v15  ;;  %v5920_v63 = vsel %vm5793_vm13, %v11479_v18, %v15451_v41  ;;  %v5842_v28 = vsel %vm5793_vm13, 0.0, %v5841_v20 }
 0x6f5   : > { %v5980_v13 = vperm.slane %v5974_v1, %v15406_v0  ;;  %v5997_v26 = vrot.slane %v5984_v27, 4  ;;  %v6000_v46 = vsel %vm5793_vm13, %v5984_v27, %v5999_v6  ;;  %v5918_v45 = vsel %vm5793_vm13, %v5917_v12, %v11469_v17 }
 0x6f6   : > { %v6008_v10 = vperm.slane %v6000_v46, %v15434_v35  ;;  %v5924_v39 = vperm.slane %v5918_v45, %v15406_v0  ;;  %v5928_v15 = vperm.slane %v5920_v63, %v15406_v0  ;;  %v5898_v55 = vsel %vm5793_vm13, 0.0, %v5897_v25 }
 0x6f7   : > { %v5985_v41 = vrot.slane %v5980_v13, 4  ;;  %v5988_v20 = vsel %vm5793_vm13, %v5980_v13, %v5987_v34  ;;  %v5998_v56 = vsel %vm5793_vm13, %v5997_v26, %v5972_v19  ;;  %v6241_v62 = vsel %vm5793_vm13, %v5843_v9, %v15493_v61 }
 0x6f8   : > { %v5996_v44 = vperm.slane %v5988_v20, %v15434_v35  ;;  %v6004_v17 = vperm.slane %v5998_v56, %v15434_v35  ;;  %v6015_v47 = vrot.slane %v6008_v10, 4  ;;  %v5929_v8 = vrot.slane %v5924_v39, 4 }
 0x6f9   : > { %v5986_v32 = vsel %vm5793_vm13, %v5985_v41, %v5968_v21  ;;  %v5932_v18 = vsel %vm5793_vm13, %v5924_v39, %v5931_v50  ;;  %v5941_v6 = vrot.slane %v5928_v15, 4  ;;  %v5944_v25 = vsel %vm5793_vm13, %v5928_v15, %v5943_v49 }
 0x6fa   : > { %v15586_v30 = vperm.slane %v5986_v32, %v15434_v35  ;;  %v15588_v19 = vrot.slane %v5996_v44, 4  ;;  %v6013_v24 = vrot.slane %v6004_v17, 4  ;;  %v15591_v61 = vsel %vm5793_vm13, 0.0, %v6015_v47 }
 0x6fb   : > { %v6414_v9 = vsel %vm5793_vm13, %v6015_v47, %v6004_v17  ;;  %v6419_v34 = vrot.slane %v15591_v61, 4  ;;  %v5930_v21 = vsel %vm5793_vm13, %v5929_v8, %v5912_v29  ;;  %v5940_v27 = vperm.slane %v5932_v18, %v15434_v35  ;;  %v11488_v32 = vpop.permute.xlu1 %11487 }
 0x6fc   : > { %v6009_v12 = vrot.slane %v15586_v30, 4  ;;  %v15600_v49 = vsel %vm5793_vm13, 0.0, %v15588_v19  ;;  %v15603_v50 = vsel %vm5793_vm13, 0.0, %v6013_v24  ;;  %v15606_v1 = vperm.slane %v6414_v9, %v15406_v0  ;;  %v11493_v9 = vpop.permute.xlu0 %11492 }
 0x6fd   : > { %v6408_v63 = vrot.slane %v15600_v49, 4  ;;  %v15610_v13 = vperm.slane %v5930_v21, %v15434_v35  ;;  %v5942_v29 = vsel %vm5793_vm13, %v5941_v6, %v5916_v7  ;;  %v5952_v26 = vperm.slane %v5944_v25, %v15434_v35 }
 0x6fe   : > { %v5948_v46 = vperm.slane %v5942_v29, %v15434_v35  ;;  %v15615_v45 = vrot.slane %v5940_v27, 4  ;;  %v15618_v10 = vperm.slane %v6241_v62, %v15406_v0  ;;  %v6247_v39 = vsel %vm5793_vm13, %v6246_v31, %v5842_v28 }
 0x6ff   : > { %v5953_v15 = vrot.slane %v15610_v13, 4  ;;  %v5959_v41 = vrot.slane %v5952_v26, 4  ;;  %v15625_v20 = vperm.slane %v6247_v39, %v15406_v0  ;;  %v6258_v7 = vsel %vm5793_vm13, %v6257_v54, %v15524_v11 }
 0x700   : > { %v15633_v56 = vsel %vm5793_vm13, 0.0, %v15615_v45  ;;  %v5957_v62 = vrot.slane %v5948_v46, 4  ;;  %v15636_v14 = vperm.slane %v6258_v7, %v15406_v0  ;;  %v6265_v31 = vrot.slane %v15618_v10, 4 }
 0x701   : > { %v15640_v28 = vsel %vm5793_vm13, 0.0, %v5959_v41  ;;  %v6354_v44 = vrot.slane %v15633_v56, 4  ;;  %v6360_v17 = vsel %vm5793_vm13, %v5959_v41, %v5948_v46  ;;  %v6277_v53 = vrot.slane %v15541_v36, 4 }
 0x702   : > { %v15646_v11 = vsel %vm5793_vm13, 0.0, %v5957_v62  ;;  %v15649_v54 = vperm.slane %v6360_v17, %v15406_v0  ;;  %v6365_v47 = vrot.slane %v15640_v28, 4  ;;  %v6266_v8 = vsel %vm5793_vm13, %v15625_v20, %v6265_v31 }
 0x703   : > { %v6274_v18 = vperm.slane %v6266_v8, %v15434_v35  ;;  %v6278_v6 = vsel %vm5793_vm13, %v15636_v14, %v6277_v53  ;;  %v6295_v25 = vsel %vm5793_vm13, %v15490_v23, %v15488_v59  ;;  %v6301_v24 = vsel %vm5793_vm13, %v6300_v58, %v5898_v55 }
 0x704   : > { %v6286_v21 = vperm.slane %v6278_v6, %v15434_v35  ;;  %v15665_v27 = vperm.slane %v6295_v25, %v15406_v0  ;;  %v15668_v29 = vperm.slane %v6301_v24, %v15406_v0  ;;  %v6312_v26 = vsel %vm5793_vm13, %v6311_v42, %v15513_v38 }
 0x705   : > { %v6293_v46 = vrot.slane %v6274_v18, 4  ;;  %v15675_v59 = vperm.slane %v6312_v26, %v15406_v0  ;;  %v6331_v23 = vrot.slane %v15509_v51, 4  ;;  %v11490_v22 = vunpack.i.h.bf16 %v11488_v32 }
 0x706   : > { %v6291_v58 = vrot.slane %v6286_v21, 4  ;;  %v6319_v55 = vrot.slane %v15665_v27, 4  ;;  %v11489_v39 = vunpack.i.l.bf16 %v11488_v32  ;;  %v11495_v41 = vunpack.i.h.bf16 %v11493_v9 }
 0x707   : > { %v6332_v7 = vsel %vm5793_vm13, %v15675_v59, %v6331_v23  ;;  %v6294_v62 = vsel %vm5793_vm13, %v6286_v21, %v6293_v46  ;;  %v6073_v5 = vrot.slane %v11490_v22, 4  ;;  %v6076_v42 = vsel %vm5793_vm13, %v11490_v22, %v6075_v52 }
 0x708   : > { %v6292_v38 = vsel %vm5793_vm13, %v6291_v58, %v6274_v18  ;;  %v6320_v31 = vsel %vm5793_vm13, %v15668_v29, %v6319_v55  ;;  %v6340_v17 = vperm.slane %v6332_v7, %v15434_v35  ;;  %v6697_v53 = vpack.c.bf16 %v6294_v62, %v6294_v62 }
 0x709   : > { %v6328_v8 = vperm.slane %v6320_v31, %v15434_v35  ;;  %v6689_v32 = vpack.c.bf16 %v6292_v38, %v6292_v38  ;;  %v6074_v6 = vsel %vm5793_vm13, %v6073_v5, %v15377_v3  ;;  %v6084_v25 = vperm.slane %v6076_v42, %v15406_v0 }
 0x70a   : > { %v6345_v24 = vrot.slane %v6340_v17, 4  ;;  %v7153_v21 = vunpack.c.l.b16 %v6697_v53  ;;  %v6080_v52 = vperm.slane %v6074_v6, %v15406_v0  ;;  %v6017_v26 = vrot.slane %v11489_v39, 4 }
 0x70b   : > { %v6347_v18 = vrot.slane %v6328_v8, 4  ;;  %v7028_v46 = vunpack.c.l.b16 %v6689_v32  ;;  %v6111_v23 = vrot.slane %v6084_v25, 4  ;;  %v6020_v22 = vsel %vm5793_vm13, %v11489_v39, %v6019_v33 }
 0x70c   : > { %v6346_v58 = vsel %vm5793_vm13, %v6345_v24, %v6328_v8  ;;  %v6099_v55 = vrot.slane %v6080_v52, 4  ;;  %v6018_v3 = vsel %vm5793_vm13, %v6017_v26, %v15375_v16  ;;  %v6028_v7 = vperm.slane %v6020_v22, %v15406_v0 }
 0x70d   : > { %v6690_v62 = vpack.c.bf16 %v6346_v58, %v6346_v58  ;;  %v6348_v5 = vsel %vm5793_vm13, %v6340_v17, %v6347_v18  ;;  %v6024_v42 = vperm.slane %v6018_v3, %v15406_v0  ;;  %v6085_v38 = vrot.slane %v11495_v41, 4 }
 0x70e   : > { %v6698_v31 = vpack.c.bf16 %v6348_v5, %v6348_v5  ;;  %v6055_v53 = vrot.slane %v6028_v7, 4  ;;  %v6088_v32 = vsel %vm5793_vm13, %v11495_v41, %v15528_v48  ;;  %v11494_v33 = vunpack.i.l.bf16 %v11493_v9 }
 0x70f   : > { %v7029_v39 = vunpack.c.l.b16 %v6690_v62  ;;  %v6043_v8 = vrot.slane %v6024_v42, 4  ;;  %v6086_v16 = vsel %vm5793_vm13, %v6085_v38, %v11485_v57  ;;  %v6096_v6 = vperm.slane %v6088_v32, %v15406_v0 }
 0x710   : > { %v7154_v24 = vunpack.c.l.b16 %v6698_v31  ;;  %v6092_v17 = vperm.slane %v6086_v16, %v15406_v0  ;;  %v6029_v26 = vrot.slane %v11494_v33, 4  ;;  %v6032_v18 = vsel %vm5793_vm13, %v11494_v33, %v15532_v37 }
 0x711   : > { %v7036_v22 = vpack.c.b16 %v7029_v39, %v7028_v46  ;;  %v6109_v58 = vrot.slane %v6096_v6, 4  ;;  %v6112_v48 = vsel %vm5793_vm13, %v6096_v6, %v6111_v23  ;;  %v6040_v9 = vperm.slane %v6032_v18, %v15406_v0 }
 0x712   : > { %v7161_v41 = vpack.c.b16 %v7154_v24, %v7153_v21  ;;  %v6097_v3 = vrot.slane %v6092_v17, 4  ;;  %v6100_v62 = vsel %vm5793_vm13, %v6092_v17, %v6099_v55  ;;  %v6120_v57 = vperm.slane %v6112_v48, %v15434_v35 }
 0x713   : > { %10486 = vmatmul.msk.bf16.vlgmr.msra.gmra.mxu3 %vm6829_vm12, %v7036_v22  ;;  %v6108_v5 = vperm.slane %v6100_v62, %v15434_v35  ;;  %v6110_v38 = vsel %vm5793_vm13, %v6109_v58, %v6084_v25  ;;  %v6030_v37 = vsel %vm5793_vm13, %v6029_v26, %v11484_v43  ;;  %v6053_v46 = vrot.slane %v6040_v9, 4 }
 0x714   : > { %10522 = vmatmul.msk.bf16.vlgmr.msrb.gmra.mxu0 %vm6829_vm12, %v7161_v41  ;;  %v6098_v21 = vsel %vm5793_vm13, %v6097_v3, %v6080_v52  ;;  %v6116_v23 = vperm.slane %v6110_v38, %v15434_v35  ;;  %v6127_v55 = vrot.slane %v6120_v57, 4  ;;  %v6036_v31 = vperm.slane %v6030_v37, %v15406_v0 }
 0x715   : > { %v15727_v32 = vperm.slane %v6098_v21, %v15434_v35  ;;  %v15729_v33 = vrot.slane %v6108_v5, 4  ;;  %v6054_v25 = vsel %vm5793_vm13, %v6053_v46, %v6028_v7  ;;  %v6056_v60 = vsel %vm5793_vm13, %v6040_v9, %v6055_v53 }
 0x716   : > { %v6125_v43 = vrot.slane %v6116_v23, 4  ;;  %v15734_v39 = vsel %vm5793_vm13, 0.0, %v6127_v55  ;;  %v6522_v52 = vsel %vm5793_vm13, %v6127_v55, %v6116_v23  ;;  %v6041_v16 = vrot.slane %v6036_v31, 4 }
 0x717   : > { %v6121_v6 = vrot.slane %v15727_v32, 4  ;;  %v15740_v24 = vsel %vm5793_vm13, 0.0, %v15729_v33  ;;  %v15743_v17 = vperm.slane %v6522_v52, %v15406_v0  ;;  %v6527_v7 = vrot.slane %v15734_v39, 4 }
 0x718   : > { %v15747_v53 = vsel %vm5793_vm13, 0.0, %v6125_v43  ;;  %v6516_v26 = vrot.slane %v15740_v24, 4  ;;  %v6042_v18 = vsel %vm5793_vm13, %v6041_v16, %v6024_v42  ;;  %v6044_v22 = vsel %vm5793_vm13, %v6036_v31, %v6043_v8 }
 0x719   : > { %v15753_v58 = vperm.slane %v6042_v18, %v15434_v35  ;;  %v6052_v48 = vperm.slane %v6044_v22, %v15434_v35  ;;  %v6060_v9 = vperm.slane %v6054_v25, %v15434_v35  ;;  %v6064_v41 = vperm.slane %v6056_v60, %v15434_v35 }
 0x71a   : > { %v6263_v3 = vrot.slane %v15625_v20, 4  ;;  %v6275_v62 = vrot.slane %v15636_v14, 4  ;;  %v6317_v57 = vrot.slane %v15668_v29, 4  ;;  %v6329_v5 = vrot.slane %v15675_v59, 4 }
 0x71b   : > { %v6065_v42 = vrot.slane %v15753_v58, 4  ;;  %v15763_v8 = vrot.slane %v6052_v48, 4  ;;  %v6069_v38 = vrot.slane %v6060_v9, 4  ;;  %v6071_v37 = vrot.slane %v6064_v41, 4 }
 0x71c   : > { %v6264_v46 = vsel %vm5793_vm13, %v6263_v3, %v15618_v10  ;;  %v6276_v21 = vsel %vm5793_vm13, %v6275_v62, %v15541_v36  ;;  %v6318_v20 = vsel %vm5793_vm13, %v6317_v57, %v15665_v27  ;;  %v6330_v14 = vsel %vm5793_vm13, %v6329_v5, %v15509_v51 }
 0x71d   : > { %v15775_v29 = vsel %vm5793_vm13, 0.0, %v15763_v8  ;;  %v15778_v59 = vsel %vm5793_vm13, 0.0, %v6069_v38  ;;  %v15781_v23 = vsel %vm5793_vm13, 0.0, %v6071_v37  ;;  %v6468_v10 = vsel %vm5793_vm13, %v6071_v37, %v6060_v9 }
 0x71e   : > { %v6462_v36 = vrot.slane %v15775_v29, 4  ;;  %v15786_v55 = vperm.slane %v6468_v10, %v15406_v0  ;;  %v6473_v27 = vrot.slane %v15781_v23, 4  ;;  %v6270_v51 = vperm.slane %v6264_v46, %v15434_v35 }
 0x71f   : > { %v6282_v31 = vperm.slane %v6276_v21, %v15434_v35  ;;  %v6324_v25 = vperm.slane %v6318_v20, %v15434_v35  ;;  %v6336_v60 = vperm.slane %v6330_v14, %v15434_v35  ;;  %v5954_v43 = vsel %vm5793_vm13, 0.0, %v5953_v15 }
 0x720   : > { %v6289_v52 = vrot.slane %v6270_v51, 4  ;;  %v6010_v16 = vsel %vm5793_vm13, 0.0, %v6009_v12  ;;  %v6349_v18 = vsel %vm5793_vm13, %v15615_v45, %v15610_v13  ;;  %v6355_v22 = vsel %vm5793_vm13, %v6354_v44, %v5954_v43 }
 0x721   : > { %v6287_v48 = vrot.slane %v6282_v31, 4  ;;  %v6341_v9 = vrot.slane %v6336_v60, 4  ;;  %v6343_v41 = vrot.slane %v6324_v25, 4  ;;  %v6353_v3 = vperm.slane %v6349_v18, %v15406_v0 }
 0x722   : > { %v6290_v15 = vsel %vm5793_vm13, %v6282_v31, %v6289_v52  ;;  %v6359_v62 = vperm.slane %v6355_v22, %v15406_v0  ;;  %v6366_v12 = vsel %vm5793_vm13, %v6365_v47, %v15646_v11  ;;  %v6385_v13 = vrot.slane %v15649_v54, 4 }
 0x723   : > { %v6288_v45 = vsel %vm5793_vm13, %v6287_v48, %v6270_v51  ;;  %v6342_v56 = vsel %vm5793_vm13, %v6341_v9, %v6324_v25  ;;  %v6344_v44 = vsel %vm5793_vm13, %v6336_v60, %v6343_v41  ;;  %v6681_v57 = vpack.c.bf16 %v6290_v15, %v6290_v15 }
 0x724   : > { %v6673_v5 = vpack.c.bf16 %v6288_v45, %v6288_v45  ;;  %v6674_v38 = vpack.c.bf16 %v6342_v56, %v6342_v56  ;;  %v6682_v37 = vpack.c.bf16 %v6344_v44, %v6344_v44  ;;  %v6370_v46 = vperm.slane %v6366_v12, %v15406_v0 }
 0x725   : > { %v6903_v21 = vunpack.c.l.b16 %v6681_v57  ;;  %v6373_v20 = vrot.slane %v6353_v3, 4  ;;  %v6403_v28 = vsel %vm5793_vm13, %v15588_v19, %v15586_v30  ;;  %v6409_v11 = vsel %vm5793_vm13, %v6408_v63, %v6010_v16 }
 0x726   : > { %v6777_v47 = vunpack.c.l.b16 %v6673_v5  ;;  %v6778_v14 = vunpack.c.l.b16 %v6674_v38  ;;  %v6904_v10 = vunpack.c.l.b16 %v6682_v37  ;;  %v6386_v51 = vsel %vm5793_vm13, %v6370_v46, %v6385_v13 }
 0x727   : > { %v6374_v31 = vsel %vm5793_vm13, %v6359_v62, %v6373_v20  ;;  %v6394_v25 = vperm.slane %v6386_v51, %v15434_v35  ;;  %v6407_v60 = vperm.slane %v6403_v28, %v15406_v0  ;;  %v6413_v43 = vperm.slane %v6409_v11, %v15406_v0 }
 0x728   : > { %v6785_v52 = vpack.c.b16 %v6778_v14, %v6777_v47  ;;  %v6911_v18 = vpack.c.b16 %v6904_v10, %v6903_v21  ;;  %v6382_v30 = vperm.slane %v6374_v31, %v15434_v35  ;;  %v6420_v19 = vsel %vm5793_vm13, %v6419_v34, %v15603_v50 }
 0x729   : > { %v6399_v49 = vrot.slane %v6394_v25, 4  ;;  %v6424_v63 = vperm.slane %v6420_v19, %v15406_v0  ;;  %v6427_v16 = vrot.slane %v6407_v60, 4  ;;  %v6439_v22 = vrot.slane %v15606_v1, 4 }
 0x72a   : > { %10414 = vmatmul.msk.bf16.vlgmr.msra.gmra.mxu1 %vm6829_vm12, %v6785_v52  ;;  %10450 = vmatmul.msk.bf16.vlgmr.msra.gmra.mxu2 %vm6829_vm12, %v6911_v18  ;;  %v6371_v48 = vrot.slane %v6359_v62, 4  ;;  %v6383_v9 = vrot.slane %v6370_v46, 4  ;;  %v6425_v41 = vrot.slane %v6413_v43, 4  ;;  %v6401_v15 = vrot.slane %v6382_v30, 4 }
 0x72b   : > { %v6400_v12 = vsel %vm5793_vm13, %v6399_v49, %v6382_v30  ;;  %v6428_v61 = vsel %vm5793_vm13, %v6413_v43, %v6427_v16  ;;  %v6440_v34 = vsel %vm5793_vm13, %v6424_v63, %v6439_v22  ;;  %v6437_v50 = vrot.slane %v6424_v63, 4 }
 0x72c   : > { %v6436_v13 = vperm.slane %v6428_v61, %v15434_v35  ;;  %v6448_v45 = vperm.slane %v6440_v34, %v15434_v35  ;;  %v6691_v56 = vpack.c.bf16 %v6400_v12, %v6400_v12  ;;  %v6372_v44 = vsel %vm5793_vm13, %v6371_v48, %v6353_v3 }
 0x72d   : > { %v6378_v57 = vperm.slane %v6372_v44, %v15434_v35  ;;  %v6384_v62 = vsel %vm5793_vm13, %v6383_v9, %v15649_v54  ;;  %v6426_v5 = vsel %vm5793_vm13, %v6425_v41, %v6407_v60  ;;  %v6438_v38 = vsel %vm5793_vm13, %v6437_v50, %v15606_v1 }
 0x72e   : > { %v6453_v37 = vrot.slane %v6448_v45, 4  ;;  %v7030_v46 = vunpack.c.l.b16 %v6691_v56  ;;  %v6390_v21 = vperm.slane %v6384_v62, %v15434_v35  ;;  %v6432_v20 = vperm.slane %v6426_v5, %v15434_v35 }
 0x72f   : > { %v6444_v28 = vperm.slane %v6438_v38, %v15434_v35  ;;  %v6402_v3 = vsel %vm5793_vm13, %v6394_v25, %v6401_v15  ;;  %v6455_v11 = vrot.slane %v6436_v13, 4  ;;  %v6397_v47 = vrot.slane %v6378_v57, 4 }
 0x730   : > { %v6454_v14 = vsel %vm5793_vm13, %v6453_v37, %v6436_v13  ;;  %v6395_v54 = vrot.slane %v6390_v21, 4  ;;  %v6699_v10 = vpack.c.bf16 %v6402_v3, %v6402_v3  ;;  %v6451_v51 = vrot.slane %v6432_v20, 4 }
 0x731   : > { %v6692_v31 = vpack.c.bf16 %v6454_v14, %v6454_v14  ;;  %v6449_v60 = vrot.slane %v6444_v28, 4  ;;  %v6456_v1 = vsel %vm5793_vm13, %v6448_v45, %v6455_v11  ;;  %v6398_v43 = vsel %vm5793_vm13, %v6390_v21, %v6397_v47 }
 0x732   : > { %v6396_v52 = vsel %vm5793_vm13, %v6395_v54, %v6378_v57  ;;  %v6700_v18 = vpack.c.bf16 %v6456_v1, %v6456_v1  ;;  %v7155_v30 = vunpack.c.l.b16 %v6699_v10  ;;  %v6452_v19 = vsel %vm5793_vm13, %v6444_v28, %v6451_v51 }
 0x733   : > { %v7031_v25 = vunpack.c.l.b16 %v6692_v31  ;;  %v6450_v49 = vsel %vm5793_vm13, %v6449_v60, %v6432_v20  ;;  %v6675_v63 = vpack.c.bf16 %v6396_v52, %v6396_v52  ;;  %v6683_v16 = vpack.c.bf16 %v6398_v43, %v6398_v43 }
 0x734   : > { %v6676_v22 = vpack.c.bf16 %v6450_v49, %v6450_v49  ;;  %v7156_v48 = vunpack.c.l.b16 %v6700_v18  ;;  %v6684_v9 = vpack.c.bf16 %v6452_v19, %v6452_v19  ;;  %v6066_v41 = vsel %vm5793_vm13, 0.0, %v6065_v42 }
 0x735   : > { %v7037_v15 = vpack.c.b16 %v7031_v25, %v7030_v46  ;;  %v6779_v12 = vunpack.c.l.b16 %v6675_v63  ;;  %v6905_v61 = vunpack.c.l.b16 %v6683_v16  ;;  %v6122_v34 = vsel %vm5793_vm13, 0.0, %v6121_v6 }
 0x736   : > { %v6780_v50 = vunpack.c.l.b16 %v6676_v22  ;;  %v7162_v13 = vpack.c.b16 %v7156_v48, %v7155_v30  ;;  %v6906_v45 = vunpack.c.l.b16 %v6684_v9  ;;  %v6457_v56 = vsel %vm5793_vm13, %v15763_v8, %v15753_v58 }
 0x737   : > { %10487 = vmatmul.msk.bf16.gmra.mxu3 %vm6829_vm12, %v7037_v15  ;;  %v6461_v44 = vperm.slane %v6457_v56, %v15406_v0  ;;  %v6463_v42 = vsel %vm5793_vm13, %v6462_v36, %v6066_v41  ;;  %v6474_v6 = vsel %vm5793_vm13, %v6473_v27, %v15778_v59  ;;  %v6493_v57 = vrot.slane %v15786_v55, 4 }
 0x738   : > { %v6786_v62 = vpack.c.b16 %v6780_v50, %v6779_v12  ;;  %10523 = vmatmul.msk.bf16.gmra.mxu0 %vm6829_vm12, %v7162_v13  ;;  %v6912_v5 = vpack.c.b16 %v6906_v45, %v6905_v61  ;;  %v6467_v58 = vperm.slane %v6463_v42, %v15406_v0  ;;  %v6478_v8 = vperm.slane %v6474_v6, %v15406_v0 }
 0x739   : > { %v6481_v38 = vrot.slane %v6461_v44, 4  ;;  %v6511_v29 = vsel %vm5793_vm13, %v15729_v33, %v15727_v32  ;;  %v6517_v23 = vsel %vm5793_vm13, %v6516_v26, %v6122_v34  ;;  %v6528_v59 = vsel %vm5793_vm13, %v6527_v7, %v15747_v53 }
 0x73a   : > { %10415 = vmatmul.msk.bf16.gmra.mxu1 %vm6829_vm12, %v6786_v62  ;;  %10451 = vmatmul.msk.bf16.gmra.mxu2 %vm6829_vm12, %v6912_v5  ;;  %v6494_v36 = vsel %vm5793_vm13, %v6478_v8, %v6493_v57  ;;  %v6515_v27 = vperm.slane %v6511_v29, %v15406_v0  ;;  %v6521_v37 = vperm.slane %v6517_v23, %v15406_v0  ;;  %v6547_v32 = vrot.slane %v15743_v17, 4 }
 0x73b   : > { %v6482_v33 = vsel %vm5793_vm13, %v6467_v58, %v6481_v38  ;;  %v6502_v24 = vperm.slane %v6494_v36, %v15434_v35  ;;  %v6532_v39 = vperm.slane %v6528_v59, %v15406_v0  ;;  %v6479_v26 = vrot.slane %v6467_v58, 4 }
 0x73c   : > { %v6490_v7 = vperm.slane %v6482_v33, %v15434_v35  ;;  %v6535_v53 = vrot.slane %v6515_v27, 4  ;;  %v6491_v46 = vrot.slane %v6478_v8, 4  ;;  %v6533_v21 = vrot.slane %v6521_v37, 4 }
 0x73d   : > { %v6507_v20 = vrot.slane %v6502_v24, 4  ;;  %v6548_v28 = vsel %vm5793_vm13, %v6532_v39, %v6547_v32  ;;  %v6480_v3 = vsel %vm5793_vm13, %v6479_v26, %v6461_v44  ;;  %v6545_v11 = vrot.slane %v6532_v39, 4 }
 0x73e   : > { %v6536_v47 = vsel %vm5793_vm13, %v6521_v37, %v6535_v53  ;;  %v6556_v14 = vperm.slane %v6548_v28, %v15434_v35  ;;  %v6486_v54 = vperm.slane %v6480_v3, %v15434_v35  ;;  %v6492_v10 = vsel %vm5793_vm13, %v6491_v46, %v15786_v55 }
 0x73f   : > { %v6508_v51 = vsel %vm5793_vm13, %v6507_v20, %v6490_v7  ;;  %v6544_v31 = vperm.slane %v6536_v47, %v15434_v35  ;;  %v6498_v60 = vperm.slane %v6492_v10, %v15434_v35  ;;  %v6534_v1 = vsel %vm5793_vm13, %v6533_v21, %v6515_v27  ;;  %v11498_v37 = vpop.permute.xlu2 %11497 }
 0x740   : > { %v6561_v43 = vrot.slane %v6556_v14, 4  ;;  %v6693_v52 = vpack.c.bf16 %v6508_v51, %v6508_v51  ;;  %v6540_v18 = vperm.slane %v6534_v1, %v15434_v35  ;;  %v6546_v30 = vsel %vm5793_vm13, %v6545_v11, %v15743_v17 }
 0x741   : > { %v6503_v19 = vrot.slane %v6498_v60, 4  ;;  %v6552_v25 = vperm.slane %v6546_v30, %v15434_v35  ;;  %v6509_v49 = vrot.slane %v6490_v7, 4  ;;  %v6563_v55 = vrot.slane %v6544_v31, 4 }
 0x742   : > { %v6562_v63 = vsel %vm5793_vm13, %v6561_v43, %v6544_v31  ;;  %v7032_v16 = vunpack.c.l.b16 %v6693_v52  ;;  %v6505_v22 = vrot.slane %v6486_v54, 4  ;;  %v6559_v48 = vrot.slane %v6540_v18, 4 }
 0x743   : > { %v6694_v9 = vpack.c.bf16 %v6562_v63, %v6562_v63  ;;  %v6504_v41 = vsel %vm5793_vm13, %v6503_v19, %v6486_v54  ;;  %v6557_v15 = vrot.slane %v6552_v25, 4  ;;  %v6510_v12 = vsel %vm5793_vm13, %v6502_v24, %v6509_v49 }
 0x744   : > { %v6677_v61 = vpack.c.bf16 %v6504_v41, %v6504_v41  ;;  %v6564_v34 = vsel %vm5793_vm13, %v6556_v14, %v6563_v55  ;;  %v6701_v17 = vpack.c.bf16 %v6510_v12, %v6510_v12  ;;  %v6506_v50 = vsel %vm5793_vm13, %v6498_v60, %v6505_v22 }
 0x745   : > { %v7033_v13 = vunpack.c.l.b16 %v6694_v9  ;;  %v6558_v45 = vsel %vm5793_vm13, %v6557_v15, %v6540_v18  ;;  %v6702_v56 = vpack.c.bf16 %v6564_v34, %v6564_v34  ;;  %v6560_v44 = vsel %vm5793_vm13, %v6552_v25, %v6559_v48 }
 0x746   : > { %v6678_v42 = vpack.c.bf16 %v6558_v45, %v6558_v45  ;;  %v6781_v6 = vunpack.c.l.b16 %v6677_v61  ;;  %v7157_v57 = vunpack.c.l.b16 %v6701_v17  ;;  %v6685_v62 = vpack.c.bf16 %v6506_v50, %v6506_v50 }
 0x747   : > { %v7038_v5 = vpack.c.b16 %v7033_v13, %v7032_v16  ;;  %v7158_v58 = vunpack.c.l.b16 %v6702_v56  ;;  %v6686_v8 = vpack.c.bf16 %v6560_v44, %v6560_v44  ;;  %v11500_v32 = vunpack.i.h.bf16 %v11498_v37 }
 0x748   : > { %v6782_v38 = vunpack.c.l.b16 %v6678_v42  ;;  %v6907_v29 = vunpack.c.l.b16 %v6685_v62  ;;  %v11499_v33 = vunpack.i.l.bf16 %v11498_v37  ;;  %v6187_v24 = vrot.slane %v15454_v2, 4 }
 0x749   : > { %10488 = vmatmul.msk.bf16.gmra.mxu3 %vm6829_vm12, %v7038_v5  ;;  %v7163_v23 = vpack.c.b16 %v7158_v58, %v7157_v57  ;;  %v6908_v59 = vunpack.c.l.b16 %v6686_v8  ;;  %v6131_v26 = vrot.slane %v15457_v4, 4  ;;  %v6199_v28 = vrot.slane %v11500_v32, 4 }
 0x74a   : > { %v6787_v36 = vpack.c.b16 %v6782_v38, %v6781_v6  ;;  %v6143_v54 = vrot.slane %v11499_v33, 4 }
 0x74b   : > { %10524 = vmatmul.msk.bf16.gmra.mxu0 %vm6829_vm12, %v7163_v23  ;;  %v6913_v27 = vpack.c.b16 %v6908_v59, %v6907_v29 }
 0x74c   : > { %10416 = vmatmul.msk.bf16.gmra.mxu1 %vm6829_vm12, %v6787_v36 }
 0x74d   : > { %10452 = vmatmul.msk.bf16.gmra.mxu2 %vm6829_vm12, %v6913_v27 }
 0x756   : > { %v11503_v39 = vpop.permute.xlu1 %11502  ;;  %v11508_v7 = vpop.permute.xlu0 %11507 }
 0x757   : > { %v11505_v53 = vunpack.i.h.bf16 %v11503_v39  ;;  %v11504_v46 = vunpack.i.l.bf16 %v11503_v39  ;;  %v11510_v21 = vunpack.i.h.bf16 %v11508_v7  ;;  %v11509_v20 = vunpack.i.l.bf16 %v11508_v7 }
 0x759   : > { %v6185_v3 = vrot.slane %v11505_v53, 4  ;;  %v6188_v11 = vsel %vm5793_vm13, %v11505_v53, %v6187_v24  ;;  %v6129_v47 = vrot.slane %v11504_v46, 4  ;;  %v6132_v14 = vsel %vm5793_vm13, %v11504_v46, %v6131_v26 }
 0x75a   : > { %v6196_v10 = vperm.slane %v6188_v11, %v15406_v0  ;;  %v6197_v51 = vrot.slane %v11510_v21, 4  ;;  %v6200_v31 = vsel %vm5793_vm13, %v11510_v21, %v6199_v28  ;;  %v6141_v52 = vrot.slane %v11509_v20, 4 }
 0x75b   : > { %v6186_v60 = vsel %vm5793_vm13, %v6185_v3, %v15454_v2  ;;  %v6130_v1 = vsel %vm5793_vm13, %v6129_v47, %v15457_v4  ;;  %v6208_v43 = vperm.slane %v6200_v31, %v15406_v0  ;;  %v6140_v25 = vperm.slane %v6132_v14, %v15406_v0 }
 0x75c   : > { %v6192_v18 = vperm.slane %v6186_v60, %v15406_v0  ;;  %v6223_v30 = vrot.slane %v6196_v10, 4  ;;  %v6136_v19 = vperm.slane %v6130_v1, %v15406_v0  ;;  %v6198_v49 = vsel %vm5793_vm13, %v6197_v51, %v11500_v32 }
 0x75d   : > { %v6221_v55 = vrot.slane %v6208_v43, 4  ;;  %v6142_v63 = vsel %vm5793_vm13, %v6141_v52, %v11499_v33  ;;  %v6144_v2 = vsel %vm5793_vm13, %v11509_v20, %v6143_v54  ;;  %v6204_v4 = vperm.slane %v6198_v49, %v15406_v0 }
 0x75e   : > { %v6211_v16 = vrot.slane %v6192_v18, 4  ;;  %v6155_v22 = vrot.slane %v6136_v19, 4  ;;  %v6224_v48 = vsel %vm5793_vm13, %v6208_v43, %v6223_v30  ;;  %v6148_v15 = vperm.slane %v6142_v63, %v15406_v0 }
 0x75f   : > { %v6222_v9 = vsel %vm5793_vm13, %v6221_v55, %v6196_v10  ;;  %v6232_v41 = vperm.slane %v6224_v48, %v15434_v35  ;;  %v6152_v12 = vperm.slane %v6144_v2, %v15406_v0  ;;  %v6167_v61 = vrot.slane %v6140_v25, 4 }
 0x760   : > { %v6209_v34 = vrot.slane %v6204_v4, 4  ;;  %v6212_v17 = vsel %vm5793_vm13, %v6204_v4, %v6211_v16  ;;  %v6228_v50 = vperm.slane %v6222_v9, %v15434_v35  ;;  %v6153_v56 = vrot.slane %v6148_v15, 4 }
 0x761   : > { %v6220_v13 = vperm.slane %v6212_v17, %v15434_v35  ;;  %v6239_v45 = vrot.slane %v6232_v41, 4  ;;  %v6156_v44 = vsel %vm5793_vm13, %v6148_v15, %v6155_v22  ;;  %v6165_v62 = vrot.slane %v6152_v12, 4 }
 0x762   : > { %v6210_v42 = vsel %vm5793_vm13, %v6209_v34, %v6192_v18  ;;  %v6237_v6 = vrot.slane %v6228_v50, 4  ;;  %v6164_v57 = vperm.slane %v6156_v44, %v15434_v35  ;;  %v6154_v59 = vsel %vm5793_vm13, %v6153_v56, %v6136_v19 }
 0x763   : > { %v6216_v5 = vperm.slane %v6210_v42, %v15434_v35  ;;  %v6235_v58 = vrot.slane %v6220_v13, 4  ;;  %v6240_v8 = vsel %vm5793_vm13, 0.0, %v6239_v45  ;;  %v6630_v29 = vsel %vm5793_vm13, %v6239_v45, %v6228_v50 }
 0x764   : > { %v6238_v38 = vsel %vm5793_vm13, 0.0, %v6237_v6  ;;  %v6635_v23 = vrot.slane %v6240_v8, 4  ;;  %v6160_v37 = vperm.slane %v6154_v59, %v15434_v35  ;;  %v6166_v32 = vsel %vm5793_vm13, %v6165_v62, %v6140_v25 }
 0x765   : > { %v6233_v36 = vrot.slane %v6216_v5, 4  ;;  %v6236_v27 = vsel %vm5793_vm13, 0.0, %v6235_v58  ;;  %v6168_v24 = vsel %vm5793_vm13, %v6152_v12, %v6167_v61  ;;  %v6172_v39 = vperm.slane %v6166_v32, %v15434_v35 }
 0x766   : > { %v6624_v33 = vrot.slane %v6236_v27, 4  ;;  %v6179_v26 = vrot.slane %v6164_v57, 4  ;;  %v6634_v7 = vperm.slane %v6630_v29, %v15406_v0  ;;  %v6176_v53 = vperm.slane %v6168_v24, %v15434_v35 }
 0x767   : > { %v6177_v46 = vrot.slane %v6160_v37, 4  ;;  %v6619_v21 = vsel %vm5793_vm13, %v6235_v58, %v6216_v5  ;;  %v6234_v28 = vsel %vm5793_vm13, 0.0, %v6233_v36  ;;  %v6181_v47 = vrot.slane %v6172_v39, 4 }
 0x768   : > { %v6180_v20 = vsel %vm5793_vm13, 0.0, %v6179_v26  ;;  %v6565_v3 = vsel %vm5793_vm13, %v6179_v26, %v6160_v37  ;;  %v6623_v11 = vperm.slane %v6619_v21, %v15406_v0  ;;  %v6183_v14 = vrot.slane %v6176_v53, 4 }
 0x769   : > { %v6570_v54 = vrot.slane %v6180_v20, 4  ;;  %v6569_v10 = vperm.slane %v6565_v3, %v15406_v0  ;;  %v6178_v51 = vsel %vm5793_vm13, 0.0, %v6177_v46  ;;  %v6625_v31 = vsel %vm5793_vm13, %v6624_v33, %v6234_v28 }
 0x76a   : > { %v6636_v60 = vsel %vm5793_vm13, %v6635_v23, %v6238_v38  ;;  %v6643_v1 = vrot.slane %v6623_v11, 4  ;;  %v6184_v43 = vsel %vm5793_vm13, 0.0, %v6183_v14  ;;  %v6576_v52 = vsel %vm5793_vm13, %v6183_v14, %v6172_v39 }
 0x76b   : > { %v6571_v18 = vsel %vm5793_vm13, %v6570_v54, %v6178_v51  ;;  %v6589_v30 = vrot.slane %v6569_v10, 4  ;;  %v6580_v19 = vperm.slane %v6576_v52, %v15406_v0  ;;  %v6581_v25 = vrot.slane %v6184_v43, 4 }
 0x76c   : > { %v6575_v49 = vperm.slane %v6571_v18, %v15406_v0  ;;  %v6629_v55 = vperm.slane %v6625_v31, %v15406_v0  ;;  %v6182_v63 = vsel %vm5793_vm13, 0.0, %v6181_v47  ;;  %v6640_v2 = vperm.slane %v6636_v60, %v15406_v0 }
 0x76d   : > { %v6655_v16 = vrot.slane %v6634_v7, 4  ;;  %v6582_v22 = vsel %vm5793_vm13, %v6581_v25, %v6182_v63  ;;  %v6601_v48 = vrot.slane %v6580_v19, 4 }
 0x76e   : > { %v6590_v4 = vsel %vm5793_vm13, %v6575_v49, %v6589_v30  ;;  %v6644_v9 = vsel %vm5793_vm13, %v6629_v55, %v6643_v1  ;;  %v6586_v41 = vperm.slane %v6582_v22, %v15406_v0  ;;  %v6587_v17 = vrot.slane %v6575_v49, 4 }
 0x76f   : > { %v6598_v15 = vperm.slane %v6590_v4, %v15434_v35  ;;  %v6652_v12 = vperm.slane %v6644_v9, %v15434_v35  ;;  %v6656_v61 = vsel %vm5793_vm13, %v6640_v2, %v6655_v16  ;;  %v6641_v50 = vrot.slane %v6629_v55, 4 }
 0x770   : > { %v6664_v34 = vperm.slane %v6656_v61, %v15434_v35  ;;  %v6653_v13 = vrot.slane %v6640_v2, 4  ;;  %v6602_v45 = vsel %vm5793_vm13, %v6586_v41, %v6601_v48  ;;  %v6599_v56 = vrot.slane %v6586_v41, 4  ;;  %v5404_v2 = vld [vmem:[%s12521_s2] sm:$0xff] }
 0x771   : > { %v6617_v44 = vrot.slane %v6598_v15, 4  ;;  %v6671_v42 = vrot.slane %v6652_v12, 4  ;;  %v6610_v6 = vperm.slane %v6602_v45, %v15434_v35  ;;  %v6588_v62 = vsel %vm5793_vm13, %v6587_v17, %v6569_v10 }
 0x772   : > { %v6669_v57 = vrot.slane %v6664_v34, 4  ;;  %v6642_v5 = vsel %vm5793_vm13, %v6641_v50, %v6623_v11  ;;  %v6594_v58 = vperm.slane %v6588_v62, %v15434_v35  ;;  %v6600_v8 = vsel %vm5793_vm13, %v6599_v56, %v6580_v19  ;;  %v5406_v62 = vld [vmem:[%s12521_s2 + $0x10] sm:$0xff] }
 0x773   : > { %v6648_v38 = vperm.slane %v6642_v5, %v15434_v35  ;;  %v6654_v29 = vsel %vm5793_vm13, %v6653_v13, %v6634_v7  ;;  %v6615_v23 = vrot.slane %v6610_v6, 4  ;;  %v6606_v36 = vperm.slane %v6600_v8, %v15434_v35 }
 0x774   : > { %v6670_v59 = vsel %vm5793_vm13, %v6669_v57, %v6652_v12  ;;  %v6660_v27 = vperm.slane %v6654_v29, %v15434_v35  ;;  %v6618_v32 = vsel %vm5793_vm13, %v6610_v6, %v6617_v44  ;;  %v6672_v33 = vsel %vm5793_vm13, %v6664_v34, %v6671_v42  ;;  %v5405_v12 = vld [vmem:[%s12521_s2 + $0x8] sm:$0xff] }
 0x775   : > { %v6696_v37 = vpack.c.bf16 %v6670_v59, %v6670_v59  ;;  %v6613_v24 = vrot.slane %v6594_v58, 4  ;;  %v6616_v39 = vsel %vm5793_vm13, %v6615_v23, %v6598_v15  ;;  %v6611_v26 = vrot.slane %v6606_v36, 4  ;;  %v5408_v23 = vld [vmem:[%s12521_s2 + $0x20] sm:$0xff] }
 0x776   : > { %v6665_v53 = vrot.slane %v6660_v27, 4  ;;  %v6703_v46 = vpack.c.bf16 %v6618_v32, %v6618_v32  ;;  %v6695_v21 = vpack.c.bf16 %v6616_v39, %v6616_v39  ;;  %v6704_v20 = vpack.c.bf16 %v6672_v33, %v6672_v33  ;;  %v5409_v32 = vld [vmem:[%s12521_s2 + $0x28] sm:$0xff]  ;;  %v5407_v33 = vld [vmem:[%s12521_s2 + $0x18] sm:$0xff] }
 0x777   : > { %v7035_v7 = vunpack.c.l.b16 %v6696_v37  ;;  %v6614_v28 = vsel %vm5793_vm13, %v6606_v36, %v6613_v24  ;;  %v6612_v3 = vsel %vm5793_vm13, %v6611_v26, %v6594_v58  ;;  %v6667_v14 = vrot.slane %v6648_v38, 4 }
 0x778   : > { %v6666_v11 = vsel %vm5793_vm13, %v6665_v53, %v6648_v38  ;;  %v7159_v47 = vunpack.c.l.b16 %v6703_v46  ;;  %v7034_v54 = vunpack.c.l.b16 %v6695_v21  ;;  %v6679_v10 = vpack.c.bf16 %v6612_v3, %v6612_v3 }
 0x779   : > { %v6680_v51 = vpack.c.bf16 %v6666_v11, %v6666_v11  ;;  %v7160_v31 = vunpack.c.l.b16 %v6704_v20  ;;  %v6668_v60 = vsel %vm5793_vm13, %v6660_v27, %v6667_v14  ;;  %v6687_v1 = vpack.c.bf16 %v6614_v28, %v6614_v28 }
 0x77a   : > { %v7039_v43 = vpack.c.b16 %v7035_v7, %v7034_v54  ;;  %v6783_v52 = vunpack.c.l.b16 %v6679_v10  ;;  %v6688_v19 = vpack.c.bf16 %v6668_v60, %v6668_v60 }
 0x77b   : > { %v6784_v18 = vunpack.c.l.b16 %v6680_v51  ;;  %v7164_v30 = vpack.c.b16 %v7160_v31, %v7159_v47  ;;  %v6909_v25 = vunpack.c.l.b16 %v6687_v1  ;;  %v16082_v31 = vld [vmem:[%s12521_s2 + $0x30] sm:$0xff] }
 0x77c   : > { %10489 = vmatmul.msk.bf16.gmra.mxu3 %vm6829_vm12, %v7039_v43  ;;  %v6910_v55 = vunpack.c.l.b16 %v6688_v19 }
 0x77d   : > { %v6788_v49 = vpack.c.b16 %v6784_v18, %v6783_v52  ;;  %10525 = vmatmul.msk.bf16.gmra.mxu0 %vm6829_vm12, %v7164_v30  ;;  %v16091_v18 = vld [vmem:[%s12521_s2 + $0x38] sm:$0xff] }
 0x77e   : > { %v6914_v63 = vpack.c.b16 %v6910_v55, %v6909_v25 }
 0x77f   : > { %10417 = vmatmul.msk.bf16.gmra.mxu1 %vm6829_vm12, %v6788_v49 }
 0x780   : > { %10453 = vmatmul.msk.bf16.gmra.mxu2 %vm6829_vm12, %v6914_v63 }
 0x791   : > { %v7250_v16 = vpop.f32.mrf.mxu0 }
 0x792   : > { %v16016_v22 = vadd.f32 %v7250_v16, %v5404_v2 }
 0x794   : > { %7318 = vmax.xlane.f32.xlu1 %v16016_v22 }
 0x796   : > { %v7125_v4 = vpop.f32.mrf.mxu3 }
 0x797   : > { %v16019_v48 = vadd.f32 %v7125_v4, %v5404_v2 }
 0x799   : > { %v7252_v61 = vpop.f32.mrf.mxu0 }
 0x79a   : > { %v16028_v50 = vadd.f32 %v7252_v61, %v5405_v12 }
 0x79c   : > { %7302 = vmax.xlane.f32.xlu1 %v16019_v48 }
 0x79e   : > { %v7127_v13 = vpop.f32.mrf.mxu3 }
 0x79f   : > { %v16036_v6 = vadd.f32 %v7127_v13, %v5405_v12 }
 0x7a7   : > { %v6875_v9 = vpop.f32.mrf.mxu1 }
 0x7a8   : > { %v16022_v41 = vadd.f32 %v6875_v9, %v5404_v2 }
 0x7aa   : > { %7270 = vmax.xlane.f32.xlu0 %v16022_v41 }
 0x7ad   : > { %v7000_v15 = vpop.f32.mrf.mxu2 }
 0x7ae   : > { %v16026_v34 = vadd.f32 %v7000_v15, %v5404_v2 }
 0x7af   : > { %v6877_v17 = vpop.f32.mrf.mxu1 }
 0x7b0   : > { %7286 = vmax.xlane.f32.xlu2 %v16026_v34  ;;  %v16034_v44 = vadd.f32 %v6877_v17, %v5405_v12 }
 0x7b2   : > { %7320 = vmax.xlane.f32.xlu0 %v16028_v50 }
 0x7b5   : > { %v7002_v45 = vpop.f32.mrf.mxu2  ;;  %v7255_v29 = vpop.f32.mrf.mxu0 }
 0x7b6   : > { %v16032_v56 = vadd.f32 %v7002_v45, %v5405_v12  ;;  %v16049_v59 = vadd.f32 %v7255_v29, %v5406_v62 }
 0x7b7   : > { %v6880_v42 = vpop.f32.mrf.mxu1 }
 0x7b8   : > { %7288 = vmax.xlane.f32.xlu1 %v16032_v56  ;;  %7272 = vmax.xlane.f32.xlu2 %v16034_v44  ;;  %v16063_v46 = vadd.f32 %v6880_v42, %v5406_v62 }
 0x7ba   : > { %7304 = vmax.xlane.f32.xlu0 %v16036_v6  ;;  %v7130_v57 = vpop.f32.mrf.mxu3 }
 0x7bb   : > { %v16042_v58 = vadd.f32 %v7130_v57, %v5406_v62 }
 0x7bd   : > { %v7005_v5 = vpop.f32.mrf.mxu2  ;;  %v7257_v11 = vpop.f32.mrf.mxu0 }
 0x7be   : > { %v16044_v8 = vadd.f32 %v7005_v5, %v5406_v62  ;;  %v16104_v9 = vadd.f32 %v7257_v11, %v5407_v33 }
 0x7bf   : > { %v6882_v38 = vpop.f32.mrf.mxu1 }
 0x7c0   : > { %7306 = vmax.xlane.f32.xlu2 %v16042_v58  ;;  %v16069_v7 = vadd.f32 %v6882_v38, %v5407_v33 }
 0x7c2   : > { %7290 = vmax.xlane.f32.xlu0 %v16044_v8  ;;  %v7132_v53 = vpop.f32.mrf.mxu3 }
 0x7c3   : > { %v16065_v21 = vadd.f32 %v7132_v53, %v5407_v33 }
 0x7c5   : > { %v7007_v37 = vpop.f32.mrf.mxu2 }
 0x7c6   : > { %v16059_v26 = vadd.f32 %v7007_v37, %v5407_v33 }
 0x7c8   : > { %v7260_v54 = vpop.f32.mrf.mxu0 }
 0x7c9   : > { %v6885_v36 = vpop.f32.mrf.mxu1  ;;  %v16078_v10 = vadd.f32 %v7260_v54, %v5408_v23 }
 0x7ca   : > { %v16051_v27 = vadd.f32 %v6885_v36, %v5408_v23  ;;  %7322 = vmax.xlane.f32.xlu0 %v16049_v59 }
 0x7cc   : > { %7278 = vmax.xlane.f32.xlu2 %v16051_v27  ;;  %v7135_v28 = vpop.f32.mrf.mxu3 }
 0x7cd   : > { %v16072_v3 = vadd.f32 %v7135_v28, %v5408_v23 }
 0x7d0   : > { %v7010_v20 = vpop.f32.mrf.mxu2  ;;  %v7262_v55 = vpop.f32.mrf.mxu0 }
 0x7d1   : > { %v6887_v24 = vpop.f32.mrf.mxu1  ;;  %v16106_v15 = vadd.f32 %v7262_v55, %v5409_v32  ;;  %v16111_v12 = vadd.f32 %v7010_v20, %v5408_v23 }
 0x7d2   : > { %v16057_v39 = vadd.f32 %v6887_v24, %v5409_v32 }
 0x7d4   : > { %7280 = vmax.xlane.f32.xlu1 %v16057_v39  ;;  %7292 = vmax.xlane.f32.xlu2 %v16059_v26  ;;  %v7137_v51 = vpop.f32.mrf.mxu3 }
 0x7d5   : > { %v16093_v19 = vadd.f32 %v7137_v51, %v5409_v32 }
 0x7d8   : > { %v7012_v47 = vpop.f32.mrf.mxu2 }
 0x7d9   : > { %v16075_v14 = vadd.f32 %v7012_v47, %v5409_v32 }
 0x7dc   : > { %7308 = vmax.xlane.f32.xlu1 %v16065_v21  ;;  %7274 = vmax.xlane.f32.xlu2 %v16063_v46 }
 0x7e4   : > { %7276 = vmax.xlane.f32.xlu1 %v16069_v7 }
 0x7ec   : > { %7310 = vmax.xlane.f32.xlu1 %v16072_v3 }
 0x7f4   : > { %7296 = vmax.xlane.f32.xlu1 %v16075_v14 }
 0x7fc   : > { %7326 = vmax.xlane.f32.xlu1 %v16078_v10  ;;  %v6890_v60 = vpop.f32.mrf.mxu1 }
 0x7fd   : > { %v16085_v1 = vadd.f32 %v6890_v60, %v16082_v31 }
 0x7ff   : > { %7282 = vmax.xlane.f32.xlu0 %v16085_v1  ;;  %v7140_v52 = vpop.f32.mrf.mxu3 }
 0x800   : > { %v16118_v13 = vadd.f32 %v7140_v52, %v16082_v31 }
 0x803   : > { %v7015_v11 = vpop.f32.mrf.mxu2 }
 0x804   : > { %v6892_v30 = vpop.f32.mrf.mxu1  ;;  %v16140_v51 = vadd.f32 %v7015_v11, %v16082_v31 }
 0x805   : > { %v16096_v25 = vadd.f32 %v6892_v30, %v16091_v18 }
 0x807   : > { %v16088_v43 = vpop.xlane.xlu1 %7318  ;;  %7284 = vmax.xlane.f32.xlu2 %v16096_v25  ;;  %7312 = vmax.xlane.f32.xlu0 %v16093_v19  ;;  %v7142_v2 = vpop.f32.mrf.mxu3 }
 0x808   : > { %v16102_v4 = vadd.f32 %v7142_v2, %v16091_v18 }
 0x80a   : > { %7316 = vmax.xlane.f32.xlu1 %v16102_v4 }
 0x80b   : > { %v7017_v60 = vpop.f32.mrf.mxu2 }
 0x80c   : > { %v16148_v30 = vadd.f32 %v7017_v60, %v16091_v18  ;;  %v10913_v60 = vld [vmem:[#allocation3 + $0xa0] sm:$0xff] }
 0x80f   : > { %v7303_v49 = vpop.xlane.xlu1 %7302  ;;  %7324 = vmax.xlane.f32.xlu2 %v16104_v9  ;;  %7328 = vmax.xlane.f32.xlu0 %v16106_v15 }
 0x810   : > { %v7350_v63 = vsub.f32 %v16019_v48, %v7303_v49 }
 0x812   : > { %v7398_v16 = vmul.f32 1.442695, %v7350_v63 }
 0x814   : > { %11596 = vpow2.f32 %v7398_v16 }
 0x817   : > { %7294 = vmax.xlane.f32.xlu2 %v16111_v12 }
 0x81a   : > { %v16113_v61 = vpop.eup %11596 }
 0x81b   : > { %7462 = vadd.xlane.f32.xlu0 %v16113_v61 }
 0x81d   : > { %v7271_v48 = vpop.xlane.xlu0 %7270 }
 0x81f   : > { %7314 = vmax.xlane.f32.xlu2 %v16118_v13 }
 0x823   : > { %v7287_v17 = vpop.xlane.xlu2 %7286 }
 0x824   : > { %v7342_v38 = vsub.f32 %v16026_v34, %v7287_v17 }
 0x825   : > { %v7321_v45 = vpop.xlane.xlu0 %7320 }
 0x826   : > { %v7382_v29 = vmul.f32 1.442695, %v7342_v38  ;;  %v7359_v55 = vsub.f32 %v16028_v50, %v7321_v45 }
 0x828   : > { %v7416_v63 = vmul.f32 1.442695, %v7359_v55 }
 0x82b   : > { %v16121_v42 = vpop.xlane.xlu2 %7272  ;;  %v7289_v37 = vpop.xlane.xlu1 %7288 }
 0x82c   : > { %v7343_v47 = vsub.f32 %v16032_v56, %v7289_v37  ;;  %v10916_v37 = vld [vmem:[#allocation3 + $0xb8] sm:$0xff] }
 0x82d   : > { %v7305_v57 = vpop.xlane.xlu0 %7304  ;;  %7928 = vmatpush.bf16.msrb.mxu3 %v10916_v37 }
 0x82e   : > { %v7351_v62 = vsub.f32 %v16036_v6, %v7305_v57  ;;  %v7384_v54 = vmul.f32 1.442695, %v7343_v47 }
 0x830   : > { %v7400_v5 = vmul.f32 1.442695, %v7351_v62 }
 0x832   : > { %11598 = vpow2.f32 %v7400_v5 }
 0x833   : > { %v16125_v23 = vpop.xlane.xlu2 %7306  ;;  %11600 = vpow2.f32 %v7382_v29 }
 0x835   : > { %v7291_v2 = vpop.xlane.xlu0 %7290 }
 0x836   : > { %v7344_v16 = vsub.f32 %v16044_v8, %v7291_v2 }
 0x838   : > { %v16127_v36 = vpop.eup %11598  ;;  %v7386_v17 = vmul.f32 1.442695, %v7344_v16 }
 0x839   : > { %7464 = vadd.xlane.f32.xlu2 %v16127_v36  ;;  %v16130_v33 = vpop.eup %11600 }
 0x83d   : > { %v16167_v45 = vpop.xlane.xlu0 %7322 }
 0x83f   : > { %v7279_v32 = vpop.xlane.xlu2 %7278 }
 0x840   : > { %v7338_v24 = vsub.f32 %v16051_v27, %v7279_v32  ;;  %v10900_v32 = vld [vmem:[#allocation3 + $0x38] sm:$0xff] }
 0x841   : > { %7446 = vadd.xlane.f32.xlu2 %v16130_v33  ;;  %10981 = vmatpush.bf16.msrb.mxu2 %v10900_v32 }
 0x842   : > { %v7374_v6 = vmul.f32 1.442695, %v7338_v24  ;;  %v10915_v24 = vld [vmem:[#allocation3 + $0xb0] sm:$0xff]  ;;  %7726 = vmatpush.bf16.msrb.mxu1 %v10900_v32 }
 0x843   : > { %7929 = vmatpush.bf16.msrb.mxu3 %v10915_v24 }
 0x844   : > { %11602 = vpow2.f32 %v7374_v6 }
 0x847   : > { %v7281_v34 = vpop.xlane.xlu1 %7280  ;;  %v16165_v5 = vpop.xlane.xlu2 %7292 }
 0x848   : > { %v7339_v53 = vsub.f32 %v16057_v39, %v7281_v34  ;;  %v7334_v39 = vsub.f32 %v16022_v41, %v7271_v48 }
 0x84a   : > { %v16135_v20 = vpop.eup %11602  ;;  %v7376_v28 = vmul.f32 1.442695, %v7339_v53  ;;  %v7366_v52 = vmul.f32 1.442695, %v7334_v39  ;;  %v10899_v39 = vld [vmem:[#allocation3 + $0x30] sm:$0xff] }
 0x84b   : > { %7438 = vadd.xlane.f32.xlu1 %v16135_v20  ;;  %10982 = vmatpush.bf16.msrb.mxu2 %v10899_v39 }
 0x84c   : > { %11604 = vpow2.f32 %v7376_v28  ;;  %7727 = vmatpush.bf16.msrb.mxu1 %v10899_v39 }
 0x84d   : > { %11606 = vpow2.f32 %v7384_v54  ;;  %v10914_v54 = vld [vmem:[#allocation3 + $0xa8] sm:$0xff] }
 0x84e   : > { %11608 = vpow2.f32 %v7366_v52  ;;  %7930 = vmatpush.bf16.msrb.mxu3 %v10914_v54  ;;  %v10897_v54 = vld [vmem:[#allocation3 + $0x20] sm:$0xff] }
 0x84f   : > { %v16152_v49 = vpop.xlane.xlu1 %7308  ;;  %11610 = vpow2.f32 %v7416_v63  ;;  %v16173_v6 = vpop.xlane.xlu2 %7274 }
 0x850   : > { %11612 = vpow2.f32 %v7386_v17 }
 0x852   : > { %v16142_v27 = vpop.eup %11604  ;;  %7931 = vmatpush.bf16.msrb.mxu3 %v10913_v60  ;;  %v10911_v60 = vld [vmem:[#allocation3 + $0x90] sm:$0xff] }
 0x853   : > { %7298 = vmax.xlane.f32.xlu1 %v16140_v51  ;;  %7440 = vadd.xlane.f32.xlu0 %v16142_v27  ;;  %v16150_v56 = vpop.eup %11606 }
 0x854   : > { %v16157_v41 = vpop.eup %11608 }
 0x855   : > { %v16161_v57 = vpop.eup %11610 }
 0x856   : > { %v16169_v29 = vpop.eup %11612 }
 0x857   : > { %v7277_v48 = vpop.xlane.xlu1 %7276 }
 0x858   : > { %v7337_v62 = vsub.f32 %v16069_v7, %v7277_v48  ;;  %v7335_v48 = vsub.f32 %v16034_v44, %v16121_v42  ;;  %v7352_v44 = vsub.f32 %v16042_v58, %v16125_v23  ;;  %v7345_v58 = vsub.f32 %v16059_v26, %v16165_v5 }
 0x859   : > { %v7360_v26 = vsub.f32 %v16049_v59, %v16167_v45 }
 0x85a   : > { %v7372_v38 = vmul.f32 1.442695, %v7337_v62  ;;  %v7368_v62 = vmul.f32 1.442695, %v7335_v48  ;;  %v10896_v48 = vld [vmem:[#allocation3 + $0x18] sm:$0xff] }
 0x85b   : > { %7448 = vadd.xlane.f32.xlu1 %v16150_v56  ;;  %7300 = vmax.xlane.f32.xlu0 %v16148_v30 }
 0x85c   : > { %11614 = vpow2.f32 %v7372_v38 }
 0x85f   : > { %v7311_v50 = vpop.xlane.xlu1 %7310 }
 0x860   : > { %v7354_v8 = vsub.f32 %v16072_v3, %v7311_v50 }
 0x862   : > { %v7406_v7 = vmul.f32 1.442695, %v7354_v8  ;;  %v16176_v11 = vpop.eup %11614  ;;  %v7358_v8 = vsub.f32 %v16016_v22, %v16088_v43  ;;  %v7353_v22 = vsub.f32 %v16065_v21, %v16152_v49  ;;  %v7336_v21 = vsub.f32 %v16063_v46, %v16173_v6  ;;  %v10912_v49 = vld [vmem:[#allocation3 + $0x98] sm:$0xff] }
 0x863   : > { %7430 = vadd.xlane.f32.xlu1 %v16157_v41  ;;  %7932 = vmatpush.bf16.msrb.mxu3 %v10912_v49 }
 0x864   : > { %11616 = vpow2.f32 %v7406_v7  ;;  %v7414_v37 = vmul.f32 1.442695, %v7358_v8  ;;  %v7404_v43 = vmul.f32 1.442695, %v7353_v22  ;;  %v7370_v5 = vmul.f32 1.442695, %v7336_v21 }
 0x867   : > { %v7297_v53 = vpop.xlane.xlu1 %7296  ;;  %7933 = vmatpush.bf16.msrb.mxu3 %v10911_v60 }
 0x868   : > { %v7347_v3 = vsub.f32 %v16075_v14, %v7297_v53  ;;  %v7265_v14 = vpop.f32.mrf.mxu0 }
 0x86a   : > { %v7392_v52 = vmul.f32 1.442695, %v7347_v3  ;;  %v16181_v63 = vpop.eup %11616 }
 0x86b   : > { %7480 = vadd.xlane.f32.xlu1 %v16161_v57 }
 0x86f   : > { %v7327_v8 = vpop.xlane.xlu1 %7326 }
 0x870   : > { %v7267_v42 = vpop.f32.mrf.mxu0 }
 0x871   : > { %v16206_v24 = vadd.f32 %v7267_v42, %v16091_v18  ;;  %v10895_v42 = vld [vmem:[#allocation3 + $0x10] sm:$0xff] }
 0x872   : > { %v7283_v34 = vpop.xlane.xlu0 %7282 }
 0x873   : > { %7450 = vadd.xlane.f32.xlu1 %v16169_v29  ;;  %v7340_v28 = vsub.f32 %v16085_v1, %v7283_v34 }
 0x875   : > { %v7378_v47 = vmul.f32 1.442695, %v7340_v28  ;;  %v7388_v28 = vmul.f32 1.442695, %v7345_v58 }
 0x877   : > { %11618 = vpow2.f32 %v7378_v47 }
 0x878   : > { %11620 = vpow2.f32 %v7392_v52 }
 0x87a   : > { %v7285_v55 = vpop.xlane.xlu2 %7284  ;;  %v7313_v34 = vpop.xlane.xlu0 %7312 }
 0x87b   : > { %7436 = vadd.xlane.f32.xlu1 %v16176_v11  ;;  %v7341_v1 = vsub.f32 %v16096_v25, %v7285_v55  ;;  %v16192_v25 = vadd.f32 %v7265_v14, %v16082_v31  ;;  %v7402_v31 = vmul.f32 1.442695, %v7352_v44  ;;  %v7418_v55 = vmul.f32 1.442695, %v7360_v26 }
 0x87c   : > { %v7355_v45 = vsub.f32 %v16093_v19, %v7313_v34  ;;  %v10909_v19 = vld [vmem:[#allocation3 + $0x80] sm:$0xff] }
 0x87d   : > { %v16183_v2 = vpop.eup %11618  ;;  %v7380_v16 = vmul.f32 1.442695, %v7341_v1 }
 0x87e   : > { %7442 = vadd.xlane.f32.xlu0 %v16183_v2  ;;  %v16189_v50 = vpop.eup %11620  ;;  %v7408_v14 = vmul.f32 1.442695, %v7355_v45 }
 0x87f   : > { %11622 = vpow2.f32 %v7380_v16 }
 0x880   : > { %11624 = vpow2.f32 %v7368_v62  ;;  %v10910_v62 = vld [vmem:[#allocation3 + $0x88] sm:$0xff] }
 0x881   : > { %11626 = vpow2.f32 %v7414_v37  ;;  %7934 = vmatpush.bf16.msrb.mxu3 %v10910_v62 }
 0x882   : > { %v7325_v17 = vpop.xlane.xlu2 %7324  ;;  %11628 = vpow2.f32 %v7402_v31  ;;  %v7329_v1 = vpop.xlane.xlu0 %7328  ;;  %v7362_v31 = vsub.f32 %v16078_v10, %v7327_v8 }
 0x883   : > { %7470 = vadd.xlane.f32.xlu1 %v16181_v63  ;;  %11630 = vpow2.f32 %v7404_v43  ;;  %v7361_v59 = vsub.f32 %v16104_v9, %v7325_v17 }
 0x885   : > { %v16194_v38 = vpop.eup %11622  ;;  %v7420_v6 = vmul.f32 1.442695, %v7361_v59  ;;  %7935 = vmatpush.bf16.msrb.mxu3 %v10909_v19 }
 0x886   : > { %7444 = vadd.xlane.f32.xlu2 %v16194_v38  ;;  %7330 = vmax.xlane.f32.xlu0 %v16192_v25  ;;  %v16208_v7 = vpop.eup %11624 }
 0x887   : > { %v16217_v53 = vpop.eup %11626 }
 0x888   : > { %v16219_v47 = vpop.eup %11628 }
 0x889   : > { %v16227_v39 = vpop.eup %11630 }
 0x88a   : > { %v16203_v32 = vpop.xlane.xlu2 %7294 }
 0x88b   : > { %7456 = vadd.xlane.f32.xlu1 %v16189_v50  ;;  %v7346_v9 = vsub.f32 %v16111_v12, %v16203_v32  ;;  %v7422_v12 = vmul.f32 1.442695, %v7362_v31  ;;  %v7317_v32 = vpop.xlane.xlu1 %7316 }
 0x88d   : > { %v7390_v22 = vmul.f32 1.442695, %v7346_v9 }
 0x88e   : > { %7332 = vmax.xlane.f32.xlu2 %v16206_v24  ;;  %7432 = vadd.xlane.f32.xlu0 %v16208_v7  ;;  %v7463_v17 = vpop.xlane.xlu0 %7462 }
 0x892   : > { %v7315_v23 = vpop.xlane.xlu2 %7314 }
 0x893   : > { %v7356_v18 = vsub.f32 %v16118_v13, %v7315_v23  ;;  %v10898_v13 = vld [vmem:[#allocation3 + $0x28] sm:$0xff]  ;;  %v7363_v23 = vsub.f32 %v16106_v15, %v7329_v1 }
 0x894   : > { %10983 = vmatpush.bf16.msrb.mxu2 %v10898_v13  ;;  %7728 = vmatpush.bf16.msrb.mxu1 %v10898_v13 }
 0x895   : > { %v7410_v3 = vmul.f32 1.442695, %v7356_v18  ;;  %v7357_v18 = vsub.f32 %v16102_v4, %v7317_v32 }
 0x896   : > { %7478 = vadd.xlane.f32.xlu2 %v16217_v53  ;;  %7466 = vadd.xlane.f32.xlu0 %v16219_v47 }
 0x897   : > { %11632 = vpow2.f32 %v7410_v3  ;;  %v10894_v3 = vld [vmem:[#allocation3 + $0x8] sm:$0xff]  ;;  %v7412_v49 = vmul.f32 1.442695, %v7357_v18 }
 0x898   : > { %11634 = vpow2.f32 %v7388_v28  ;;  %10984 = vmatpush.bf16.msrb.mxu2 %v10897_v54  ;;  %7729 = vmatpush.bf16.msrb.mxu1 %v10897_v54  ;;  %v7424_v28 = vmul.f32 1.442695, %v7363_v23  ;;  %v10893_v54 = vld [vmem:[#allocation3] sm:$0xff]  ;;  %v10922_v18 = vld [vmem:[#allocation3 + $0xe8] sm:$0xff] }
 0x899   : > { %11636 = vpow2.f32 %v7370_v5 }
 0x89a   : > { %11638 = vpow2.f32 %v7418_v55 }
 0x89b   : > { %11640 = vpow2.f32 %v7420_v6 }
 0x89c   : > { %10985 = vmatpush.bf16.msrb.mxu2 %v10896_v48  ;;  %7730 = vmatpush.bf16.msrb.mxu1 %v10896_v48  ;;  %11642 = vpow2.f32 %v7408_v14 }
 0x89d   : > { %v16229_v52 = vpop.eup %11632  ;;  %11644 = vrcp.f32 %v7463_v17 }
 0x89e   : > { %v16231_v46 = vpop.eup %11634  ;;  %7468 = vadd.xlane.f32.xlu2 %v16227_v39  ;;  %7474 = vadd.xlane.f32.xlu1 %v16229_v52 }
 0x89f   : > { %7452 = vadd.xlane.f32.xlu0 %v16231_v46  ;;  %v16238_v16 = vpop.eup %11636 }
 0x8a0   : > { %v16241_v44 = vpop.eup %11638  ;;  %10986 = vmatpush.bf16.msrb.mxu2 %v10895_v42  ;;  %7731 = vmatpush.bf16.msrb.mxu1 %v10895_v42 }
 0x8a1   : > { %v16247_v58 = vpop.eup %11640 }
 0x8a2   : > { %v16250_v43 = vpop.eup %11642 }
 0x8a3   : > { %v11645_v34 = vpop.eup %11644 }
 0x8a4   : > { %v7542_v21 = vmul.f32 %v11645_v34, %v16113_v61  ;;  %10987 = vmatpush.bf16.msrb.mxu2 %v10894_v3  ;;  %7732 = vmatpush.bf16.msrb.mxu1 %v10894_v3  ;;  %v10924_v34 = vld [vmem:[#allocation3 + $0xf8] sm:$0xff]  ;;  %v10921_v3 = vld [vmem:[#allocation3 + $0xe0] sm:$0xff] }
 0x8a5   : > { %8029 = vmatpush.bf16.msra.mxu0 %v10924_v34 }
 0x8a6   : > { %7434 = vadd.xlane.f32.xlu2 %v16238_v16  ;;  %v7574_v5 = vpack.c.bf16 %v7542_v21, %v7542_v21  ;;  %v10905_v21 = vld [vmem:[#allocation3 + $0x60] sm:$0xff] }
 0x8a7   : > { %7482 = vadd.xlane.f32.xlu0 %v16241_v44 }
 0x8a8   : > { %v7864_v55 = vunpack.c.l.b16 %v7574_v5  ;;  %10988 = vmatpush.bf16.msrb.mxu2 %v10893_v54  ;;  %7733 = vmatpush.bf16.msrb.mxu1 %v10893_v54  ;;  %v10904_v5 = vld [vmem:[#allocation3 + $0x58] sm:$0xff] }
 0x8ac   : > { %v7465_v37 = vpop.xlane.xlu2 %7464 }
 0x8ad   : > { %11646 = vrcp.f32 %v7465_v37 }
 0x8ae   : > { %7484 = vadd.xlane.f32.xlu2 %v16247_v58  ;;  %11648 = vpow2.f32 %v7390_v22 }
 0x8af   : > { %7472 = vadd.xlane.f32.xlu0 %v16250_v43  ;;  %11650 = vpow2.f32 %v7422_v12 }
 0x8b0   : > { %11652 = vpow2.f32 %v7424_v28  ;;  %v10906_v28 = vld [vmem:[#allocation3 + $0x68] sm:$0xff] }
 0x8b1   : > { %11654 = vpow2.f32 %v7412_v49  ;;  %v10920_v49 = vld [vmem:[#allocation3 + $0xd8] sm:$0xff] }
 0x8b3   : > { %v11647_v10 = vpop.eup %11646 }
 0x8b4   : > { %v7543_v26 = vmul.f32 %v11647_v10, %v16127_v36  ;;  %v16257_v13 = vpop.eup %11648  ;;  %v10923_v10 = vld [vmem:[#allocation3 + $0xf0] sm:$0xff]  ;;  %v7447_v54 = vpop.xlane.xlu2 %7446 }
 0x8b5   : > { %v16260_v60 = vpop.eup %11650  ;;  %8030 = vmatpush.bf16.msra.mxu0 %v10923_v10 }
 0x8b6   : > { %v7575_v15 = vpack.c.bf16 %v7543_v26, %v7543_v26  ;;  %7454 = vadd.xlane.f32.xlu2 %v16257_v13  ;;  %v16263_v36 = vpop.eup %11652 }
 0x8b7   : > { %7486 = vadd.xlane.f32.xlu0 %v16260_v60  ;;  %v16266_v59 = vpop.eup %11654 }
 0x8b8   : > { %v7865_v1 = vunpack.c.l.b16 %v7575_v15  ;;  %v10919_v15 = vld [vmem:[#allocation3 + $0xd0] sm:$0xff] }
 0x8b9   : > { %8031 = vmatpush.bf16.msra.mxu0 %v10922_v18 }
 0x8ba   : > { %v7872_v61 = vpack.c.b16 %v7865_v1, %v7864_v55  ;;  %v10903_v1 = vld [vmem:[#allocation3 + $0x50] sm:$0xff] }
 0x8bc   : > { %7936 = vmatmul.bf16.vlgmr.msrb.gmra.mxu3 %v7872_v61  ;;  %v10918_v61 = vld [vmem:[#allocation3 + $0xc8] sm:$0xff] }
 0x8bd   : > { %8032 = vmatpush.bf16.msra.mxu0 %v10921_v3 }
 0x8be   : > { %v7439_v4 = vpop.xlane.xlu1 %7438  ;;  %7488 = vadd.xlane.f32.xlu2 %v16263_v36 }
 0x8bf   : > { %11656 = vrcp.f32 %v7439_v4  ;;  %7476 = vadd.xlane.f32.xlu0 %v16266_v59 }
 0x8c1   : > { %8033 = vmatpush.bf16.msra.mxu0 %v10920_v49 }
 0x8c5   : > { %v11657_v14 = vpop.eup %11656  ;;  %8034 = vmatpush.bf16.msra.mxu0 %v10919_v15 }
 0x8c6   : > { %v7299_v45 = vpop.xlane.xlu1 %7298  ;;  %v7441_v6 = vpop.xlane.xlu0 %7440  ;;  %v7530_v8 = vmul.f32 %v11657_v14, %v16135_v20 }
 0x8c7   : > { %v7348_v48 = vsub.f32 %v16140_v51, %v7299_v45  ;;  %11658 = vrcp.f32 %v7441_v6  ;;  %v10902_v45 = vld [vmem:[#allocation3 + $0x48] sm:$0xff]  ;;  %v10917_v6 = vld [vmem:[#allocation3 + $0xc0] sm:$0xff] }
 0x8c8   : > { %v7562_v19 = vpack.c.bf16 %v7530_v8, %v7530_v8 }
 0x8c9   : > { %v7394_v62 = vmul.f32 1.442695, %v7348_v48  ;;  %8035 = vmatpush.bf16.msra.mxu0 %v10918_v61 }
 0x8ca   : > { %v7666_v32 = vunpack.c.l.b16 %v7562_v19 }
 0x8cb   : > { %11660 = vpow2.f32 %v7394_v62 }
 0x8cd   : > { %v11659_v9 = vpop.eup %11658  ;;  %8036 = vmatpush.bf16.msra.mxu0 %v10917_v6 }
 0x8ce   : > { %v7301_v17 = vpop.xlane.xlu0 %7300  ;;  %v7531_v42 = vmul.f32 %v11659_v9, %v16142_v27  ;;  %v10908_v27 = vld [vmem:[#allocation3 + $0x78] sm:$0xff]  ;;  %v7449_v26 = vpop.xlane.xlu1 %7448 }
 0x8cf   : > { %v7349_v37 = vsub.f32 %v16148_v30, %v7301_v17  ;;  %7827 = vmatpush.bf16.msra.mxu2 %v10908_v27  ;;  %v10907_v30 = vld [vmem:[#allocation3 + $0x70] sm:$0xff]  ;;  %v10901_v17 = vld [vmem:[#allocation3 + $0x40] sm:$0xff] }
 0x8d0   : > { %v7563_v31 = vpack.c.bf16 %v7531_v42, %v7531_v42 }
 0x8d1   : > { %v16273_v22 = vpop.eup %11660  ;;  %v7396_v12 = vmul.f32 1.442695, %v7349_v37 }
 0x8d2   : > { %v7667_v23 = vunpack.c.l.b16 %v7563_v31  ;;  %7458 = vadd.xlane.f32.xlu2 %v16273_v22 }
 0x8d3   : > { %11662 = vpow2.f32 %v7396_v12  ;;  %7828 = vmatpush.bf16.msra.mxu2 %v10907_v30 }
 0x8d4   : > { %v7672_v51 = vpack.c.b16 %v7667_v23, %v7666_v32 }
 0x8d6   : > { %7744 = vmatmul.bf16.vlgmr.msrb.gmra.mxu2 %v7672_v51  ;;  %v7431_v4 = vpop.xlane.xlu1 %7430 }
 0x8d7   : > { %7829 = vmatpush.bf16.msra.mxu2 %v10906_v28 }
 0x8d9   : > { %v16276_v20 = vpop.eup %11662 }
 0x8da   : > { %7460 = vadd.xlane.f32.xlu1 %v16276_v20 }
 0x8db   : > { %7830 = vmatpush.bf16.msra.mxu2 %v10905_v21 }
 0x8de   : > { %v7481_v9 = vpop.xlane.xlu1 %7480 }
 0x8df   : > { %7831 = vmatpush.bf16.msra.mxu2 %v10904_v5 }
 0x8e3   : > { %7832 = vmatpush.bf16.msra.mxu2 %v10903_v1 }
 0x8e7   : > { %7833 = vmatpush.bf16.msra.mxu2 %v10902_v45 }
 0x8eb   : > { %7834 = vmatpush.bf16.msra.mxu2 %v10901_v17 }
 0x8f1   : > { %v7443_v55 = vpop.xlane.xlu0 %7442 }
 0x8f2   : > { %11664 = vrcp.f32 %v7443_v55 }
 0x8f8   : > { %v11665_v62 = vpop.eup %11664 }
 0x8f9   : > { %v7445_v14 = vpop.xlane.xlu2 %7444  ;;  %v7331_v48 = vpop.xlane.xlu0 %7330  ;;  %v7532_v19 = vmul.f32 %v11665_v62, %v16183_v2 }
 0x8fa   : > { %11666 = vrcp.f32 %v7445_v14  ;;  %v7364_v8 = vsub.f32 %v16192_v25, %v7331_v48  ;;  %v7451_v2 = vpop.xlane.xlu1 %7450 }
 0x8fb   : > { %11668 = vrcp.f32 %v7431_v4  ;;  %v7564_v23 = vpack.c.bf16 %v7532_v19, %v7532_v19 }
 0x8fc   : > { %v7426_v42 = vmul.f32 1.442695, %v7364_v8 }
 0x8fd   : > { %v7668_v30 = vunpack.c.l.b16 %v7564_v23 }
 0x8fe   : > { %11670 = vpow2.f32 %v7426_v42 }
 0x8ff   : > { %11672 = vrcp.f32 %v7449_v26 }
 0x900   : > { %v11667_v37 = vpop.eup %11666 }
 0x901   : > { %v7333_v31 = vpop.xlane.xlu2 %7332  ;;  %v7433_v12 = vpop.xlane.xlu0 %7432  ;;  %v7533_v32 = vmul.f32 %v11667_v37, %v16194_v38 }
 0x902   : > { %v11669_v51 = vpop.eup %11668  ;;  %v7365_v25 = vsub.f32 %v16206_v24, %v7333_v31  ;;  %11674 = vrcp.f32 %v7433_v12  ;;  %v7437_v48 = vpop.xlane.xlu1 %7436 }
 0x903   : > { %11676 = vrcp.f32 %v7447_v54  ;;  %v7565_v34 = vpack.c.bf16 %v7533_v32, %v7533_v32  ;;  %v7526_v28 = vmul.f32 %v11669_v51, %v16157_v41 }
 0x904   : > { %v16283_v27 = vpop.eup %11670  ;;  %11678 = vrcp.f32 %v7481_v9  ;;  %v7428_v10 = vmul.f32 1.442695, %v7365_v25 }
 0x905   : > { %7490 = vadd.xlane.f32.xlu0 %v16283_v27  ;;  %v7669_v18 = vunpack.c.l.b16 %v7565_v34  ;;  %v11673_v38 = vpop.eup %11672  ;;  %v7558_v15 = vpack.c.bf16 %v7526_v28, %v7526_v28 }
 0x906   : > { %11680 = vpow2.f32 %v7428_v10  ;;  %v7535_v4 = vmul.f32 %v11673_v38, %v16150_v56 }
 0x907   : > { %v7673_v3 = vpack.c.b16 %v7669_v18, %v7668_v30  ;;  %v7662_v45 = vunpack.c.l.b16 %v7558_v15 }
 0x908   : > { %v11675_v21 = vpop.eup %11674  ;;  %v7567_v14 = vpack.c.bf16 %v7535_v4, %v7535_v4 }
 0x909   : > { %v11677_v26 = vpop.eup %11676  ;;  %v7479_v24 = vpop.xlane.xlu2 %7478  ;;  %7749 = vmatmul.bf16.gmra.mxu2 %v7673_v3  ;;  %v7527_v5 = vmul.f32 %v11675_v21, %v16208_v7 }
 0x90a   : > { %v7467_v49 = vpop.xlane.xlu0 %7466  ;;  %v11679_v54 = vpop.eup %11678  ;;  %11682 = vrcp.f32 %v7479_v24  ;;  %v7534_v41 = vmul.f32 %v11677_v26, %v16130_v33  ;;  %v7764_v33 = vunpack.c.l.b16 %v7567_v14 }
 0x90b   : > { %v7559_v55 = vpack.c.bf16 %v7527_v5, %v7527_v5  ;;  %11684 = vrcp.f32 %v7467_v49  ;;  %v7551_v61 = vmul.f32 %v11679_v54, %v16161_v57  ;;  %v7471_v34 = vpop.xlane.xlu1 %7470 }
 0x90c   : > { %v16289_v1 = vpop.eup %11680  ;;  %v7566_v8 = vpack.c.bf16 %v7534_v41, %v7534_v41 }
 0x90d   : > { %7492 = vadd.xlane.f32.xlu2 %v16289_v1  ;;  %v7663_v6 = vunpack.c.l.b16 %v7559_v55  ;;  %v7583_v9 = vpack.c.bf16 %v7551_v61, %v7551_v61 }
 0x90e   : > { %v7763_v57 = vunpack.c.l.b16 %v7566_v8 }
 0x90f   : > { %v7670_v7 = vpack.c.b16 %v7663_v6, %v7662_v45  ;;  %v7966_v31 = vunpack.c.l.b16 %v7583_v9 }
 0x910   : > { %v11683_v62 = vpop.eup %11682  ;;  %v7771_v51 = vpack.c.b16 %v7764_v33, %v7763_v57 }
 0x911   : > { %v7550_v56 = vmul.f32 %v11683_v62, %v16217_v53  ;;  %v7469_v17 = vpop.xlane.xlu2 %7468  ;;  %7734 = vmatmul.bf16.vlgmr.msrb.gmra.mxu1 %v7670_v7  ;;  %v11685_v42 = vpop.eup %11684 }
 0x912   : > { %11686 = vrcp.f32 %v7469_v17  ;;  %v7453_v19 = vpop.xlane.xlu0 %7452  ;;  %v7544_v32 = vmul.f32 %v11685_v42, %v16219_v47 }
 0x913   : > { %v7582_v37 = vpack.c.bf16 %v7550_v56, %v7550_v56  ;;  %11688 = vrcp.f32 %v7451_v2  ;;  %v7457_v54 = vpop.xlane.xlu1 %7456 }
 0x914   : > { %v7576_v30 = vpack.c.bf16 %v7544_v32, %v7544_v32  ;;  %11690 = vrcp.f32 %v7437_v48 }
 0x915   : > { %v7965_v12 = vunpack.c.l.b16 %v7582_v37  ;;  %11692 = vrcp.f32 %v7471_v34 }
 0x916   : > { %11694 = vrcp.f32 %v7453_v19  ;;  %v7866_v38 = vunpack.c.l.b16 %v7576_v30 }
 0x917   : > { %v7973_v23 = vpack.c.b16 %v7966_v31, %v7965_v12 }
 0x918   : > { %v11687_v25 = vpop.eup %11686 }
 0x919   : > { %8037 = vmatmul.bf16.vlgmr.msra.gmra.mxu0 %v7973_v23  ;;  %v7435_v10 = vpop.xlane.xlu2 %7434  ;;  %7835 = vmatmul.bf16.vlgmr.msra.gmra.mxu2 %v7771_v51  ;;  %v7545_v53 = vmul.f32 %v11687_v25, %v16227_v39  ;;  %v11689_v21 = vpop.eup %11688 }
 0x91a   : > { %v7483_v18 = vpop.xlane.xlu0 %7482  ;;  %11696 = vrcp.f32 %v7435_v10  ;;  %v11691_v26 = vpop.eup %11690  ;;  %v7536_v2 = vmul.f32 %v11689_v21, %v16169_v29 }
 0x91b   : > { %v7577_v28 = vpack.c.bf16 %v7545_v53, %v7545_v53  ;;  %11698 = vrcp.f32 %v7483_v18  ;;  %v11693_v49 = vpop.eup %11692  ;;  %v7529_v4 = vmul.f32 %v11691_v26, %v16176_v11  ;;  %v7475_v32 = vpop.xlane.xlu1 %7474 }
 0x91c   : > { %v11695_v5 = vpop.eup %11694  ;;  %v7568_v41 = vpack.c.bf16 %v7536_v2, %v7536_v2  ;;  %v7546_v61 = vmul.f32 %v11693_v49, %v16181_v63 }
 0x91d   : > { %v7867_v3 = vunpack.c.l.b16 %v7577_v28  ;;  %v7561_v14 = vpack.c.bf16 %v7529_v4, %v7529_v4  ;;  %v7537_v48 = vmul.f32 %v11695_v5, %v16231_v46 }
 0x91e   : > { %v7578_v63 = vpack.c.bf16 %v7546_v61, %v7546_v61  ;;  %v7765_v37 = vunpack.c.l.b16 %v7568_v41 }
 0x91f   : > { %v7873_v47 = vpack.c.b16 %v7867_v3, %v7866_v38  ;;  %v7569_v56 = vpack.c.bf16 %v7537_v48, %v7537_v48 }
 0x920   : > { %v11697_v15 = vpop.eup %11696  ;;  %v7868_v51 = vunpack.c.l.b16 %v7578_v63 }
 0x921   : > { %v7485_v24 = vpop.xlane.xlu2 %7484  ;;  %7941 = vmatmul.bf16.gmra.mxu3 %v7873_v47  ;;  %v11699_v55 = vpop.eup %11698  ;;  %v7528_v6 = vmul.f32 %v11697_v15, %v16238_v16  ;;  %v7665_v16 = vunpack.c.l.b16 %v7561_v14  ;;  %v7766_v57 = vunpack.c.l.b16 %v7569_v56 }
 0x922   : > { %11700 = vrcp.f32 %v7485_v24  ;;  %v7473_v39 = vpop.xlane.xlu0 %7472  ;;  %v7552_v7 = vmul.f32 %v11699_v55, %v16241_v44 }
 0x923   : > { %11702 = vrcp.f32 %v7473_v39  ;;  %v7560_v9 = vpack.c.bf16 %v7528_v6, %v7528_v6  ;;  %v7772_v23 = vpack.c.b16 %v7766_v57, %v7765_v37 }
 0x924   : > { %11704 = vrcp.f32 %v7457_v54  ;;  %v7584_v11 = vpack.c.bf16 %v7552_v7, %v7552_v7 }
 0x925   : > { %v7664_v33 = vunpack.c.l.b16 %v7560_v9 }
 0x926   : > { %v7967_v44 = vunpack.c.l.b16 %v7584_v11 }
 0x928   : > { %v11701_v45 = vpop.eup %11700 }
 0x929   : > { %v7455_v62 = vpop.xlane.xlu2 %7454  ;;  %v7553_v29 = vmul.f32 %v11701_v45, %v16247_v58  ;;  %v11703_v8 = vpop.eup %11702  ;;  %v7671_v58 = vpack.c.b16 %v7665_v16, %v7664_v33  ;;  %7840 = vmatmul.bf16.gmra.mxu2 %v7772_v23 }
 0x92a   : > { %11706 = vrcp.f32 %v7455_v62  ;;  %v7487_v17 = vpop.xlane.xlu0 %7486  ;;  %v7547_v42 = vmul.f32 %v11703_v8, %v16250_v43  ;;  %v11705_v46 = vpop.eup %11704 }
 0x92b   : > { %v7585_v19 = vpack.c.bf16 %v7553_v29, %v7553_v29  ;;  %7739 = vmatmul.bf16.gmra.mxu1 %v7671_v58  ;;  %11708 = vrcp.f32 %v7475_v32  ;;  %v7539_v30 = vmul.f32 %v11705_v46, %v16189_v50 }
 0x92c   : > { %v7579_v31 = vpack.c.bf16 %v7547_v42, %v7547_v42  ;;  %11710 = vrcp.f32 %v7487_v17 }
 0x92d   : > { %v7968_v12 = vunpack.c.l.b16 %v7585_v19  ;;  %v7571_v38 = vpack.c.bf16 %v7539_v30, %v7539_v30 }
 0x92e   : > { %v7869_v25 = vunpack.c.l.b16 %v7579_v31 }
 0x92f   : > { %v7974_v34 = vpack.c.b16 %v7968_v12, %v7967_v44  ;;  %v7768_v49 = vunpack.c.l.b16 %v7571_v38 }
 0x930   : > { %v11707_v10 = vpop.eup %11706  ;;  %v7874_v53 = vpack.c.b16 %v7869_v25, %v7868_v51 }
 0x931   : > { %v7489_v43 = vpop.xlane.xlu2 %7488  ;;  %8042 = vmatmul.bf16.gmra.mxu0 %v7974_v34  ;;  %v7538_v28 = vmul.f32 %v11707_v10, %v16257_v13  ;;  %v11709_v47 = vpop.eup %11708 }
 0x932   : > { %11712 = vrcp.f32 %v7489_v43  ;;  %7946 = vmatmul.bf16.gmra.mxu3 %v7874_v53  ;;  %v7477_v18 = vpop.xlane.xlu0 %7476  ;;  %v11711_v21 = vpop.eup %11710  ;;  %v7548_v2 = vmul.f32 %v11709_v47, %v16229_v52 }
 0x933   : > { %11714 = vrcp.f32 %v7477_v18  ;;  %v7570_v3 = vpack.c.bf16 %v7538_v28, %v7538_v28  ;;  %v7554_v15 = vmul.f32 %v11711_v21, %v16260_v60 }
 0x934   : > { %v7580_v4 = vpack.c.bf16 %v7548_v2, %v7548_v2 }
 0x935   : > { %v7767_v26 = vunpack.c.l.b16 %v7570_v3  ;;  %v7586_v13 = vpack.c.bf16 %v7554_v15, %v7554_v15 }
 0x936   : > { %v7870_v45 = vunpack.c.l.b16 %v7580_v4 }
 0x937   : > { %v7773_v39 = vpack.c.b16 %v7768_v49, %v7767_v26  ;;  %v7969_v14 = vunpack.c.l.b16 %v7586_v13 }
 0x938   : > { %v11713_v24 = vpop.eup %11712 }
 0x939   : > { %v11715_v5 = vpop.eup %11714  ;;  %v7555_v54 = vmul.f32 %v11713_v24, %v16263_v36  ;;  %7845 = vmatmul.bf16.gmra.mxu2 %v7773_v39 }
 0x93a   : > { %v7549_v50 = vmul.f32 %v11715_v5, %v16266_v59 }
 0x93b   : > { %v7587_v41 = vpack.c.bf16 %v7555_v54, %v7555_v54 }
 0x93c   : > { %v7581_v55 = vpack.c.bf16 %v7549_v50, %v7549_v50 }
 0x93d   : > { %v7970_v48 = vunpack.c.l.b16 %v7587_v41 }
 0x93e   : > { %v7871_v6 = vunpack.c.l.b16 %v7581_v55 }
 0x93f   : > { %v7975_v62 = vpack.c.b16 %v7970_v48, %v7969_v14  ;;  %v7937_v23 = vpop.f32.mrf.mxu3 }
 0x940   : > { %v7875_v7 = vpack.c.b16 %v7871_v6, %v7870_v45  ;;  %v8058_v25 = vrot.slane %v7937_v23, 4 }
 0x941   : > { %8047 = vmatmul.bf16.gmra.mxu0 %v7975_v62 }
 0x942   : > { %7951 = vmatmul.bf16.gmra.mxu3 %v7875_v7 }
 0x945   : > { %v7459_v61 = vpop.xlane.xlu2 %7458 }
 0x946   : > { %11716 = vrcp.f32 %v7459_v61 }
 0x947   : > { %v7939_v30 = vpop.f32.mrf.mxu3 }
 0x948   : > { %v8114_v24 = vrot.slane %v7939_v30, 4 }
 0x94c   : > { %v11717_v52 = vpop.eup %11716 }
 0x94d   : > { %v7461_v59 = vpop.xlane.xlu1 %7460  ;;  %v7540_v60 = vmul.f32 %v11717_v52, %v16273_v22 }
 0x94e   : > { %11718 = vrcp.f32 %v7461_v59 }
 0x94f   : > { %v7572_v36 = vpack.c.bf16 %v7540_v60, %v7540_v60 }
 0x951   : > { %v7769_v56 = vunpack.c.l.b16 %v7572_v36 }
 0x954   : > { %v11719_v29 = vpop.eup %11718 }
 0x955   : > { %v7541_v8 = vmul.f32 %v11719_v29, %v16276_v20 }
 0x957   : > { %v7573_v9 = vpack.c.bf16 %v7541_v8, %v7541_v8 }
 0x959   : > { %v7770_v11 = vunpack.c.l.b16 %v7573_v9  ;;  %v16313_v63 = vpop.f32.mrf.mxu2 }
 0x95b   : > { %v7774_v17 = vpack.c.b16 %v7770_v11, %v7769_v56 }
 0x95d   : > { %7850 = vmatmul.bf16.gmra.mxu2 %v7774_v17 }
 0x961   : > { %v16315_v16 = vpop.f32.mrf.mxu2 }
 0x978   : > { %v7491_v42 = vpop.xlane.xlu0 %7490 }
 0x979   : > { %11720 = vrcp.f32 %v7491_v42 }
 0x97f   : > { %v11721_v33 = vpop.eup %11720 }
 0x980   : > { %v7493_v19 = vpop.xlane.xlu2 %7492  ;;  %v7556_v22 = vmul.f32 %v11721_v33, %v16283_v27 }
 0x981   : > { %11722 = vrcp.f32 %v7493_v19 }
 0x982   : > { %v7588_v20 = vpack.c.bf16 %v7556_v22, %v7556_v22 }
 0x984   : > { %v7971_v44 = vunpack.c.l.b16 %v7588_v20 }
 0x987   : > { %v11723_v37 = vpop.eup %11722 }
 0x988   : > { %v7557_v57 = vmul.f32 %v11723_v37, %v16289_v1 }
 0x98a   : > { %v7589_v46 = vpack.c.bf16 %v7557_v57, %v7557_v57 }
 0x98c   : > { %v16319_v31 = vpop.f32.mrf.mxu2  ;;  %v7972_v12 = vunpack.c.l.b16 %v7589_v46 }
 0x98e   : > { %v7976_v32 = vpack.c.b16 %v7972_v12, %v7971_v44  ;;  %v7735_v58 = vpop.f32.mrf.mxu1 }
 0x98f   : > { %v8059_v34 = vsel %vm5793_vm13, %v8058_v25, %v7735_v58  ;;  %v8060_v27 = vrot.slane %v7735_v58, 4 }
 0x990   : > { %8052 = vmatmul.bf16.gmra.mxu0 %v7976_v32  ;;  %v8065_v43 = vperm.slane %v8059_v34, %v15406_v0 }
 0x991   : > { %v8061_v28 = vsel %vm5793_vm13, %v7937_v23, %v8060_v27 }
 0x992   : > { %v8084_v47 = vrot.slane %v8065_v43, 4  ;;  %v8069_v5 = vperm.slane %v8061_v28, %v15406_v0  ;;  %v8284_v28 = vrot.slane %v16313_v63, 4 }
 0x994   : > { %v16321_v51 = vpop.f32.mrf.mxu2  ;;  %v8096_v41 = vrot.slane %v8069_v5, 4 }
 0x996   : > { %v8038_v10 = vpop.f32.mrf.mxu0  ;;  %v7737_v1 = vpop.f32.mrf.mxu1 }
 0x997   : > { %v8070_v53 = vrot.slane %v8038_v10, 4  ;;  %v8116_v21 = vrot.slane %v7737_v1, 4  ;;  %v8115_v50 = vsel %vm5793_vm13, %v8114_v24, %v7737_v1 }
 0x998   : > { %v8121_v61 = vperm.slane %v8115_v50, %v15406_v0 }
 0x999   : > { %v8117_v4 = vsel %vm5793_vm13, %v7939_v30, %v8116_v21 }
 0x99a   : > { %v8125_v48 = vperm.slane %v8117_v4, %v15406_v0  ;;  %v8140_v29 = vrot.slane %v8121_v61, 4 }
 0x99c   : > { %v7836_v18 = vpop.f32.mrf.mxu2  ;;  %v8152_v9 = vrot.slane %v8125_v48, 4 }
 0x99d   : > { %v8071_v38 = vsel %vm5793_vm13, %v8070_v53, %v7836_v18  ;;  %v8072_v3 = vrot.slane %v7836_v18, 4 }
 0x99e   : > { %v8077_v26 = vperm.slane %v8071_v38, %v15406_v0  ;;  %v8040_v54 = vpop.f32.mrf.mxu0  ;;  %v8340_v38 = vrot.slane %v16315_v16, 4 }
 0x99f   : > { %v8073_v49 = vsel %vm5793_vm13, %v8038_v10, %v8072_v3  ;;  %v8126_v45 = vrot.slane %v8040_v54, 4 }
 0x9a0   : > { %v8082_v39 = vrot.slane %v8077_v26, 4  ;;  %v8085_v2 = vsel %vm5793_vm13, %v8077_v26, %v8084_v47  ;;  %v8081_v15 = vperm.slane %v8073_v49, %v15406_v0 }
 0x9a1   : > { %v8093_v13 = vperm.slane %v8085_v2, %v15434_v35 }
 0x9a2   : > { %v8083_v55 = vsel %vm5793_vm13, %v8082_v39, %v8065_v43  ;;  %v8094_v7 = vrot.slane %v8081_v15, 4  ;;  %v8097_v52 = vsel %vm5793_vm13, %v8081_v15, %v8096_v41 }
 0x9a3   : > { %v8089_v62 = vperm.slane %v8083_v55, %v15434_v35  ;;  %v8108_v36 = vrot.slane %v8093_v13, 4  ;;  %v8105_v56 = vperm.slane %v8097_v52, %v15434_v35 }
 0x9a4   : > { %v7838_v6 = vpop.f32.mrf.mxu2  ;;  %v7942_v14 = vpop.f32.mrf.mxu3  ;;  %v8095_v42 = vsel %vm5793_vm13, %v8094_v7, %v8069_v5 }
 0x9a5   : > { %v8127_v59 = vsel %vm5793_vm13, %v8126_v45, %v7838_v6  ;;  %v8128_v60 = vrot.slane %v7838_v6, 4  ;;  %v8106_v19 = vrot.slane %v8089_v62, 4  ;;  %v8109_v33 = vsel %vm5793_vm13, 0.0, %v8108_v36 }
 0x9a6   : > { %v8133_v11 = vperm.slane %v8127_v59, %v15406_v0  ;;  %v8101_v46 = vperm.slane %v8095_v42, %v15434_v35  ;;  %v8112_v44 = vrot.slane %v8105_v56, 4  ;;  %v8506_v25 = vsel %vm5793_vm13, %v8108_v36, %v8089_v62 }
 0x9a7   : > { %v8129_v8 = vsel %vm5793_vm13, %v8040_v54, %v8128_v60  ;;  %v8107_v23 = vsel %vm5793_vm13, 0.0, %v8106_v19  ;;  %v8511_v34 = vrot.slane %v8109_v33, 4  ;;  %v8170_v30 = vrot.slane %v7942_v14, 4 }
 0x9a8   : > { %v8137_v17 = vperm.slane %v8129_v8, %v15406_v0  ;;  %v8138_v22 = vrot.slane %v8133_v11, 4  ;;  %v8141_v37 = vsel %vm5793_vm13, %v8133_v11, %v8140_v29  ;;  %v7740_v58 = vpop.f32.mrf.mxu1  ;;  %v8113_v3 = vsel %vm5793_vm13, 0.0, %v8112_v44 }
 0x9a9   : > { %v8149_v20 = vperm.slane %v8141_v37, %v15434_v35  ;;  %v8172_v18 = vrot.slane %v7740_v58, 4  ;;  %v16360_v47 = vperm.slane %v8506_v25, %v15406_v0  ;;  %v8110_v24 = vrot.slane %v8101_v46, 4 }
 0x9aa   : > { %v8153_v57 = vsel %vm5793_vm13, %v8137_v17, %v8152_v9  ;;  %v8139_v12 = vsel %vm5793_vm13, %v8138_v22, %v8121_v61  ;;  %v8150_v32 = vrot.slane %v8137_v17, 4  ;;  %v8512_v49 = vsel %vm5793_vm13, %v8511_v34, %v8107_v23 }
 0x9ab   : > { %v8161_v10 = vperm.slane %v8153_v57, %v15434_v35  ;;  %v8145_v1 = vperm.slane %v8139_v12, %v15434_v35  ;;  %v8164_v53 = vrot.slane %v8149_v20, 4  ;;  %v8173_v39 = vsel %vm5793_vm13, %v7942_v14, %v8172_v18 }
 0x9ac   : > { %v7944_v27 = vpop.f32.mrf.mxu3  ;;  %v8151_v21 = vsel %vm5793_vm13, %v8150_v32, %v8125_v48  ;;  %v8517_v2 = vsel %vm5793_vm13, %v8112_v44, %v8101_v46  ;;  %v8171_v54 = vsel %vm5793_vm13, %v8170_v30, %v7740_v58  ;;  %v7841_v4 = vpop.f32.mrf.mxu2  ;;  %v8522_v55 = vrot.slane %v8113_v3, 4 }
 0x9ad   : > { %v8168_v5 = vrot.slane %v8161_v10, 4  ;;  %v8162_v50 = vrot.slane %v8145_v1, 4  ;;  %v8165_v15 = vsel %vm5793_vm13, 0.0, %v8164_v53  ;;  %v8157_v13 = vperm.slane %v8151_v21, %v15434_v35 }
 0x9ae   : > { %v8043_v43 = vpop.f32.mrf.mxu0  ;;  %v8181_v41 = vperm.slane %v8173_v39, %v15406_v0  ;;  %v8184_v61 = vrot.slane %v7841_v4, 4  ;;  %v16371_v45 = vperm.slane %v8512_v49, %v15406_v0  ;;  %v8530_v6 = vrot.slane %v16360_v47, 4 }
 0x9af   : > { %v8182_v26 = vrot.slane %v8043_v43, 4  ;;  %v8226_v14 = vrot.slane %v7944_v27, 4  ;;  %v8169_v62 = vsel %vm5793_vm13, 0.0, %v8168_v5  ;;  %v8565_v52 = vrot.slane %v8165_v15, 4 }
 0x9b0   : > { %v7742_v48 = vpop.f32.mrf.mxu1  ;;  %v8177_v59 = vperm.slane %v8171_v54, %v15406_v0  ;;  %v8185_v60 = vsel %vm5793_vm13, %v8043_v43, %v8184_v61  ;;  %v8163_v36 = vsel %vm5793_vm13, 0.0, %v8162_v50  ;;  %v8560_v29 = vsel %vm5793_vm13, %v8164_v53, %v8145_v1 }
 0x9b1   : > { %v8183_v7 = vsel %vm5793_vm13, %v8182_v26, %v7841_v4  ;;  %v8193_v9 = vperm.slane %v8185_v60, %v15406_v0  ;;  %v8166_v56 = vrot.slane %v8157_v13, 4  ;;  %v8208_v11 = vrot.slane %v8181_v41, 4 }
 0x9b2   : > { %v8189_v8 = vperm.slane %v8183_v7, %v15406_v0  ;;  %v8228_v17 = vrot.slane %v7742_v48, 4  ;;  %v8111_v19 = vsel %vm5793_vm13, 0.0, %v8110_v24  ;;  %v8571_v33 = vsel %vm5793_vm13, %v8168_v5, %v8157_v13 }
 0x9b3   : > { %v8576_v22 = vrot.slane %v8169_v62, 4  ;;  %v8206_v37 = vrot.slane %v8193_v9, 4  ;;  %v16385_v57 = vperm.slane %v8517_v2, %v15406_v0  ;;  %v16388_v20 = vperm.slane %v8560_v29, %v15406_v0 }
 0x9b4   : > { %v8566_v46 = vsel %vm5793_vm13, %v8565_v52, %v8163_v36  ;;  %v8196_v44 = vrot.slane %v8177_v59, 4  ;;  %v8209_v12 = vsel %vm5793_vm13, %v8193_v9, %v8208_v11  ;;  %v8227_v58 = vsel %vm5793_vm13, %v8226_v14, %v7742_v48  ;;  %v7843_v34 = vpop.f32.mrf.mxu2 }
 0x9b5   : > { %v7947_v42 = vpop.f32.mrf.mxu3  ;;  %v8194_v23 = vrot.slane %v8189_v8, 4  ;;  %v8217_v25 = vperm.slane %v8209_v12, %v15434_v35  ;;  %v8229_v43 = vsel %vm5793_vm13, %v7944_v27, %v8228_v17  ;;  %v8240_v1 = vrot.slane %v7843_v34, 4 }
 0x9b6   : > { %v8045_v32 = vpop.f32.mrf.mxu0  ;;  %v8285_v10 = vsel %vm5793_vm13, %v7947_v42, %v8284_v28  ;;  %v8167_v53 = vsel %vm5793_vm13, 0.0, %v8166_v56  ;;  %v8523_v30 = vsel %vm5793_vm13, %v8522_v55, %v8111_v19  ;;  %v16399_v18 = vperm.slane %v8566_v46, %v15406_v0 }
 0x9b7   : > { %v8197_v3 = vsel %vm5793_vm13, %v8189_v8, %v8196_v44  ;;  %v8207_v21 = vsel %vm5793_vm13, %v8206_v37, %v8181_v41  ;;  %v8238_v26 = vrot.slane %v8045_v32, 4  ;;  %v8584_v24 = vrot.slane %v16388_v20, 4 }
 0x9b8   : > { %v8233_v49 = vperm.slane %v8227_v58, %v15406_v0  ;;  %v8282_v28 = vrot.slane %v7947_v42, 4  ;;  %v16406_v27 = vperm.slane %v8285_v10, %v15406_v0  ;;  %v8237_v5 = vperm.slane %v8229_v43, %v15406_v0 }
 0x9b9   : > { %v8195_v39 = vsel %vm5793_vm13, %v8194_v23, %v8177_v59  ;;  %v8224_v2 = vrot.slane %v8217_v25, 4  ;;  %v8239_v50 = vsel %vm5793_vm13, %v8238_v26, %v7843_v34  ;;  %v8205_v15 = vperm.slane %v8197_v3, %v15434_v35 }
 0x9ba   : > { %v8213_v54 = vperm.slane %v8207_v21, %v15434_v35  ;;  %v8241_v4 = vsel %vm5793_vm13, %v8045_v32, %v8240_v1  ;;  %v16415_v55 = vperm.slane %v8523_v30, %v15406_v0  ;;  %v8245_v13 = vperm.slane %v8239_v50, %v15406_v0 }
 0x9bb   : > { %v8249_v41 = vperm.slane %v8241_v4, %v15406_v0  ;;  %v8531_v61 = vsel %vm5793_vm13, %v16371_v45, %v8530_v6  ;;  %v8542_v14 = vrot.slane %v16385_v57, 4  ;;  %v8252_v48 = vrot.slane %v8233_v49, 4 }
 0x9bc   : > { %v16423_v7 = vperm.slane %v8195_v39, %v15434_v35  ;;  %v8283_v62 = vsel %vm5793_vm13, %v8282_v28, %v16313_v63  ;;  %v8577_v52 = vsel %vm5793_vm13, %v8576_v22, %v8167_v53  ;;  %v8264_v59 = vrot.slane %v8237_v5, 4 }
 0x9bd   : > { %v8225_v60 = vsel %vm5793_vm13, 0.0, %v8224_v2  ;;  %v8320_v36 = vrot.slane %v16406_v27, 4  ;;  %v16431_v29 = vperm.slane %v8571_v33, %v15406_v0  ;;  %v8220_v6 = vrot.slane %v8205_v15, 4 }
 0x9be   : > { %v8222_v8 = vrot.slane %v8213_v54, 4  ;;  %v8625_v9 = vsel %vm5793_vm13, %v8224_v2, %v8213_v54  ;;  %v8539_v56 = vperm.slane %v8531_v61, %v15434_v35  ;;  %v8250_v11 = vrot.slane %v8245_v13, 4  ;;  %v7949_v61 = vpop.f32.mrf.mxu3 }
 0x9bf   : > { %v8262_v17 = vrot.slane %v8249_v41, 4  ;;  %v8543_v63 = vsel %vm5793_vm13, %v16415_v55, %v8542_v14  ;;  %v8581_v42 = vperm.slane %v8577_v52, %v15406_v0  ;;  %v8218_v19 = vrot.slane %v16423_v7, 4 }
 0x9c0   : > { %v8630_v22 = vrot.slane %v8225_v60, 4  ;;  %v16440_v37 = vperm.slane %v8283_v62, %v15406_v0  ;;  %v8585_v33 = vsel %vm5793_vm13, %v16399_v18, %v8584_v24  ;;  %v8253_v46 = vsel %vm5793_vm13, %v8245_v13, %v8252_v48  ;;  %v7846_v24 = vpop.f32.mrf.mxu2  ;;  %v8048_v48 = vpop.f32.mrf.mxu0 }
 0x9c1   : > { %v8265_v44 = vsel %vm5793_vm13, %v8249_v41, %v8264_v59  ;;  %v8593_v12 = vperm.slane %v8585_v33, %v15434_v35  ;;  %v8596_v32 = vrot.slane %v16431_v29, 4  ;;  %v16449_v58 = vsel %vm5793_vm13, 0.0, %v8220_v6 }
 0x9c2   : > { %v8223_v23 = vsel %vm5793_vm13, 0.0, %v8222_v8  ;;  %v16453_v25 = vperm.slane %v8625_v9, %v15406_v0  ;;  %v8551_v34 = vperm.slane %v8543_v63, %v15434_v35  ;;  %v8251_v10 = vsel %vm5793_vm13, %v8250_v11, %v8233_v49 }
 0x9c3   : > { %v8263_v43 = vsel %vm5793_vm13, %v8262_v17, %v8237_v5  ;;  %v8558_v1 = vrot.slane %v8539_v56, 4  ;;  %v8597_v53 = vsel %vm5793_vm13, %v8581_v42, %v8596_v32  ;;  %v16461_v30 = vsel %vm5793_vm13, %v8220_v6, %v16423_v7 }
 0x9c4   : > { %v8261_v3 = vperm.slane %v8253_v46, %v15434_v35  ;;  %v8273_v21 = vperm.slane %v8265_v44, %v15434_v35  ;;  %v8605_v26 = vperm.slane %v8597_v53, %v15434_v35  ;;  %v8619_v28 = vrot.slane %v16449_v58, 4 }
 0x9c5   : > { %v16468_v49 = vsel %vm5793_vm13, %v8630_v22, %v8223_v23  ;;  %v8308_v5 = vrot.slane %v16440_v37, 4  ;;  %v8612_v39 = vrot.slane %v8593_v12, 4  ;;  %v8650_v2 = vrot.slane %v16453_v25, 4 }
 0x9c6   : > { %v16473_v50 = vperm.slane %v8251_v10, %v15434_v35  ;;  %v8269_v15 = vperm.slane %v8263_v43, %v15434_v35  ;;  %v8556_v54 = vrot.slane %v8551_v34, 4  ;;  %v8559_v4 = vsel %vm5793_vm13, %v8551_v34, %v8558_v1 }
 0x9c7   : > { %v8613_v13 = vsel %vm5793_vm13, %v8605_v26, %v8612_v39  ;;  %v8296_v41 = vrot.slane %v7846_v24, 4  ;;  %v8610_v14 = vrot.slane %v8605_v26, 4  ;;  %v16478_v62 = vrot.slane %v8261_v3, 4 }
 0x9c8   : > { %v8280_v52 = vrot.slane %v8273_v21, 4  ;;  %v11521_v59 = vpack.i.bf16 %v8613_v13, %v8559_v4  ;;  %v8557_v60 = vsel %vm5793_vm13, %v8556_v54, %v8539_v56  ;;  %v8528_v8 = vrot.slane %v16371_v45, 4  ;;  %v7848_v1 = vpop.f32.mrf.mxu2 }
 0x9c9   : > { %v8611_v6 = vsel %vm5793_vm13, %v8610_v14, %v8593_v12  ;;  %v8540_v9 = vrot.slane %v16415_v55, 4  ;;  %v8582_v11 = vrot.slane %v16399_v18, 4  ;;  %v8338_v17 = vrot.slane %v7949_v61, 4 }
 0x9ca   : > { %11522 = vrot.lane.b32.xlu2 %v11521_v59, %s12214_s11  ;;  %v11516_v63 = vpack.i.bf16 %v8611_v6, %v8557_v60  ;;  %v8594_v22 = vrot.slane %v8581_v42, 4  ;;  %v8294_v33 = vrot.slane %v8048_v48, 4  ;;  %v8529_v46 = vsel %vm5793_vm13, %v8528_v8, %v16360_v47 }
 0x9cb   : > { %v8541_v56 = vsel %vm5793_vm13, %v8540_v9, %v16385_v57  ;;  %v8583_v44 = vsel %vm5793_vm13, %v8582_v11, %v16388_v20  ;;  %v8297_v45 = vsel %vm5793_vm13, %v8048_v48, %v8296_v41  ;;  %v16495_v18 = vperm.slane %v8529_v46, %v15434_v35  ;;  %v8050_v41 = vpop.f32.mrf.mxu0 }
 0x9cc   : > { %11517 = vrot.lane.b32.xlu0 %v11516_v63, %s12213_s10  ;;  %v16498_v55 = vperm.slane %v8541_v56, %v15434_v35  ;;  %v16501_v42 = vperm.slane %v8583_v44, %v15434_v35  ;;  %v8595_v47 = vsel %vm5793_vm13, %v8594_v22, %v16431_v29  ;;  %v8278_v57 = vrot.slane %v8269_v15, 4 }
 0x9cd   : > { %v16506_v12 = vperm.slane %v8595_v47, %v15434_v35  ;;  %v8295_v20 = vsel %vm5793_vm13, %v8294_v33, %v7846_v24  ;;  %v8305_v32 = vperm.slane %v8297_v45, %v15406_v0  ;;  %v8281_v23 = vsel %vm5793_vm13, 0.0, %v8280_v52 }
 0x9ce   : > { %v8554_v34 = vrot.slane %v16495_v18, 4  ;;  %v8608_v10 = vrot.slane %v16501_v42, 4  ;;  %v8301_v43 = vperm.slane %v8295_v20, %v15406_v0  ;;  %v8339_v29 = vsel %vm5793_vm13, %v8338_v17, %v16315_v16 }
 0x9cf   : > { %v8341_v53 = vsel %vm5793_vm13, %v7949_v61, %v8340_v38  ;;  %v8318_v3 = vrot.slane %v8305_v32, 4  ;;  %v8321_v21 = vsel %vm5793_vm13, %v8305_v32, %v8320_v36  ;;  %v8352_v13 = vrot.slane %v7848_v1, 4 }
 0x9d0   : > { %v8555_v26 = vsel %vm5793_vm13, %v16498_v55, %v8554_v34  ;;  %v8609_v24 = vsel %vm5793_vm13, %v16506_v12, %v8608_v10  ;;  %v8306_v39 = vrot.slane %v8301_v43, 4  ;;  %v8309_v54 = vsel %vm5793_vm13, %v8301_v43, %v8308_v5 }
 0x9d1   : > { %v11511_v4 = vpack.i.bf16 %v8609_v24, %v8555_v26  ;;  %v8319_v16 = vsel %vm5793_vm13, %v8318_v3, %v16406_v27  ;;  %v8329_v38 = vperm.slane %v8321_v21, %v15434_v35  ;;  %v16532_v36 = vsel %vm5793_vm13, 0.0, %v16478_v62 }
 0x9d2   : > { %v8679_v61 = vsel %vm5793_vm13, %v8280_v52, %v8269_v15  ;;  %v8684_v14 = vrot.slane %v8281_v23, 4  ;;  %v8325_v48 = vperm.slane %v8319_v16, %v15434_v35  ;;  %v8279_v59 = vsel %vm5793_vm13, 0.0, %v8278_v57 }
 0x9d3   : > { %v8349_v5 = vperm.slane %v8341_v53, %v15406_v0  ;;  %11512 = vrot.lane.b32.xlu1 %v11511_v4, %s12215_s20  ;;  %v8317_v27 = vperm.slane %v8309_v54, %v15434_v35  ;;  %v8336_v60 = vrot.slane %v8329_v38, 4  ;;  %v16542_v6 = vperm.slane %v16468_v49, %v15406_v0 }
 0x9d4   : > { %v8345_v8 = vperm.slane %v8339_v29, %v15406_v0  ;;  %v8307_v15 = vsel %vm5793_vm13, %v8306_v39, %v16440_v37  ;;  %v8350_v52 = vrot.slane %v8050_v41, 4  ;;  %v16548_v9 = vperm.slane %v8679_v61, %v15406_v0 }
 0x9d5   : > { %v8334_v11 = vrot.slane %v8325_v48, 4  ;;  %v8337_v17 = vsel %vm5793_vm13, 0.0, %v8336_v60  ;;  %v8353_v63 = vsel %vm5793_vm13, %v8050_v41, %v8352_v13  ;;  %v8274_v22 = vrot.slane %v16473_v50, 4 }
 0x9d6   : > { %v8668_v49 = vsel %vm5793_vm13, %v16478_v62, %v16473_v50  ;;  %v8673_v33 = vrot.slane %v16532_v36, 4  ;;  %v8685_v46 = vsel %vm5793_vm13, %v8684_v14, %v8279_v59  ;;  %v8376_v37 = vrot.slane %v8349_v5, 4 }
 0x9d7   : > { %v16559_v56 = vperm.slane %v8307_v15, %v15434_v35  ;;  %v8332_v44 = vrot.slane %v8317_v27, 4  ;;  %v8351_v45 = vsel %vm5793_vm13, %v8350_v52, %v7848_v1  ;;  %v8364_v47 = vrot.slane %v8345_v8, 4 }
 0x9d8   : > { %v8738_v57 = vrot.slane %v8337_v17, 4  ;;  %v8357_v20 = vperm.slane %v8351_v45, %v15406_v0  ;;  %v8361_v32 = vperm.slane %v8353_v63, %v15406_v0  ;;  %v16565_v23 = vperm.slane %v8685_v46, %v15406_v0 }
 0x9d9   : > { %v8704_v50 = vrot.slane %v16548_v9, 4  ;;  %v8335_v62 = vsel %vm5793_vm13, 0.0, %v8334_v11  ;;  %v8733_v34 = vsel %vm5793_vm13, %v8336_v60, %v8325_v48  ;;  %v8330_v53 = vrot.slane %v16559_v56, 4 }
 0x9da   : > { %v8362_v10 = vrot.slane %v8357_v20, 4  ;;  %v8365_v43 = vsel %vm5793_vm13, %v8357_v20, %v8364_v47  ;;  %v8374_v29 = vrot.slane %v8361_v32, 4  ;;  %v8377_v1 = vsel %vm5793_vm13, %v8361_v32, %v8376_v37 }
 0x9db   : > { %v16574_v3 = vsel %vm5793_vm13, 0.0, %v8332_v44  ;;  %v8373_v21 = vperm.slane %v8365_v43, %v15434_v35  ;;  %v8385_v26 = vperm.slane %v8377_v1, %v15434_v35  ;;  %v16579_v24 = vperm.slane %v8733_v34, %v15406_v0 }
 0x9dc   : > { %v8739_v39 = vsel %vm5793_vm13, %v8738_v57, %v8335_v62  ;;  %v8363_v54 = vsel %vm5793_vm13, %v8362_v10, %v8345_v8  ;;  %v8375_v4 = vsel %vm5793_vm13, %v8374_v29, %v8349_v5  ;;  %v16590_v36 = vsel %vm5793_vm13, %v8332_v44, %v16559_v56 }
 0x9dd   : > { %v16585_v16 = vperm.slane %v8363_v54, %v15434_v35  ;;  %v8381_v38 = vperm.slane %v8375_v4, %v15434_v35  ;;  %v8388_v13 = vrot.slane %v8373_v21, 4  ;;  %v8392_v41 = vrot.slane %v8385_v26, 4 }
 0x9de   : > { %v8727_v61 = vrot.slane %v16574_v3, 4  ;;  %v8219_v14 = vsel %vm5793_vm13, 0.0, %v8218_v19  ;;  %v8618_v48 = vperm.slane %v16461_v30, %v15406_v0  ;;  %v16599_v59 = vperm.slane %v8739_v39, %v15406_v0 }
 0x9df   : > { %v16602_v5 = vsel %vm5793_vm13, 0.0, %v8388_v13  ;;  %v8390_v27 = vrot.slane %v8381_v38, 4  ;;  %v8393_v60 = vsel %vm5793_vm13, 0.0, %v8392_v41  ;;  %v8758_v8 = vrot.slane %v16579_v24, 4 }
 0x9e0   : > { %v8386_v15 = vrot.slane %v16585_v16, 4  ;;  %v8787_v7 = vsel %vm5793_vm13, %v8392_v41, %v8381_v38  ;;  %v8275_v19 = vsel %vm5793_vm13, 0.0, %v8274_v22  ;;  %v8776_v30 = vsel %vm5793_vm13, %v8388_v13, %v16585_v16 }
 0x9e1   : > { %v8781_v52 = vrot.slane %v16602_v5, 4  ;;  %v8620_v11 = vsel %vm5793_vm13, %v8619_v28, %v8219_v14  ;;  %v8638_v17 = vrot.slane %v8618_v48, 4  ;;  %v8792_v63 = vrot.slane %v8393_v60, 4 }
 0x9e2   : > { %v8624_v46 = vperm.slane %v8620_v11, %v15406_v0  ;;  %v8651_v37 = vsel %vm5793_vm13, %v16542_v6, %v8650_v2  ;;  %v8672_v22 = vperm.slane %v8668_v49, %v15406_v0  ;;  %v8391_v44 = vsel %vm5793_vm13, 0.0, %v8390_v27 }
 0x9e3   : > { %v16623_v45 = vperm.slane %v8787_v7, %v15406_v0  ;;  %v8659_v58 = vperm.slane %v8651_v37, %v15434_v35  ;;  %v8674_v28 = vsel %vm5793_vm13, %v8673_v33, %v8275_v19  ;;  %v8705_v32 = vsel %vm5793_vm13, %v16565_v23, %v8704_v50 }
 0x9e4   : > { %v8639_v47 = vsel %vm5793_vm13, %v8624_v46, %v8638_v17  ;;  %v8678_v57 = vperm.slane %v8674_v28, %v15406_v0  ;;  %v8692_v20 = vrot.slane %v8672_v22, 4  ;;  %v8713_v62 = vperm.slane %v8705_v32, %v15434_v35 }
 0x9e5   : > { %v8647_v2 = vperm.slane %v8639_v47, %v15434_v35  ;;  %v8664_v49 = vrot.slane %v8659_v58, 4  ;;  %v8636_v34 = vrot.slane %v8624_v46, 4  ;;  %v8648_v43 = vrot.slane %v16542_v6, 4 }
 0x9e6   : > { %v8693_v10 = vsel %vm5793_vm13, %v8678_v57, %v8692_v20  ;;  %v8690_v29 = vrot.slane %v8678_v57, 4  ;;  %v8702_v33 = vrot.slane %v16565_v23, 4  ;;  %v8793_v1 = vsel %vm5793_vm13, %v8792_v63, %v8391_v44 }
 0x9e7   : > { %v8701_v21 = vperm.slane %v8693_v10, %v15434_v35  ;;  %v8718_v26 = vrot.slane %v8713_v62, 4  ;;  %v8666_v39 = vrot.slane %v8647_v2, 4  ;;  %v8665_v50 = vsel %vm5793_vm13, %v8664_v49, %v8647_v2 }
 0x9e8   : > { %v8637_v54 = vsel %vm5793_vm13, %v8636_v34, %v8618_v48  ;;  %v8649_v4 = vsel %vm5793_vm13, %v8648_v43, %v16453_v25  ;;  %v8691_v16 = vsel %vm5793_vm13, %v8690_v29, %v8672_v22  ;;  %v8703_v13 = vsel %vm5793_vm13, %v8702_v33, %v16548_v9 }
 0x9e9   : > { %v8719_v6 = vsel %vm5793_vm13, %v8718_v26, %v8701_v21  ;;  %v8720_v38 = vrot.slane %v8701_v21, 4  ;;  %v16645_v23 = vperm.slane %v8637_v54, %v15434_v35  ;;  %v8797_v41 = vperm.slane %v8793_v1, %v15406_v0 }
 0x9ea   : > { %v11531_v14 = vpack.i.bf16 %v8719_v6, %v8665_v50  ;;  %v8667_v5 = vsel %vm5793_vm13, %v8659_v58, %v8666_v39  ;;  %v16652_v48 = vperm.slane %v8691_v16, %v15434_v35  ;;  %v16656_v27 = vperm.slane %v8649_v4, %v15434_v35 }
 0x9eb   : > { %v8721_v25 = vsel %vm5793_vm13, %v8713_v62, %v8720_v38  ;;  %v8662_v60 = vrot.slane %v16645_v23, 4  ;;  %v8331_v7 = vsel %vm5793_vm13, 0.0, %v8330_v53  ;;  %v8812_v9 = vrot.slane %v16623_v45, 4 }
 0x9ec   : > { %11532 = vrot.lane.b32.xlu1 %v11531_v14, %s12213_s10  ;;  %v11536_v19 = vpack.i.bf16 %v8721_v25, %v8667_v5  ;;  %v16665_v11 = vperm.slane %v8703_v13, %v15434_v35  ;;  %v8716_v17 = vrot.slane %v16652_v48, 4  ;;  %v8387_v46 = vsel %vm5793_vm13, 0.0, %v8386_v15 }
 0x9ed   : > { %v8663_v63 = vsel %vm5793_vm13, %v16656_v27, %v8662_v60  ;;  %v8726_v56 = vperm.slane %v16590_v36, %v15406_v0  ;;  %v8728_v53 = vsel %vm5793_vm13, %v8727_v61, %v8331_v7  ;;  %v8759_v44 = vsel %vm5793_vm13, %v16599_v59, %v8758_v8 }
 0x9ee   : > { %11537 = vrot.lane.b32.xlu2 %v11536_v19, %s12214_s11  ;;  %v8717_v37 = vsel %vm5793_vm13, %v16665_v11, %v8716_v17  ;;  %v8732_v22 = vperm.slane %v8728_v53, %v15406_v0  ;;  %v8780_v58 = vperm.slane %v8776_v30, %v15406_v0  ;;  %v8767_v36 = vperm.slane %v8759_v44, %v15434_v35  ;;  %v7851_v17 = vpop.f32.mrf.mxu2  ;;  %v10931_v44 = vld [vmem:[#allocation13 + $0x30] sm:$0xff] }
 0x9ef   : > { %v11526_v15 = vpack.i.bf16 %v8717_v37, %v8663_v63  ;;  %v8746_v28 = vrot.slane %v8726_v56, 4  ;;  %v8782_v3 = vsel %vm5793_vm13, %v8781_v52, %v8387_v46  ;;  %v8813_v57 = vsel %vm5793_vm13, %v8797_v41, %v8812_v9  ;;  %v10932_v46 = vld [vmem:[#allocation13 + $0x38] sm:$0xff] }
 0x9f0   : > { %v8786_v61 = vperm.slane %v8782_v3, %v15406_v0  ;;  %v8800_v47 = vrot.slane %v8780_v58, 4  ;;  %v8744_v20 = vrot.slane %v8732_v22, 4  ;;  %v8772_v2 = vrot.slane %v8767_v36, 4  ;;  %9132 = vmatpush.bf16.msra.mxu1 %v10932_v46 }
 0x9f1   : > { %11527 = vrot.lane.b32.xlu0 %v11526_v15, %s12215_s20  ;;  %v8747_v32 = vsel %vm5793_vm13, %v8732_v22, %v8746_v28  ;;  %v8821_v8 = vperm.slane %v8813_v57, %v15434_v35  ;;  %v8756_v30 = vrot.slane %v16599_v59, 4  ;;  %v8552_v10 = vrot.slane %v16498_v55, 4 }
 0x9f2   : > { %v8755_v49 = vperm.slane %v8747_v32, %v15434_v35  ;;  %v8801_v62 = vsel %vm5793_vm13, %v8786_v61, %v8800_v47  ;;  %v8745_v52 = vsel %vm5793_vm13, %v8744_v20, %v8726_v56  ;;  %v8798_v34 = vrot.slane %v8786_v61, 4  ;;  %v10930_v61 = vld [vmem:[#allocation13 + $0x28] sm:$0xff] }
 0x9f3   : > { %v8809_v43 = vperm.slane %v8801_v62, %v15434_v35  ;;  %v8826_v29 = vrot.slane %v8821_v8, 4  ;;  %v8751_v33 = vperm.slane %v8745_v52, %v15434_v35  ;;  %v8606_v1 = vrot.slane %v16506_v12, 4 }
 0x9f4   : > { %v8774_v21 = vrot.slane %v8755_v49, 4  ;;  %v8799_v26 = vsel %vm5793_vm13, %v8798_v34, %v8780_v58  ;;  %v8773_v59 = vsel %vm5793_vm13, %v8772_v2, %v8755_v49  ;;  %v8757_v55 = vsel %vm5793_vm13, %v8756_v30, %v16579_v24  ;;  %9133 = vmatpush.bf16.msra.mxu1 %v10931_v44  ;;  %v10929_v34 = vld [vmem:[#allocation13 + $0x20] sm:$0xff] }
 0x9f5   : > { %v8827_v39 = vsel %vm5793_vm13, %v8826_v29, %v8809_v43  ;;  %v8828_v50 = vrot.slane %v8809_v43, 4  ;;  %v16702_v54 = vperm.slane %v8799_v26, %v15434_v35  ;;  %v8770_v16 = vrot.slane %v8751_v33, 4 }
 0x9f6   : > { %v11546_v4 = vpack.i.bf16 %v8827_v39, %v8773_v59  ;;  %v8810_v6 = vrot.slane %v8797_v41, 4  ;;  %v8775_v38 = vsel %vm5793_vm13, %v8767_v36, %v8774_v21  ;;  %v16711_v14 = vsel %vm5793_vm13, %v8552_v10, %v16495_v18  ;;  %v7853_v47 = vpop.f32.mrf.mxu2 }
 0x9f7   : > { %v8829_v12 = vsel %vm5793_vm13, %v8821_v8, %v8828_v50  ;;  %v8824_v13 = vrot.slane %v16702_v54, 4  ;;  %v16718_v24 = vsel %vm5793_vm13, %v8606_v1, %v16501_v42  ;;  %v8763_v41 = vperm.slane %v8757_v55, %v15434_v35  ;;  %v10928_v50 = vld [vmem:[#allocation13 + $0x18] sm:$0xff] }
 0x9f8   : > { %11547 = vrot.lane.b32.xlu1 %v11546_v4, %s12213_s10  ;;  %v11551_v5 = vpack.i.bf16 %v8829_v12, %v8775_v38  ;;  %v8811_v25 = vsel %vm5793_vm13, %v8810_v6, %v16623_v45  ;;  %v8660_v7 = vrot.slane %v16656_v27, 4  ;;  %v7952_v45 = vpop.f32.mrf.mxu3  ;;  %v8714_v63 = vrot.slane %v16665_v11, 4  ;;  %9134 = vmatpush.bf16.msra.mxu1 %v10930_v61 }
 0x9f9   : > { %v16722_v60 = vperm.slane %v8811_v25, %v15434_v35  ;;  %v8771_v18 = vsel %vm5793_vm13, %v8763_v41, %v8770_v16  ;;  %v8396_v27 = vrot.slane %v16319_v31, 4  ;;  %v8408_v37 = vrot.slane %v7851_v17, 4 }
 0x9fa   : > { %11552 = vrot.lane.b32.xlu2 %v11551_v5, %s12214_s11  ;;  %v16732_v42 = vsel %vm5793_vm13, %v8660_v7, %v16645_v23  ;;  %v16738_v56 = vsel %vm5793_vm13, %v8714_v63, %v16652_v48  ;;  %v8452_v15 = vrot.slane %v16321_v51, 4  ;;  %v8768_v28 = vrot.slane %v8763_v41, 4 }
 0x9fb   : > { %v8825_v9 = vsel %vm5793_vm13, %v16722_v60, %v8824_v13  ;;  %v8397_v53 = vsel %vm5793_vm13, %v7952_v45, %v8396_v27  ;;  %v8394_v36 = vrot.slane %v7952_v45, 4  ;;  %v8464_v62 = vrot.slane %v7853_v47, 4 }
 0x9fc   : > { %v11541_v19 = vpack.i.bf16 %v8825_v9, %v8771_v18  ;;  %v8405_v11 = vperm.slane %v8397_v53, %v15406_v0  ;;  %v16747_v2 = vsel %vm5793_vm13, %v8768_v28, %v8751_v33  ;;  %9135 = vmatpush.bf16.msra.mxu1 %v10929_v34 }
 0x9fd   : > { %v8395_v8 = vsel %vm5793_vm13, %v8394_v36, %v16319_v31 }
 0x9fe   : > { %11542 = vrot.lane.b32.xlu0 %v11541_v19, %s12215_s20  ;;  %v8432_v32 = vrot.slane %v8405_v11, 4  ;;  %v8401_v21 = vperm.slane %v8395_v8, %v15406_v0 }
 0xa00   : > { %v7954_v58 = vpop.f32.mrf.mxu3  ;;  %v8420_v38 = vrot.slane %v8401_v21, 4  ;;  %9136 = vmatpush.bf16.msra.mxu1 %v10928_v50 }
 0xa01   : > { %v8450_v3 = vrot.slane %v7954_v58, 4  ;;  %v8453_v48 = vsel %vm5793_vm13, %v7954_v58, %v8452_v15 }
 0xa02   : > { %v8461_v49 = vperm.slane %v8453_v48, %v15406_v0 }
 0xa03   : > { %v8451_v30 = vsel %vm5793_vm13, %v8450_v3, %v16321_v51  ;;  %v8822_v51 = vrot.slane %v16722_v60, 4 }
 0xa04   : > { %v8457_v31 = vperm.slane %v8451_v30, %v15406_v0  ;;  %v8488_v26 = vrot.slane %v8461_v49, 4 }
 0xa05   : > { %v16771_v7 = vsel %vm5793_vm13, %v8822_v51, %v16702_v54 }
 0xa06   : > { %v8476_v12 = vrot.slane %v8457_v31, 4 }
 0xa0d   : > { %v8053_v22 = vpop.f32.mrf.mxu0 }
 0xa0e   : > { %v8409_v23 = vsel %vm5793_vm13, %v8053_v22, %v8408_v37  ;;  %v8406_v20 = vrot.slane %v8053_v22, 4 }
 0xa0f   : > { %v8417_v57 = vperm.slane %v8409_v23, %v15406_v0 }
 0xa10   : > { %v8407_v29 = vsel %vm5793_vm13, %v8406_v20, %v7851_v17 }
 0xa11   : > { %v8430_v10 = vrot.slane %v8417_v57, 4  ;;  %v8433_v43 = vsel %vm5793_vm13, %v8417_v57, %v8432_v32  ;;  %v8413_v4 = vperm.slane %v8407_v29, %v15406_v0 }
 0xa12   : > { %v8441_v59 = vperm.slane %v8433_v43, %v15434_v35 }
 0xa13   : > { %v8431_v55 = vsel %vm5793_vm13, %v8430_v10, %v8405_v11  ;;  %v8421_v18 = vsel %vm5793_vm13, %v8413_v4, %v8420_v38  ;;  %v8418_v63 = vrot.slane %v8413_v4, 4 }
 0xa14   : > { %v8437_v25 = vperm.slane %v8431_v55, %v15434_v35  ;;  %v8448_v41 = vrot.slane %v8441_v59, 4  ;;  %v8429_v46 = vperm.slane %v8421_v18, %v15434_v35  ;;  %v10927_v59 = vld [vmem:[#allocation13 + $0x10] sm:$0xff] }
 0xa15   : > { %v8055_v52 = vpop.f32.mrf.mxu0  ;;  %v8419_v58 = vsel %vm5793_vm13, %v8418_v63, %v8401_v21  ;;  %9137 = vmatpush.bf16.msra.mxu1 %v10927_v59 }
 0xa16   : > { %v8462_v1 = vrot.slane %v8055_v52, 4  ;;  %v8465_v33 = vsel %vm5793_vm13, %v8055_v52, %v8464_v62  ;;  %v8446_v53 = vrot.slane %v8437_v25, 4  ;;  %v8449_v37 = vsel %vm5793_vm13, 0.0, %v8448_v41 }
 0xa17   : > { %v8473_v6 = vperm.slane %v8465_v33, %v15406_v0  ;;  %v8841_v23 = vsel %vm5793_vm13, %v8448_v41, %v8437_v25  ;;  %v8846_v15 = vrot.slane %v8449_v37, 4  ;;  %v8444_v28 = vrot.slane %v8429_v46, 4 }
 0xa18   : > { %v8463_v39 = vsel %vm5793_vm13, %v8462_v1, %v7853_v47  ;;  %v8447_v36 = vsel %vm5793_vm13, 0.0, %v8446_v53  ;;  %v8425_v47 = vperm.slane %v8419_v58, %v15434_v35  ;;  %v8845_v57 = vperm.slane %v8841_v23, %v15406_v0  ;;  %v10925_v23 = vld [vmem:[#allocation13] sm:$0xff] }
 0xa19   : > { %v8469_v16 = vperm.slane %v8463_v39, %v15406_v0  ;;  %v8486_v13 = vrot.slane %v8473_v6, 4  ;;  %v8489_v5 = vsel %vm5793_vm13, %v8473_v6, %v8488_v26  ;;  %v8847_v8 = vsel %vm5793_vm13, %v8846_v15, %v8447_v36 }
 0xa1a   : > { %v8497_v60 = vperm.slane %v8489_v5, %v15434_v35  ;;  %v8445_v30 = vsel %vm5793_vm13, 0.0, %v8444_v28  ;;  %v8442_v34 = vrot.slane %v8425_v47, 4  ;;  %v8851_v10 = vperm.slane %v8847_v8, %v15406_v0 }
 0xa1b   : > { %v8477_v9 = vsel %vm5793_vm13, %v8469_v16, %v8476_v12  ;;  %v8487_v19 = vsel %vm5793_vm13, %v8486_v13, %v8461_v49  ;;  %v8474_v27 = vrot.slane %v8469_v16, 4  ;;  %v8866_v43 = vrot.slane %v8845_v57, 4 }
 0xa1c   : > { %v8493_v45 = vperm.slane %v8487_v19, %v15434_v35  ;;  %v8504_v17 = vrot.slane %v8497_v60, 4  ;;  %v8485_v22 = vperm.slane %v8477_v9, %v15434_v35  ;;  %v8830_v1 = vsel %vm5793_vm13, %v8444_v28, %v8425_v47  ;;  %v10926_v60 = vld [vmem:[#allocation13 + $0x8] sm:$0xff] }
 0xa1d   : > { %v8475_v11 = vsel %vm5793_vm13, %v8474_v27, %v8457_v31  ;;  %v8835_v33 = vrot.slane %v8445_v30, 4  ;;  %v8443_v39 = vsel %vm5793_vm13, 0.0, %v8442_v34  ;;  %v8834_v4 = vperm.slane %v8830_v1, %v15406_v0  ;;  %9138 = vmatpush.bf16.msra.mxu1 %v10926_v60 }
 0xa1e   : > { %v8502_v54 = vrot.slane %v8493_v45, 4  ;;  %v8505_v44 = vsel %vm5793_vm13, 0.0, %v8504_v17  ;;  %v8500_v3 = vrot.slane %v8485_v22, 4  ;;  %v8895_v61 = vsel %vm5793_vm13, %v8504_v17, %v8493_v45 }
 0xa1f   : > { %v8900_v48 = vrot.slane %v8505_v44, 4  ;;  %v8481_v20 = vperm.slane %v8475_v11, %v15434_v35  ;;  %v8899_v62 = vperm.slane %v8895_v61, %v15406_v0  ;;  %v8867_v55 = vsel %vm5793_vm13, %v8851_v10, %v8866_v43 }
 0xa20   : > { %v8503_v32 = vsel %vm5793_vm13, 0.0, %v8502_v54  ;;  %v8501_v49 = vsel %vm5793_vm13, 0.0, %v8500_v3  ;;  %v8836_v16 = vsel %vm5793_vm13, %v8835_v33, %v8443_v39  ;;  %v8875_v6 = vperm.slane %v8867_v55, %v15434_v35 }
 0xa21   : > { %v8901_v52 = vsel %vm5793_vm13, %v8900_v48, %v8503_v32  ;;  %v8498_v29 = vrot.slane %v8481_v20, 4  ;;  %v8889_v21 = vrot.slane %v8501_v49, 4  ;;  %v8884_v31 = vsel %vm5793_vm13, %v8500_v3, %v8481_v20  ;;  %9139 = vmatpush.bf16.msra.mxu1 %v10925_v23 }
 0xa22   : > { %v8905_v26 = vperm.slane %v8901_v52, %v15406_v0  ;;  %v8920_v51 = vrot.slane %v8899_v62, 4  ;;  %v8888_v38 = vperm.slane %v8884_v31, %v15406_v0  ;;  %v8840_v13 = vperm.slane %v8836_v16, %v15406_v0 }
 0xa23   : > { %v8499_v50 = vsel %vm5793_vm13, 0.0, %v8498_v29  ;;  %v8854_v5 = vrot.slane %v8834_v4, 4  ;;  %v8880_v18 = vrot.slane %v8875_v6, 4  ;;  %v8864_v63 = vrot.slane %v8851_v10, 4 }
 0xa24   : > { %v8890_v12 = vsel %vm5793_vm13, %v8889_v21, %v8499_v50  ;;  %v8921_v41 = vsel %vm5793_vm13, %v8905_v26, %v8920_v51  ;;  %v8908_v9 = vrot.slane %v8888_v38, 4  ;;  %v8852_v17 = vrot.slane %v8840_v13, 4  ;;  %v11523_v29 = vpop.permute.xlu2 %11522 }
 0xa25   : > { %v8894_v25 = vperm.slane %v8890_v12, %v15406_v0  ;;  %v8929_v19 = vperm.slane %v8921_v41, %v15434_v35  ;;  %v8855_v45 = vsel %vm5793_vm13, %v8840_v13, %v8854_v5  ;;  %v8918_v22 = vrot.slane %v8905_v26, 4 }
 0xa26   : > { %v8863_v46 = vperm.slane %v8855_v45, %v15434_v35  ;;  %v8853_v54 = vsel %vm5793_vm13, %v8852_v17, %v8834_v4  ;;  %v8865_v44 = vsel %vm5793_vm13, %v8864_v63, %v8845_v57  ;;  %v11525_v26 = vunpack.i.h.bf16 %v11523_v29 }
 0xa27   : > { %v8906_v27 = vrot.slane %v8894_v25, 4  ;;  %v8909_v53 = vsel %vm5793_vm13, %v8894_v25, %v8908_v9  ;;  %v8934_v37 = vrot.slane %v8929_v19, 4  ;;  %v8859_v28 = vperm.slane %v8853_v54, %v15434_v35 }
 0xa28   : > { %v8917_v0 = vperm.slane %v8909_v53, %v15434_v35  ;;  %v8881_v15 = vsel %vm5793_vm13, %v8880_v18, %v8863_v46  ;;  %v8882_v11 = vrot.slane %v8863_v46, 4  ;;  %v8919_v48 = vsel %vm5793_vm13, %v8918_v22, %v8899_v62 }
 0xa29   : > { %v8907_v58 = vsel %vm5793_vm13, %v8906_v27, %v8888_v38  ;;  %v8871_v20 = vperm.slane %v8865_v44, %v15434_v35  ;;  %v8878_v32 = vrot.slane %v8859_v28, 4  ;;  %v8925_v30 = vperm.slane %v8919_v48, %v15434_v35 }
 0xa2a   : > { %v8935_v36 = vsel %vm5793_vm13, %v8934_v37, %v8917_v0  ;;  %v8936_v3 = vrot.slane %v8917_v0, 4  ;;  %v8913_v61 = vperm.slane %v8907_v58, %v15434_v35  ;;  %v8883_v57 = vsel %vm5793_vm13, %v8875_v6, %v8882_v11 }
 0xa2b   : > { %v11561_v47 = vpack.i.bf16 %v8935_v36, %v8881_v15  ;;  %v8879_v34 = vsel %vm5793_vm13, %v8871_v20, %v8878_v32  ;;  %v11524_v51 = vunpack.i.l.bf16 %v11523_v29  ;;  %v8876_v38 = vrot.slane %v8871_v20, 4 }
 0xa2c   : > { %v8937_v8 = vsel %vm5793_vm13, %v8929_v19, %v8936_v3  ;;  %v8932_v49 = vrot.slane %v8913_v61, 4  ;;  %v8930_v13 = vrot.slane %v8925_v30, 4 }
 0xa2d   : > { %11562 = vrot.lane.b32.xlu1 %v11561_v47, %s12213_s10  ;;  %v11566_v52 = vpack.i.bf16 %v8937_v8, %v8883_v57  ;;  %v8877_v12 = vsel %vm5793_vm13, %v8876_v38, %v8859_v28  ;;  %v11806_v38 = vld [vmem:[%s15232_s9 + $0x10] sm:$0xff]  ;;  %s17542_s10 = sld [smem:[#allocation28_spill]] }
 0xa2e   : > { %v8933_v10 = vsel %vm5793_vm13, %v8925_v30, %v8932_v49  ;;  %v8931_v9 = vsel %vm5793_vm13, %v8930_v13, %v8913_v61 }
 0xa2f   : > { %11567 = vrot.lane.b32.xlu2 %v11566_v52, %s12214_s11  ;;  %v11556_v62 = vpack.i.bf16 %v8933_v10, %v8879_v34  ;;  %s10831_s11 = sshll.u32 %s17506_s12, 3  ;;  %s10082_s12 = sshll.u32 %s12543_s13, 4  ;;  %s10083_s12 = int_to_ptr.vmem [resolvable:$true] %s10082_s12 }
 0xa31   : > { %11557 = vrot.lane.b32.xlu0 %v11556_v62, %s12215_s20 }
 0xa33   : > { %s10832_s20 = sshll.u32 %s17542_s10, 4 }
 0xa34   : > { %s10079_s2 = sadd.s32 %s10832_s20, %s10831_s11 }
 0xa35   : > { %s10833_s27 = sshll.u32 %s10079_s2, 3 }
 0xa36   : > { %s10081_s6 = scalar_lea.hbm %s17543_s7, %s10833_s27 }
 0xa37   : > { %s10084_s21 = sshll.u32 %s10081_s6, 4  ;;  %s10085_s21 = int_to_ptr.hbm [resolvable:$true] %s10084_s21 }
 0xa38   : > { %s12066_s14 = sshra.s32 %s10085_s21, 4  ;;  %s12067_s14 = int_to_ptr.hbm [resolvable:$true] %s12066_s14 }
 0xa39   : > { %s12068_s8 = scalar_lea.hbm %s12067_s14, 64  ;;  %p12073_p1 = scmp.lt.s32.totalorder %s12067_s14, %s17543_s7 }
 0xa3a   : > { %p12069_p10 = scmp.ne.s32.totalorder %s12067_s14, %s12068_s8  ;;  %p12074_p3 = scmp.lt.s32.totalorder %s12072_s16, %s12068_s8 }
 0xa3c   : > { %p12070_p13 = pnand %p12069_p10, %p12476_p12  ;;  %p12075_p9 = por %p12074_p3, %p12073_p1 }
 0xa3e   : > { %v11518_v43 = vpop.permute.xlu0 %11517  ;;  %p12071_p0 = pneg %p12070_p13 }
 0xa3f   : > { %v11520_v33 = vunpack.i.h.bf16 %v11518_v43  ;;  %v11519_v21 = vunpack.i.l.bf16 %v11518_v43 }
 0xa40   : > { %p12076_p11 = pnand %p12075_p9, %p12071_p0 }
 0xa45   : > { %v11513_v1 = vpop.permute.xlu1 %11512 }
 0xa46   : > { %v11515_v35 = vunpack.i.h.bf16 %v11513_v1  ;;  %v11514_v31 = vunpack.i.l.bf16 %v11513_v1 }
 0xa48   : > { %v9034_v59 = vsel %vm6829_vm12, %v16711_v14, %v11514_v31  ;;  %v9035_v39 = vsel %vm6829_vm12, %v16718_v24, %v11515_v35  ;;  %v11538_v25 = vpop.permute.xlu2 %11537  ;;  %v11574_v35 = vld [vmem:[%s17509_s19] ss:$0 sm:$0xff] }
 0xa49   : > { %v9044_v50 = vsel %vm9042_vm14, %v9035_v39, %v11520_v33  ;;  %v9043_v4 = vsel %vm9042_vm14, %v9034_v59, %v11519_v21  ;;  %v11540_v19 = vunpack.i.h.bf16 %v11538_v25  ;;  %v11539_v45 = vunpack.i.l.bf16 %v11538_v25  ;;  %v11807_v25 = vld [vmem:[%s15232_s9 + $0x18] sm:$0xff] }
 0xa4a   : > { %v9052_v55 = vsel %vm9051_vm15, %v9043_v4, %v11524_v51  ;;  %v9053_v16 = vsel %vm9051_vm15, %v9044_v50, %v11525_v26  ;;  %v11804_v51 = vld [vmem:[%s15232_s9] sm:$0xff]  ;;  %v11805_v4 = vld [vmem:[%s15232_s9 + $0x8] sm:$0xff] }
 0xa4b   : > { %v9060_v6 = vpack.c.bf16 %v9053_v16, %v9052_v55 }
 0xa4d   : > { %9140 = vmatmul.bf16.vlgmr.msra.gmra.mxu1 %v9060_v6 }
 0xa54   : > { %v11553_v54 = vpop.permute.xlu2 %11552 }
 0xa55   : > { %v11555_v11 = vunpack.i.h.bf16 %v11553_v54  ;;  %v11554_v28 = vunpack.i.l.bf16 %v11553_v54 }
 0xa5e   : > { %v11533_v5 = vpop.permute.xlu1 %11532 }
 0xa5f   : > { %v11535_v24 = vunpack.i.h.bf16 %v11533_v5  ;;  %v11534_v18 = vunpack.i.l.bf16 %v11533_v5 }
 0xa63   : > { %v11528_v14 = vpop.permute.xlu0 %11527 }
 0xa64   : > { %v11530_v41 = vunpack.i.h.bf16 %v11528_v14  ;;  %v11529_v60 = vunpack.i.l.bf16 %v11528_v14 }
 0xa66   : > { %v9037_v17 = vsel %vm6829_vm12, %v16738_v56, %v11530_v41  ;;  %v9036_v63 = vsel %vm6829_vm12, %v16732_v42, %v11529_v60 }
 0xa67   : > { %v9045_v27 = vsel %vm9042_vm14, %v9036_v63, %v11534_v18  ;;  %v9046_v46 = vsel %vm9042_vm14, %v9037_v17, %v11535_v24  ;;  %v11808_v24 = vld [vmem:[%s15232_s9 + $0x20] sm:$0xff] }
 0xa68   : > { %v9054_v53 = vsel %vm9051_vm15, %v9045_v27, %v11539_v45  ;;  %v9055_v37 = vsel %vm9051_vm15, %v9046_v46, %v11540_v19  ;;  %v11809_v45 = vld [vmem:[%s15232_s9 + $0x28] sm:$0xff]  ;;  %v11810_v46 = vld [vmem:[%s15232_s9 + $0x30] sm:$0xff] }
 0xa69   : > { %v9061_v22 = vpack.c.bf16 %v9055_v37, %v9054_v53 }
 0xa6a   : > { %v11548_v0 = vpop.permute.xlu1 %11547 }
 0xa6b   : > { %9145 = vmatmul.bf16.gmra.mxu1 %v9061_v22  ;;  %v11550_v15 = vunpack.i.h.bf16 %v11548_v0  ;;  %v11549_v56 = vunpack.i.l.bf16 %v11548_v0 }
 0xa70   : > { %v11543_v44 = vpop.permute.xlu0 %11542 }
 0xa71   : > { %v11545_v58 = vunpack.i.h.bf16 %v11543_v44  ;;  %v11544_v23 = vunpack.i.l.bf16 %v11543_v44 }
 0xa73   : > { %v9039_v42 = vsel %vm6829_vm12, %v16771_v7, %v11545_v58  ;;  %v9038_v36 = vsel %vm6829_vm12, %v16747_v2, %v11544_v23 }
 0xa74   : > { %v9047_v3 = vsel %vm9042_vm14, %v9038_v36, %v11549_v56  ;;  %v9048_v61 = vsel %vm9042_vm14, %v9039_v42, %v11550_v15 }
 0xa75   : > { %v9056_v48 = vsel %vm9051_vm15, %v9047_v3, %v11554_v28  ;;  %v9057_v47 = vsel %vm9051_vm15, %v9048_v61, %v11555_v11  ;;  %v11811_v11 = vld [vmem:[%s15232_s9 + $0x38] sm:$0xff]  ;;  %s17511_s9 = sld [smem:[#allocation44_spill]] }
 0xa76   : > { %v9062_v20 = vpack.c.bf16 %v9057_v47, %v9056_v48 }
 0xa7b   : > { %9150 = vmatmul.bf16.gmra.mxu1 %v9062_v20 }
 0xa89   : > { %v11568_v57 = vpop.permute.xlu2 %11567 }
 0xa8a   : > { %v11570_v34 = vunpack.i.h.bf16 %v11568_v57  ;;  %v11569_v2 = vunpack.i.l.bf16 %v11568_v57 }
 0xa9f   : > { %v11563_v32 = vpop.permute.xlu1 %11562 }
 0xaa0   : > { %v11565_v7 = vunpack.i.h.bf16 %v11563_v32  ;;  %v11564_v52 = vunpack.i.l.bf16 %v11563_v32 }
 0xaa3   : > { %v11558_v8 = vpop.permute.xlu0 %11557 }
 0xaa4   : > { %v11560_v30 = vunpack.i.h.bf16 %v11558_v8  ;;  %v11559_v49 = vunpack.i.l.bf16 %v11558_v8 }
 0xaa6   : > { %v9041_v10 = vsel %vm6829_vm12, %v8931_v9, %v11560_v30  ;;  %v9040_v62 = vsel %vm6829_vm12, %v8877_v12, %v11559_v49 }
 0xaa7   : > { %v9049_v43 = vsel %vm9042_vm14, %v9040_v62, %v11564_v52  ;;  %v9050_v29 = vsel %vm9042_vm14, %v9041_v10, %v11565_v7 }
 0xaa8   : > { %v9058_v1 = vsel %vm9051_vm15, %v9049_v43, %v11569_v2  ;;  %v9059_v33 = vsel %vm9051_vm15, %v9050_v29, %v11570_v34 }
 0xaa9   : > { %v9063_v21 = vpack.c.bf16 %v9059_v33, %v9058_v1  ;;  %v10744_v33 = vld [vmem:[#allocation15 + $0x70] sm:$0xf] }
 0xaab   : > { %9155 = vmatmul.bf16.gmra.mxu1 %v9063_v21  ;;  %v10948_v21 = vld [vmem:[#allocation15 + $0x74] sm:$0xf0] }
 0xaca   : > { %v9141_v31 = vpop.f32.mrf.mxu1 }
 0xacb   : > { %v9142_v26 = vadd.f32 %v11574_v35, %v9141_v31  ;;  %v10745_v31 = vor.u32 %v10948_v21, %v10744_v33  ;;  %v10937_v33 = vld [vmem:[#allocation15 + $0x24] sm:$0xf]  ;;  %v10706_v21 = vld [vmem:[#allocation15 + $0x28] sm:$0xf0] }
 0xacd   : > { %v16868_v59 = vadd.f32 %v11804_v51, %v9142_v26  ;;  %v10746_v26 = vld [vmem:[#allocation15 + $0x78] sm:$0xf0]  ;;  %9459 = vmatpush.bf16.msrb.mxu2 %v10745_v31 }
 0xacf   : > { %9171 = vadd.xlane.f32.xlu0 %v16868_v59 }
 0xad2   : > { %v9143_v39 = vpop.f32.mrf.mxu1 }
 0xad3   : > { %v9144_v50 = vadd.f32 %v11574_v35, %v9143_v39  ;;  %v10736_v39 = vld [vmem:[#allocation15 + $0x60] sm:$0xf] }
 0xad5   : > { %v16872_v55 = vadd.f32 %v11805_v4, %v9144_v50  ;;  %v10946_v50 = vld [vmem:[#allocation15 + $0x64] sm:$0xf0]  ;;  %v10945_v4 = vld [vmem:[#allocation15 + $0x64] sm:$0xf] }
 0xad7   : > { %9173 = vadd.xlane.f32.xlu1 %v16872_v55 }
 0xae8   : > { %v9146_v16 = vpop.f32.mrf.mxu1 }
 0xae9   : > { %v9147_v6 = vadd.f32 %v11574_v35, %v9146_v16 }
 0xaeb   : > { %v16876_v12 = vadd.f32 %v11806_v38, %v9147_v6  ;;  %v10737_v6 = vor.u32 %v10946_v50, %v10736_v39  ;;  %v10738_v38 = vld [vmem:[#allocation15 + $0x68] sm:$0xf0] }
 0xaed   : > { %9175 = vadd.xlane.f32.xlu2 %v16876_v12  ;;  %9460 = vmatpush.bf16.msrb.mxu2 %v10737_v6 }
 0xaf0   : > { %v9148_v13 = vpop.f32.mrf.mxu1 }
 0xaf1   : > { %v9149_v5 = vadd.f32 %v11574_v35, %v9148_v13  ;;  %v10728_v13 = vld [vmem:[#allocation15 + $0x50] sm:$0xf] }
 0xaf3   : > { %v16880_v14 = vadd.f32 %v11807_v25, %v9149_v5  ;;  %v10944_v5 = vld [vmem:[#allocation15 + $0x54] sm:$0xf0] }
 0xaf5   : > { %9177 = vadd.xlane.f32.xlu0 %v16880_v14 }
 0xaf8   : > { %v9151_v41 = vpop.f32.mrf.mxu1 }
 0xaf9   : > { %v9152_v60 = vadd.f32 %v11574_v35, %v9151_v41  ;;  %v10741_v41 = vor.u32 %v10945_v4, %v10738_v38  ;;  %v10696_v4 = vld [vmem:[#allocation15 + $0x10] sm:$0xf]  ;;  %v10935_v38 = vld [vmem:[#allocation15 + $0x14] sm:$0xf] }
 0xafb   : > { %v16884_v18 = vadd.f32 %v11808_v24, %v9152_v60  ;;  %v10943_v60 = vld [vmem:[#allocation15 + $0x54] sm:$0xf]  ;;  %v10730_v24 = vld [vmem:[#allocation15 + $0x58] sm:$0xf0] }
 0xafd   : > { %9179 = vadd.xlane.f32.xlu1 %v16884_v18 }
 0xb00   : > { %v9153_v9 = vpop.f32.mrf.mxu1 }
 0xb01   : > { %v9154_v19 = vadd.f32 %v11574_v35, %v9153_v9  ;;  %v10729_v9 = vor.u32 %v10944_v5, %v10728_v13  ;;  %v10698_v13 = vld [vmem:[#allocation15 + $0x18] sm:$0xf0]  ;;  %v10688_v5 = vld [vmem:[#allocation15] sm:$0xf] }
 0xb03   : > { %v16888_v17 = vadd.f32 %v11809_v45, %v9154_v19  ;;  %v10733_v45 = vor.u32 %v10943_v60, %v10730_v24  ;;  %9461 = vmatpush.bf16.msrb.mxu2 %v10729_v9  ;;  %v10701_v60 = vor.u32 %v10935_v38, %v10698_v13  ;;  %v10934_v24 = vld [vmem:[#allocation15 + $0x4] sm:$0xf0]  ;;  %v10933_v9 = vld [vmem:[#allocation15 + $0x4] sm:$0xf] }
 0xb05   : > { %9181 = vadd.xlane.f32.xlu2 %v16888_v17 }
 0xb28   : > { %v9156_v63 = vpop.f32.mrf.mxu1 }
 0xb29   : > { %v9157_v27 = vadd.f32 %v11574_v35, %v9156_v63  ;;  %v10720_v63 = vld [vmem:[#allocation15 + $0x40] sm:$0xf] }
 0xb2b   : > { %v16892_v53 = vadd.f32 %v11810_v46, %v9157_v27  ;;  %v10942_v27 = vld [vmem:[#allocation15 + $0x44] sm:$0xf0]  ;;  %v10941_v46 = vld [vmem:[#allocation15 + $0x44] sm:$0xf] }
 0xb2d   : > { %9183 = vadd.xlane.f32.xlu2 %v16892_v53 }
 0xb30   : > { %v9158_v44 = vpop.f32.mrf.mxu1 }
 0xb31   : > { %v9159_v23 = vadd.f32 %v11574_v35, %v9158_v44  ;;  %v10947_v35 = vld [vmem:[#allocation15 + $0x74] sm:$0xf] }
 0xb32   : > { %v10749_v51 = vor.u32 %v10947_v35, %v10746_v26  ;;  %v10709_v26 = vor.u32 %v10937_v33, %v10706_v21 }
 0xb33   : > { %v16906_v28 = vadd.f32 %v11811_v11, %v9159_v23 }
 0xb34   : > { %9488 = vmatpush.bf16.msra.mxu3 %v10749_v51 }
 0xb38   : > { %9489 = vmatpush.bf16.msra.mxu3 %v10741_v41 }
 0xb3c   : > { %9490 = vmatpush.bf16.msra.mxu3 %v10733_v45  ;;  %v10690_v45 = vld [vmem:[#allocation15 + $0x8] sm:$0xf0] }
 0xb42   : > { %v9172_v37 = vpop.xlane.xlu0 %9171 }
 0xb43   : > { %v9187_v22 = vmul.f32 %v9172_v37, %v15241_v40  ;;  %v10722_v37 = vld [vmem:[#allocation15 + $0x48] sm:$0xf0] }
 0xb45   : > { %v16897_v0 = vsub.f32 %v16868_v59, %v9187_v22  ;;  %v10721_v22 = vor.u32 %v10942_v27, %v10720_v63  ;;  %v10689_v63 = vor.u32 %v10934_v24, %v10688_v5 }
 0xb47   : > { %v9203_v54 = vmul.f32 %v16897_v0, %v16897_v0  ;;  %9462 = vmatpush.bf16.msrb.mxu2 %v10721_v22 }
 0xb49   : > { %9211 = vadd.xlane.f32.xlu0 %v9203_v54  ;;  %v10725_v54 = vor.u32 %v10941_v46, %v10722_v37  ;;  %v10693_v46 = vor.u32 %v10933_v9, %v10690_v45 }
 0xb4a   : > { %v9174_v58 = vpop.xlane.xlu1 %9173 }
 0xb4b   : > { %v9188_v15 = vmul.f32 %v9174_v58, %v15241_v40  ;;  %9491 = vmatpush.bf16.msra.mxu3 %v10725_v54 }
 0xb4d   : > { %v16903_v56 = vsub.f32 %v16872_v55, %v9188_v15 }
 0xb4f   : > { %v9204_v42 = vmul.f32 %v16903_v56, %v16903_v56 }
 0xb51   : > { %9213 = vadd.xlane.f32.xlu1 %v9204_v42  ;;  %9185 = vadd.xlane.f32.xlu0 %v16906_v28 }
 0xb60   : > { %v9176_v36 = vpop.xlane.xlu2 %9175 }
 0xb61   : > { %v9189_v3 = vmul.f32 %v9176_v36, %v15241_v40 }
 0xb63   : > { %v16913_v61 = vsub.f32 %v16876_v12, %v9189_v3 }
 0xb65   : > { %v9205_v48 = vmul.f32 %v16913_v61, %v16913_v61 }
 0xb67   : > { %9215 = vadd.xlane.f32.xlu1 %v9205_v48 }
 0xb68   : > { %v9178_v47 = vpop.xlane.xlu0 %9177 }
 0xb69   : > { %v9190_v20 = vmul.f32 %v9178_v47, %v15241_v40 }
 0xb6b   : > { %v16919_v32 = vsub.f32 %v16880_v14, %v9190_v20 }
 0xb6d   : > { %v9206_v57 = vmul.f32 %v16919_v32, %v16919_v32 }
 0xb6f   : > { %9217 = vadd.xlane.f32.xlu2 %v9206_v57  ;;  %v10712_v57 = vld [vmem:[#allocation15 + $0x30] sm:$0xf] }
 0xb70   : > { %v9180_v8 = vpop.xlane.xlu1 %9179 }
 0xb71   : > { %v9191_v30 = vmul.f32 %v9180_v8, %v15241_v40  ;;  %v10940_v8 = vld [vmem:[#allocation15 + $0x34] sm:$0xf0] }
 0xb73   : > { %v16925_v49 = vsub.f32 %v16884_v18, %v9191_v30 }
 0xb75   : > { %v9207_v7 = vmul.f32 %v16925_v49, %v16925_v49 }
 0xb77   : > { %9219 = vadd.xlane.f32.xlu0 %v9207_v7  ;;  %v10713_v7 = vor.u32 %v10940_v8, %v10712_v57 }
 0xb78   : > { %v9182_v52 = vpop.xlane.xlu2 %9181 }
 0xb79   : > { %v9192_v34 = vmul.f32 %v9182_v52, %v15241_v40  ;;  %v10939_v52 = vld [vmem:[#allocation15 + $0x34] sm:$0xf]  ;;  %9463 = vmatpush.bf16.msrb.mxu2 %v10713_v7 }
 0xb7b   : > { %v16931_v2 = vsub.f32 %v16888_v17, %v9192_v34  ;;  %v10714_v34 = vld [vmem:[#allocation15 + $0x38] sm:$0xf0] }
 0xb7d   : > { %v9208_v10 = vmul.f32 %v16931_v2, %v16931_v2 }
 0xb7f   : > { %9221 = vadd.xlane.f32.xlu1 %v9208_v10  ;;  %v10704_v10 = vld [vmem:[#allocation15 + $0x20] sm:$0xf] }
 0xba0   : > { %v9184_v62 = vpop.xlane.xlu2 %9183 }
 0xba1   : > { %v9193_v43 = vmul.f32 %v9184_v62, %v15241_v40 }
 0xba3   : > { %v16937_v29 = vsub.f32 %v16892_v53, %v9193_v43  ;;  %v10717_v43 = vor.u32 %v10939_v52, %v10714_v34 }
 0xba5   : > { %v9209_v1 = vmul.f32 %v16937_v29, %v16937_v29  ;;  %9492 = vmatpush.bf16.msra.mxu3 %v10717_v43 }
 0xba7   : > { %9223 = vadd.xlane.f32.xlu2 %v9209_v1  ;;  %v10938_v1 = vld [vmem:[#allocation15 + $0x24] sm:$0xf0] }
 0xba8   : > { %v10705_v35 = vor.u32 %v10938_v1, %v10704_v10 }
 0xba9   : > { %9493 = vmatpush.bf16.msra.mxu3 %v10709_v26 }
 0xbaa   : > { %9464 = vmatpush.bf16.msrb.mxu2 %v10705_v35 }
 0xbad   : > { %9494 = vmatpush.bf16.msra.mxu3 %v10701_v60 }
 0xbb1   : > { %9495 = vmatpush.bf16.msra.mxu3 %v10693_v46 }
 0xbbc   : > { %v9212_v16 = vpop.xlane.xlu0 %9211 }
 0xbbd   : > { %v9227_v25 = vmul.f32 %v9212_v16, %v15241_v40  ;;  %v10936_v16 = vld [vmem:[#allocation15 + $0x14] sm:$0xf0] }
 0xbbe   : > { %v10697_v6 = vor.u32 %v10936_v16, %v10696_v4 }
 0xbbf   : > { %v16942_v19 = vadd.f32 1e-05, %v9227_v25 }
 0xbc0   : > { %9465 = vmatpush.bf16.msrb.mxu2 %v10697_v6 }
 0xbc1   : > { %11724 = vrsqrt.f32 %v16942_v19  ;;  %vm9249_vm2 = vweird.f32 %v16942_v19 }
 0xbc4   : > { %v9214_v44 = vpop.xlane.xlu1 %9213  ;;  %v9186_v58 = vpop.xlane.xlu0 %9185  ;;  %9466 = vmatpush.bf16.msrb.mxu2 %v10689_v63 }
 0xbc5   : > { %v9228_v23 = vmul.f32 %v9214_v44, %v15241_v40  ;;  %v9194_v15 = vmul.f32 %v9186_v58, %v15241_v40 }
 0xbc7   : > { %v11725_v11 = vpop.eup %11724  ;;  %v9236_v42 = vadd.f32 1e-05, %v9228_v23  ;;  %v16948_v36 = vsub.f32 %v16906_v28, %v9194_v15  ;;  %v16961_v23 = vld [vmem:[%s17510_s4] ss:$0 sm:$0xff] }
 0xbc8   : > { %v9244_v3 = vmul.f32 %v11725_v11, %v16942_v19  ;;  %vm9250_vm0 = vweird.f32 %v11725_v11  ;;  %v16966_v15 = vld [vmem:[%s17511_s9] ss:$0 sm:$0xff]  ;;  %s10068_s9 = scalar_lea.sflag [#allocation6], %s612_s15 }
 0xbc9   : > { %11726 = vrsqrt.f32 %v9236_v42  ;;  %v9210_v48 = vmul.f32 %v16948_v36, %v16948_v36  ;;  %vm9251_vm3 = vmor %vm9249_vm2, %vm9250_vm0  ;;  %vm9259_vm4 = vweird.f32 %v9236_v42 }
 0xbca   : > { %v9245_v47 = vmul.f32 %v11725_v11, %v9244_v3 }
 0xbcb   : > { %9225 = vadd.xlane.f32.xlu0 %v9210_v48 }
 0xbcc   : > { %v9246_v20 = vmul.f32 0.5, %v9245_v47 }
 0xbce   : > { %v9247_v51 = vsub.f32 1.5, %v9246_v20 }
 0xbcf   : > { %v11727_v30 = vpop.eup %11726 }
 0xbd0   : > { %v9254_v62 = vmul.f32 %v11727_v30, %v9236_v42  ;;  %v9248_v25 = vmul.f32 %v11725_v11, %v9247_v51  ;;  %vm9260_vm1 = vweird.f32 %v11727_v30 }
 0xbd1   : > { %vm9261_vm5 = vmor %vm9259_vm4, %vm9260_vm1 }
 0xbd2   : > { %v9255_v31 = vmul.f32 %v11727_v30, %v9254_v62  ;;  %v9252_v22 = vsel %vm9251_vm3, %v11725_v11, %v9248_v25 }
 0xbd3   : > { %v9323_v58 = vmul.f32 %v9252_v22, %v16897_v0 }
 0xbd4   : > { %v9256_v39 = vmul.f32 0.5, %v9255_v31 }
 0xbd5   : > { %v9334_v3 = vmul.f32 %v16961_v23, %v9323_v58 }
 0xbd6   : > { %v9257_v50 = vsub.f32 1.5, %v9256_v39 }
 0xbd7   : > { %v9345_v47 = vadd.f32 %v16966_v15, %v9334_v3 }
 0xbd8   : > { %v9258_v41 = vmul.f32 %v11727_v30, %v9257_v50 }
 0xbda   : > { %v9216_v27 = vpop.xlane.xlu1 %9215  ;;  %v9262_v54 = vsel %vm9261_vm5, %v11727_v30, %v9258_v41 }
 0xbdb   : > { %v9229_v37 = vmul.f32 %v9216_v27, %v15241_v40  ;;  %v9324_v19 = vmul.f32 %v9262_v54, %v16903_v56 }
 0xbdd   : > { %v9237_v44 = vadd.f32 1e-05, %v9229_v37  ;;  %v9335_v0 = vmul.f32 %v16961_v23, %v9324_v19 }
 0xbdf   : > { %11728 = vrsqrt.f32 %v9237_v44  ;;  %v9346_v20 = vadd.f32 %v16966_v15, %v9335_v0  ;;  %vm9269_vm7 = vweird.f32 %v9237_v44 }
 0xbe1   : > { %v9353_v8 = vpack.c.bf16 %v9346_v20, %v9345_v47 }
 0xbe2   : > { %v9218_v11 = vpop.xlane.xlu2 %9217 }
 0xbe3   : > { %v9230_v42 = vmul.f32 %v9218_v11, %v15241_v40  ;;  %9467 = vmatmul.bf16.vlgmr.msrb.gmra.mxu2 %v9353_v8  ;;  %9496 = vmatmul.bf16.vlgmr.msra.gmra.mxu3 %v9353_v8 }
 0xbe5   : > { %v11729_v48 = vpop.eup %11728  ;;  %v9238_v56 = vadd.f32 1e-05, %v9230_v42 }
 0xbe6   : > { %v9264_v57 = vmul.f32 %v11729_v48, %v9237_v44  ;;  %vm9270_vm6 = vweird.f32 %v11729_v48 }
 0xbe7   : > { %11730 = vrsqrt.f32 %v9238_v56  ;;  %vm9271_vm8 = vmor %vm9269_vm7, %vm9270_vm6  ;;  %vm9279_vm10 = vweird.f32 %v9238_v56 }
 0xbe8   : > { %v9265_v30 = vmul.f32 %v11729_v48, %v9264_v57 }
 0xbea   : > { %v9266_v7 = vmul.f32 0.5, %v9265_v30  ;;  %v9220_v52 = vpop.xlane.xlu0 %9219 }
 0xbeb   : > { %v9231_v34 = vmul.f32 %v9220_v52, %v15241_v40 }
 0xbec   : > { %v9267_v10 = vsub.f32 1.5, %v9266_v7 }
 0xbed   : > { %v11731_v62 = vpop.eup %11730  ;;  %v9239_v43 = vadd.f32 1e-05, %v9231_v34 }
 0xbee   : > { %v9268_v1 = vmul.f32 %v11729_v48, %v9267_v10  ;;  %v9274_v33 = vmul.f32 %v11731_v62, %v9238_v56  ;;  %vm9280_vm9 = vweird.f32 %v11731_v62 }
 0xbef   : > { %11732 = vrsqrt.f32 %v9239_v43  ;;  %vm9281_vm11 = vmor %vm9279_vm10, %vm9280_vm9  ;;  %vm9289_vm13 = vweird.f32 %v9239_v43 }
 0xbf0   : > { %v9275_v21 = vmul.f32 %v11731_v62, %v9274_v33  ;;  %v9272_v26 = vsel %vm9271_vm8, %v11729_v48, %v9268_v1 }
 0xbf1   : > { %v9325_v16 = vmul.f32 %v9272_v26, %v16913_v61 }
 0xbf2   : > { %v9276_v35 = vmul.f32 0.5, %v9275_v21  ;;  %v9222_v31 = vpop.xlane.xlu1 %9221 }
 0xbf3   : > { %v9232_v51 = vmul.f32 %v9222_v31, %v15241_v40  ;;  %v9336_v41 = vmul.f32 %v16961_v23, %v9325_v16 }
 0xbf4   : > { %v9277_v39 = vsub.f32 1.5, %v9276_v35 }
 0xbf5   : > { %v11733_v50 = vpop.eup %11732  ;;  %v9240_v4 = vadd.f32 1e-05, %v9232_v51  ;;  %v9347_v63 = vadd.f32 %v16966_v15, %v9336_v41 }
 0xbf6   : > { %v9278_v6 = vmul.f32 %v11731_v62, %v9277_v39  ;;  %v9284_v38 = vmul.f32 %v11733_v50, %v9239_v43  ;;  %vm9290_vm12 = vweird.f32 %v11733_v50 }
 0xbf7   : > { %11734 = vrsqrt.f32 %v9240_v4  ;;  %vm9291_vm14 = vmor %vm9289_vm13, %vm9290_vm12  ;;  %vm9299_vm0 = vweird.f32 %v9240_v4 }
 0xbf8   : > { %v9285_v13 = vmul.f32 %v11733_v50, %v9284_v38  ;;  %v9282_v5 = vsel %vm9281_vm11, %v11731_v62, %v9278_v6 }
 0xbf9   : > { %v9326_v25 = vmul.f32 %v9282_v5, %v16919_v32 }
 0xbfa   : > { %v9286_v60 = vmul.f32 0.5, %v9285_v13 }
 0xbfb   : > { %v9337_v24 = vmul.f32 %v16961_v23, %v9326_v25 }
 0xbfc   : > { %v9287_v9 = vsub.f32 1.5, %v9286_v60 }
 0xbfd   : > { %v11735_v45 = vpop.eup %11734  ;;  %v9348_v61 = vadd.f32 %v16966_v15, %v9337_v24 }
 0xbfe   : > { %v9288_v27 = vmul.f32 %v11733_v50, %v9287_v9  ;;  %v9294_v46 = vmul.f32 %v11735_v45, %v9240_v4  ;;  %vm9300_vm15 = vweird.f32 %v11735_v45 }
 0xbff   : > { %v9354_v37 = vpack.c.bf16 %v9348_v61, %v9347_v63  ;;  %vm9301_vm1 = vmor %vm9299_vm0, %vm9300_vm15 }
 0xc00   : > { %v9295_v22 = vmul.f32 %v11735_v45, %v9294_v46  ;;  %v9292_v32 = vsel %vm9291_vm14, %v11733_v50, %v9288_v27 }
 0xc01   : > { %9472 = vmatmul.bf16.gmra.mxu2 %v9354_v37  ;;  %9501 = vmatmul.bf16.gmra.mxu3 %v9354_v37  ;;  %v9327_v58 = vmul.f32 %v9292_v32, %v16925_v49 }
 0xc02   : > { %v9296_v54 = vmul.f32 0.5, %v9295_v22 }
 0xc03   : > { %v9338_v3 = vmul.f32 %v16961_v23, %v9327_v58 }
 0xc04   : > { %v9297_v44 = vsub.f32 1.5, %v9296_v54 }
 0xc05   : > { %v9349_v48 = vadd.f32 %v16966_v15, %v9338_v3 }
 0xc06   : > { %v9298_v19 = vmul.f32 %v11735_v45, %v9297_v44 }
 0xc08   : > { %v9302_v11 = vsel %vm9301_vm1, %v11735_v45, %v9298_v19  ;;  %v10956_v19 = vld [vmem:[#allocation16 + $0x38] sm:$0xff] }
 0xc09   : > { %v9328_v42 = vmul.f32 %v9302_v11, %v16931_v2  ;;  %v10964_v11 = vld [vmem:[#allocation16 + $0x78] sm:$0xff]  ;;  %9993 = vmatpush.bf16.msrb.mxu0 %v10956_v19 }
 0xc0a   : > { %10022 = vmatpush.bf16.msrb.mxu1 %v10964_v11 }
 0xc0b   : > { %v9339_v0 = vmul.f32 %v16961_v23, %v9328_v42 }
 0xc0d   : > { %v9350_v56 = vadd.f32 %v16966_v15, %v9339_v0  ;;  %v10955_v0 = vld [vmem:[#allocation16 + $0x30] sm:$0xff] }
 0xc0e   : > { %9994 = vmatpush.bf16.msrb.mxu0 %v10955_v0 }
 0xc0f   : > { %v9355_v47 = vpack.c.bf16 %v9350_v56, %v9349_v48  ;;  %v10963_v48 = vld [vmem:[#allocation16 + $0x70] sm:$0xff] }
 0xc10   : > { %10023 = vmatpush.bf16.msrb.mxu1 %v10963_v48  ;;  %v10951_v48 = vld [vmem:[#allocation16 + $0x10] sm:$0xff] }
 0xc11   : > { %9477 = vmatmul.bf16.gmra.mxu2 %v9355_v47  ;;  %9506 = vmatmul.bf16.gmra.mxu3 %v9355_v47 }
 0xc1a   : > { %v9224_v20 = vpop.xlane.xlu2 %9223 }
 0xc1b   : > { %v9233_v49 = vmul.f32 %v9224_v20, %v15241_v40 }
 0xc1d   : > { %v9241_v57 = vadd.f32 1e-05, %v9233_v49 }
 0xc1f   : > { %11736 = vrsqrt.f32 %v9241_v57  ;;  %vm9309_vm3 = vweird.f32 %v9241_v57 }
 0xc25   : > { %v11737_v8 = vpop.eup %11736 }
 0xc26   : > { %v9304_v30 = vmul.f32 %v11737_v8, %v9241_v57  ;;  %vm9310_vm2 = vweird.f32 %v11737_v8 }
 0xc27   : > { %vm9311_vm4 = vmor %vm9309_vm3, %vm9310_vm2 }
 0xc28   : > { %v9305_v7 = vmul.f32 %v11737_v8, %v9304_v30 }
 0xc2a   : > { %v9306_v10 = vmul.f32 0.5, %v9305_v7 }
 0xc2c   : > { %v9307_v62 = vsub.f32 1.5, %v9306_v10 }
 0xc2e   : > { %v9308_v1 = vmul.f32 %v11737_v8, %v9307_v62  ;;  %v10954_v62 = vld [vmem:[#allocation16 + $0x28] sm:$0xff] }
 0xc2f   : > { %9995 = vmatpush.bf16.msrb.mxu0 %v10954_v62 }
 0xc30   : > { %v9312_v35 = vsel %vm9311_vm4, %v11737_v8, %v9308_v1 }
 0xc31   : > { %v9329_v51 = vmul.f32 %v9312_v35, %v16937_v29  ;;  %v9373_v29 = vld [vmem:[%s17512_s24] sm:$0x3] }
 0xc32   : > { %v16998_v5 = vperm.slane %v9373_v29, 0  ;;  %v17003_v41 = vperm.slane %v9373_v29, 1 }
 0xc33   : > { %v9340_v4 = vmul.f32 %v16961_v23, %v9329_v51  ;;  %v10961_v51 = vld [vmem:[#allocation16 + $0x60] sm:$0xff] }
 0xc35   : > { %v9351_v6 = vadd.f32 %v16966_v15, %v9340_v4 }
 0xc3e   : > { %v9226_v2 = vpop.xlane.xlu0 %9225 }
 0xc3f   : > { %v9234_v52 = vmul.f32 %v9226_v2, %v15241_v40 }
 0xc41   : > { %v9242_v34 = vadd.f32 1e-05, %v9234_v52 }
 0xc43   : > { %11738 = vrsqrt.f32 %v9242_v34  ;;  %vm9319_vm6 = vweird.f32 %v9242_v34 }
 0xc49   : > { %v11739_v43 = vpop.eup %11738 }
 0xc4a   : > { %v9314_v33 = vmul.f32 %v11739_v43, %v9242_v34  ;;  %vm9320_vm5 = vweird.f32 %v11739_v43 }
 0xc4b   : > { %vm9321_vm7 = vmor %vm9319_vm6, %vm9320_vm5 }
 0xc4c   : > { %v9315_v21 = vmul.f32 %v11739_v43, %v9314_v33 }
 0xc4e   : > { %v9316_v31 = vmul.f32 0.5, %v9315_v21 }
 0xc50   : > { %v9317_v26 = vsub.f32 1.5, %v9316_v31 }
 0xc52   : > { %v9318_v39 = vmul.f32 %v11739_v43, %v9317_v26  ;;  %v10953_v26 = vld [vmem:[#allocation16 + $0x20] sm:$0xff] }
 0xc53   : > { %9996 = vmatpush.bf16.msrb.mxu0 %v10953_v26 }
 0xc54   : > { %v9322_v40 = vsel %vm9321_vm7, %v11739_v43, %v9318_v39  ;;  %v10962_v43 = vld [vmem:[#allocation16 + $0x68] sm:$0xff] }
 0xc55   : > { %v9330_v50 = vmul.f32 %v9322_v40, %v16948_v36  ;;  %10024 = vmatpush.bf16.msrb.mxu1 %v10962_v43 }
 0xc57   : > { %v9341_v16 = vmul.f32 %v16961_v23, %v9330_v50 }
 0xc59   : > { %v9352_v38 = vadd.f32 %v16966_v15, %v9341_v16  ;;  %10025 = vmatpush.bf16.msrb.mxu1 %v10961_v51 }
 0xc5b   : > { %v9356_v13 = vpack.c.bf16 %v9352_v38, %v9351_v6 }
 0xc5d   : > { %9482 = vmatmul.bf16.gmra.mxu2 %v9356_v13  ;;  %9511 = vmatmul.bf16.gmra.mxu3 %v9356_v13 }
 0xc66   : > { %v9468_v25 = vpop.f32.mrf.mxu2  ;;  %v9497_v23 = vpop.f32.mrf.mxu3 }
 0xc67   : > { %v17001_v36 = vadd.f32 %v9468_v25, %v16998_v5  ;;  %v17007_v15 = vadd.f32 %v9497_v23, %v17003_v41 }
 0xc69   : > { %v10750_v60 = vmul.f32 -1.702, %v17001_v36  ;;  %v10751_v9 = vmul.f32 -1.702, %v17007_v15 }
 0xc6b   : > { %v9549_v24 = vmul.f32 1.442695, %v10750_v60  ;;  %v9551_v45 = vmul.f32 1.442695, %v10751_v9 }
 0xc6d   : > { %11740 = vpow2.f32 %v9549_v24 }
 0xc6e   : > { %v9470_v63 = vpop.f32.mrf.mxu2  ;;  %11742 = vpow2.f32 %v9551_v45  ;;  %v9499_v46 = vpop.f32.mrf.mxu3 }
 0xc6f   : > { %v17011_v61 = vadd.f32 %v9470_v63, %v16998_v5  ;;  %v17015_v37 = vadd.f32 %v9499_v46, %v17003_v41  ;;  %v10952_v46 = vld [vmem:[#allocation16 + $0x18] sm:$0xff] }
 0xc70   : > { %9997 = vmatpush.bf16.msrb.mxu0 %v10952_v46 }
 0xc71   : > { %v10752_v27 = vmul.f32 -1.702, %v17011_v61  ;;  %v10753_v54 = vmul.f32 -1.702, %v17015_v37 }
 0xc73   : > { %v11741_v22 = vpop.eup %11740  ;;  %v9553_v32 = vmul.f32 1.442695, %v10752_v27  ;;  %v9555_v3 = vmul.f32 1.442695, %v10753_v54 }
 0xc74   : > { %v11743_v44 = vpop.eup %11742  ;;  %v17018_v58 = vadd.f32 1.0, %v11741_v22  ;;  %v10960_v22 = vld [vmem:[#allocation16 + $0x58] sm:$0xff]  ;;  %9998 = vmatpush.bf16.msrb.mxu0 %v10951_v48 }
 0xc75   : > { %11744 = vpow2.f32 %v9553_v32  ;;  %v17020_v42 = vadd.f32 1.0, %v11743_v44  ;;  %10026 = vmatpush.bf16.msrb.mxu1 %v10960_v22 }
 0xc76   : > { %11746 = vrcp.f32 %v17018_v58  ;;  %vm9602_vm8 = vweird.f32 %v17018_v58  ;;  %v9606_v6 = vand.u32 2147483647, %v17018_v58  ;;  %v9608_v25 = vand.u32 2147483648, %v17018_v58 }
 0xc77   : > { %11748 = vpow2.f32 %v9555_v3  ;;  %vm9617_vm9 = vweird.f32 %v17020_v42  ;;  %v9623_v24 = vand.u32 2147483648, %v17020_v42 }
 0xc78   : > { %11750 = vrcp.f32 %v17020_v42  ;;  %vm17077_vm13 = vcmp.eq.f32.partialorder %v9606_v6, 8.507059e+37  ;;  %v9609_v22 = vor.u32 1.1754944e-38, %v9608_v25 }
 0xc7b   : > { %v11745_v56 = vpop.eup %11744 }
 0xc7c   : > { %v17024_v47 = vadd.f32 1.0, %v11745_v56  ;;  %v17027_v49 = vpop.eup %11746  ;;  %v10959_v56 = vld [vmem:[#allocation16 + $0x50] sm:$0xff] }
 0xc7d   : > { %v11749_v8 = vpop.eup %11748  ;;  %v9598_v10 = vmul.f32 %v17027_v49, %v17018_v58  ;;  %vm9603_vm10 = vweird.f32 %v17027_v49  ;;  %10027 = vmatpush.bf16.msrb.mxu1 %v10959_v56 }
 0xc7e   : > { %11752 = vrcp.f32 %v17024_v47  ;;  %v17032_v7 = vpop.eup %11750  ;;  %v17034_v2 = vadd.f32 1.0, %v11749_v8  ;;  %vm9632_vm11 = vweird.f32 %v17024_v47  ;;  %v9636_v44 = vand.u32 2147483647, %v17024_v47  ;;  %vm17104_vm1 = vmor %vm9602_vm8, %vm9603_vm10 }
 0xc7f   : > { %v9613_v33 = vmul.f32 %v17032_v7, %v17020_v42  ;;  %v9599_v40 = vsub.f32 1.0, %v9598_v10  ;;  %vm9618_vm14 = vweird.f32 %v17032_v7  ;;  %v9638_v8 = vand.u32 2147483648, %v17024_v47 }
 0xc80   : > { %11754 = vrcp.f32 %v17034_v2  ;;  %vm9647_vm2 = vweird.f32 %v17034_v2  ;;  %vm9637_vm3 = vcmp.eq.f32.partialorder %v9636_v44, 8.507059e+37  ;;  %vm17131_vm5 = vmor %vm9617_vm9, %vm9618_vm14 }
 0xc81   : > { %v9614_v38 = vsub.f32 1.0, %v9613_v33  ;;  %v9600_v63 = vmul.f32 %v17027_v49, %v9599_v40  ;;  %v9653_v33 = vand.u32 2147483648, %v17034_v2 }
 0xc83   : > { %v9615_v54 = vmul.f32 %v17032_v7, %v9614_v38  ;;  %v9601_v43 = vadd.f32 %v17027_v49, %v9600_v63 }
 0xc84   : > { %v9473_v20 = vpop.f32.mrf.mxu2  ;;  %v9502_v30 = vpop.f32.mrf.mxu3 }
 0xc85   : > { %v17030_v57 = vadd.f32 %v9473_v20, %v16998_v5  ;;  %v17038_v34 = vadd.f32 %v9502_v30, %v17003_v41  ;;  %v17043_v1 = vpop.eup %11752 }
 0xc86   : > { %v9628_v31 = vmul.f32 %v17043_v1, %v17024_v47  ;;  %v17055_v29 = vpop.eup %11754  ;;  %vm9633_vm12 = vweird.f32 %v17043_v1 }
 0xc87   : > { %v10754_v52 = vmul.f32 -1.702, %v17030_v57  ;;  %v10755_v35 = vmul.f32 -1.702, %v17038_v34  ;;  %v9643_v9 = vmul.f32 %v17055_v29, %v17034_v2  ;;  %vm9648_vm15 = vweird.f32 %v17055_v29  ;;  %vm17093_vm0 = vmor %vm9632_vm11, %vm9633_vm12 }
 0xc88   : > { %v9629_v50 = vsub.f32 1.0, %v9628_v31  ;;  %vm17119_vm4 = vmor %vm9647_vm2, %vm9648_vm15 }
 0xc89   : > { %v9557_v21 = vmul.f32 1.442695, %v10754_v52  ;;  %v9559_v4 = vmul.f32 1.442695, %v10755_v35  ;;  %v9644_v19 = vsub.f32 1.0, %v9643_v9 }
 0xc8a   : > { %v9630_v23 = vmul.f32 %v17043_v1, %v9629_v50  ;;  %v9621_v50 = vand.u32 2147483647, %v17020_v42 }
 0xc8b   : > { %11756 = vpow2.f32 %v9557_v21  ;;  %v9645_v30 = vmul.f32 %v17055_v29, %v9644_v19  ;;  %v9616_v21 = vadd.f32 %v17032_v7, %v9615_v54 }
 0xc8c   : > { %v9475_v39 = vpop.f32.mrf.mxu2  ;;  %v9504_v13 = vpop.f32.mrf.mxu3  ;;  %11758 = vpow2.f32 %v9559_v4  ;;  %v9631_v3 = vadd.f32 %v17043_v1, %v9630_v23  ;;  %v9639_v4 = vor.u32 1.1754944e-38, %v9638_v8  ;;  %v9654_v23 = vor.u32 1.1754944e-38, %v9653_v33  ;;  %v10950_v8 = vld [vmem:[#allocation16 + $0x8] sm:$0xff]  ;;  %v10957_v33 = vld [vmem:[#allocation16 + $0x40] sm:$0xff] }
 0xc8d   : > { %v17051_v16 = vadd.f32 %v9475_v39, %v16998_v5  ;;  %v17065_v45 = vadd.f32 %v9504_v13, %v17003_v41  ;;  %v9646_v31 = vadd.f32 %v17055_v29, %v9645_v30  ;;  %v9651_v39 = vand.u32 2147483647, %v17034_v2  ;;  %v10958_v30 = vld [vmem:[#allocation16 + $0x48] sm:$0xff]  ;;  %9999 = vmatpush.bf16.msrb.mxu0 %v10950_v8 }
 0xc8e   : > { %v9635_v47 = vsel %vm17093_vm0, %v17043_v1, %v9631_v3  ;;  %v9605_v2 = vsel %vm17104_vm1, %v17027_v49, %v9601_v43  ;;  %v9620_v49 = vsel %vm17131_vm5, %v17032_v7, %v9616_v21  ;;  %vm9622_vm7 = vcmp.eq.f32.partialorder %v9621_v50, 8.507059e+37  ;;  %10028 = vmatpush.bf16.msrb.mxu1 %v10958_v30  ;;  %v10949_v43 = vld [vmem:[#allocation16] sm:$0xff] }
 0xc8f   : > { %v10756_v60 = vmul.f32 -1.702, %v17051_v16  ;;  %v10757_v11 = vmul.f32 -1.702, %v17065_v45  ;;  %v9650_v13 = vsel %vm17119_vm4, %v17055_v29, %v9646_v31  ;;  %v9640_v63 = vsel %vm9637_vm3, %v9639_v4, %v9635_v47 }
 0xc90   : > { %v9624_v29 = vor.u32 1.1754944e-38, %v9623_v24  ;;  %vm9652_vm6 = vcmp.eq.f32.partialorder %v9651_v39, 8.507059e+37  ;;  %v9610_v19 = vsel %vm17077_vm13, %v9609_v22, %v9605_v2  ;;  %v9839_v3 = vmul.f32 %v9640_v63, %v17011_v61 }
 0xc91   : > { %v9561_v27 = vmul.f32 1.442695, %v10756_v60  ;;  %v11757_v32 = vpop.eup %11756  ;;  %v9563_v52 = vmul.f32 1.442695, %v10757_v11  ;;  %v9655_v44 = vsel %vm9652_vm6, %v9654_v23, %v9650_v13  ;;  %v9837_v61 = vmul.f32 %v9610_v19, %v17001_v36  ;;  %10000 = vmatpush.bf16.msrb.mxu0 %v10949_v43 }
 0xc92   : > { %v17075_v0 = vadd.f32 1.0, %v11757_v32  ;;  %v11759_v62 = vpop.eup %11758  ;;  %v9625_v11 = vsel %vm9622_vm7, %v9624_v29, %v9620_v49  ;;  %10029 = vmatpush.bf16.msrb.mxu1 %v10957_v33 }
 0xc93   : > { %11760 = vpow2.f32 %v9561_v27  ;;  %v17098_v26 = vadd.f32 1.0, %v11759_v62  ;;  %v9838_v62 = vmul.f32 %v9625_v11, %v17007_v15  ;;  %v9853_v47 = vpack.c.bf16 %v9839_v3, %v9837_v61 }
 0xc94   : > { %v9478_v10 = vpop.f32.mrf.mxu2  ;;  %11762 = vrcp.f32 %v17075_v0  ;;  %v9507_v9 = vpop.f32.mrf.mxu3  ;;  %v9668_v24 = vand.u32 2147483648, %v17075_v0  ;;  %v9666_v21 = vand.u32 2147483647, %v17075_v0  ;;  %vm9662_vm8 = vweird.f32 %v17075_v0 }
 0xc95   : > { %11764 = vpow2.f32 %v9563_v52  ;;  %v17114_v40 = vadd.f32 %v9478_v10, %v16998_v5  ;;  %v17145_v42 = vadd.f32 %v9507_v9, %v17003_v41  ;;  %v9840_v10 = vmul.f32 %v9655_v44, %v17015_v37  ;;  %10001 = vmatmul.bf16.vlgmr.msrb.gmra.mxu0 %v9853_v47 }
 0xc96   : > { %11766 = vrcp.f32 %v17098_v26  ;;  %v9669_v36 = vor.u32 1.1754944e-38, %v9668_v24  ;;  %vm9677_vm9 = vweird.f32 %v17098_v26  ;;  %v9681_v50 = vand.u32 2147483647, %v17098_v26 }
 0xc97   : > { %v10758_v60 = vmul.f32 -1.702, %v17114_v40  ;;  %v10759_v56 = vmul.f32 -1.702, %v17145_v42  ;;  %v9854_v15 = vpack.c.bf16 %v9840_v10, %v9838_v62  ;;  %vm17181_vm10 = vcmp.eq.f32.partialorder %v9666_v21, 8.507059e+37 }
 0xc98   : > { %vm9682_vm4 = vcmp.eq.f32.partialorder %v9681_v50, 8.507059e+37 }
 0xc99   : > { %v11761_v1 = vpop.eup %11760  ;;  %v9565_v32 = vmul.f32 1.442695, %v10758_v60  ;;  %v9567_v31 = vmul.f32 1.442695, %v10759_v56  ;;  %v9683_v60 = vand.u32 2147483648, %v17098_v26  ;;  %10030 = vmatmul.bf16.vlgmr.msrb.gmra.mxu1 %v9854_v15 }
 0xc9a   : > { %v17142_v27 = vadd.f32 1.0, %v11761_v1  ;;  %v17147_v46 = vpop.eup %11762 }
 0xc9b   : > { %v11765_v54 = vpop.eup %11764  ;;  %v9658_v7 = vmul.f32 %v17147_v46, %v17075_v0  ;;  %vm9663_vm11 = vweird.f32 %v17147_v46  ;;  %v9684_v21 = vor.u32 1.1754944e-38, %v9683_v60 }
 0xc9c   : > { %11768 = vrcp.f32 %v17142_v27  ;;  %v17157_v48 = vadd.f32 1.0, %v11765_v54  ;;  %v17159_v58 = vpop.eup %11766  ;;  %v9480_v52 = vpop.f32.mrf.mxu2  ;;  %v9696_v2 = vand.u32 2147483647, %v17142_v27  ;;  %v9698_v49 = vand.u32 2147483648, %v17142_v27  ;;  %vm17205_vm0 = vmor %vm9662_vm8, %vm9663_vm11 }
 0xc9d   : > { %v9659_v25 = vsub.f32 1.0, %v9658_v7  ;;  %11770 = vpow2.f32 %v9565_v32  ;;  %v9673_v20 = vmul.f32 %v17159_v58, %v17098_v26  ;;  %v17171_v51 = vadd.f32 %v9480_v52, %v16998_v5  ;;  %v9509_v13 = vpop.f32.mrf.mxu3 }
 0xc9e   : > { %11772 = vrcp.f32 %v17157_v48  ;;  %v17192_v54 = vadd.f32 %v9509_v13, %v17003_v41  ;;  %vm9692_vm12 = vweird.f32 %v17142_v27  ;;  %vm9678_vm14 = vweird.f32 %v17159_v58 }
 0xc9f   : > { %v9674_v35 = vsub.f32 1.0, %v9673_v20  ;;  %v9660_v39 = vmul.f32 %v17147_v46, %v9659_v25  ;;  %11774 = vpow2.f32 %v9567_v31  ;;  %v10760_v38 = vmul.f32 -1.702, %v17171_v51  ;;  %vm17220_vm2 = vmor %vm9677_vm9, %vm9678_vm14 }
 0xca0   : > { %vm17198_vm15 = vcmp.eq.f32.partialorder %v9696_v2, 8.507059e+37  ;;  %v9699_v24 = vor.u32 1.1754944e-38, %v9698_v49  ;;  %v9711_v8 = vand.u32 2147483647, %v17157_v48  ;;  %v9713_v0 = vand.u32 2147483648, %v17157_v48 }
 0xca1   : > { %v9675_v1 = vmul.f32 %v17159_v58, %v9674_v35  ;;  %v9661_v29 = vadd.f32 %v17147_v46, %v9660_v39  ;;  %v9569_v32 = vmul.f32 1.442695, %v10760_v38  ;;  %v10761_v10 = vmul.f32 -1.702, %v17192_v54 }
 0xca2   : > { %v11769_v37 = vpop.eup %11768  ;;  %vm9707_vm5 = vweird.f32 %v17157_v48  ;;  %vm9712_vm7 = vcmp.eq.f32.partialorder %v9711_v8, 8.507059e+37 }
 0xca3   : > { %v9688_v4 = vmul.f32 %v11769_v37, %v17142_v27  ;;  %v11771_v6 = vpop.eup %11770  ;;  %vm9693_vm13 = vweird.f32 %v11769_v37  ;;  %v9676_v19 = vadd.f32 %v17159_v58, %v9675_v1  ;;  %v9665_v52 = vsel %vm17205_vm0, %v17147_v46, %v9661_v29 }
 0xca4   : > { %v17187_v63 = vadd.f32 1.0, %v11771_v6  ;;  %v11773_v22 = vpop.eup %11772  ;;  %vm9694_vm1 = vmor %vm9692_vm12, %vm9693_vm13  ;;  %v9571_v33 = vmul.f32 1.442695, %v10761_v10  ;;  %v9670_v31 = vsel %vm17181_vm10, %v9669_v36, %v9665_v52 }
 0xca5   : > { %v9689_v9 = vsub.f32 1.0, %v9688_v4  ;;  %v9703_v7 = vmul.f32 %v11773_v22, %v17157_v48  ;;  %v11775_v30 = vpop.eup %11774  ;;  %vm9708_vm3 = vweird.f32 %v11773_v22  ;;  %v9680_v27 = vsel %vm17220_vm2, %v17159_v58, %v9676_v19 }
 0xca6   : > { %11776 = vrcp.f32 %v17187_v63  ;;  %v17224_v43 = vadd.f32 1.0, %v11775_v30  ;;  %vm9709_vm6 = vmor %vm9707_vm5, %vm9708_vm3  ;;  %v9685_v58 = vsel %vm9682_vm4, %v9684_v21, %v9680_v27  ;;  %v9841_v48 = vmul.f32 %v9670_v31, %v17030_v57 }
 0xca7   : > { %v9690_v44 = vmul.f32 %v11769_v37, %v9689_v9  ;;  %v9704_v56 = vsub.f32 1.0, %v9703_v7  ;;  %11778 = vpow2.f32 %v9569_v32  ;;  %v9842_v36 = vmul.f32 %v9685_v58, %v17038_v34 }
 0xca8   : > { %11780 = vrcp.f32 %v17224_v43  ;;  %vm9722_vm9 = vweird.f32 %v17187_v63  ;;  %vm9737_vm14 = vweird.f32 %v17224_v43  ;;  %v9743_v10 = vand.u32 2147483648, %v17224_v43 }
 0xca9   : > { %v9691_v25 = vadd.f32 %v11769_v37, %v9690_v44  ;;  %v9705_v62 = vmul.f32 %v11773_v22, %v9704_v56  ;;  %11782 = vpow2.f32 %v9571_v33  ;;  %v9728_v44 = vand.u32 2147483648, %v17187_v63 }
 0xcaa   : > { %v9744_v31 = vor.u32 1.1754944e-38, %v9743_v10 }
 0xcab   : > { %v9695_v61 = vsel %vm9694_vm1, %v11769_v37, %v9691_v25  ;;  %v9706_v26 = vadd.f32 %v11773_v22, %v9705_v62  ;;  %v9714_v37 = vor.u32 1.1754944e-38, %v9713_v0  ;;  %v9729_v52 = vor.u32 1.1754944e-38, %v9728_v44 }
 0xcac   : > { %v9700_v46 = vsel %vm17198_vm15, %v9699_v24, %v9695_v61  ;;  %v11777_v35 = vpop.eup %11776  ;;  %v9741_v0 = vand.u32 2147483647, %v17224_v43 }
 0xcad   : > { %v9843_v47 = vmul.f32 %v9700_v46, %v17051_v16  ;;  %v9710_v39 = vsel %vm9709_vm6, %v11773_v22, %v9706_v26  ;;  %v9718_v15 = vmul.f32 %v11777_v35, %v17187_v63  ;;  %v11779_v50 = vpop.eup %11778  ;;  %vm9723_vm8 = vweird.f32 %v11777_v35 }
 0xcae   : > { %v9715_v4 = vsel %vm9712_vm7, %v9714_v37, %v9710_v39  ;;  %v9591_v2 = vadd.f32 1.0, %v11779_v50  ;;  %v11781_v38 = vpop.eup %11780  ;;  %vm17244_vm10 = vmor %vm9722_vm9, %vm9723_vm8  ;;  %vm9742_vm4 = vcmp.eq.f32.partialorder %v9741_v0, 8.507059e+37 }
 0xcaf   : > { %v9844_v6 = vmul.f32 %v9715_v4, %v17065_v45  ;;  %v9719_v1 = vsub.f32 1.0, %v9718_v15  ;;  %v9855_v13 = vpack.c.bf16 %v9843_v47, %v9841_v48  ;;  %v11783_v23 = vpop.eup %11782  ;;  %v9733_v60 = vmul.f32 %v11781_v38, %v17224_v43 }
 0xcb0   : > { %11784 = vrcp.f32 %v9591_v2  ;;  %v9592_v49 = vadd.f32 1.0, %v11783_v23  ;;  %v9726_v45 = vand.u32 2147483647, %v17187_v63  ;;  %v9756_v11 = vand.u32 2147483647, %v9591_v2 }
 0xcb1   : > { %v9856_v16 = vpack.c.bf16 %v9844_v6, %v9842_v36  ;;  %v9720_v9 = vmul.f32 %v11777_v35, %v9719_v1  ;;  %v9734_v22 = vsub.f32 1.0, %v9733_v60  ;;  %10006 = vmatmul.bf16.gmra.mxu0 %v9855_v13  ;;  %vm9738_vm12 = vweird.f32 %v11781_v38 }
 0xcb2   : > { %11786 = vrcp.f32 %v9592_v49  ;;  %vm17250_vm11 = vcmp.eq.f32.partialorder %v9726_v45, 8.507059e+37  ;;  %v9758_v56 = vand.u32 2147483648, %v9591_v2  ;;  %vm17257_vm15 = vmor %vm9737_vm14, %vm9738_vm12  ;;  %vm9752_vm0 = vweird.f32 %v9591_v2 }
 0xcb3   : > { %10035 = vmatmul.bf16.gmra.mxu1 %v9856_v16  ;;  %v9721_v29 = vadd.f32 %v11777_v35, %v9720_v9  ;;  %v9735_v32 = vmul.f32 %v11781_v38, %v9734_v22  ;;  %vm9757_vm1 = vcmp.eq.f32.partialorder %v9756_v11, 8.507059e+37  ;;  %v9771_v33 = vand.u32 2147483647, %v9592_v49 }
 0xcb4   : > { %v9759_v46 = vor.u32 1.1754944e-38, %v9758_v56  ;;  %v9773_v21 = vand.u32 2147483648, %v9592_v49  ;;  %vm9767_vm5 = vweird.f32 %v9592_v49 }
 0xcb5   : > { %v9725_v25 = vsel %vm17244_vm10, %v11777_v35, %v9721_v29  ;;  %v9736_v8 = vadd.f32 %v11781_v38, %v9735_v32  ;;  %vm9772_vm7 = vcmp.eq.f32.partialorder %v9771_v33, 8.507059e+37 }
 0xcb6   : > { %v11785_v57 = vpop.eup %11784  ;;  %v9730_v27 = vsel %vm17250_vm11, %v9729_v52, %v9725_v25  ;;  %v9774_v50 = vor.u32 1.1754944e-38, %v9773_v21 }
 0xcb7   : > { %v9748_v34 = vmul.f32 %v11785_v57, %v9591_v2  ;;  %vm9753_vm13 = vweird.f32 %v11785_v57  ;;  %v9740_v26 = vsel %vm17257_vm15, %v11781_v38, %v9736_v8  ;;  %v9845_v58 = vmul.f32 %v9730_v27, %v17114_v40 }
 0xcb8   : > { %v11787_v3 = vpop.eup %11786  ;;  %vm9754_vm2 = vmor %vm9752_vm0, %vm9753_vm13  ;;  %v9745_v15 = vsel %vm9742_vm4, %v9744_v31, %v9740_v26 }
 0xcb9   : > { %v9749_v19 = vsub.f32 1.0, %v9748_v34  ;;  %v9763_v63 = vmul.f32 %v11787_v3, %v9592_v49  ;;  %vm9768_vm3 = vweird.f32 %v11787_v3  ;;  %v9846_v1 = vmul.f32 %v9745_v15, %v17145_v42 }
 0xcba   : > { %vm9769_vm6 = vmor %vm9767_vm5, %vm9768_vm3 }
 0xcbb   : > { %v9750_v30 = vmul.f32 %v11785_v57, %v9749_v19  ;;  %v9764_v62 = vsub.f32 1.0, %v9763_v63 }
 0xcbd   : > { %v9751_v61 = vadd.f32 %v11785_v57, %v9750_v30  ;;  %v9765_v43 = vmul.f32 %v11787_v3, %v9764_v62 }
 0xcbf   : > { %v9755_v35 = vsel %vm9754_vm2, %v11785_v57, %v9751_v61  ;;  %v9766_v39 = vadd.f32 %v11787_v3, %v9765_v43 }
 0xcc0   : > { %v9760_v37 = vsel %vm9757_vm1, %v9759_v46, %v9755_v35 }
 0xcc1   : > { %v9847_v47 = vmul.f32 %v9760_v37, %v17171_v51  ;;  %v9770_v4 = vsel %vm9769_vm6, %v11787_v3, %v9766_v39 }
 0xcc2   : > { %v9775_v6 = vsel %vm9772_vm7, %v9774_v50, %v9770_v4 }
 0xcc3   : > { %v9857_v48 = vpack.c.bf16 %v9847_v47, %v9845_v58  ;;  %v9848_v2 = vmul.f32 %v9775_v6, %v17192_v54 }
 0xcc5   : > { %10011 = vmatmul.bf16.gmra.mxu0 %v9857_v48  ;;  %v9858_v36 = vpack.c.bf16 %v9848_v2, %v9846_v1 }
 0xcc7   : > { %10040 = vmatmul.bf16.gmra.mxu1 %v9858_v36 }
 0xce0   : > { %v9483_v38 = vpop.f32.mrf.mxu2  ;;  %v9512_v51 = vpop.f32.mrf.mxu3 }
 0xce1   : > { %v17270_v40 = vadd.f32 %v9483_v38, %v16998_v5  ;;  %v17273_v13 = vadd.f32 %v9512_v51, %v17003_v41 }
 0xce3   : > { %v10762_v23 = vmul.f32 -1.702, %v17270_v40  ;;  %v10763_v60 = vmul.f32 -1.702, %v17273_v13 }
 0xce5   : > { %v9573_v16 = vmul.f32 1.442695, %v10762_v23  ;;  %v9575_v9 = vmul.f32 1.442695, %v10763_v60 }
 0xce7   : > { %11788 = vpow2.f32 %v9573_v16 }
 0xce8   : > { %11790 = vpow2.f32 %v9575_v9  ;;  %v9485_v42 = vpop.f32.mrf.mxu2  ;;  %v9514_v49 = vpop.f32.mrf.mxu3 }
 0xce9   : > { %v17278_v54 = vadd.f32 %v9485_v42, %v16998_v5  ;;  %v17281_v22 = vadd.f32 %v9514_v49, %v17003_v41 }
 0xceb   : > { %v10764_v57 = vmul.f32 -1.702, %v17278_v54  ;;  %v10765_v29 = vmul.f32 -1.702, %v17281_v22 }
 0xced   : > { %v11789_v45 = vpop.eup %11788  ;;  %v9577_v32 = vmul.f32 1.442695, %v10764_v57  ;;  %v9579_v7 = vmul.f32 1.442695, %v10765_v29 }
 0xcee   : > { %v11791_v34 = vpop.eup %11790  ;;  %v9593_v44 = vadd.f32 1.0, %v11789_v45 }
 0xcef   : > { %v9594_v19 = vadd.f32 1.0, %v11791_v34  ;;  %11792 = vpow2.f32 %v9577_v32 }
 0xcf0   : > { %11794 = vrcp.f32 %v9593_v44  ;;  %vm9782_vm9 = vweird.f32 %v9593_v44  ;;  %v9786_v62 = vand.u32 2147483647, %v9593_v44  ;;  %v9788_v27 = vand.u32 2147483648, %v9593_v44 }
 0xcf1   : > { %11796 = vrcp.f32 %v9594_v19  ;;  %vm9797_vm10 = vweird.f32 %v9594_v19  ;;  %v9801_v33 = vand.u32 2147483647, %v9594_v19  ;;  %v9803_v31 = vand.u32 2147483648, %v9594_v19 }
 0xcf2   : > { %11798 = vpow2.f32 %v9579_v7  ;;  %vm9787_vm14 = vcmp.eq.f32.partialorder %v9786_v62, 8.507059e+37  ;;  %v9789_v15 = vor.u32 1.1754944e-38, %v9788_v27 }
 0xcf3   : > { %v9804_v23 = vor.u32 1.1754944e-38, %v9803_v31  ;;  %vm9802_vm4 = vcmp.eq.f32.partialorder %v9801_v33, 8.507059e+37 }
 0xcf5   : > { %v11793_v5 = vpop.eup %11792 }
 0xcf6   : > { %v11795_v11 = vpop.eup %11794  ;;  %v9595_v3 = vadd.f32 1.0, %v11793_v5 }
 0xcf7   : > { %v11797_v25 = vpop.eup %11796  ;;  %v9778_v41 = vmul.f32 %v11795_v11, %v9593_v44  ;;  %vm9783_vm8 = vweird.f32 %v11795_v11 }
 0xcf8   : > { %v11799_v24 = vpop.eup %11798  ;;  %v9793_v56 = vmul.f32 %v11797_v25, %v9594_v19  ;;  %11800 = vrcp.f32 %v9595_v3  ;;  %v9818_v26 = vand.u32 2147483648, %v9595_v3  ;;  %vm17285_vm11 = vmor %vm9782_vm9, %vm9783_vm8  ;;  %vm9798_vm12 = vweird.f32 %v11797_v25 }
 0xcf9   : > { %v9779_v8 = vsub.f32 1.0, %v9778_v41  ;;  %v9596_v30 = vadd.f32 1.0, %v11799_v24  ;;  %v9816_v39 = vand.u32 2147483647, %v9595_v3  ;;  %vm9812_vm15 = vweird.f32 %v9595_v3  ;;  %vm17292_vm0 = vmor %vm9797_vm10, %vm9798_vm12 }
 0xcfa   : > { %v9794_v63 = vsub.f32 1.0, %v9793_v56  ;;  %v9819_v6 = vor.u32 1.1754944e-38, %v9818_v26 }
 0xcfb   : > { %v9780_v52 = vmul.f32 %v11795_v11, %v9779_v8  ;;  %11802 = vrcp.f32 %v9596_v30  ;;  %v9831_v1 = vand.u32 2147483647, %v9596_v30  ;;  %v9833_v2 = vand.u32 2147483648, %v9596_v30 }
 0xcfc   : > { %v9795_v10 = vmul.f32 %v11797_v25, %v9794_v63  ;;  %vm9817_vm3 = vcmp.eq.f32.partialorder %v9816_v39, 8.507059e+37  ;;  %vm9827_vm5 = vweird.f32 %v9596_v30 }
 0xcfd   : > { %v9781_v20 = vadd.f32 %v11795_v11, %v9780_v52  ;;  %v9834_v29 = vor.u32 1.1754944e-38, %v9833_v2  ;;  %vm9832_vm7 = vcmp.eq.f32.partialorder %v9831_v1, 8.507059e+37 }
 0xcfe   : > { %v11801_v0 = vpop.eup %11800  ;;  %v9796_v43 = vadd.f32 %v11797_v25, %v9795_v10 }
 0xcff   : > { %v9808_v61 = vmul.f32 %v11801_v0, %v9595_v3  ;;  %v9785_v58 = vsel %vm17285_vm11, %v11795_v11, %v9781_v20  ;;  %vm9813_vm13 = vweird.f32 %v11801_v0 }
 0xd00   : > { %v9790_v36 = vsel %vm9787_vm14, %v9789_v15, %v9785_v58  ;;  %v9800_v38 = vsel %vm17292_vm0, %v11797_v25, %v9796_v43  ;;  %vm9814_vm1 = vmor %vm9812_vm15, %vm9813_vm13 }
 0xd01   : > { %v11803_v46 = vpop.eup %11802  ;;  %v9809_v21 = vsub.f32 1.0, %v9808_v61  ;;  %v9849_v42 = vmul.f32 %v9790_v36, %v17270_v40  ;;  %v9805_v49 = vsel %vm9802_vm4, %v9804_v23, %v9800_v38  ;;  %v11577_v40 = vld [vmem:[%s17541_s18] ss:$0 sm:$0xff] }
 0xd02   : > { %v9823_v37 = vmul.f32 %v11803_v46, %v9596_v30  ;;  %vm9828_vm2 = vweird.f32 %v11803_v46  ;;  %v9850_v44 = vmul.f32 %v9805_v49, %v17273_v13 }
 0xd03   : > { %v9810_v47 = vmul.f32 %v11801_v0, %v9809_v21  ;;  %vm9829_vm6 = vmor %vm9827_vm5, %vm9828_vm2 }
 0xd04   : > { %v9824_v50 = vsub.f32 1.0, %v9823_v37 }
 0xd05   : > { %v9811_v48 = vadd.f32 %v11801_v0, %v9810_v47 }
 0xd06   : > { %v9825_v51 = vmul.f32 %v11803_v46, %v9824_v50 }
 0xd07   : > { %v9815_v60 = vsel %vm9814_vm1, %v11801_v0, %v9811_v48 }
 0xd08   : > { %v9820_v16 = vsel %vm9817_vm3, %v9819_v6, %v9815_v60  ;;  %v9826_v9 = vadd.f32 %v11803_v46, %v9825_v51 }
 0xd09   : > { %v9851_v57 = vmul.f32 %v9820_v16, %v17278_v54 }
 0xd0a   : > { %v9830_v45 = vsel %vm9829_vm6, %v11803_v46, %v9826_v9 }
 0xd0b   : > { %v9835_v32 = vsel %vm9832_vm7, %v9834_v29, %v9830_v45  ;;  %v9859_v34 = vpack.c.bf16 %v9851_v57, %v9849_v42 }
 0xd0c   : > { %v9852_v7 = vmul.f32 %v9835_v32, %v17281_v22 }
 0xd0d   : > { %10016 = vmatmul.bf16.gmra.mxu0 %v9859_v34 }
 0xd0e   : > { %v9860_v19 = vpack.c.bf16 %v9852_v7, %v9850_v44 }
 0xd10   : > { %10045 = vmatmul.bf16.gmra.mxu1 %v9860_v19 }
 0xd12   : > { %v10002_v54 = vpop.f32.mrf.mxu0 }
 0xd13   : > { %v10003_v11 = vadd.f32 %v11577_v40, %v10002_v54 }
 0xd16   : > { %v10031_v5 = vpop.f32.mrf.mxu1 }
 0xd17   : > { %v10032_v3 = vadd.f32 %v10031_v5, %v10003_v11 }
 0xd19   : > { %v10051_v25 = vadd.f32 %v10032_v3, %v16868_v59 }
 0xd1a   : > { %v10004_v41 = vpop.f32.mrf.mxu0 }
 0xd1b   : > { %10059 = vst [vmem:[%s12543_s13] sm:$0xff] %v10051_v25  ;;  %v10005_v22 = vadd.f32 %v11577_v40, %v10004_v41 }
 0xd1e   : > { %v10033_v13 = vpop.f32.mrf.mxu1 }
 0xd1f   : > { %v10034_v24 = vadd.f32 %v10033_v13, %v10005_v22 }
 0xd21   : > { %v10052_v56 = vadd.f32 %v10034_v24, %v16872_v55 }
 0xd23   : > { %10060 = vst [vmem:[%s12543_s13 + $0x8] sm:$0xff] %v10052_v56 }
 0xd2e   : > { %v10007_v8 = vpop.f32.mrf.mxu0 }
 0xd2f   : > { %v10008_v63 = vadd.f32 %v11577_v40, %v10007_v8 }
 0xd30   : > { %v10036_v30 = vpop.f32.mrf.mxu1 }
 0xd31   : > { %v10037_v52 = vadd.f32 %v10036_v30, %v10008_v63 }
 0xd33   : > { %v10053_v0 = vadd.f32 %v10037_v52, %v16876_v12 }
 0xd35   : > { %10061 = vst [vmem:[%s12543_s13 + $0x10] sm:$0xff] %v10053_v0 }
 0xd36   : > { %v10009_v10 = vpop.f32.mrf.mxu0 }
 0xd37   : > { %v10010_v20 = vadd.f32 %v11577_v40, %v10009_v10 }
 0xd38   : > { %v10038_v59 = vpop.f32.mrf.mxu1 }
 0xd39   : > { %v10039_v61 = vadd.f32 %v10038_v59, %v10010_v20 }
 0xd3b   : > { %v10054_v62 = vadd.f32 %v10039_v61, %v16880_v14 }
 0xd3d   : > { %10062 = vst [vmem:[%s12543_s13 + $0x18] sm:$0xff] %v10054_v62 }
 0xd42   : > { %v10012_v55 = vpop.f32.mrf.mxu0 }
 0xd43   : > { %v10013_v27 = vadd.f32 %v11577_v40, %v10012_v55 }
 0xd44   : > { %v10041_v46 = vpop.f32.mrf.mxu1 }
 0xd45   : > { %v10042_v33 = vadd.f32 %v10041_v46, %v10013_v27 }
 0xd47   : > { %v10055_v21 = vadd.f32 %v10042_v33, %v16884_v18 }
 0xd49   : > { %10063 = vst [vmem:[%s12543_s13 + $0x20] sm:$0xff] %v10055_v21 }
 0xd4a   : > { %v10014_v26 = vpop.f32.mrf.mxu0 }
 0xd4b   : > { %v10015_v12 = vadd.f32 %v11577_v40, %v10014_v26 }
 0xd4c   : > { %v10043_v35 = vpop.f32.mrf.mxu1 }
 0xd4d   : > { %v10044_v43 = vadd.f32 %v10043_v35, %v10015_v12 }
 0xd4f   : > { %v10056_v31 = vadd.f32 %v10044_v43, %v16888_v17 }
 0xd51   : > { %10064 = vst [vmem:[%s12543_s13 + $0x28] sm:$0xff] %v10056_v31 }
 0xd8a   : > { %v10017_v14 = vpop.f32.mrf.mxu0 }
 0xd8b   : > { %v10018_v37 = vadd.f32 %v11577_v40, %v10017_v14 }
 0xd8d   : > { %v10046_v58 = vpop.f32.mrf.mxu1 }
 0xd8e   : > { %v10047_v47 = vadd.f32 %v10046_v58, %v10018_v37 }
 0xd90   : > { %v10057_v18 = vadd.f32 %v10047_v47, %v16892_v53 }
 0xd92   : > { %10065 = vst [vmem:[%s12543_s13 + $0x30] sm:$0xff] %v10057_v18  ;;  %v10019_v39 = vpop.f32.mrf.mxu0 }
 0xd93   : > { %v10020_v17 = vadd.f32 %v11577_v40, %v10019_v39 }
 0xd95   : > { %v10048_v15 = vpop.f32.mrf.mxu1 }
 0xd96   : > { %v10049_v50 = vadd.f32 %v10048_v15, %v10020_v17 }
 0xd98   : > { %v10058_v4 = vadd.f32 %v10049_v50, %v16906_v28 }
 0xd9a   : > { %10066 = vst [vmem:[%s12543_s13 + $0x38] sm:$0xff] %v10058_v4 }
 0xd9b   : > { %12079 = shalt.err (!%p12076_p11)
}
 0xd9c   : > { %s12218_s15 = smov 128   ;;  %s12219_s13 = smov 8  }
 0xd9d   : > { %11017 = dma.vmem_to_hbm [thread:$0]  (%p12476_p12), %s10083_s12, 1024, %s10085_s21, %s10068_s9, %s12218_s15, %s12218_s15, %s12219_s13  }
 0xd9e PF: > { %s17545_s11 = sld [smem:[#allocation26_spill]]  ;;  %p11062_p2 = scmp.ge.s32.totalorder %s12194_s0, 2 }
 0xda0   : > { %p11046_p4 = pnand %p11062_p2, %p12480_p7 }
 0xda2   : > { %p11047_p5 = pneg %p11046_p4 }
 0xda4   : > { %s10099_s2 = sand.u32 1, %s17545_s11  }
 0xda5   : > { %s10100_s27 = scalar_lea.sflag [#allocation6], %s10099_s2 }
 0xda6   : > { %12149 = dma.done.wait (%p11047_p5), %s10100_s27, 1024  }
 0xda7   : > { %12151 = vsyncadd (%p11047_p5), %s10100_s27, 4294966272  ;;  %s38_s0 = sadd.s32 1, %s12194_s0   ;;  %s17547_s19 = sld [smem:[#allocation30_spill]] }
 0xda8   : > { %p35_p6 = scmp.ge.s32.totalorder %s38_s0, 6   ;;  %s17548_s4 = sld [smem:[#allocation31_spill]] }
 0xda9   : > { %s17549_s21 = smov %s12158_s22  ;;  %s17550_s22 = smov %s12162_s23 }
 0xdaa   : > { %s17551_s23 = smov %s12493_s5  ;;  %s17552_s24 = smov %s12170_s25 }
 0xdab   : > { %s17553_s25 = smov %s12174_s26  ;;  %s17554_s26 = smov %s12490_s3 }
 0xdac   : > { %s17555_s27 = smov %s12186_s29  ;;  %s17556_s28 = smov %s12190_s30 }
 0xdad   : > { %s17557_s29 = smov %s17547_s19  ;;  %37 = sbr.rel (!%p35_p6) target bundleno = 31 (0x1f), region = 171 }
 0xdae   : > { %s17558_s30 = smov %s17548_s4 }
 0xdb2   :  { %10106 = vsyncpa [#allocation5], 1 }
 0xdb3   :  { %10108 = vsyncpa [#allocation5 + $0x1], 1 }
 0xdb4   :  { %10109 = vsyncpa [#allocation8], 1 }
 0xdb5   :  { %10111 = vsyncpa [#allocation8 + $0x1], 1 }
 0xdb6   :  { %10112 = vsyncpa [#allocation11], 1 }
 0xdb7   :  { %10113 = vsyncpa [#allocation14], 1 }
 0xdb8   :  { %10114 = vsyncpa [#allocation17], 1 }
 0xdb9   :  { %10115 = vsyncpa [#allocation6], 1 }
 0xdba   :  { %10117 = vsyncpa [#allocation6 + $0x1], 1 }

</bundles_post_ra>
